<compile_context>
chip_gen: v7x
topology: tpu7x:2x2x1
jax: 0.10.0
libtpu: 0.0.40
codegen_flags: <defaults>
</compile_context>

<pallas_src>
import functools

import jax
import jax.numpy as jnp
from jax.experimental import pallas as pl
from jax.experimental.pallas import tpu as pltpu

BN_EPS = 1e-5  # torch.nn.BatchNorm1d default eps


# ----------------------------------------------------------------------------
# Small helpers: padding-aware VMEM sizing and generation-aware budgets.
# ----------------------------------------------------------------------------
def _round_up(x, m):
    return (x + m - 1) // m * m


def _sublane(itemsize):
    # Sublane packing multiple: 8 rows for 32-bit, 16 for bf16, 32 for 8-bit.
    return max(8, 32 // int(itemsize))


def _vmem_capacity_bytes():
    try:
        return int(pltpu.get_tpu_info().vmem_capacity_bytes)
    except Exception:
        return 64 << 20  # conservative fallback: v7x per-TensorCore VMEM


def _padded_block_bytes(B, tc, thw, itemsize):
    """VMEM footprint of one (B, tc, thw) block incl. (sublane, lane) padding."""
    return B * _round_up(tc, _sublane(itemsize)) * _round_up(thw, 128) * itemsize


def _choose_tiles(B, C, HW, itemsize, target_block_bytes):
    """Pick (tc, thw) honoring the (8,128) block rules, sized to the target.

    Small maps collapse to a single (C, HW) block (zero pipeline-step overhead).
    When tiling is needed, channel tiles are multiples of 128 (lane-dense pooled
    output) and tile counts that are even (>=2) are preferred so v7x's two
    TensorCores split the parallel C axis evenly; on v5e/v6e (single TC) the
    preference is a no-op.
    """
    if _padded_block_bytes(B, C, HW, itemsize) <= target_block_bytes:
        return C, HW

    c_cands = [c for c in range(128, C + 1, 128) if C % c == 0] or [C]

    def c_key(tc):
        n = C // tc
        grp = 0 if (n >= 2 and n % 2 == 0) else (1 if n == 1 else 2)
        return (grp, -tc)

    c_cands.sort(key=c_key)

    if HW % 128 == 0:
        s_cands = [s for s in range(HW, 0, -128) if HW % s == 0]
    else:
        s_cands = [HW]  # full extent satisfies the (8,128) rule when unaligned

    for tc in c_cands:
        for thw in s_cands:
            if _padded_block_bytes(B, tc, thw, itemsize) <= target_block_bytes:
                return tc, thw
    # Nothing meets the target (huge B with unaligned HW): smallest legal block;
    # the VMEM-budget clamp in the wrapper handles the rest.
    return min(c_cands), min(s_cands)


def _choose_head_tile(N_pad, C, w_itemsize, target_block_bytes):
    """Largest N-tile (multiple of 128) whose (tn, C) weight block fits the target."""
    def blk_bytes(t):
        return _round_up(t, _sublane(w_itemsize)) * C * w_itemsize

    if blk_bytes(N_pad) <= target_block_bytes:
        return N_pad
    cands = [t for t in range(N_pad - 128, 0, -128) if N_pad % t == 0]
    cands.sort(key=lambda t: (0 if (N_pad // t) % 2 == 0 else 1, -t))
    for t in cands:
        if blk_bytes(t) <= target_block_bytes:
            return t
    return 128


# ----------------------------------------------------------------------------
# Kernel 1: streaming global average pool (GAP) over the spatial axis.
# ----------------------------------------------------------------------------
def gap_kernel(x_ref, gf_ref, acc_ref, *, inv_hw):
    """x_ref:   (B, C_tile, HW_tile)  native dtype (f32 or bf16)
       gf_ref:  (B, C_tile)           f32, written on the last HW step
       acc_ref: (B, C_tile)           f32 VMEM accumulator (persists across steps)
    """
    si = pl.program_id(1)

    @pl.when(si == 0)
    def _init():
        acc_ref[...] = jnp.zeros_like(acc_ref)

    # Upcast after the DMA so bf16 inputs are streamed at half the HBM bytes.
    x = x_ref[...].astype(jnp.float32)
    acc_ref[...] += jnp.sum(x, axis=-1)

    @pl.when(si == pl.num_programs(1) - 1)
    def _finalize():
        gf_ref[...] = acc_ref[...] * inv_hw


# ----------------------------------------------------------------------------
# Kernel 2: fused BatchNorm1d (training-mode batch stats) + bias-free Linear,
#           tiled over the class dimension N.
# ----------------------------------------------------------------------------
def bn_classifier_kernel(gf_ref, gamma_ref, beta_ref, w_ref, cls_ref):
    """gf_ref: (B, C) f32, gamma/beta: (1, C) f32,
       w_ref: (tn, C) native dtype (PyTorch Linear layout, contract on C),
       cls_ref: (B, tn) f32 (lane-dense; N padded to a multiple of 128)."""
    gf = gf_ref[...]                                   # (B, C)
    mu = jnp.mean(gf, axis=0, keepdims=True)           # (1, C)
    xc = gf - mu
    var = jnp.mean(xc * xc, axis=0, keepdims=True)     # biased, as in BN training fwd
    feat = xc * jax.lax.rsqrt(var + BN_EPS)
    feat = feat * gamma_ref[...] + beta_ref[...]
    # TODO(synk): BatchNorm1d running_mean/running_var momentum updates (training
    # side effects) are not modeled; the forward outputs are unaffected.
    w = w_ref[...]                                     # (tn, C)
    if w.dtype != jnp.float32:
        feat = feat.astype(w.dtype)                    # bf16 x bf16 -> f32 MXU
    cls_ref[...] = jax.lax.dot_general(
        feat, w, (((1,), (1,)), ((), ())), preferred_element_type=jnp.float32
    )


# ----------------------------------------------------------------------------
# Wrapper.
# ----------------------------------------------------------------------------
def backbone_forward(feature_map_nchw, bn_weight, bn_bias, cls_weight):
    """Backbone.forward head (training=True, neck='bnneck').

    cls_weight is in PyTorch Linear layout (num_classes, C) and is streamed in
    its native dtype (supply bf16 weights to halve the dominant HBM traffic).
    Returns (cls_score, global_feat), matching the PyTorch module.
    """
    B, C, H, W = feature_map_nchw.shape
    HW = H * W
    N = cls_weight.shape[0]
    if B < 2:
        # PyTorch raises for BatchNorm1d training-mode forward with one sample.
        raise ValueError("BatchNorm1d training-mode forward requires batch size >= 2")

    vmem_cap = _vmem_capacity_bytes()
    # v5e/v6e report 128 MiB physical VMEM -> 8 MiB blocks, ~96 MiB scoped budget.
    # v7x reports 64 MiB per TC            -> 7 MiB blocks, ~48 MiB scoped budget.
    target_block_bytes = (8 << 20) if vmem_cap >= (100 << 20) else (7 << 20)
    gap_budget = (vmem_cap * 3) // 4
    head_budget = min(gap_budget, 48 << 20)

    # --- Kernel 1: GAP ------------------------------------------------------
    # Free reshape: NCHW is already (B, C, H*W)-contiguous. No transpose, no cast.
    x = feature_map_nchw.reshape(B, C, HW)
    itemsize = jnp.dtype(x.dtype).itemsize
    tc, thw = _choose_tiles(B, C, HW, itemsize, target_block_bytes)
    grid = (C // tc, HW // thw)

    in_block = _padded_block_bytes(B, tc, thw, itemsize)
    out_block = _round_up(B, 8) * _round_up(tc, 128) * 4       # (B, tc) f32
    gap_vmem = 2 * in_block + 2 * out_block + out_block + (1 << 20)
    gap_vmem = int(min(max(gap_vmem, 16 << 20), gap_budget))

    global_feat = pl.pallas_call(
        functools.partial(gap_kernel, inv_hw=1.0 / HW),
        out_shape=jax.ShapeDtypeStruct((B, C), jnp.float32),
        grid_spec=pltpu.PrefetchScalarGridSpec(
            num_scalar_prefetch=0,
            grid=grid,
            in_specs=[pl.BlockSpec((B, tc, thw), lambda ci, si: (0, ci, si))],
            out_specs=pl.BlockSpec((B, tc), lambda ci, si: (0, ci)),
            scratch_shapes=[pltpu.VMEM((B, tc), jnp.float32)],
        ),
        compiler_params=pltpu.CompilerParams(
            dimension_semantics=("parallel", "arbitrary"),
            vmem_limit_bytes=gap_vmem,
        ),
    )(x)

    # --- Kernel 2: BN + classifier, tiled over N ----------------------------
    gamma = bn_weight.reshape(1, C).astype(jnp.float32)
    beta = bn_bias.reshape(1, C).astype(jnp.float32)

    N_pad = _round_up(N, 128)          # lane-dense output store
    w = cls_weight
    if N_pad != N:
        w = jnp.pad(w, ((0, N_pad - N), (0, 0)))
    w_itemsize = jnp.dtype(w.dtype).itemsize
    tn = _choose_head_tile(N_pad, C, w_itemsize, target_block_bytes)

    gf_bytes = _round_up(B, 8) * C * 4
    gb_bytes = 8 * C * 4
    w_block_bytes = _round_up(tn, _sublane(w_itemsize)) * C * w_itemsize
    out_block_bytes = _round_up(B, 8) * tn * 4
    head_vmem = 2 * (gf_bytes + 2 * gb_bytes + w_block_bytes + out_block_bytes) + (1 << 20)
    head_vmem = int(min(max(head_vmem, 16 << 20), head_budget))

    cls_padded = pl.pallas_call(
        bn_classifier_kernel,
        out_shape=jax.ShapeDtypeStruct((B, N_pad), jnp.float32),
        grid_spec=pltpu.PrefetchScalarGridSpec(
            num_scalar_prefetch=0,
            grid=(N_pad // tn,),
            in_specs=[
                pl.BlockSpec((B, C), lambda j: (0, 0)),
                pl.BlockSpec((1, C), lambda j: (0, 0)),
                pl.BlockSpec((1, C), lambda j: (0, 0)),
                pl.BlockSpec((tn, C), lambda j: (j, 0)),
            ],
            out_specs=pl.BlockSpec((B, tn), lambda j: (0, j)),
        ),
        compiler_params=pltpu.CompilerParams(
            dimension_semantics=("parallel",),
            vmem_limit_bytes=head_vmem,
        ),
    )(global_feat, gamma, beta, w)

    cls_score = cls_padded if N_pad == N else cls_padded[:, :N]
    return cls_score, global_feat


def reference_forward(feature_map_nchw, bn_weight, bn_bias, cls_weight):
    """Pure-JAX reference of the same computation (correctness check)."""
    gf = jnp.mean(feature_map_nchw.astype(jnp.float32), axis=(2, 3))  # (B, C)
    mu = jnp.mean(gf, axis=0, keepdims=True)
    var = jnp.mean((gf - mu) ** 2, axis=0, keepdims=True)
    feat = (gf - mu) / jnp.sqrt(var + BN_EPS) * bn_weight[None, :] + bn_bias[None, :]
    return feat @ cls_weight.astype(jnp.float32).T, gf


if __name__ == "__main__":
    # Module-consistent small shapes:
    #   model_name='efficientnet_v2' -> in_planes (C) = 1280
    #   base output feature map: (B=2, C=1280, H=8, W=8); num_classes = 128.
    B, C, H, W = 2, 1280, 8, 8
    NUM_CLASSES = 128

    key = jax.random.PRNGKey(0)
    k_x, k_w, k_w2 = jax.random.split(key, 3)

    feature_map = jax.random.normal(k_x, (B, C, H, W), dtype=jnp.float32)
    # Parameter init per the module:
    #   bottleneck (BatchNorm1d): weights_init_kaiming -> weight=1, bias=0
    bn_weight = jnp.ones((C,), dtype=jnp.float32)
    bn_bias = jnp.zeros((C,), dtype=jnp.float32)
    #   classifier (Linear, bias=False): weights_init_classifier -> normal(std=0.001)
    cls_weight = 0.001 * jax.random.normal(k_w, (NUM_CLASSES, C), dtype=jnp.float32)

    # --- f32 path: exact match against the pure-JAX reference ---------------
    cls_score, global_feat = backbone_forward(feature_map, bn_weight, bn_bias, cls_weight)
    jax.block_until_ready((cls_score, global_feat))
    ref_cls, ref_feat = reference_forward(feature_map, bn_weight, bn_bias, cls_weight)
    assert cls_score.shape == (B, NUM_CLASSES) and global_feat.shape == (B, C)
    assert jnp.allclose(global_feat, ref_feat, rtol=1e-5, atol=1e-5)
    assert jnp.allclose(cls_score, ref_cls, rtol=1e-4, atol=1e-5)

    # --- bf16 classifier weight (one-time parameter prep): halves the head's
    #     dominant HBM stream; bf16 x bf16 -> f32 MXU accumulate. -------------
    cls_weight_bf16 = cls_weight.astype(jnp.bfloat16)
    cls_bf16w, _ = backbone_forward(feature_map, bn_weight, bn_bias, cls_weight_bf16)
    jax.block_until_ready(cls_bf16w)
    assert jnp.allclose(cls_bf16w, ref_cls, rtol=2e-2, atol=2e-3)

    # --- non-128-multiple num_classes: exercises the pad-to-lane-dense + slice
    #     output path (e.g. 751 identities in ReID). --------------------------
    N2 = 100
    cls_weight2 = 0.001 * jax.random.normal(k_w2, (N2, C), dtype=jnp.float32)
    cls2, _ = backbone_forward(feature_map, bn_weight, bn_bias, cls_weight2)
    jax.block_until_ready(cls2)
    ref_cls2, _ = reference_forward(feature_map, bn_weight, bn_bias, cls_weight2)
    assert cls2.shape == (B, N2)
    assert jnp.allclose(cls2, ref_cls2, rtol=1e-4, atol=1e-5)

    # --- bf16 base-output path: no wrapper cast; the GAP kernel streams bf16
    #     and upcasts in-register before accumulating. ------------------------
    cls_bf16, gf_bf16 = backbone_forward(
        feature_map.astype(jnp.bfloat16), bn_weight, bn_bias, cls_weight
    )
    jax.block_until_ready((cls_bf16, gf_bf16))
    assert bool(jnp.all(jnp.isfinite(gf_bf16))) and bool(jnp.all(jnp.isfinite(cls_bf16)))
    assert jnp.allclose(gf_bf16, ref_feat, rtol=0.0, atol=2e-2)

    print("KERNEL_OK")
</pallas_src>

<mosaic_0001>
module attributes {stable_mosaic.version = 11 : i64} {
  func.func @gap_kernel(%arg0: i32, %arg1: i32, %arg2: memref<2x1280x64xf32, #tpu.memory_space<vmem>>, %arg3: memref<2x1280xf32, #tpu.memory_space<vmem>>, %arg4: memref<2x1280xf32, #tpu.memory_space<vmem>>) attributes {dimension_semantics = [#tpu.dimension_semantics<parallel>, #tpu.dimension_semantics<arbitrary>], iteration_bounds = array<i64: 1, 1>, scalar_prefetch = 0 : i64, scratch_operands = 1 : i64, tpu.core_type = #tpu.core_type<tc>, window_params = [{transform_indices = @transform_0, window_bounds = array<i64: 2, 1280, 64>}, {transform_indices = @transform_1, window_bounds = array<i64: 2, 1280>}]} {
    %c0_i32 = arith.constant 0 : i32
    %0 = arith.cmpi eq, %arg1, %c0_i32 : i32
    %1 = arith.extui %0 : i1 to i32
    %c0_i32_0 = arith.constant 0 : i32
    %2 = arith.cmpi ne, %1, %c0_i32_0 : i32
    scf.if %2 {
      %cst_9 = arith.constant 0.000000e+00 : f32
      %11 = vector.broadcast %cst_9 : f32 to vector<2x1280xf32>
      %c0_10 = arith.constant 0 : index
      %c0_11 = arith.constant 0 : index
      %12 = vector.load %arg4[%c0_10, %c0_11] : memref<2x1280xf32, #tpu.memory_space<vmem>>, vector<2x1280xf32>
      tpu.vector_store %arg4[%c0_10, %c0_11], %11 {strides = array<i32>} : memref<2x1280xf32, #tpu.memory_space<vmem>>, vector<2x1280xf32>,
    } else {
    }
    %c0 = arith.constant 0 : index
    %c0_1 = arith.constant 0 : index
    %c0_2 = arith.constant 0 : index
    %3 = vector.load %arg2[%c0, %c0_1, %c0_2] : memref<2x1280x64xf32, #tpu.memory_space<vmem>>, vector<2x1280x64xf32>
    %c0_3 = arith.constant 0 : index
    %c0_4 = arith.constant 0 : index
    %4 = vector.load %arg4[%c0_3, %c0_4] : memref<2x1280xf32, #tpu.memory_space<vmem>>, vector<2x1280xf32>
    %cst = arith.constant dense<0.000000e+00> : vector<2x1280xf32>
    %5 = vector.multi_reduction <add>, %3, %cst [2] : vector<2x1280x64xf32> to vector<2x1280xf32>
    %6 = arith.addf %4, %5 : vector<2x1280xf32>
    %c0_5 = arith.constant 0 : index
    %c0_6 = arith.constant 0 : index
    %7 = vector.load %arg4[%c0_5, %c0_6] : memref<2x1280xf32, #tpu.memory_space<vmem>>, vector<2x1280xf32>
    tpu.vector_store %arg4[%c0_5, %c0_6], %6 {strides = array<i32>} : memref<2x1280xf32, #tpu.memory_space<vmem>>, vector<2x1280xf32>,
    %c0_i32_7 = arith.constant 0 : i32
    %8 = arith.cmpi eq, %arg1, %c0_i32_7 : i32
    %9 = arith.extui %8 : i1 to i32
    %c0_i32_8 = arith.constant 0 : i32
    %10 = arith.cmpi ne, %9, %c0_i32_8 : i32
    scf.if %10 {
      %c0_9 = arith.constant 0 : index
      %c0_10 = arith.constant 0 : index
      %11 = vector.load %arg4[%c0_9, %c0_10] : memref<2x1280xf32, #tpu.memory_space<vmem>>, vector<2x1280xf32>
      %cst_11 = arith.constant 1.562500e-02 : f32
      %12 = vector.broadcast %cst_11 : f32 to vector<2x1280xf32>
      %13 = arith.mulf %11, %12 : vector<2x1280xf32>
      %c0_12 = arith.constant 0 : index
      %c0_13 = arith.constant 0 : index
      %14 = vector.load %arg3[%c0_12, %c0_13] : memref<2x1280xf32, #tpu.memory_space<vmem>>, vector<2x1280xf32>
      tpu.vector_store %arg3[%c0_12, %c0_13], %13 {strides = array<i32>} : memref<2x1280xf32, #tpu.memory_space<vmem>>, vector<2x1280xf32>,
    } else {
    }
    return
  }
  func.func @transform_0(%arg0: i32, %arg1: i32) -> (i32, i32, i32) {
    %c0_i32 = arith.constant 0 : i32
    %c0_i32_0 = arith.constant 0 : i32
    return %c0_i32, %arg0, %arg1 : i32, i32, i32
  }
  func.func @transform_1(%arg0: i32, %arg1: i32) -> (i32, i32) {
    %c0_i32 = arith.constant 0 : i32
    %c0_i32_0 = arith.constant 0 : i32
    return %c0_i32, %arg0 : i32, i32
  }
}

</mosaic_0001>

<bundles_post_ra>
// kernel: tpu_custom_call.1
= control target key start
LH: loop header
LB: loop body
LE: loop exit
PB: predicated region body
PF: predicated region fallthrough
CT: control target
= control target key end

     0   :  { %vm339_vm0 = vcmask 523264   ;;  %s27461_s0 = inlined_call_operand.vmem [shape: f32[2,1280,64], index: 0, kind: input, shape index: {}]   ;;  %s27462_s1 = inlined_call_operand.hbm [shape: f32[2,1280], index: 1, kind: output, shape index: {}]  }
   0x1   :  { %v18_v0 = vld [vmem:[%s27461_s0 + $0x10] sm:$0xff]  ;;  %v16_v1 = vld [vmem:[%s27461_s0] sm:$0xff]  ;;  %v19_v2 = vld [vmem:[%s27461_s0 + $0x18] sm:$0xff] }
   0x2   :  { %v346_v3 = vsel %vm339_vm0, %v18_v0, 0.0  ;;  %v340_v4 = vsel %vm339_vm0, %v16_v1, 0.0  ;;  %v17_v5 = vld [vmem:[%s27461_s0 + $0x8] sm:$0xff]  ;;  %v349_v6 = vsel %vm339_vm0, %v19_v2, 0.0  ;;  %v20_v9 = vld [vmem:[%s27461_s0 + $0x20] sm:$0xff]  ;;  %v23_v12 = vld [vmem:[%s27461_s0 + $0x38] sm:$0xff] }
   0x3   :  { %347 = vadd.xlane.f32.xlu1 %v346_v3  ;;  %341 = vadd.xlane.f32.xlu0 %v340_v4  ;;  %v343_v7 = vsel %vm339_vm0, %v17_v5, 0.0  ;;  %v21_v8 = vld [vmem:[%s27461_s0 + $0x28] sm:$0xff]  ;;  %v352_v11 = vsel %vm339_vm0, %v20_v9, 0.0  ;;  %v22_v13 = vld [vmem:[%s27461_s0 + $0x30] sm:$0xff]  ;;  %v361_v14 = vsel %vm339_vm0, %v23_v12, 0.0  ;;  %v24_v17 = vld [vmem:[%s27461_s0 + $0x40] sm:$0xff] }
   0x4   :  { %v355_v10 = vsel %vm339_vm0, %v21_v8, 0.0  ;;  %v358_v15 = vsel %vm339_vm0, %v22_v13, 0.0  ;;  %v25_v16 = vld [vmem:[%s27461_s0 + $0x48] sm:$0xff]  ;;  %v364_v19 = vsel %vm339_vm0, %v24_v17, 0.0  ;;  %v27_v20 = vld [vmem:[%s27461_s0 + $0x58] sm:$0xff]  ;;  %v26_v21 = vld [vmem:[%s27461_s0 + $0x50] sm:$0xff] }
   0x5   :  { %v367_v18 = vsel %vm339_vm0, %v25_v16, 0.0  ;;  %v373_v22 = vsel %vm339_vm0, %v27_v20, 0.0  ;;  %v370_v23 = vsel %vm339_vm0, %v26_v21, 0.0  ;;  %v29_v24 = vld [vmem:[%s27461_s0 + $0x68] sm:$0xff]  ;;  %v28_v25 = vld [vmem:[%s27461_s0 + $0x60] sm:$0xff]  ;;  %v31_v28 = vld [vmem:[%s27461_s0 + $0x78] sm:$0xff] }
   0x6   :  { %v379_v26 = vsel %vm339_vm0, %v29_v24, 0.0  ;;  %v376_v27 = vsel %vm339_vm0, %v28_v25, 0.0  ;;  %v30_v29 = vld [vmem:[%s27461_s0 + $0x70] sm:$0xff]  ;;  %v385_v30 = vsel %vm339_vm0, %v31_v28, 0.0 }
   0x7   :  { %350 = vadd.xlane.f32.xlu1 %v349_v6  ;;  %344 = vadd.xlane.f32.xlu0 %v343_v7  ;;  %v382_v31 = vsel %vm339_vm0, %v30_v29, 0.0 }
   0xb   :  { %356 = vadd.xlane.f32.xlu1 %v355_v10  ;;  %353 = vadd.xlane.f32.xlu0 %v352_v11 }
   0xf   :  { %362 = vadd.xlane.f32.xlu1 %v361_v14  ;;  %359 = vadd.xlane.f32.xlu0 %v358_v15 }
  0x13   :  { %368 = vadd.xlane.f32.xlu1 %v367_v18  ;;  %365 = vadd.xlane.f32.xlu0 %v364_v19 }
  0x17   :  { %374 = vadd.xlane.f32.xlu1 %v373_v22  ;;  %371 = vadd.xlane.f32.xlu0 %v370_v23 }
  0x1b   :  { %380 = vadd.xlane.f32.xlu1 %v379_v26  ;;  %377 = vadd.xlane.f32.xlu0 %v376_v27 }
  0x1c   :  { %6 = vsyncpa [#allocation4], 0  ;;  %v33_v32 = vld [vmem:[%s27461_s0 + $0x88] sm:$0xff]  ;;  %v32_v33 = vld [vmem:[%s27461_s0 + $0x80] sm:$0xff]  ;;  %vm16991_vm1 = vcmask 130112   ;;  %vm16998_vm2 = vcmask 195712  }
  0x1d   :  { %v391_v34 = vsel %vm339_vm0, %v33_v32, 0.0  ;;  %v388_v35 = vsel %vm339_vm0, %v32_v33, 0.0  ;;  %v35_v36 = vld [vmem:[%s27461_s0 + $0x98] sm:$0xff]  ;;  %v34_v37 = vld [vmem:[%s27461_s0 + $0x90] sm:$0xff]  ;;  %v37_v40 = vld [vmem:[%s27461_s0 + $0xa8] sm:$0xff]  ;;  %vm17005_vm3 = vcmask 261312  }
  0x1e   :  { %v397_v38 = vsel %vm339_vm0, %v35_v36, 0.0  ;;  %v394_v39 = vsel %vm339_vm0, %v34_v37, 0.0  ;;  %v36_v41 = vld [vmem:[%s27461_s0 + $0xa0] sm:$0xff]  ;;  %v403_v42 = vsel %vm339_vm0, %v37_v40, 0.0  ;;  %v39_v44 = vld [vmem:[%s27461_s0 + $0xb8] sm:$0xff]  ;;  %v38_v45 = vld [vmem:[%s27461_s0 + $0xb0] sm:$0xff] }
  0x1f   :  { %386 = vadd.xlane.f32.xlu1 %v385_v30  ;;  %383 = vadd.xlane.f32.xlu0 %v382_v31  ;;  %v400_v43 = vsel %vm339_vm0, %v36_v41, 0.0  ;;  %v409_v46 = vsel %vm339_vm0, %v39_v44, 0.0  ;;  %v406_v47 = vsel %vm339_vm0, %v38_v45, 0.0  ;;  %v41_v48 = vld [vmem:[%s27461_s0 + $0xc8] sm:$0xff]  ;;  %v40_v49 = vld [vmem:[%s27461_s0 + $0xc0] sm:$0xff]  ;;  %v43_v52 = vld [vmem:[%s27461_s0 + $0xd8] sm:$0xff] }
  0x20   :  { %v415_v50 = vsel %vm339_vm0, %v41_v48, 0.0  ;;  %v412_v51 = vsel %vm339_vm0, %v40_v49, 0.0  ;;  %v42_v53 = vld [vmem:[%s27461_s0 + $0xd0] sm:$0xff]  ;;  %v421_v54 = vsel %vm339_vm0, %v43_v52, 0.0  ;;  %v45_v56 = vld [vmem:[%s27461_s0 + $0xe8] sm:$0xff]  ;;  %v44_v57 = vld [vmem:[%s27461_s0 + $0xe0] sm:$0xff] }
  0x21   :  { %v418_v55 = vsel %vm339_vm0, %v42_v53, 0.0  ;;  %v427_v58 = vsel %vm339_vm0, %v45_v56, 0.0  ;;  %v424_v59 = vsel %vm339_vm0, %v44_v57, 0.0  ;;  %v47_v60 = vld [vmem:[%s27461_s0 + $0xf8] sm:$0xff]  ;;  %v46_v61 = vld [vmem:[%s27461_s0 + $0xf0] sm:$0xff]  ;;  %v49_v0 = vld [vmem:[%s27461_s0 + $0x108] sm:$0xff] }
  0x22   :  { %v433_v62 = vsel %vm339_vm0, %v47_v60, 0.0  ;;  %v430_v63 = vsel %vm339_vm0, %v46_v61, 0.0  ;;  %v48_v1 = vld [vmem:[%s27461_s0 + $0x100] sm:$0xff]  ;;  %v439_v2 = vsel %vm339_vm0, %v49_v0, 0.0  ;;  %v51_v4 = vld [vmem:[%s27461_s0 + $0x118] sm:$0xff]  ;;  %v50_v5 = vld [vmem:[%s27461_s0 + $0x110] sm:$0xff] }
  0x23   :  { %392 = vadd.xlane.f32.xlu1 %v391_v34  ;;  %389 = vadd.xlane.f32.xlu0 %v388_v35  ;;  %v436_v3 = vsel %vm339_vm0, %v48_v1, 0.0  ;;  %v445_v6 = vsel %vm339_vm0, %v51_v4, 0.0  ;;  %v442_v7 = vsel %vm339_vm0, %v50_v5, 0.0  ;;  %v53_v8 = vld [vmem:[%s27461_s0 + $0x128] sm:$0xff]  ;;  %v52_v9 = vld [vmem:[%s27461_s0 + $0x120] sm:$0xff]  ;;  %v55_v12 = vld [vmem:[%s27461_s0 + $0x138] sm:$0xff] }
  0x24   :  { %v451_v10 = vsel %vm339_vm0, %v53_v8, 0.0  ;;  %v448_v11 = vsel %vm339_vm0, %v52_v9, 0.0  ;;  %v54_v13 = vld [vmem:[%s27461_s0 + $0x130] sm:$0xff]  ;;  %v457_v14 = vsel %vm339_vm0, %v55_v12, 0.0  ;;  %v57_v16 = vld [vmem:[%s27461_s0 + $0x148] sm:$0xff]  ;;  %v56_v17 = vld [vmem:[%s27461_s0 + $0x140] sm:$0xff] }
  0x25   :  { %v454_v15 = vsel %vm339_vm0, %v54_v13, 0.0  ;;  %v463_v18 = vsel %vm339_vm0, %v57_v16, 0.0  ;;  %v460_v19 = vsel %vm339_vm0, %v56_v17, 0.0  ;;  %v59_v20 = vld [vmem:[%s27461_s0 + $0x158] sm:$0xff]  ;;  %v58_v21 = vld [vmem:[%s27461_s0 + $0x150] sm:$0xff]  ;;  %v61_v24 = vld [vmem:[%s27461_s0 + $0x168] sm:$0xff] }
  0x26   :  { %v469_v22 = vsel %vm339_vm0, %v59_v20, 0.0  ;;  %v466_v23 = vsel %vm339_vm0, %v58_v21, 0.0  ;;  %v60_v25 = vld [vmem:[%s27461_s0 + $0x160] sm:$0xff]  ;;  %v475_v26 = vsel %vm339_vm0, %v61_v24, 0.0  ;;  %v63_v28 = vld [vmem:[%s27461_s0 + $0x178] sm:$0xff]  ;;  %v62_v29 = vld [vmem:[%s27461_s0 + $0x170] sm:$0xff] }
  0x27   :  { %398 = vadd.xlane.f32.xlu1 %v397_v38  ;;  %395 = vadd.xlane.f32.xlu0 %v394_v39  ;;  %v472_v27 = vsel %vm339_vm0, %v60_v25, 0.0  ;;  %v481_v30 = vsel %vm339_vm0, %v63_v28, 0.0  ;;  %v478_v31 = vsel %vm339_vm0, %v62_v29, 0.0  ;;  %v65_v32 = vld [vmem:[%s27461_s0 + $0x188] sm:$0xff]  ;;  %v64_v33 = vld [vmem:[%s27461_s0 + $0x180] sm:$0xff]  ;;  %v67_v36 = vld [vmem:[%s27461_s0 + $0x198] sm:$0xff] }
  0x28   :  { %v487_v34 = vsel %vm339_vm0, %v65_v32, 0.0  ;;  %v484_v35 = vsel %vm339_vm0, %v64_v33, 0.0  ;;  %v66_v37 = vld [vmem:[%s27461_s0 + $0x190] sm:$0xff]  ;;  %v493_v38 = vsel %vm339_vm0, %v67_v36, 0.0  ;;  %v69_v40 = vld [vmem:[%s27461_s0 + $0x1a8] sm:$0xff]  ;;  %v68_v41 = vld [vmem:[%s27461_s0 + $0x1a0] sm:$0xff] }
  0x29   :  { %v490_v39 = vsel %vm339_vm0, %v66_v37, 0.0  ;;  %v71_v44 = vld [vmem:[%s27461_s0 + $0x1b8] sm:$0xff]  ;;  %v70_v45 = vld [vmem:[%s27461_s0 + $0x1b0] sm:$0xff]  ;;  %v73_v48 = vld [vmem:[%s27461_s0 + $0x1c8] sm:$0xff]  ;;  %vm17012_vm4 = vcmask 326912   ;;  %vm17019_vm5 = vcmask 392512  }
  0x2a   :  { %v72_v49 = vld [vmem:[%s27461_s0 + $0x1c0] sm:$0xff]  ;;  %v75_v52 = vld [vmem:[%s27461_s0 + $0x1d8] sm:$0xff]  ;;  %v74_v53 = vld [vmem:[%s27461_s0 + $0x1d0] sm:$0xff]  ;;  %vm17026_vm6 = vcmask 458112   ;;  %vm17033_vm7 = vcmask 523712   ;;  %vm17040_vm8 = vcmask 589312  }
  0x2b   :  { %404 = vadd.xlane.f32.xlu1 %v403_v42  ;;  %401 = vadd.xlane.f32.xlu0 %v400_v43  ;;  %v499_v42 = vsel %vm339_vm0, %v69_v40, 0.0  ;;  %v496_v43 = vsel %vm339_vm0, %v68_v41, 0.0  ;;  %v77_v56 = vld [vmem:[%s27461_s0 + $0x1e8] sm:$0xff]  ;;  %v76_v57 = vld [vmem:[%s27461_s0 + $0x1e0] sm:$0xff]  ;;  %v79_v60 = vld [vmem:[%s27461_s0 + $0x1f8] sm:$0xff]  ;;  %vm17047_vm9 = vcmask 654912  }
  0x2c   :  { %v78_v61 = vld [vmem:[%s27461_s0 + $0x1f0] sm:$0xff]  ;;  %v81_v0 = vld [vmem:[%s27461_s0 + $0x208] sm:$0xff]  ;;  %v80_v1 = vld [vmem:[%s27461_s0 + $0x200] sm:$0xff]  ;;  %vm17054_vm10 = vcmask 720512   ;;  %vm17061_vm11 = vcmask 786112   ;;  %vm17068_vm12 = vcmask 851712  }
  0x2d   :  { %v83_v4 = vld [vmem:[%s27461_s0 + $0x218] sm:$0xff]  ;;  %v82_v5 = vld [vmem:[%s27461_s0 + $0x210] sm:$0xff]  ;;  %v85_v8 = vld [vmem:[%s27461_s0 + $0x228] sm:$0xff]  ;;  %vm17075_vm13 = vcmask 917312   ;;  %vm17082_vm14 = vcmask 982912   ;;  %vm17089_vm15 = vcmask 1048512  }
  0x2e   :  { %v84_v9 = vld [vmem:[%s27461_s0 + $0x220] sm:$0xff]  ;;  %v87_v12 = vld [vmem:[%s27461_s0 + $0x238] sm:$0xff]  ;;  %v86_v13 = vld [vmem:[%s27461_s0 + $0x230] sm:$0xff] }
  0x2f   :  { %410 = vadd.xlane.f32.xlu1 %v409_v46  ;;  %407 = vadd.xlane.f32.xlu0 %v406_v47  ;;  %v505_v46 = vsel %vm339_vm0, %v71_v44, 0.0  ;;  %v502_v47 = vsel %vm339_vm0, %v70_v45, 0.0  ;;  %v89_v16 = vld [vmem:[%s27461_s0 + $0x248] sm:$0xff]  ;;  %v88_v17 = vld [vmem:[%s27461_s0 + $0x240] sm:$0xff] }
  0x30   :  { %v556_v20 = vsel %vm339_vm0, %v88_v17, 0.0  ;;  %v93_v28 = vld [vmem:[%s27461_s0 + $0x268] sm:$0xff]  ;;  %v92_v29 = vld [vmem:[%s27461_s0 + $0x260] sm:$0xff] }
  0x31   :  { %v568_v32 = vsel %vm339_vm0, %v92_v29, 0.0  ;;  %v97_v40 = vld [vmem:[%s27461_s0 + $0x288] sm:$0xff]  ;;  %v96_v41 = vld [vmem:[%s27461_s0 + $0x280] sm:$0xff] }
  0x32   :  { %v580_v44 = vsel %vm339_vm0, %v96_v41, 0.0  ;;  %v112_v29 = vld [vmem:[%s27461_s0 + $0x300] sm:$0xff] }
  0x33   :  { %416 = vadd.xlane.f32.xlu1 %v415_v50  ;;  %413 = vadd.xlane.f32.xlu0 %v412_v51  ;;  %v511_v50 = vsel %vm339_vm0, %v73_v48, 0.0  ;;  %v508_v51 = vsel %vm339_vm0, %v72_v49, 0.0 }
  0x37   :  { %422 = vadd.xlane.f32.xlu1 %v421_v54  ;;  %419 = vadd.xlane.f32.xlu0 %v418_v55  ;;  %v517_v54 = vsel %vm339_vm0, %v75_v52, 0.0  ;;  %v514_v55 = vsel %vm339_vm0, %v74_v53, 0.0  ;;  %v101_v52 = vld [vmem:[%s27461_s0 + $0x2a8] sm:$0xff]  ;;  %v100_v53 = vld [vmem:[%s27461_s0 + $0x2a0] sm:$0xff] }
  0x3b   :  { %428 = vadd.xlane.f32.xlu1 %v427_v58  ;;  %425 = vadd.xlane.f32.xlu0 %v424_v59  ;;  %v523_v58 = vsel %vm339_vm0, %v77_v56, 0.0  ;;  %v520_v59 = vsel %vm339_vm0, %v76_v57, 0.0  ;;  %v592_v56 = vsel %vm339_vm0, %v100_v53, 0.0 }
  0x3f   :  { %434 = vadd.xlane.f32.xlu1 %v433_v62  ;;  %431 = vadd.xlane.f32.xlu0 %v430_v63  ;;  %v529_v62 = vsel %vm339_vm0, %v79_v60, 0.0  ;;  %v526_v63 = vsel %vm339_vm0, %v78_v61, 0.0 }
  0x43   :  { %440 = vadd.xlane.f32.xlu1 %v439_v2  ;;  %437 = vadd.xlane.f32.xlu0 %v436_v3  ;;  %v535_v2 = vsel %vm339_vm0, %v81_v0, 0.0  ;;  %v532_v3 = vsel %vm339_vm0, %v80_v1, 0.0  ;;  %v105_v0 = vld [vmem:[%s27461_s0 + $0x2c8] sm:$0xff]  ;;  %v104_v1 = vld [vmem:[%s27461_s0 + $0x2c0] sm:$0xff] }
  0x47   :  { %446 = vadd.xlane.f32.xlu1 %v445_v6  ;;  %443 = vadd.xlane.f32.xlu0 %v442_v7  ;;  %v541_v6 = vsel %vm339_vm0, %v83_v4, 0.0  ;;  %v538_v7 = vsel %vm339_vm0, %v82_v5, 0.0  ;;  %v604_v4 = vsel %vm339_vm0, %v104_v1, 0.0  ;;  %v120_v1 = vld [vmem:[%s27461_s0 + $0x340] sm:$0xff] }
  0x4b   :  { %452 = vadd.xlane.f32.xlu1 %v451_v10  ;;  %449 = vadd.xlane.f32.xlu0 %v448_v11  ;;  %v547_v10 = vsel %vm339_vm0, %v85_v8, 0.0  ;;  %v544_v11 = vsel %vm339_vm0, %v84_v9, 0.0 }
  0x4f   :  { %458 = vadd.xlane.f32.xlu1 %v457_v14  ;;  %455 = vadd.xlane.f32.xlu0 %v454_v15  ;;  %v553_v14 = vsel %vm339_vm0, %v87_v12, 0.0  ;;  %v550_v15 = vsel %vm339_vm0, %v86_v13, 0.0  ;;  %v109_v12 = vld [vmem:[%s27461_s0 + $0x2e8] sm:$0xff]  ;;  %v108_v13 = vld [vmem:[%s27461_s0 + $0x2e0] sm:$0xff] }
  0x53   :  { %464 = vadd.xlane.f32.xlu1 %v463_v18  ;;  %461 = vadd.xlane.f32.xlu0 %v460_v19  ;;  %v559_v19 = vsel %vm339_vm0, %v89_v16, 0.0  ;;  %v616_v16 = vsel %vm339_vm0, %v108_v13, 0.0 }
  0x57   :  { %470 = vadd.xlane.f32.xlu1 %v469_v22  ;;  %467 = vadd.xlane.f32.xlu0 %v466_v23  ;;  %v91_v22 = vld [vmem:[%s27461_s0 + $0x258] sm:$0xff]  ;;  %v90_v23 = vld [vmem:[%s27461_s0 + $0x250] sm:$0xff] }
  0x58   :  { %v565_v25 = vsel %vm339_vm0, %v91_v22, 0.0 }
  0x5b   :  { %476 = vadd.xlane.f32.xlu1 %v475_v26  ;;  %473 = vadd.xlane.f32.xlu0 %v472_v27  ;;  %v562_v26 = vsel %vm339_vm0, %v90_v23, 0.0 }
  0x5f   :  { %482 = vadd.xlane.f32.xlu1 %v481_v30  ;;  %479 = vadd.xlane.f32.xlu0 %v478_v31  ;;  %v571_v31 = vsel %vm339_vm0, %v93_v28, 0.0  ;;  %v113_v28 = vld [vmem:[%s27461_s0 + $0x308] sm:$0xff] }
  0x63   :  { %488 = vadd.xlane.f32.xlu1 %v487_v34  ;;  %485 = vadd.xlane.f32.xlu0 %v484_v35  ;;  %v95_v34 = vld [vmem:[%s27461_s0 + $0x278] sm:$0xff]  ;;  %v94_v35 = vld [vmem:[%s27461_s0 + $0x270] sm:$0xff] }
  0x64   :  { %v577_v37 = vsel %vm339_vm0, %v95_v34, 0.0  ;;  %v628_v34 = vsel %vm339_vm0, %v112_v29, 0.0 }
  0x67   :  { %494 = vadd.xlane.f32.xlu1 %v493_v38  ;;  %491 = vadd.xlane.f32.xlu0 %v490_v39  ;;  %v574_v38 = vsel %vm339_vm0, %v94_v35, 0.0 }
  0x6b   :  { %500 = vadd.xlane.f32.xlu1 %v499_v42  ;;  %497 = vadd.xlane.f32.xlu0 %v496_v43  ;;  %v583_v43 = vsel %vm339_vm0, %v97_v40, 0.0 }
  0x6f   :  { %506 = vadd.xlane.f32.xlu1 %v505_v46  ;;  %503 = vadd.xlane.f32.xlu0 %v502_v47  ;;  %v99_v46 = vld [vmem:[%s27461_s0 + $0x298] sm:$0xff]  ;;  %v98_v47 = vld [vmem:[%s27461_s0 + $0x290] sm:$0xff] }
  0x70   :  { %v589_v49 = vsel %vm339_vm0, %v99_v46, 0.0  ;;  %v117_v46 = vld [vmem:[%s27461_s0 + $0x328] sm:$0xff] }
  0x73   :  { %512 = vadd.xlane.f32.xlu1 %v511_v50  ;;  %509 = vadd.xlane.f32.xlu0 %v508_v51  ;;  %v586_v50 = vsel %vm339_vm0, %v98_v47, 0.0  ;;  %v116_v47 = vld [vmem:[%s27461_s0 + $0x320] sm:$0xff] }
  0x77   :  { %518 = vadd.xlane.f32.xlu1 %v517_v54  ;;  %515 = vadd.xlane.f32.xlu0 %v514_v55  ;;  %v595_v55 = vsel %vm339_vm0, %v101_v52, 0.0  ;;  %v640_v52 = vsel %vm339_vm0, %v116_v47, 0.0  ;;  %v128_v47 = vld [vmem:[%s27461_s0 + $0x380] sm:$0xff] }
  0x7b   :  { %524 = vadd.xlane.f32.xlu1 %v523_v58  ;;  %521 = vadd.xlane.f32.xlu0 %v520_v59  ;;  %v103_v58 = vld [vmem:[%s27461_s0 + $0x2b8] sm:$0xff]  ;;  %v102_v59 = vld [vmem:[%s27461_s0 + $0x2b0] sm:$0xff] }
  0x7c   :  { %v601_v61 = vsel %vm339_vm0, %v103_v58, 0.0 }
  0x7f   :  { %530 = vadd.xlane.f32.xlu1 %v529_v62  ;;  %527 = vadd.xlane.f32.xlu0 %v526_v63  ;;  %v598_v62 = vsel %vm339_vm0, %v102_v59, 0.0 }
  0x83   :  { %536 = vadd.xlane.f32.xlu1 %v535_v2  ;;  %533 = vadd.xlane.f32.xlu0 %v532_v3  ;;  %v607_v3 = vsel %vm339_vm0, %v105_v0, 0.0  ;;  %v121_v0 = vld [vmem:[%s27461_s0 + $0x348] sm:$0xff] }
  0x87   :  { %542 = vadd.xlane.f32.xlu1 %v541_v6  ;;  %539 = vadd.xlane.f32.xlu0 %v538_v7  ;;  %v107_v6 = vld [vmem:[%s27461_s0 + $0x2d8] sm:$0xff]  ;;  %v106_v7 = vld [vmem:[%s27461_s0 + $0x2d0] sm:$0xff] }
  0x88   :  { %v613_v9 = vsel %vm339_vm0, %v107_v6, 0.0  ;;  %v652_v6 = vsel %vm339_vm0, %v120_v1, 0.0 }
  0x8b   :  { %548 = vadd.xlane.f32.xlu1 %v547_v10  ;;  %545 = vadd.xlane.f32.xlu0 %v544_v11  ;;  %v610_v10 = vsel %vm339_vm0, %v106_v7, 0.0 }
  0x8f   :  { %554 = vadd.xlane.f32.xlu1 %v553_v14  ;;  %551 = vadd.xlane.f32.xlu0 %v550_v15  ;;  %v619_v15 = vsel %vm339_vm0, %v109_v12, 0.0 }
  0x90   :  { %v19026_v18 = vpop.xlane.xlu1 %347  ;;  %v19030_v21 = vpop.xlane.xlu0 %341 }
  0x93   :  { %560 = vadd.xlane.f32.xlu1 %v559_v19  ;;  %557 = vadd.xlane.f32.xlu0 %v556_v20  ;;  %v111_v19 = vld [vmem:[%s27461_s0 + $0x2f8] sm:$0xff]  ;;  %v110_v20 = vld [vmem:[%s27461_s0 + $0x2f0] sm:$0xff] }
  0x94   :  { %v19038_v24 = vpop.xlane.xlu1 %350  ;;  %v19042_v27 = vpop.xlane.xlu0 %344  ;;  %v625_v23 = vsel %vm339_vm0, %v111_v19, 0.0  ;;  %v125_v19 = vld [vmem:[%s27461_s0 + $0x368] sm:$0xff] }
  0x97   :  { %566 = vadd.xlane.f32.xlu1 %v565_v25  ;;  %563 = vadd.xlane.f32.xlu0 %v562_v26  ;;  %v622_v25 = vsel %vm339_vm0, %v110_v20, 0.0  ;;  %v124_v20 = vld [vmem:[%s27461_s0 + $0x360] sm:$0xff] }
  0x98   :  { %v19050_v30 = vpop.xlane.xlu1 %356  ;;  %v19054_v33 = vpop.xlane.xlu0 %353 }
  0x9b   :  { %572 = vadd.xlane.f32.xlu1 %v571_v31  ;;  %569 = vadd.xlane.f32.xlu0 %v568_v32  ;;  %v631_v32 = vsel %vm339_vm0, %v113_v28, 0.0  ;;  %v664_v28 = vsel %vm339_vm0, %v124_v20, 0.0 }
  0x9c   :  { %v19062_v36 = vpop.xlane.xlu1 %362  ;;  %v19066_v39 = vpop.xlane.xlu0 %359 }
  0x9f   :  { %578 = vadd.xlane.f32.xlu1 %v577_v37  ;;  %575 = vadd.xlane.f32.xlu0 %v574_v38  ;;  %v115_v37 = vld [vmem:[%s27461_s0 + $0x318] sm:$0xff]  ;;  %v114_v38 = vld [vmem:[%s27461_s0 + $0x310] sm:$0xff] }
  0xa0   :  { %v19074_v42 = vpop.xlane.xlu1 %368  ;;  %v19078_v45 = vpop.xlane.xlu0 %365  ;;  %v637_v41 = vsel %vm339_vm0, %v115_v37, 0.0 }
  0xa3   :  { %584 = vadd.xlane.f32.xlu1 %v583_v43  ;;  %581 = vadd.xlane.f32.xlu0 %v580_v44  ;;  %v634_v43 = vsel %vm339_vm0, %v114_v38, 0.0 }
  0xa4   :  { %v19086_v48 = vpop.xlane.xlu1 %374  ;;  %v19090_v51 = vpop.xlane.xlu0 %371 }
  0xa7   :  { %590 = vadd.xlane.f32.xlu1 %v589_v49  ;;  %587 = vadd.xlane.f32.xlu0 %v586_v50  ;;  %v643_v50 = vsel %vm339_vm0, %v117_v46, 0.0  ;;  %v129_v46 = vld [vmem:[%s27461_s0 + $0x388] sm:$0xff] }
  0xa8   :  { %v19098_v54 = vpop.xlane.xlu1 %380  ;;  %v19102_v57 = vpop.xlane.xlu0 %377 }
  0xab   :  { %596 = vadd.xlane.f32.xlu1 %v595_v55  ;;  %593 = vadd.xlane.f32.xlu0 %v592_v56  ;;  %v119_v55 = vld [vmem:[%s27461_s0 + $0x338] sm:$0xff]  ;;  %v118_v56 = vld [vmem:[%s27461_s0 + $0x330] sm:$0xff] }
  0xac   :  { %v19110_v60 = vpop.xlane.xlu1 %386  ;;  %v19114_v63 = vpop.xlane.xlu0 %383  ;;  %v649_v59 = vsel %vm339_vm0, %v119_v55, 0.0  ;;  %v676_v55 = vsel %vm339_vm0, %v128_v47, 0.0  ;;  %v136_v47 = vld [vmem:[%s27461_s0 + $0x3c0] sm:$0xff] }
  0xaf   :  { %602 = vadd.xlane.f32.xlu1 %v601_v61  ;;  %599 = vadd.xlane.f32.xlu0 %v598_v62  ;;  %v646_v61 = vsel %vm339_vm0, %v118_v56, 0.0 }
  0xb0   :  { %v19122_v2 = vpop.xlane.xlu1 %392  ;;  %v19126_v5 = vpop.xlane.xlu0 %389 }
  0xb3   :  { %608 = vadd.xlane.f32.xlu1 %v607_v3  ;;  %605 = vadd.xlane.f32.xlu0 %v604_v4  ;;  %v655_v4 = vsel %vm339_vm0, %v121_v0, 0.0 }
  0xb4   :  { %v19134_v8 = vpop.xlane.xlu1 %398  ;;  %v19138_v11 = vpop.xlane.xlu0 %395 }
  0xb7   :  { %614 = vadd.xlane.f32.xlu1 %v613_v9  ;;  %611 = vadd.xlane.f32.xlu0 %v610_v10  ;;  %v123_v9 = vld [vmem:[%s27461_s0 + $0x358] sm:$0xff]  ;;  %v122_v10 = vld [vmem:[%s27461_s0 + $0x350] sm:$0xff] }
  0xb8   :  { %v19146_v14 = vpop.xlane.xlu1 %404  ;;  %v19150_v17 = vpop.xlane.xlu0 %401  ;;  %v661_v13 = vsel %vm339_vm0, %v123_v9, 0.0  ;;  %v133_v9 = vld [vmem:[%s27461_s0 + $0x3a8] sm:$0xff] }
  0xbb   :  { %620 = vadd.xlane.f32.xlu1 %v619_v15  ;;  %617 = vadd.xlane.f32.xlu0 %v616_v16  ;;  %v658_v15 = vsel %vm339_vm0, %v122_v10, 0.0  ;;  %v132_v10 = vld [vmem:[%s27461_s0 + $0x3a0] sm:$0xff] }
  0xbc   :  { %v19158_v22 = vpop.xlane.xlu1 %410  ;;  %v19162_v26 = vpop.xlane.xlu0 %407 }
  0xbf   :  { %626 = vadd.xlane.f32.xlu1 %v625_v23  ;;  %623 = vadd.xlane.f32.xlu0 %v622_v25  ;;  %v667_v25 = vsel %vm339_vm0, %v125_v19, 0.0  ;;  %v688_v19 = vsel %vm339_vm0, %v132_v10, 0.0 }
  0xc0   :  { %v19170_v31 = vpop.xlane.xlu1 %416  ;;  %v19174_v35 = vpop.xlane.xlu0 %413 }
  0xc3   :  { %632 = vadd.xlane.f32.xlu1 %v631_v32  ;;  %629 = vadd.xlane.f32.xlu0 %v628_v34  ;;  %v127_v32 = vld [vmem:[%s27461_s0 + $0x378] sm:$0xff]  ;;  %v126_v34 = vld [vmem:[%s27461_s0 + $0x370] sm:$0xff] }
  0xc4   :  { %v19182_v40 = vpop.xlane.xlu1 %422  ;;  %v19186_v44 = vpop.xlane.xlu0 %419  ;;  %v673_v38 = vsel %vm339_vm0, %v127_v32, 0.0 }
  0xc7   :  { %638 = vadd.xlane.f32.xlu1 %v637_v41  ;;  %635 = vadd.xlane.f32.xlu0 %v634_v43  ;;  %v670_v41 = vsel %vm339_vm0, %v126_v34, 0.0 }
  0xc8   :  { %v19194_v49 = vpop.xlane.xlu1 %428  ;;  %v19198_v53 = vpop.xlane.xlu0 %425 }
  0xcb   :  { %644 = vadd.xlane.f32.xlu1 %v643_v50  ;;  %641 = vadd.xlane.f32.xlu0 %v640_v52  ;;  %v679_v52 = vsel %vm339_vm0, %v129_v46, 0.0  ;;  %v137_v46 = vld [vmem:[%s27461_s0 + $0x3c8] sm:$0xff] }
  0xcc   :  { %v19206_v58 = vpop.xlane.xlu1 %434  ;;  %v19210_v62 = vpop.xlane.xlu0 %431 }
  0xcf   :  { %650 = vadd.xlane.f32.xlu1 %v649_v59  ;;  %647 = vadd.xlane.f32.xlu0 %v646_v61  ;;  %v131_v59 = vld [vmem:[%s27461_s0 + $0x398] sm:$0xff]  ;;  %v130_v61 = vld [vmem:[%s27461_s0 + $0x390] sm:$0xff] }
  0xd0   :  { %v19218_v3 = vpop.xlane.xlu1 %440  ;;  %v19222_v7 = vpop.xlane.xlu0 %437  ;;  %v685_v1 = vsel %vm339_vm0, %v131_v59, 0.0  ;;  %v700_v59 = vsel %vm339_vm0, %v136_v47, 0.0 }
  0xd1   :  { %27778 = vst [vmem:[#allocation6_spill] sm:$0xff] %v19218_v3  ;;  %27779 = vst [vmem:[#allocation7_spill] sm:$0xff] %v19222_v7 }
  0xd3   :  { %656 = vadd.xlane.f32.xlu1 %v655_v4  ;;  %653 = vadd.xlane.f32.xlu0 %v652_v6  ;;  %v682_v4 = vsel %vm339_vm0, %v130_v61, 0.0 }
  0xd4   :  { %v19230_v12 = vpop.xlane.xlu1 %446  ;;  %v19234_v16 = vpop.xlane.xlu0 %443 }
  0xd5   :  { %27780 = vst [vmem:[#allocation8_spill] sm:$0xff] %v19230_v12  ;;  %27781 = vst [vmem:[#allocation9_spill] sm:$0xff] %v19234_v16 }
  0xd7   :  { %662 = vadd.xlane.f32.xlu1 %v661_v13  ;;  %659 = vadd.xlane.f32.xlu0 %v658_v15  ;;  %v691_v15 = vsel %vm339_vm0, %v133_v9, 0.0 }
  0xd8   :  { %v19242_v23 = vpop.xlane.xlu1 %452  ;;  %v19246_v29 = vpop.xlane.xlu0 %449 }
  0xd9   :  { %27782 = vst [vmem:[#allocation10_spill] sm:$0xff] %v19242_v23  ;;  %27783 = vst [vmem:[#allocation11_spill] sm:$0xff] %v19246_v29 }
  0xdb   :  { %668 = vadd.xlane.f32.xlu1 %v667_v25  ;;  %665 = vadd.xlane.f32.xlu0 %v664_v28  ;;  %v135_v25 = vld [vmem:[%s27461_s0 + $0x3b8] sm:$0xff]  ;;  %v134_v28 = vld [vmem:[%s27461_s0 + $0x3b0] sm:$0xff] }
  0xdc   :  { %v19254_v37 = vpop.xlane.xlu1 %458  ;;  %v19258_v43 = vpop.xlane.xlu0 %455  ;;  %v697_v34 = vsel %vm339_vm0, %v135_v25, 0.0  ;;  %v141_v25 = vld [vmem:[%s27461_s0 + $0x3e8] sm:$0xff] }
  0xdd   :  { %27784 = vst [vmem:[#allocation12_spill] sm:$0xff] %v19254_v37  ;;  %27785 = vst [vmem:[#allocation13_spill] sm:$0xff] %v19258_v43 }
  0xdf   :  { %674 = vadd.xlane.f32.xlu1 %v673_v38  ;;  %671 = vadd.xlane.f32.xlu0 %v670_v41  ;;  %v694_v38 = vsel %vm339_vm0, %v134_v28, 0.0  ;;  %v140_v28 = vld [vmem:[%s27461_s0 + $0x3e0] sm:$0xff] }
  0xe0   :  { %v19266_v50 = vpop.xlane.xlu1 %464  ;;  %v19270_v56 = vpop.xlane.xlu0 %461 }
  0xe1   :  { %27786 = vst [vmem:[#allocation14_spill] sm:$0xff] %v19266_v50  ;;  %27787 = vst [vmem:[#allocation15_spill] sm:$0xff] %v19270_v56 }
  0xe3   :  { %680 = vadd.xlane.f32.xlu1 %v679_v52  ;;  %677 = vadd.xlane.f32.xlu0 %v676_v55  ;;  %v703_v55 = vsel %vm339_vm0, %v137_v46, 0.0  ;;  %v712_v46 = vsel %vm339_vm0, %v140_v28, 0.0  ;;  %v144_v28 = vld [vmem:[%s27461_s0 + $0x400] sm:$0xff] }
  0xe4   :  { %v19278_v0 = vpop.xlane.xlu1 %470  ;;  %v19282_v6 = vpop.xlane.xlu0 %467 }
  0xe5   :  { %27788 = vst [vmem:[#allocation16_spill] sm:$0xff] %v19278_v0  ;;  %27789 = vst [vmem:[#allocation17_spill] sm:$0xff] %v19282_v6 }
  0xe7   :  { %686 = vadd.xlane.f32.xlu1 %v685_v1  ;;  %683 = vadd.xlane.f32.xlu0 %v682_v4  ;;  %v139_v1 = vld [vmem:[%s27461_s0 + $0x3d8] sm:$0xff]  ;;  %v138_v4 = vld [vmem:[%s27461_s0 + $0x3d0] sm:$0xff] }
  0xe8   :  { %v19290_v13 = vpop.xlane.xlu1 %476  ;;  %v19294_v20 = vpop.xlane.xlu0 %473  ;;  %v709_v10 = vsel %vm339_vm0, %v139_v1, 0.0 }
  0xe9   :  { %27790 = vst [vmem:[#allocation18_spill] sm:$0xff] %v19290_v13  ;;  %27791 = vst [vmem:[#allocation19_spill] sm:$0xff] %v19294_v20  ;;  %v241_v20 = vld [vmem:[%s27461_s0 + $0x708] sm:$0xff] }
  0xeb   :  { %692 = vadd.xlane.f32.xlu1 %v691_v15  ;;  %689 = vadd.xlane.f32.xlu0 %v688_v19  ;;  %v706_v15 = vsel %vm339_vm0, %v138_v4, 0.0 }
  0xec   :  { %v19302_v32 = vpop.xlane.xlu1 %482  ;;  %v19306_v41 = vpop.xlane.xlu0 %479 }
  0xed   :  { %27792 = vst [vmem:[#allocation20_spill] sm:$0xff] %v19302_v32  ;;  %27793 = vst [vmem:[#allocation21_spill] sm:$0xff] %v19306_v41 }
  0xef   :  { %698 = vadd.xlane.f32.xlu1 %v697_v34  ;;  %695 = vadd.xlane.f32.xlu0 %v694_v38  ;;  %v715_v38 = vsel %vm339_vm0, %v141_v25, 0.0  ;;  %v145_v25 = vld [vmem:[%s27461_s0 + $0x408] sm:$0xff] }
  0xf0   :  { %v19314_v52 = vpop.xlane.xlu1 %488  ;;  %v19318_v61 = vpop.xlane.xlu0 %485 }
  0xf1   :  { %27794 = vst [vmem:[#allocation22_spill] sm:$0xff] %v19314_v52  ;;  %27795 = vst [vmem:[#allocation23_spill] sm:$0xff] %v19318_v61  ;;  %v18717_v52 = vmov 1987475062  }
  0xf2   :  { %v1642_v41 = vunpack.c.l.s4 %v18717_v52 }
  0xf3   :  { %704 = vadd.xlane.f32.xlu1 %v703_v55  ;;  %701 = vadd.xlane.f32.xlu0 %v700_v59  ;;  %v143_v55 = vld [vmem:[%s27461_s0 + $0x3f8] sm:$0xff]  ;;  %v142_v59 = vld [vmem:[%s27461_s0 + $0x3f0] sm:$0xff] }
  0xf4   :  { %v19326_v9 = vpop.xlane.xlu1 %494  ;;  %v19330_v19 = vpop.xlane.xlu0 %491  ;;  %v721_v4 = vsel %vm339_vm0, %v143_v55, 0.0  ;;  %v724_v55 = vsel %vm339_vm0, %v144_v28, 0.0  ;;  %v149_v28 = vld [vmem:[%s27461_s0 + $0x428] sm:$0xff]  ;;  %v1643_v32 = vunpack.c.0.s8 %v1642_v41 }
  0xf5   :  { %27796 = vst [vmem:[#allocation24_spill] sm:$0xff] %v19326_v9  ;;  %27797 = vst [vmem:[#allocation25_spill] sm:$0xff] %v19330_v19  ;;  %v18716_v9 = vmov 1414812756  }
  0xf6   :  { %v1635_v61 = vunpack.c.l.s4 %v18716_v9 }
  0xf7   :  { %710 = vadd.xlane.f32.xlu1 %v709_v10  ;;  %707 = vadd.xlane.f32.xlu0 %v706_v15  ;;  %v718_v10 = vsel %vm339_vm0, %v142_v59, 0.0  ;;  %v147_v59 = vld [vmem:[%s27461_s0 + $0x418] sm:$0xff] }
  0xf8   :  { %v19338_v34 = vpop.xlane.xlu1 %500  ;;  %v19342_v47 = vpop.xlane.xlu0 %497 }
  0xf9   :  { %27798 = vst [vmem:[#allocation26_spill] sm:$0xff] %v19338_v34  ;;  %27799 = vst [vmem:[#allocation27_spill] sm:$0xff] %v19342_v47  ;;  %v18714_v47 = vmov 269488144  }
  0xfa   :  { %v1621_v34 = vunpack.c.l.s4 %v18714_v47  ;;  %v235_v47 = vld [vmem:[%s27461_s0 + $0x6d8] sm:$0xff] }
  0xfb   :  { %716 = vadd.xlane.f32.xlu1 %v715_v38  ;;  %713 = vadd.xlane.f32.xlu0 %v712_v46  ;;  %v727_v46 = vsel %vm339_vm0, %v145_v25, 0.0  ;;  %v997_v9 = vsel %vm339_vm0, %v235_v47, 0.0 }
  0xfc   :  { %v19350_v1 = vpop.xlane.xlu1 %506  ;;  %v19354_v15 = vpop.xlane.xlu0 %503 }
  0xfd   :  { %27800 = vst [vmem:[#allocation28_spill] sm:$0xff] %v19350_v1  ;;  %27801 = vst [vmem:[#allocation29_spill] sm:$0xff] %v19354_v15  ;;  %v146_v15 = vld [vmem:[%s27461_s0 + $0x410] sm:$0xff] }
  0xfe   :  { %v730_v25 = vsel %vm339_vm0, %v146_v15, 0.0  ;;  %v151_v15 = vld [vmem:[%s27461_s0 + $0x438] sm:$0xff] }
  0xff   :  { %722 = vadd.xlane.f32.xlu1 %v721_v4  ;;  %719 = vadd.xlane.f32.xlu0 %v718_v10  ;;  %v733_v10 = vsel %vm339_vm0, %v147_v59, 0.0 }
 0x100   :  { %v19362_v38 = vpop.xlane.xlu1 %512  ;;  %v19366_v1 = vpop.xlane.xlu0 %509 }
 0x101   :  { %27802 = vst [vmem:[#allocation30_spill] sm:$0xff] %v19362_v38  ;;  %27803 = vst [vmem:[#allocation31_spill] sm:$0xff] %v19366_v1  ;;  %v148_v1 = vld [vmem:[%s27461_s0 + $0x420] sm:$0xff] }
 0x102   :  { %v736_v59 = vsel %vm339_vm0, %v148_v1, 0.0  ;;  %v153_v1 = vld [vmem:[%s27461_s0 + $0x448] sm:$0xff] }
 0x103   :  { %728 = vadd.xlane.f32.xlu1 %v727_v46  ;;  %725 = vadd.xlane.f32.xlu0 %v724_v55  ;;  %v739_v55 = vsel %vm339_vm0, %v149_v28, 0.0 }
 0x104   :  { %v19374_v4 = vpop.xlane.xlu1 %518  ;;  %v19378_v38 = vpop.xlane.xlu0 %515 }
 0x105   :  { %27804 = vst [vmem:[#allocation32_spill] sm:$0xff] %v19374_v4  ;;  %27805 = vst [vmem:[#allocation33_spill] sm:$0xff] %v19378_v38  ;;  %v150_v38 = vld [vmem:[%s27461_s0 + $0x430] sm:$0xff] }
 0x106   :  { %v742_v28 = vsel %vm339_vm0, %v150_v38, 0.0  ;;  %v155_v38 = vld [vmem:[%s27461_s0 + $0x458] sm:$0xff] }
 0x107   :  { %734 = vadd.xlane.f32.xlu1 %v733_v10  ;;  %731 = vadd.xlane.f32.xlu0 %v730_v25  ;;  %v745_v25 = vsel %vm339_vm0, %v151_v15, 0.0 }
 0x108   :  { %v19386_v46 = vpop.xlane.xlu1 %524  ;;  %v19390_v4 = vpop.xlane.xlu0 %521 }
 0x109   :  { %27806 = vst [vmem:[#allocation34_spill] sm:$0xff] %v19386_v46  ;;  %27807 = vst [vmem:[#allocation35_spill] sm:$0xff] %v19390_v4  ;;  %v152_v4 = vld [vmem:[%s27461_s0 + $0x440] sm:$0xff] }
 0x10a   :  { %v748_v15 = vsel %vm339_vm0, %v152_v4, 0.0  ;;  %v157_v4 = vld [vmem:[%s27461_s0 + $0x468] sm:$0xff] }
 0x10b   :  { %740 = vadd.xlane.f32.xlu1 %v739_v55  ;;  %737 = vadd.xlane.f32.xlu0 %v736_v59  ;;  %v751_v59 = vsel %vm339_vm0, %v153_v1, 0.0 }
 0x10c   :  { %v19398_v10 = vpop.xlane.xlu1 %530  ;;  %v19402_v46 = vpop.xlane.xlu0 %527 }
 0x10d   :  { %27808 = vst [vmem:[#allocation36_spill] sm:$0xff] %v19398_v10  ;;  %27809 = vst [vmem:[#allocation37_spill] sm:$0xff] %v19402_v46  ;;  %v154_v46 = vld [vmem:[%s27461_s0 + $0x450] sm:$0xff] }
 0x10e   :  { %v754_v1 = vsel %vm339_vm0, %v154_v46, 0.0  ;;  %v159_v46 = vld [vmem:[%s27461_s0 + $0x478] sm:$0xff] }
 0x10f   :  { %746 = vadd.xlane.f32.xlu1 %v745_v25  ;;  %743 = vadd.xlane.f32.xlu0 %v742_v28  ;;  %v757_v28 = vsel %vm339_vm0, %v155_v38, 0.0 }
 0x110   :  { %v19410_v55 = vpop.xlane.xlu1 %536  ;;  %v19414_v10 = vpop.xlane.xlu0 %533 }
 0x111   :  { %27810 = vst [vmem:[#allocation38_spill] sm:$0xff] %v19410_v55  ;;  %27811 = vst [vmem:[#allocation39_spill] sm:$0xff] %v19414_v10  ;;  %v156_v10 = vld [vmem:[%s27461_s0 + $0x460] sm:$0xff] }
 0x112   :  { %v760_v38 = vsel %vm339_vm0, %v156_v10, 0.0  ;;  %v161_v10 = vld [vmem:[%s27461_s0 + $0x488] sm:$0xff] }
 0x113   :  { %752 = vadd.xlane.f32.xlu1 %v751_v59  ;;  %749 = vadd.xlane.f32.xlu0 %v748_v15  ;;  %v763_v15 = vsel %vm339_vm0, %v157_v4, 0.0 }
 0x114   :  { %v19422_v25 = vpop.xlane.xlu1 %542  ;;  %v19426_v55 = vpop.xlane.xlu0 %539 }
 0x115   :  { %27812 = vst [vmem:[#allocation40_spill] sm:$0xff] %v19422_v25  ;;  %27813 = vst [vmem:[#allocation41_spill] sm:$0xff] %v19426_v55  ;;  %v158_v55 = vld [vmem:[%s27461_s0 + $0x470] sm:$0xff] }
 0x116   :  { %v766_v4 = vsel %vm339_vm0, %v158_v55, 0.0  ;;  %v163_v55 = vld [vmem:[%s27461_s0 + $0x498] sm:$0xff] }
 0x117   :  { %758 = vadd.xlane.f32.xlu1 %v757_v28  ;;  %755 = vadd.xlane.f32.xlu0 %v754_v1  ;;  %v769_v1 = vsel %vm339_vm0, %v159_v46, 0.0 }
 0x118   :  { %v19434_v59 = vpop.xlane.xlu1 %548  ;;  %v19438_v25 = vpop.xlane.xlu0 %545 }
 0x119   :  { %27814 = vst [vmem:[#allocation42_spill] sm:$0xff] %v19434_v59  ;;  %27815 = vst [vmem:[#allocation43_spill] sm:$0xff] %v19438_v25  ;;  %v160_v25 = vld [vmem:[%s27461_s0 + $0x480] sm:$0xff] }
 0x11a   :  { %v772_v46 = vsel %vm339_vm0, %v160_v25, 0.0  ;;  %v165_v25 = vld [vmem:[%s27461_s0 + $0x4a8] sm:$0xff] }
 0x11b   :  { %764 = vadd.xlane.f32.xlu1 %v763_v15  ;;  %761 = vadd.xlane.f32.xlu0 %v760_v38  ;;  %v775_v38 = vsel %vm339_vm0, %v161_v10, 0.0 }
 0x11c   :  { %v19446_v28 = vpop.xlane.xlu1 %554  ;;  %v19450_v59 = vpop.xlane.xlu0 %551 }
 0x11d   :  { %27816 = vst [vmem:[#allocation44_spill] sm:$0xff] %v19446_v28  ;;  %27817 = vst [vmem:[#allocation45_spill] sm:$0xff] %v19450_v59  ;;  %v162_v59 = vld [vmem:[%s27461_s0 + $0x490] sm:$0xff] }
 0x11e   :  { %v778_v10 = vsel %vm339_vm0, %v162_v59, 0.0  ;;  %v167_v59 = vld [vmem:[%s27461_s0 + $0x4b8] sm:$0xff] }
 0x11f   :  { %770 = vadd.xlane.f32.xlu1 %v769_v1  ;;  %767 = vadd.xlane.f32.xlu0 %v766_v4  ;;  %v781_v4 = vsel %vm339_vm0, %v163_v55, 0.0 }
 0x120   :  { %v19458_v15 = vpop.xlane.xlu1 %560  ;;  %v19462_v28 = vpop.xlane.xlu0 %557 }
 0x121   :  { %27818 = vst [vmem:[#allocation46_spill] sm:$0xff] %v19458_v15  ;;  %27819 = vst [vmem:[#allocation47_spill] sm:$0xff] %v19462_v28  ;;  %v164_v28 = vld [vmem:[%s27461_s0 + $0x4a0] sm:$0xff] }
 0x122   :  { %v784_v55 = vsel %vm339_vm0, %v164_v28, 0.0  ;;  %v169_v28 = vld [vmem:[%s27461_s0 + $0x4c8] sm:$0xff] }
 0x123   :  { %776 = vadd.xlane.f32.xlu1 %v775_v38  ;;  %773 = vadd.xlane.f32.xlu0 %v772_v46  ;;  %v787_v46 = vsel %vm339_vm0, %v165_v25, 0.0 }
 0x124   :  { %v19470_v1 = vpop.xlane.xlu1 %566  ;;  %v19474_v15 = vpop.xlane.xlu0 %563 }
 0x125   :  { %27820 = vst [vmem:[#allocation48_spill] sm:$0xff] %v19470_v1  ;;  %27821 = vst [vmem:[#allocation49_spill] sm:$0xff] %v19474_v15  ;;  %v166_v15 = vld [vmem:[%s27461_s0 + $0x4b0] sm:$0xff] }
 0x126   :  { %v790_v25 = vsel %vm339_vm0, %v166_v15, 0.0  ;;  %v171_v15 = vld [vmem:[%s27461_s0 + $0x4d8] sm:$0xff] }
 0x127   :  { %782 = vadd.xlane.f32.xlu1 %v781_v4  ;;  %779 = vadd.xlane.f32.xlu0 %v778_v10  ;;  %v793_v10 = vsel %vm339_vm0, %v167_v59, 0.0 }
 0x128   :  { %v19482_v38 = vpop.xlane.xlu1 %572  ;;  %v19486_v1 = vpop.xlane.xlu0 %569 }
 0x129   :  { %27822 = vst [vmem:[#allocation50_spill] sm:$0xff] %v19482_v38  ;;  %27823 = vst [vmem:[#allocation51_spill] sm:$0xff] %v19486_v1  ;;  %v168_v1 = vld [vmem:[%s27461_s0 + $0x4c0] sm:$0xff] }
 0x12a   :  { %v796_v59 = vsel %vm339_vm0, %v168_v1, 0.0  ;;  %v173_v1 = vld [vmem:[%s27461_s0 + $0x4e8] sm:$0xff] }
 0x12b   :  { %788 = vadd.xlane.f32.xlu1 %v787_v46  ;;  %785 = vadd.xlane.f32.xlu0 %v784_v55  ;;  %v799_v55 = vsel %vm339_vm0, %v169_v28, 0.0 }
 0x12c   :  { %v19494_v4 = vpop.xlane.xlu1 %578  ;;  %v19498_v38 = vpop.xlane.xlu0 %575 }
 0x12d   :  { %27824 = vst [vmem:[#allocation52_spill] sm:$0xff] %v19494_v4  ;;  %27825 = vst [vmem:[#allocation53_spill] sm:$0xff] %v19498_v38  ;;  %v170_v38 = vld [vmem:[%s27461_s0 + $0x4d0] sm:$0xff] }
 0x12e   :  { %v802_v28 = vsel %vm339_vm0, %v170_v38, 0.0  ;;  %v175_v38 = vld [vmem:[%s27461_s0 + $0x4f8] sm:$0xff] }
 0x12f   :  { %794 = vadd.xlane.f32.xlu1 %v793_v10  ;;  %791 = vadd.xlane.f32.xlu0 %v790_v25  ;;  %v805_v25 = vsel %vm339_vm0, %v171_v15, 0.0 }
 0x130   :  { %v19506_v46 = vpop.xlane.xlu1 %584  ;;  %v19510_v4 = vpop.xlane.xlu0 %581 }
 0x131   :  { %27826 = vst [vmem:[#allocation54_spill] sm:$0xff] %v19506_v46  ;;  %27827 = vst [vmem:[#allocation55_spill] sm:$0xff] %v19510_v4  ;;  %v172_v4 = vld [vmem:[%s27461_s0 + $0x4e0] sm:$0xff] }
 0x132   :  { %v808_v15 = vsel %vm339_vm0, %v172_v4, 0.0  ;;  %v177_v4 = vld [vmem:[%s27461_s0 + $0x508] sm:$0xff] }
 0x133   :  { %800 = vadd.xlane.f32.xlu1 %v799_v55  ;;  %797 = vadd.xlane.f32.xlu0 %v796_v59  ;;  %v811_v59 = vsel %vm339_vm0, %v173_v1, 0.0 }
 0x134   :  { %v19518_v10 = vpop.xlane.xlu1 %590  ;;  %v19522_v46 = vpop.xlane.xlu0 %587 }
 0x135   :  { %27828 = vst [vmem:[#allocation56_spill] sm:$0xff] %v19518_v10  ;;  %27829 = vst [vmem:[#allocation57_spill] sm:$0xff] %v19522_v46  ;;  %v174_v46 = vld [vmem:[%s27461_s0 + $0x4f0] sm:$0xff] }
 0x136   :  { %v814_v1 = vsel %vm339_vm0, %v174_v46, 0.0  ;;  %v179_v46 = vld [vmem:[%s27461_s0 + $0x518] sm:$0xff] }
 0x137   :  { %806 = vadd.xlane.f32.xlu1 %v805_v25  ;;  %803 = vadd.xlane.f32.xlu0 %v802_v28  ;;  %v817_v28 = vsel %vm339_vm0, %v175_v38, 0.0 }
 0x138   :  { %v19530_v55 = vpop.xlane.xlu1 %596  ;;  %v19534_v10 = vpop.xlane.xlu0 %593 }
 0x139   :  { %27830 = vst [vmem:[#allocation58_spill] sm:$0xff] %v19530_v55  ;;  %27831 = vst [vmem:[#allocation59_spill] sm:$0xff] %v19534_v10  ;;  %v176_v10 = vld [vmem:[%s27461_s0 + $0x500] sm:$0xff] }
 0x13a   :  { %v820_v38 = vsel %vm339_vm0, %v176_v10, 0.0  ;;  %v181_v10 = vld [vmem:[%s27461_s0 + $0x528] sm:$0xff] }
 0x13b   :  { %812 = vadd.xlane.f32.xlu1 %v811_v59  ;;  %809 = vadd.xlane.f32.xlu0 %v808_v15  ;;  %v823_v15 = vsel %vm339_vm0, %v177_v4, 0.0 }
 0x13c   :  { %v19542_v25 = vpop.xlane.xlu1 %602  ;;  %v19546_v55 = vpop.xlane.xlu0 %599 }
 0x13d   :  { %27832 = vst [vmem:[#allocation60_spill] sm:$0xff] %v19542_v25  ;;  %27833 = vst [vmem:[#allocation61_spill] sm:$0xff] %v19546_v55  ;;  %v178_v55 = vld [vmem:[%s27461_s0 + $0x510] sm:$0xff] }
 0x13e   :  { %v826_v4 = vsel %vm339_vm0, %v178_v55, 0.0  ;;  %v183_v55 = vld [vmem:[%s27461_s0 + $0x538] sm:$0xff] }
 0x13f   :  { %818 = vadd.xlane.f32.xlu1 %v817_v28  ;;  %815 = vadd.xlane.f32.xlu0 %v814_v1  ;;  %v829_v1 = vsel %vm339_vm0, %v179_v46, 0.0 }
 0x140   :  { %v19554_v59 = vpop.xlane.xlu1 %608  ;;  %v19558_v25 = vpop.xlane.xlu0 %605 }
 0x141   :  { %27834 = vst [vmem:[#allocation62_spill] sm:$0xff] %v19554_v59  ;;  %27835 = vst [vmem:[#allocation63_spill] sm:$0xff] %v19558_v25  ;;  %v180_v25 = vld [vmem:[%s27461_s0 + $0x520] sm:$0xff] }
 0x142   :  { %v832_v46 = vsel %vm339_vm0, %v180_v25, 0.0  ;;  %v185_v25 = vld [vmem:[%s27461_s0 + $0x548] sm:$0xff] }
 0x143   :  { %824 = vadd.xlane.f32.xlu1 %v823_v15  ;;  %821 = vadd.xlane.f32.xlu0 %v820_v38  ;;  %v835_v38 = vsel %vm339_vm0, %v181_v10, 0.0 }
 0x144   :  { %v19566_v28 = vpop.xlane.xlu1 %614  ;;  %v19570_v59 = vpop.xlane.xlu0 %611 }
 0x145   :  { %27836 = vst [vmem:[#allocation64_spill] sm:$0xff] %v19566_v28  ;;  %27837 = vst [vmem:[#allocation65_spill] sm:$0xff] %v19570_v59  ;;  %v182_v59 = vld [vmem:[%s27461_s0 + $0x530] sm:$0xff] }
 0x146   :  { %v838_v10 = vsel %vm339_vm0, %v182_v59, 0.0  ;;  %v187_v59 = vld [vmem:[%s27461_s0 + $0x558] sm:$0xff] }
 0x147   :  { %830 = vadd.xlane.f32.xlu1 %v829_v1  ;;  %827 = vadd.xlane.f32.xlu0 %v826_v4  ;;  %v841_v4 = vsel %vm339_vm0, %v183_v55, 0.0 }
 0x148   :  { %v19578_v15 = vpop.xlane.xlu1 %620  ;;  %v19582_v28 = vpop.xlane.xlu0 %617 }
 0x149   :  { %27838 = vst [vmem:[#allocation66_spill] sm:$0xff] %v19578_v15  ;;  %27839 = vst [vmem:[#allocation67_spill] sm:$0xff] %v19582_v28  ;;  %v184_v28 = vld [vmem:[%s27461_s0 + $0x540] sm:$0xff] }
 0x14a   :  { %v844_v55 = vsel %vm339_vm0, %v184_v28, 0.0  ;;  %v189_v28 = vld [vmem:[%s27461_s0 + $0x568] sm:$0xff] }
 0x14b   :  { %836 = vadd.xlane.f32.xlu1 %v835_v38  ;;  %833 = vadd.xlane.f32.xlu0 %v832_v46  ;;  %v847_v46 = vsel %vm339_vm0, %v185_v25, 0.0 }
 0x14c   :  { %v19590_v1 = vpop.xlane.xlu1 %626  ;;  %v19594_v15 = vpop.xlane.xlu0 %623 }
 0x14d   :  { %27840 = vst [vmem:[#allocation68_spill] sm:$0xff] %v19590_v1  ;;  %27841 = vst [vmem:[#allocation69_spill] sm:$0xff] %v19594_v15  ;;  %v186_v15 = vld [vmem:[%s27461_s0 + $0x550] sm:$0xff] }
 0x14e   :  { %v850_v25 = vsel %vm339_vm0, %v186_v15, 0.0  ;;  %v191_v15 = vld [vmem:[%s27461_s0 + $0x578] sm:$0xff] }
 0x14f   :  { %842 = vadd.xlane.f32.xlu1 %v841_v4  ;;  %839 = vadd.xlane.f32.xlu0 %v838_v10  ;;  %v853_v10 = vsel %vm339_vm0, %v187_v59, 0.0 }
 0x150   :  { %v19602_v38 = vpop.xlane.xlu1 %632  ;;  %v19606_v1 = vpop.xlane.xlu0 %629 }
 0x151   :  { %27842 = vst [vmem:[#allocation70_spill] sm:$0xff] %v19602_v38  ;;  %27843 = vst [vmem:[#allocation71_spill] sm:$0xff] %v19606_v1  ;;  %v188_v1 = vld [vmem:[%s27461_s0 + $0x560] sm:$0xff] }
 0x152   :  { %v856_v59 = vsel %vm339_vm0, %v188_v1, 0.0  ;;  %v193_v1 = vld [vmem:[%s27461_s0 + $0x588] sm:$0xff] }
 0x153   :  { %848 = vadd.xlane.f32.xlu1 %v847_v46  ;;  %845 = vadd.xlane.f32.xlu0 %v844_v55  ;;  %v859_v55 = vsel %vm339_vm0, %v189_v28, 0.0 }
 0x154   :  { %v19614_v4 = vpop.xlane.xlu1 %638  ;;  %v19618_v38 = vpop.xlane.xlu0 %635 }
 0x155   :  { %27844 = vst [vmem:[#allocation72_spill] sm:$0xff] %v19614_v4  ;;  %27845 = vst [vmem:[#allocation73_spill] sm:$0xff] %v19618_v38  ;;  %v190_v38 = vld [vmem:[%s27461_s0 + $0x570] sm:$0xff] }
 0x156   :  { %v862_v28 = vsel %vm339_vm0, %v190_v38, 0.0  ;;  %v195_v38 = vld [vmem:[%s27461_s0 + $0x598] sm:$0xff] }
 0x157   :  { %854 = vadd.xlane.f32.xlu1 %v853_v10  ;;  %851 = vadd.xlane.f32.xlu0 %v850_v25  ;;  %v865_v25 = vsel %vm339_vm0, %v191_v15, 0.0 }
 0x158   :  { %v19626_v46 = vpop.xlane.xlu1 %644  ;;  %v19630_v4 = vpop.xlane.xlu0 %641 }
 0x159   :  { %27846 = vst [vmem:[#allocation74_spill] sm:$0xff] %v19626_v46  ;;  %27847 = vst [vmem:[#allocation75_spill] sm:$0xff] %v19630_v4  ;;  %v192_v4 = vld [vmem:[%s27461_s0 + $0x580] sm:$0xff] }
 0x15a   :  { %v868_v15 = vsel %vm339_vm0, %v192_v4, 0.0  ;;  %v197_v4 = vld [vmem:[%s27461_s0 + $0x5a8] sm:$0xff] }
 0x15b   :  { %860 = vadd.xlane.f32.xlu1 %v859_v55  ;;  %857 = vadd.xlane.f32.xlu0 %v856_v59  ;;  %v871_v59 = vsel %vm339_vm0, %v193_v1, 0.0 }
 0x15c   :  { %v19638_v10 = vpop.xlane.xlu1 %650  ;;  %v19642_v46 = vpop.xlane.xlu0 %647 }
 0x15d   :  { %27848 = vst [vmem:[#allocation76_spill] sm:$0xff] %v19638_v10  ;;  %27849 = vst [vmem:[#allocation77_spill] sm:$0xff] %v19642_v46  ;;  %v194_v46 = vld [vmem:[%s27461_s0 + $0x590] sm:$0xff] }
 0x15e   :  { %v874_v1 = vsel %vm339_vm0, %v194_v46, 0.0  ;;  %v199_v46 = vld [vmem:[%s27461_s0 + $0x5b8] sm:$0xff] }
 0x15f   :  { %866 = vadd.xlane.f32.xlu1 %v865_v25  ;;  %863 = vadd.xlane.f32.xlu0 %v862_v28  ;;  %v877_v28 = vsel %vm339_vm0, %v195_v38, 0.0 }
 0x160   :  { %v19650_v55 = vpop.xlane.xlu1 %656  ;;  %v19654_v10 = vpop.xlane.xlu0 %653 }
 0x161   :  { %27850 = vst [vmem:[#allocation78_spill] sm:$0xff] %v19650_v55  ;;  %27851 = vst [vmem:[#allocation79_spill] sm:$0xff] %v19654_v10  ;;  %v196_v10 = vld [vmem:[%s27461_s0 + $0x5a0] sm:$0xff] }
 0x162   :  { %v880_v38 = vsel %vm339_vm0, %v196_v10, 0.0  ;;  %v201_v10 = vld [vmem:[%s27461_s0 + $0x5c8] sm:$0xff] }
 0x163   :  { %872 = vadd.xlane.f32.xlu1 %v871_v59  ;;  %869 = vadd.xlane.f32.xlu0 %v868_v15  ;;  %v883_v15 = vsel %vm339_vm0, %v197_v4, 0.0 }
 0x164   :  { %v19662_v25 = vpop.xlane.xlu1 %662  ;;  %v19666_v55 = vpop.xlane.xlu0 %659 }
 0x165   :  { %27852 = vst [vmem:[#allocation80_spill] sm:$0xff] %v19662_v25  ;;  %27853 = vst [vmem:[#allocation81_spill] sm:$0xff] %v19666_v55  ;;  %v198_v55 = vld [vmem:[%s27461_s0 + $0x5b0] sm:$0xff] }
 0x166   :  { %v886_v4 = vsel %vm339_vm0, %v198_v55, 0.0  ;;  %v203_v55 = vld [vmem:[%s27461_s0 + $0x5d8] sm:$0xff] }
 0x167   :  { %878 = vadd.xlane.f32.xlu1 %v877_v28  ;;  %875 = vadd.xlane.f32.xlu0 %v874_v1  ;;  %v889_v1 = vsel %vm339_vm0, %v199_v46, 0.0 }
 0x168   :  { %v19674_v59 = vpop.xlane.xlu1 %668  ;;  %v19678_v25 = vpop.xlane.xlu0 %665 }
 0x169   :  { %27854 = vst [vmem:[#allocation82_spill] sm:$0xff] %v19674_v59  ;;  %27855 = vst [vmem:[#allocation83_spill] sm:$0xff] %v19678_v25  ;;  %v200_v25 = vld [vmem:[%s27461_s0 + $0x5c0] sm:$0xff] }
 0x16a   :  { %v892_v46 = vsel %vm339_vm0, %v200_v25, 0.0  ;;  %v205_v25 = vld [vmem:[%s27461_s0 + $0x5e8] sm:$0xff] }
 0x16b   :  { %884 = vadd.xlane.f32.xlu1 %v883_v15  ;;  %881 = vadd.xlane.f32.xlu0 %v880_v38  ;;  %v895_v38 = vsel %vm339_vm0, %v201_v10, 0.0 }
 0x16c   :  { %v19686_v28 = vpop.xlane.xlu1 %674  ;;  %v19690_v59 = vpop.xlane.xlu0 %671 }
 0x16d   :  { %27856 = vst [vmem:[#allocation84_spill] sm:$0xff] %v19686_v28  ;;  %27857 = vst [vmem:[#allocation85_spill] sm:$0xff] %v19690_v59  ;;  %v202_v59 = vld [vmem:[%s27461_s0 + $0x5d0] sm:$0xff] }
 0x16e   :  { %v898_v10 = vsel %vm339_vm0, %v202_v59, 0.0  ;;  %v207_v59 = vld [vmem:[%s27461_s0 + $0x5f8] sm:$0xff] }
 0x16f   :  { %890 = vadd.xlane.f32.xlu1 %v889_v1  ;;  %887 = vadd.xlane.f32.xlu0 %v886_v4  ;;  %v901_v4 = vsel %vm339_vm0, %v203_v55, 0.0 }
 0x170   :  { %v19698_v15 = vpop.xlane.xlu1 %680  ;;  %v19702_v28 = vpop.xlane.xlu0 %677 }
 0x171   :  { %27858 = vst [vmem:[#allocation86_spill] sm:$0xff] %v19698_v15  ;;  %27859 = vst [vmem:[#allocation87_spill] sm:$0xff] %v19702_v28  ;;  %v204_v28 = vld [vmem:[%s27461_s0 + $0x5e0] sm:$0xff] }
 0x172   :  { %v904_v55 = vsel %vm339_vm0, %v204_v28, 0.0  ;;  %v209_v28 = vld [vmem:[%s27461_s0 + $0x608] sm:$0xff] }
 0x173   :  { %896 = vadd.xlane.f32.xlu1 %v895_v38  ;;  %893 = vadd.xlane.f32.xlu0 %v892_v46  ;;  %v907_v46 = vsel %vm339_vm0, %v205_v25, 0.0 }
 0x174   :  { %v19710_v1 = vpop.xlane.xlu1 %686  ;;  %v19714_v15 = vpop.xlane.xlu0 %683 }
 0x175   :  { %27860 = vst [vmem:[#allocation88_spill] sm:$0xff] %v19710_v1  ;;  %27861 = vst [vmem:[#allocation89_spill] sm:$0xff] %v19714_v15  ;;  %v206_v15 = vld [vmem:[%s27461_s0 + $0x5f0] sm:$0xff] }
 0x176   :  { %v910_v25 = vsel %vm339_vm0, %v206_v15, 0.0  ;;  %v211_v15 = vld [vmem:[%s27461_s0 + $0x618] sm:$0xff] }
 0x177   :  { %902 = vadd.xlane.f32.xlu1 %v901_v4  ;;  %899 = vadd.xlane.f32.xlu0 %v898_v10  ;;  %v913_v10 = vsel %vm339_vm0, %v207_v59, 0.0 }
 0x178   :  { %v19722_v38 = vpop.xlane.xlu1 %692  ;;  %v19726_v1 = vpop.xlane.xlu0 %689 }
 0x179   :  { %27862 = vst [vmem:[#allocation90_spill] sm:$0xff] %v19722_v38  ;;  %27863 = vst [vmem:[#allocation91_spill] sm:$0xff] %v19726_v1  ;;  %v208_v1 = vld [vmem:[%s27461_s0 + $0x600] sm:$0xff] }
 0x17a   :  { %v916_v59 = vsel %vm339_vm0, %v208_v1, 0.0  ;;  %v213_v1 = vld [vmem:[%s27461_s0 + $0x628] sm:$0xff] }
 0x17b   :  { %908 = vadd.xlane.f32.xlu1 %v907_v46  ;;  %905 = vadd.xlane.f32.xlu0 %v904_v55  ;;  %v919_v55 = vsel %vm339_vm0, %v209_v28, 0.0 }
 0x17c   :  { %v19734_v4 = vpop.xlane.xlu1 %698  ;;  %v19738_v38 = vpop.xlane.xlu0 %695 }
 0x17d   :  { %27864 = vst [vmem:[#allocation92_spill] sm:$0xff] %v19734_v4  ;;  %27865 = vst [vmem:[#allocation93_spill] sm:$0xff] %v19738_v38  ;;  %v210_v38 = vld [vmem:[%s27461_s0 + $0x610] sm:$0xff] }
 0x17e   :  { %v922_v28 = vsel %vm339_vm0, %v210_v38, 0.0  ;;  %v215_v38 = vld [vmem:[%s27461_s0 + $0x638] sm:$0xff] }
 0x17f   :  { %914 = vadd.xlane.f32.xlu1 %v913_v10  ;;  %911 = vadd.xlane.f32.xlu0 %v910_v25  ;;  %v925_v25 = vsel %vm339_vm0, %v211_v15, 0.0 }
 0x180   :  { %v19746_v46 = vpop.xlane.xlu1 %704  ;;  %v19750_v4 = vpop.xlane.xlu0 %701 }
 0x181   :  { %27866 = vst [vmem:[#allocation94_spill] sm:$0xff] %v19746_v46  ;;  %27867 = vst [vmem:[#allocation95_spill] sm:$0xff] %v19750_v4  ;;  %v212_v4 = vld [vmem:[%s27461_s0 + $0x620] sm:$0xff] }
 0x182   :  { %v928_v15 = vsel %vm339_vm0, %v212_v4, 0.0  ;;  %v217_v4 = vld [vmem:[%s27461_s0 + $0x648] sm:$0xff] }
 0x183   :  { %920 = vadd.xlane.f32.xlu1 %v919_v55  ;;  %917 = vadd.xlane.f32.xlu0 %v916_v59  ;;  %v931_v59 = vsel %vm339_vm0, %v213_v1, 0.0 }
 0x184   :  { %v19758_v10 = vpop.xlane.xlu1 %710  ;;  %v19762_v46 = vpop.xlane.xlu0 %707 }
 0x185   :  { %27868 = vst [vmem:[#allocation96_spill] sm:$0xff] %v19758_v10  ;;  %27869 = vst [vmem:[#allocation97_spill] sm:$0xff] %v19762_v46  ;;  %v214_v46 = vld [vmem:[%s27461_s0 + $0x630] sm:$0xff] }
 0x186   :  { %v934_v1 = vsel %vm339_vm0, %v214_v46, 0.0  ;;  %v219_v46 = vld [vmem:[%s27461_s0 + $0x658] sm:$0xff] }
 0x187   :  { %926 = vadd.xlane.f32.xlu1 %v925_v25  ;;  %923 = vadd.xlane.f32.xlu0 %v922_v28  ;;  %v937_v28 = vsel %vm339_vm0, %v215_v38, 0.0 }
 0x188   :  { %v19770_v55 = vpop.xlane.xlu1 %716  ;;  %v19774_v10 = vpop.xlane.xlu0 %713 }
 0x189   :  { %27870 = vst [vmem:[#allocation98_spill] sm:$0xff] %v19770_v55  ;;  %27871 = vst [vmem:[#allocation99_spill] sm:$0xff] %v19774_v10  ;;  %v216_v10 = vld [vmem:[%s27461_s0 + $0x640] sm:$0xff] }
 0x18a   :  { %v940_v38 = vsel %vm339_vm0, %v216_v10, 0.0  ;;  %v221_v10 = vld [vmem:[%s27461_s0 + $0x668] sm:$0xff] }
 0x18b   :  { %932 = vadd.xlane.f32.xlu1 %v931_v59  ;;  %929 = vadd.xlane.f32.xlu0 %v928_v15  ;;  %v943_v15 = vsel %vm339_vm0, %v217_v4, 0.0 }
 0x18c   :  { %v19782_v25 = vpop.xlane.xlu1 %722  ;;  %v19786_v55 = vpop.xlane.xlu0 %719 }
 0x18d   :  { %27872 = vst [vmem:[#allocation100_spill] sm:$0xff] %v19782_v25  ;;  %27873 = vst [vmem:[#allocation101_spill] sm:$0xff] %v19786_v55  ;;  %v218_v55 = vld [vmem:[%s27461_s0 + $0x650] sm:$0xff] }
 0x18e   :  { %v946_v4 = vsel %vm339_vm0, %v218_v55, 0.0  ;;  %v223_v55 = vld [vmem:[%s27461_s0 + $0x678] sm:$0xff] }
 0x18f   :  { %938 = vadd.xlane.f32.xlu1 %v937_v28  ;;  %935 = vadd.xlane.f32.xlu0 %v934_v1  ;;  %v949_v1 = vsel %vm339_vm0, %v219_v46, 0.0 }
 0x190   :  { %v19794_v59 = vpop.xlane.xlu1 %728  ;;  %v19798_v25 = vpop.xlane.xlu0 %725 }
 0x191   :  { %27874 = vst [vmem:[#allocation102_spill] sm:$0xff] %v19794_v59  ;;  %27875 = vst [vmem:[#allocation103_spill] sm:$0xff] %v19798_v25  ;;  %v220_v25 = vld [vmem:[%s27461_s0 + $0x660] sm:$0xff] }
 0x192   :  { %v952_v46 = vsel %vm339_vm0, %v220_v25, 0.0  ;;  %v225_v25 = vld [vmem:[%s27461_s0 + $0x688] sm:$0xff] }
 0x193   :  { %944 = vadd.xlane.f32.xlu1 %v943_v15  ;;  %941 = vadd.xlane.f32.xlu0 %v940_v38  ;;  %v955_v38 = vsel %vm339_vm0, %v221_v10, 0.0 }
 0x194   :  { %v19806_v28 = vpop.xlane.xlu1 %734  ;;  %v19810_v59 = vpop.xlane.xlu0 %731 }
 0x195   :  { %27876 = vst [vmem:[#allocation104_spill] sm:$0xff] %v19806_v28  ;;  %27877 = vst [vmem:[#allocation105_spill] sm:$0xff] %v19810_v59  ;;  %v222_v59 = vld [vmem:[%s27461_s0 + $0x670] sm:$0xff] }
 0x196   :  { %v958_v10 = vsel %vm339_vm0, %v222_v59, 0.0  ;;  %v227_v59 = vld [vmem:[%s27461_s0 + $0x698] sm:$0xff] }
 0x197   :  { %950 = vadd.xlane.f32.xlu1 %v949_v1  ;;  %947 = vadd.xlane.f32.xlu0 %v946_v4  ;;  %v961_v4 = vsel %vm339_vm0, %v223_v55, 0.0 }
 0x198   :  { %v19818_v15 = vpop.xlane.xlu1 %740  ;;  %v19822_v28 = vpop.xlane.xlu0 %737 }
 0x199   :  { %27878 = vst [vmem:[#allocation106_spill] sm:$0xff] %v19818_v15  ;;  %27879 = vst [vmem:[#allocation107_spill] sm:$0xff] %v19822_v28  ;;  %v224_v28 = vld [vmem:[%s27461_s0 + $0x680] sm:$0xff] }
 0x19a   :  { %v964_v55 = vsel %vm339_vm0, %v224_v28, 0.0  ;;  %v229_v28 = vld [vmem:[%s27461_s0 + $0x6a8] sm:$0xff] }
 0x19b   :  { %956 = vadd.xlane.f32.xlu1 %v955_v38  ;;  %953 = vadd.xlane.f32.xlu0 %v952_v46  ;;  %v967_v46 = vsel %vm339_vm0, %v225_v25, 0.0 }
 0x19c   :  { %v19830_v1 = vpop.xlane.xlu1 %746  ;;  %v19834_v15 = vpop.xlane.xlu0 %743 }
 0x19d   :  { %27880 = vst [vmem:[#allocation108_spill] sm:$0xff] %v19830_v1  ;;  %27881 = vst [vmem:[#allocation109_spill] sm:$0xff] %v19834_v15  ;;  %v226_v15 = vld [vmem:[%s27461_s0 + $0x690] sm:$0xff] }
 0x19e   :  { %v970_v25 = vsel %vm339_vm0, %v226_v15, 0.0  ;;  %v231_v15 = vld [vmem:[%s27461_s0 + $0x6b8] sm:$0xff] }
 0x19f   :  { %962 = vadd.xlane.f32.xlu1 %v961_v4  ;;  %959 = vadd.xlane.f32.xlu0 %v958_v10  ;;  %v973_v10 = vsel %vm339_vm0, %v227_v59, 0.0 }
 0x1a0   :  { %v19842_v38 = vpop.xlane.xlu1 %752  ;;  %v19846_v1 = vpop.xlane.xlu0 %749 }
 0x1a1   :  { %27882 = vst [vmem:[#allocation110_spill] sm:$0xff] %v19842_v38  ;;  %27883 = vst [vmem:[#allocation111_spill] sm:$0xff] %v19846_v1  ;;  %v228_v1 = vld [vmem:[%s27461_s0 + $0x6a0] sm:$0xff] }
 0x1a2   :  { %v976_v59 = vsel %vm339_vm0, %v228_v1, 0.0  ;;  %v233_v1 = vld [vmem:[%s27461_s0 + $0x6c8] sm:$0xff] }
 0x1a3   :  { %968 = vadd.xlane.f32.xlu1 %v967_v46  ;;  %965 = vadd.xlane.f32.xlu0 %v964_v55  ;;  %v979_v55 = vsel %vm339_vm0, %v229_v28, 0.0 }
 0x1a4   :  { %v19854_v4 = vpop.xlane.xlu1 %758  ;;  %v19858_v38 = vpop.xlane.xlu0 %755 }
 0x1a5   :  { %27884 = vst [vmem:[#allocation112_spill] sm:$0xff] %v19854_v4  ;;  %27885 = vst [vmem:[#allocation113_spill] sm:$0xff] %v19858_v38  ;;  %v230_v38 = vld [vmem:[%s27461_s0 + $0x6b0] sm:$0xff] }
 0x1a6   :  { %v982_v28 = vsel %vm339_vm0, %v230_v38, 0.0  ;;  %v991_v38 = vsel %vm339_vm0, %v233_v1, 0.0 }
 0x1a7   :  { %974 = vadd.xlane.f32.xlu1 %v973_v10  ;;  %971 = vadd.xlane.f32.xlu0 %v970_v25  ;;  %v985_v25 = vsel %vm339_vm0, %v231_v15, 0.0 }
 0x1a8   :  { %v19866_v46 = vpop.xlane.xlu1 %764  ;;  %v19870_v4 = vpop.xlane.xlu0 %761 }
 0x1a9   :  { %27886 = vst [vmem:[#allocation114_spill] sm:$0xff] %v19866_v46  ;;  %27887 = vst [vmem:[#allocation115_spill] sm:$0xff] %v19870_v4  ;;  %v232_v4 = vld [vmem:[%s27461_s0 + $0x6c0] sm:$0xff] }
 0x1ab   :  { %980 = vadd.xlane.f32.xlu1 %v979_v55  ;;  %977 = vadd.xlane.f32.xlu0 %v976_v59  ;;  %v27563_v55 = vlaneseq  ;;  %v18715_v59 = vmov 842150450  }
 0x1ac   :  { %v19878_v10 = vpop.xlane.xlu1 %770  ;;  %v19882_v46 = vpop.xlane.xlu0 %767  ;;  %v1628_v19 = vunpack.c.l.s4 %v18715_v59 }
 0x1ad   :  { %27888 = vst [vmem:[#allocation116_spill] sm:$0xff] %v19878_v10  ;;  %27889 = vst [vmem:[#allocation117_spill] sm:$0xff] %v19882_v46  ;;  %v988_v46 = vsel %vm339_vm0, %v232_v4, 0.0  ;;  %v19903_v59 = vshrl.u32 %v27563_v55, 7 }
 0x1ae   :  { %v1629_v1 = vunpack.c.0.s8 %v1628_v19  ;;  %v236_v19 = vld [vmem:[%s27461_s0 + $0x6e0] sm:$0xff] }
 0x1af   :  { %986 = vadd.xlane.f32.xlu1 %v985_v25  ;;  %983 = vadd.xlane.f32.xlu0 %v982_v28  ;;  %v234_v25 = vld [vmem:[%s27461_s0 + $0x6d0] sm:$0xff]  ;;  %v1622_v28 = vunpack.c.0.s8 %v1621_v34  ;;  %27892 = vst [vmem:[#allocation120_spill] sm:$0xff] %v19903_v59  ;;  %v237_v34 = vld [vmem:[%s27461_s0 + $0x6e8] sm:$0xff] }
 0x1b0   :  { %v19890_v15 = vpop.xlane.xlu1 %776  ;;  %v19894_v10 = vpop.xlane.xlu0 %773  ;;  %v994_v52 = vsel %vm339_vm0, %v234_v25, 0.0  ;;  %v19921_v47 = vsub.s32 %v1629_v1, %v19903_v59  ;;  %v1003_v41 = vsel %vm339_vm0, %v237_v34, 0.0  ;;  %v1000_v25 = vsel %vm339_vm0, %v236_v19, 0.0  ;;  %v238_v1 = vld [vmem:[%s27461_s0 + $0x6f0] sm:$0xff] }
 0x1b1   :  { %27890 = vst [vmem:[#allocation118_spill] sm:$0xff] %v19890_v15  ;;  %27891 = vst [vmem:[#allocation119_spill] sm:$0xff] %v19894_v10  ;;  %v1636_v15 = vunpack.c.0.s8 %v1635_v61  ;;  %v19918_v55 = vsub.s32 %v1622_v28, %v19903_v59  ;;  %v239_v28 = vld [vmem:[%s27461_s0 + $0x6f8] sm:$0xff]  ;;  %v1006_v19 = vsel %vm339_vm0, %v238_v1, 0.0 }
 0x1b2   :  { %27896 = vst [vmem:[#allocation124_spill] sm:$0xff] %v19921_v47  ;;  %v1689_v34 = vrot.slane %v19026_v18, %v19921_v47  ;;  %v1633_v1 = vrot.slane %v19030_v21, %v19921_v47  ;;  %v1773_v43 = vrot.slane %v19050_v30, %v19921_v47 }
 0x1b3   :  { %992 = vadd.xlane.f32.xlu1 %v991_v38  ;;  %989 = vadd.xlane.f32.xlu0 %v988_v46  ;;  %v18718_v38 = vmov 1983009808   ;;  %27895 = vst [vmem:[#allocation123_spill] sm:$0xff] %v19918_v55  ;;  %v1654_v13 = vrot.slane %v19042_v27, %v19918_v55  ;;  %v1710_v56 = vrot.slane %v19038_v24, %v19918_v55 }
 0x1b4   :  { %v19905_v4 = vpop.xlane.xlu1 %782  ;;  %v19909_v10 = vpop.xlane.xlu0 %779  ;;  %v10583_v46 = vunpack.c.l.s4 %v18718_v38  ;;  %v19933_v38 = vsub.s32 %v1643_v32, %v19903_v59  ;;  %v1009_v32 = vsel %vm339_vm0, %v239_v28, 0.0  ;;  %v1626_v28 = vrot.slane %v19030_v21, %v19918_v55 }
 0x1b5   :  { %27893 = vst [vmem:[#allocation121_spill] sm:$0xff] %v19905_v4  ;;  %27894 = vst [vmem:[#allocation122_spill] sm:$0xff] %v19909_v10  ;;  %v19930_v4 = vsub.s32 %v1636_v15, %v19903_v59  ;;  %v1766_v50 = vrot.slane %v19050_v30, %v19918_v55 }
 0x1b6   :  { %27900 = vst [vmem:[#allocation128_spill] sm:$0xff] %v19933_v38  ;;  %v1675_v6 = vrot.slane %v19042_v27, %v19933_v38  ;;  %v1787_v37 = vrot.slane %v19050_v30, %v19933_v38 }
 0x1b7   :  { %998 = vadd.xlane.f32.xlu1 %v997_v9  ;;  %995 = vadd.xlane.f32.xlu0 %v994_v52  ;;  %27899 = vst [vmem:[#allocation127_spill] sm:$0xff] %v19930_v4  ;;  %v10584_v9 = vunpack.c.0.s8 %v10583_v46  ;;  %v1682_v52 = vrot.slane %v19026_v18, %v19918_v55  ;;  %v1703_v46 = vrot.slane %v19026_v18, %v19933_v38 }
 0x1b8   :  { %v19923_v61 = vpop.xlane.xlu1 %788  ;;  %v19927_v10 = vpop.xlane.xlu0 %785 }
 0x1b9   :  { %27897 = vst [vmem:[#allocation125_spill] sm:$0xff] %v19923_v61  ;;  %27898 = vst [vmem:[#allocation126_spill] sm:$0xff] %v19927_v10  ;;  %v1696_v61 = vrot.slane %v19026_v18, %v19930_v4  ;;  %v1640_v18 = vrot.slane %v19030_v21, %v19930_v4 }
 0x1bb   :  { %1004 = vadd.xlane.f32.xlu1 %v1003_v41  ;;  %1001 = vadd.xlane.f32.xlu0 %v1000_v25  ;;  %v240_v41 = vld [vmem:[%s27461_s0 + $0x700] sm:$0xff]  ;;  %v19962_v25 = vsub.s32 %v10584_v9, %v19903_v59  ;;  %v1661_v9 = vrot.slane %v19042_v27, %v19921_v47  ;;  %v1668_v59 = vrot.slane %v19042_v27, %v19930_v4 }
 0x1bc   :  { %v19945_v15 = vpop.xlane.xlu1 %794  ;;  %v19949_v10 = vpop.xlane.xlu0 %791  ;;  %v1731_v27 = vrot.slane %v19038_v24, %v19933_v38 }
 0x1bd   :  { %27901 = vst [vmem:[#allocation129_spill] sm:$0xff] %v19945_v15  ;;  %27902 = vst [vmem:[#allocation130_spill] sm:$0xff] %v19949_v10  ;;  %v1647_v10 = vrot.slane %v19030_v21, %v19933_v38  ;;  %v19972_v15 = vcombine.low %v1682_v52, %v1689_v34  ;;  %v1015_v21 = vsel %vm339_vm0, %v241_v20, 0.0  ;;  %v1012_v52 = vsel %vm339_vm0, %v240_v41, 0.0  ;;  %v243_v20 = vld [vmem:[%s27461_s0 + $0x718] sm:$0xff]  ;;  %v242_v41 = vld [vmem:[%s27461_s0 + $0x710] sm:$0xff] }
 0x1be   :  { %v10597_v29 = vcombine.low %v1654_v13, %v1661_v9  ;;  %v10598_v23 = vcombine.low %v1668_v59, %v1675_v6  ;;  %v244_v6 = vld [vmem:[%s27461_s0 + $0x720] sm:$0xff]  ;;  %v1738_v59 = vrot.slane %v19054_v33, %v19918_v55  ;;  %v20042_v9 = vcombine.low %v1766_v50, %v1773_v43 }
 0x1bf   :  { %1010 = vadd.xlane.f32.xlu1 %v1009_v32  ;;  %1007 = vadd.xlane.f32.xlu0 %v1006_v19  ;;  %v1717_v32 = vrot.slane %v19038_v24, %v19921_v47  ;;  %v1724_v19 = vrot.slane %v19038_v24, %v19930_v4  ;;  %v1780_v24 = vrot.slane %v19050_v30, %v19930_v4  ;;  %v245_v30 = vld [vmem:[%s27461_s0 + $0x728] sm:$0xff] }
 0x1c0   :  { %v19982_v0 = vpop.xlane.xlu1 %800  ;;  %v19986_v34 = vpop.xlane.xlu0 %797  ;;  %v20024_v7 = vcombine.low %v1640_v18, %v1647_v10  ;;  %v10622_v13 = vrot.slane %v19972_v15, %v19962_v25  ;;  %v1752_v10 = vrot.slane %v19054_v33, %v19930_v4  ;;  %v10612_v43 = vrot.slane %v10598_v23, %v19962_v25  ;;  %v246_v23 = vld [vmem:[%s27461_s0 + $0x730] sm:$0xff] }
 0x1c1   :  { %27903 = vst [vmem:[#allocation131_spill] sm:$0xff] %v19982_v0  ;;  %27904 = vst [vmem:[#allocation132_spill] sm:$0xff] %v19986_v34  ;;  %v20002_v34 = vcombine.low %v1696_v61, %v1703_v46  ;;  %v20004_v0 = vcombine.low %v1626_v28, %v1633_v1  ;;  %v1021_v46 = vsel %vm339_vm0, %v243_v20, 0.0  ;;  %v1018_v28 = vsel %vm339_vm0, %v242_v41, 0.0  ;;  %v247_v41 = vld [vmem:[%s27461_s0 + $0x738] sm:$0xff] }
 0x1c2   :  { %v20020_v16 = vcombine.low %v1710_v56, %v1717_v32  ;;  %v20022_v12 = vcombine.low %v1724_v19, %v1731_v27  ;;  %v1745_v56 = vrot.slane %v19054_v33, %v19921_v47  ;;  %v1027_v32 = vsel %vm339_vm0, %v245_v30, 0.0 }
 0x1c3   :  { %1016 = vadd.xlane.f32.xlu1 %v1015_v21  ;;  %1013 = vadd.xlane.f32.xlu0 %v1012_v52  ;;  %v10629_v18 = vrot.slane %v20002_v34, %v19962_v25  ;;  %v20044_v21 = vcombine.low %v1780_v24, %v1787_v37  ;;  %v1759_v52 = vrot.slane %v19054_v33, %v19933_v38  ;;  %v1024_v19 = vsel %vm339_vm0, %v244_v6, 0.0 }
 0x1c4   :  { %v20014_v61 = vpop.xlane.xlu1 %806  ;;  %v20018_v1 = vpop.xlane.xlu0 %803  ;;  %v10605_v20 = vrot.slane %v10597_v29, %v19962_v25  ;;  %v1822_v37 = vrot.slane %v19062_v36, %v19918_v55  ;;  %v1829_v33 = vrot.slane %v19062_v36, %v19921_v47  ;;  %v1836_v50 = vrot.slane %v19062_v36, %v19930_v4 }
 0x1c5   :  { %27905 = vst [vmem:[#allocation133_spill] sm:$0xff] %v20014_v61  ;;  %27906 = vst [vmem:[#allocation134_spill] sm:$0xff] %v20018_v1  ;;  %v1843_v34 = vrot.slane %v19062_v36, %v19933_v38  ;;  %v1794_v29 = vrot.slane %v19066_v39, %v19918_v55  ;;  %v1801_v24 = vrot.slane %v19066_v39, %v19921_v47 }
 0x1c6   :  { %v1815_v36 = vrot.slane %v19066_v39, %v19933_v38  ;;  %v1878_v30 = vrot.slane %v19074_v42, %v19918_v55  ;;  %v1885_v6 = vrot.slane %v19074_v42, %v19921_v47  ;;  %v20094_v61 = vcombine.low %v1822_v37, %v1829_v33 }
 0x1c7   :  { %1022 = vadd.xlane.f32.xlu1 %v1021_v46  ;;  %1019 = vadd.xlane.f32.xlu0 %v1018_v28  ;;  %v1808_v46 = vrot.slane %v19066_v39, %v19930_v4  ;;  %v20078_v28 = vcombine.low %v1738_v59, %v1745_v56  ;;  %v1033_v39 = vsel %vm339_vm0, %v247_v41, 0.0  ;;  %v1030_v59 = vsel %vm339_vm0, %v246_v23, 0.0  ;;  %v248_v41 = vld [vmem:[%s27461_s0 + $0x740] sm:$0xff] }
 0x1c8   :  { %v20048_v15 = vpop.xlane.xlu1 %812  ;;  %v20052_v27 = vpop.xlane.xlu0 %809  ;;  %27911 = vst [vmem:[#allocation139_spill] sm:$0xff] %v20094_v61  ;;  %v20096_v3 = vcombine.low %v1752_v10, %v1759_v52  ;;  %v20108_v23 = vcombine.low %v1836_v50, %v1843_v34  ;;  %v20110_v37 = vcombine.low %v1794_v29, %v1801_v24  ;;  %v20114_v52 = vcombine.low %v10605_v20, %v10612_v43 }
 0x1c9   :  { %27907 = vst [vmem:[#allocation135_spill] sm:$0xff] %v20048_v15  ;;  %27908 = vst [vmem:[#allocation136_spill] sm:$0xff] %v20052_v27  ;;  %v1892_v27 = vrot.slane %v19074_v42, %v19930_v4  ;;  %v1899_v15 = vrot.slane %v19074_v42, %v19933_v38  ;;  %v249_v42 = vld [vmem:[%s27461_s0 + $0x748] sm:$0xff]  ;;  %v20112_v10 = vcombine.low %v1808_v46, %v1815_v36  ;;  %v1036_v20 = vsel %vm339_vm0, %v248_v41, 0.0 }
 0x1ca   :  { %27912 = vst [vmem:[#allocation140_spill] sm:$0xff] %v20108_v23  ;;  %27913 = vst [vmem:[#allocation141_spill] sm:$0xff] %v20114_v52  ;;  %v1864_v33 = vrot.slane %v19078_v45, %v19930_v4  ;;  %v20122_v61 = vcombine.low %v1878_v30, %v1885_v6  ;;  %v1039_v29 = vsel %vm339_vm0, %v249_v42, 0.0  ;;  %v1934_v24 = vrot.slane %v19086_v48, %v19918_v55 }
 0x1cb   :  { %1028 = vadd.xlane.f32.xlu1 %v1027_v32  ;;  %1025 = vadd.xlane.f32.xlu0 %v1024_v19  ;;  %v1850_v32 = vrot.slane %v19078_v45, %v19918_v55  ;;  %v1857_v19 = vrot.slane %v19078_v45, %v19921_v47  ;;  %v20124_v50 = vcombine.low %v1892_v27, %v1899_v15  ;;  %v250_v15 = vld [vmem:[%s27461_s0 + $0x750] sm:$0xff] }
 0x1cc   :  { %v20088_v1 = vpop.xlane.xlu1 %818  ;;  %v20092_v56 = vpop.xlane.xlu0 %815  ;;  %v10588_v27 = vrot.slane %v20004_v0, %v19962_v25  ;;  %v1948_v46 = vrot.slane %v19086_v48, %v19930_v4  ;;  %v1955_v36 = vrot.slane %v19086_v48, %v19933_v38  ;;  %v1906_v30 = vrot.slane %v19090_v51, %v19918_v55 }
 0x1cd   :  { %27909 = vst [vmem:[#allocation137_spill] sm:$0xff] %v20088_v1  ;;  %27910 = vst [vmem:[#allocation138_spill] sm:$0xff] %v20092_v56  ;;  %v1871_v56 = vrot.slane %v19078_v45, %v19933_v38  ;;  %v20120_v1 = vcombine.low %v10622_v13, %v10629_v18  ;;  %v1941_v45 = vrot.slane %v19086_v48, %v19921_v47  ;;  %v251_v18 = vld [vmem:[%s27461_s0 + $0x758] sm:$0xff]  ;;  %v1042_v41 = vsel %vm339_vm0, %v250_v15, 0.0  ;;  %v252_v15 = vld [vmem:[%s27461_s0 + $0x760] sm:$0xff] }
 0x1ce   :  { %v20136_v13 = vcombine.low %v1850_v32, %v1857_v19  ;;  %v1913_v6 = vrot.slane %v19090_v51, %v19921_v47  ;;  %v10595_v0 = vrot.slane %v20024_v7, %v19962_v25  ;;  %v1990_v48 = vrot.slane %v19098_v54, %v19918_v55 }
 0x1cf   :  { %1034 = vadd.xlane.f32.xlu1 %v1033_v39  ;;  %1031 = vadd.xlane.f32.xlu0 %v1030_v59  ;;  %27914 = vst [vmem:[#allocation142_spill] sm:$0xff] %v20120_v1  ;;  %v1920_v39 = vrot.slane %v19090_v51, %v19930_v4  ;;  %v1927_v59 = vrot.slane %v19090_v51, %v19933_v38  ;;  %v1045_v42 = vsel %vm339_vm0, %v251_v18, 0.0  ;;  %v253_v18 = vld [vmem:[%s27461_s0 + $0x768] sm:$0xff] }
 0x1d0   :  { %v20126_v34 = vpop.xlane.xlu1 %824  ;;  %v20130_v43 = vpop.xlane.xlu0 %821  ;;  %27917 = vst [vmem:[#allocation145_spill] sm:$0xff] %v20136_v13  ;;  %v1997_v32 = vrot.slane %v19098_v54, %v19921_v47  ;;  %v2004_v51 = vrot.slane %v19098_v54, %v19930_v4  ;;  %v2011_v7 = vrot.slane %v19098_v54, %v19933_v38  ;;  %v20190_v54 = vcombine.low %v1906_v30, %v1913_v6  ;;  %v254_v6 = vld [vmem:[%s27461_s0 + $0x770] sm:$0xff] }
 0x1d1   :  { %27915 = vst [vmem:[#allocation143_spill] sm:$0xff] %v20126_v34  ;;  %27916 = vst [vmem:[#allocation144_spill] sm:$0xff] %v20130_v43  ;;  %v20188_v34 = vcombine.low %v1864_v33, %v1871_v56  ;;  %v20192_v1 = vcombine.low %v1920_v39, %v1927_v59  ;;  %v20194_v52 = vcombine.low %v10588_v27, %v10595_v0  ;;  %v1051_v56 = vsel %vm339_vm0, %v253_v18, 0.0 }
 0x1d2   :  { %v10639_v13 = vrot.slane %v20020_v16, %v19962_v25  ;;  %v1976_v23 = vrot.slane %v19102_v57, %v19930_v4  ;;  %v1048_v33 = vsel %vm339_vm0, %v252_v15, 0.0  ;;  %v20210_v27 = vcombine.low %v2004_v51, %v2011_v7 }
 0x1d3   :  { %1040 = vadd.xlane.f32.xlu1 %v1039_v29  ;;  %1037 = vadd.xlane.f32.xlu0 %v1036_v20  ;;  %v1962_v29 = vrot.slane %v19102_v57, %v19918_v55  ;;  %v1969_v20 = vrot.slane %v19102_v57, %v19921_v47  ;;  %27920 = vst [vmem:[#allocation148_spill] sm:$0xff] %v20192_v1  ;;  %27921 = vst [vmem:[#allocation149_spill] sm:$0xff] %v20194_v52 }
 0x1d4   :  { %v20164_v19 = vpop.xlane.xlu1 %830  ;;  %v20168_v43 = vpop.xlane.xlu0 %827  ;;  %v2046_v16 = vrot.slane %v19110_v60, %v19918_v55  ;;  %v2053_v39 = vrot.slane %v19110_v60, %v19921_v47  ;;  %v2060_v59 = vrot.slane %v19110_v60, %v19930_v4  ;;  %v2067_v0 = vrot.slane %v19110_v60, %v19933_v38 }
 0x1d5   :  { %27918 = vst [vmem:[#allocation146_spill] sm:$0xff] %v20164_v19  ;;  %27919 = vst [vmem:[#allocation147_spill] sm:$0xff] %v20168_v43  ;;  %v20184_v43 = vcombine.low %v1934_v24, %v1941_v45  ;;  %v20186_v19 = vcombine.low %v1948_v46, %v1955_v36  ;;  %v1983_v24 = vrot.slane %v19102_v57, %v19933_v38  ;;  %v255_v57 = vld [vmem:[%s27461_s0 + $0x778] sm:$0xff] }
 0x1d6   :  { %v20208_v36 = vcombine.low %v1990_v48, %v1997_v32  ;;  %v20214_v30 = vcombine.low %v1962_v29, %v1969_v20  ;;  %v2018_v48 = vrot.slane %v19114_v63, %v19918_v55  ;;  %v2025_v32 = vrot.slane %v19114_v63, %v19921_v47 }
 0x1d7   :  { %1046 = vadd.xlane.f32.xlu1 %v1045_v42  ;;  %1043 = vadd.xlane.f32.xlu0 %v1042_v41  ;;  %v2032_v42 = vrot.slane %v19114_v63, %v19930_v4  ;;  %v2039_v41 = vrot.slane %v19114_v63, %v19933_v38  ;;  %v20236_v51 = vcombine.low %v1976_v23, %v1983_v24  ;;  %v1057_v60 = vsel %vm339_vm0, %v255_v57, 0.0 }
 0x1d8   :  { %v20202_v45 = vpop.xlane.xlu1 %836  ;;  %v20206_v46 = vpop.xlane.xlu0 %833  ;;  %27924 = vst [vmem:[#allocation152_spill] sm:$0xff] %v20214_v30  ;;  %v1054_v29 = vsel %vm339_vm0, %v254_v6, 0.0  ;;  %v10646_v18 = vrot.slane %v20022_v12, %v19962_v25  ;;  %v2102_v15 = vrot.slane %v19122_v2, %v19918_v55  ;;  %v2109_v63 = vrot.slane %v19122_v2, %v19921_v47  ;;  %v256_v12 = vld [vmem:[%s27461_s0 + $0x780] sm:$0xff] }
 0x1d9   :  { %27922 = vst [vmem:[#allocation150_spill] sm:$0xff] %v20202_v45  ;;  %27923 = vst [vmem:[#allocation151_spill] sm:$0xff] %v20206_v46  ;;  %v2116_v23 = vrot.slane %v19122_v2, %v19930_v4  ;;  %v2123_v24 = vrot.slane %v19122_v2, %v19933_v38  ;;  %v2074_v57 = vrot.slane %v19126_v5, %v19918_v55 }
 0x1da   :  { %27925 = vst [vmem:[#allocation153_spill] sm:$0xff] %v20236_v51  ;;  %v2081_v6 = vrot.slane %v19126_v5, %v19921_v47  ;;  %v20268_v2 = vcombine.low %v2060_v59, %v2067_v0  ;;  %v20272_v46 = vcombine.low %v2032_v42, %v2039_v41  ;;  %v20280_v51 = vcombine.low %v10639_v13, %v10646_v18  ;;  %v259_v42 = vld [vmem:[%s27461_s0 + $0x798] sm:$0xff]  ;;  %v258_v13 = vld [vmem:[%s27461_s0 + $0x790] sm:$0xff] }
 0x1db   :  { %1052 = vadd.xlane.f32.xlu1 %v1051_v56  ;;  %1049 = vadd.xlane.f32.xlu0 %v1048_v33  ;;  %v257_v56 = vld [vmem:[%s27461_s0 + $0x788] sm:$0xff]  ;;  %v20260_v33 = vcombine.low %v2046_v16, %v2053_v39  ;;  %v1060_v39 = vsel %vm339_vm0, %v256_v12, 0.0  ;;  %v20284_v59 = vcombine.low %v2102_v15, %v2109_v63  ;;  %v20286_v0 = vcombine.low %v2116_v23, %v2123_v24 }
 0x1dc   :  { %v20238_v7 = vpop.xlane.xlu1 %842  ;;  %v20242_v20 = vpop.xlane.xlu0 %839  ;;  %27929 = vst [vmem:[#allocation157_spill] sm:$0xff] %v20272_v46  ;;  %v1063_v16 = vsel %vm339_vm0, %v257_v56, 0.0  ;;  %27932 = vst [vmem:[#allocation160_spill] sm:$0xff] %v20280_v51  ;;  %v2165_v41 = vrot.slane %v19134_v8, %v19921_v47  ;;  %v2130_v18 = vrot.slane %v19138_v11, %v19918_v55  ;;  %v2137_v15 = vrot.slane %v19138_v11, %v19921_v47 }
 0x1dd   :  { %27926 = vst [vmem:[#allocation154_spill] sm:$0xff] %v20238_v7  ;;  %27927 = vst [vmem:[#allocation155_spill] sm:$0xff] %v20242_v20  ;;  %v10741_v20 = vrot.slane %v20122_v61, %v19962_v25  ;;  %v20270_v7 = vcombine.low %v2018_v48, %v2025_v32  ;;  %v10748_v61 = vrot.slane %v20124_v50, %v19962_v25  ;;  %v1069_v56 = vsel %vm339_vm0, %v259_v42, 0.0  ;;  %v260_v42 = vld [vmem:[%s27461_s0 + $0x7a0] sm:$0xff] }
 0x1de   :  { %v2088_v48 = vrot.slane %v19126_v5, %v19930_v4  ;;  %v2095_v32 = vrot.slane %v19126_v5, %v19933_v38  ;;  %v2158_v50 = vrot.slane %v19134_v8, %v19918_v55  ;;  %v2179_v5 = vrot.slane %v19134_v8, %v19933_v38 }
 0x1df   :  { %27928 = vst [vmem:[#allocation156_spill] sm:$0xff] %v20270_v7  ;;  %1058 = vadd.xlane.f32.xlu1 %v1057_v60  ;;  %1055 = vadd.xlane.f32.xlu0 %v1054_v29  ;;  %v2172_v60 = vrot.slane %v19134_v8, %v19930_v4  ;;  %v20304_v29 = vcombine.low %v2074_v57, %v2081_v6  ;;  %v1066_v8 = vsel %vm339_vm0, %v258_v13, 0.0  ;;  %v1072_v1 = vsel %vm339_vm0, %v260_v42, 0.0 }
 0x1e0   :  { %v20274_v45 = vpop.xlane.xlu1 %848  ;;  %v20278_v52 = vpop.xlane.xlu0 %845  ;;  %v2144_v63 = vrot.slane %v19138_v11, %v19930_v4  ;;  %v2151_v23 = vrot.slane %v19138_v11, %v19933_v38  ;;  %v2214_v57 = vrot.slane %v19146_v14, %v19918_v55  ;;  %v2221_v6 = vrot.slane %v19146_v14, %v19921_v47 }
 0x1e1   :  { %27930 = vst [vmem:[#allocation158_spill] sm:$0xff] %v20274_v45  ;;  %27931 = vst [vmem:[#allocation159_spill] sm:$0xff] %v20278_v52  ;;  %v2235_v11 = vrot.slane %v19146_v14, %v19933_v38  ;;  %v2186_v13 = vrot.slane %v19150_v17, %v19918_v55  ;;  %v20344_v52 = vcombine.low %v2088_v48, %v2095_v32 }
 0x1e2   :  { %27933 = vst [vmem:[#allocation161_spill] sm:$0xff] %v20304_v29  ;;  %v20346_v45 = vcombine.low %v10741_v20, %v10748_v61  ;;  %v10656_v51 = vrot.slane %v20078_v28, %v19962_v25  ;;  %v20350_v29 = vcombine.low %v2158_v50, %v2165_v41  ;;  %v20352_v46 = vcombine.low %v2172_v60, %v2179_v5  ;;  %v263_v28 = vld [vmem:[%s27461_s0 + $0x7b8] sm:$0xff]  ;;  %v262_v20 = vld [vmem:[%s27461_s0 + $0x7b0] sm:$0xff] }
 0x1e3   :  { %1064 = vadd.xlane.f32.xlu1 %v1063_v16  ;;  %1061 = vadd.xlane.f32.xlu0 %v1060_v39  ;;  %v2228_v16 = vrot.slane %v19146_v14, %v19930_v4  ;;  %v261_v39 = vld [vmem:[%s27461_s0 + $0x7a8] sm:$0xff]  ;;  %v2207_v14 = vrot.slane %v19150_v17, %v19933_v38  ;;  %v20360_v48 = vcombine.low %v2130_v18, %v2137_v15 }
 0x1e4   :  { %v20316_v24 = vpop.xlane.xlu1 %854  ;;  %v20320_v12 = vpop.xlane.xlu0 %851  ;;  %27936 = vst [vmem:[#allocation164_spill] sm:$0xff] %v20346_v45  ;;  %v1075_v30 = vsel %vm339_vm0, %v261_v39, 0.0  ;;  %v20362_v32 = vcombine.low %v2144_v63, %v2151_v23  ;;  %v10663_v61 = vrot.slane %v20096_v3, %v19962_v25  ;;  %v10775_v50 = vrot.slane %v20184_v43, %v19962_v25 }
 0x1e5   :  { %27934 = vst [vmem:[#allocation162_spill] sm:$0xff] %v20316_v24  ;;  %27935 = vst [vmem:[#allocation163_spill] sm:$0xff] %v20320_v12  ;;  %v2193_v12 = vrot.slane %v19150_v17, %v19921_v47  ;;  %v2200_v24 = vrot.slane %v19150_v17, %v19930_v4  ;;  %v20374_v41 = vcombine.low %v2214_v57, %v2221_v6  ;;  %v265_v57 = vld [vmem:[%s27461_s0 + $0x7c8] sm:$0xff]  ;;  %v264_v6 = vld [vmem:[%s27461_s0 + $0x7c0] sm:$0xff] }
 0x1e6   :  { %v20376_v60 = vcombine.low %v2228_v16, %v2235_v11  ;;  %v2270_v15 = vrot.slane %v19158_v22, %v19918_v55  ;;  %v2277_v63 = vrot.slane %v19158_v22, %v19921_v47  ;;  %v10782_v3 = vrot.slane %v20186_v19, %v19962_v25 }
 0x1e7   :  { %1070 = vadd.xlane.f32.xlu1 %v1069_v56  ;;  %1067 = vadd.xlane.f32.xlu0 %v1066_v8  ;;  %v20378_v5 = vcombine.low %v2186_v13, %v2193_v12  ;;  %v20380_v18 = vcombine.low %v2200_v24, %v2207_v14  ;;  %v2284_v43 = vrot.slane %v19158_v22, %v19930_v4  ;;  %v1081_v24 = vsel %vm339_vm0, %v263_v28, 0.0 }
 0x1e8   :  { %v20354_v7 = vpop.xlane.xlu1 %860  ;;  %v20358_v17 = vpop.xlane.xlu0 %857  ;;  %v2291_v23 = vrot.slane %v19158_v22, %v19933_v38  ;;  %v1078_v8 = vsel %vm339_vm0, %v262_v20, 0.0  ;;  %v2249_v19 = vrot.slane %v19162_v26, %v19921_v47  ;;  %v2263_v22 = vrot.slane %v19162_v26, %v19933_v38 }
 0x1e9   :  { %27937 = vst [vmem:[#allocation165_spill] sm:$0xff] %v20354_v7  ;;  %27938 = vst [vmem:[#allocation166_spill] sm:$0xff] %v20358_v17  ;;  %v2326_v16 = vrot.slane %v19170_v31, %v19918_v55  ;;  %v2333_v11 = vrot.slane %v19170_v31, %v19921_v47  ;;  %v2340_v39 = vrot.slane %v19170_v31, %v19930_v4 }
 0x1ea   :  { %v2298_v42 = vrot.slane %v19174_v35, %v19918_v55  ;;  %v2305_v13 = vrot.slane %v19174_v35, %v19921_v47  ;;  %v20424_v14 = vcombine.low %v10656_v51, %v10663_v61  ;;  %v20426_v28 = vcombine.low %v2270_v15, %v2277_v63  ;;  %v267_v51 = vld [vmem:[%s27461_s0 + $0x7d8] sm:$0xff]  ;;  %v266_v61 = vld [vmem:[%s27461_s0 + $0x7d0] sm:$0xff] }
 0x1eb   :  { %1076 = vadd.xlane.f32.xlu1 %v1075_v30  ;;  %1073 = vadd.xlane.f32.xlu0 %v1072_v1  ;;  %v2242_v1 = vrot.slane %v19162_v26, %v19918_v55  ;;  %v2256_v30 = vrot.slane %v19162_v26, %v19930_v4  ;;  %v2347_v26 = vrot.slane %v19170_v31, %v19933_v38  ;;  %v1084_v31 = vsel %vm339_vm0, %v264_v6, 0.0 }
 0x1ec   :  { %v20392_v56 = vpop.xlane.xlu1 %866  ;;  %v20396_v12 = vpop.xlane.xlu0 %863  ;;  %27941 = vst [vmem:[#allocation169_spill] sm:$0xff] %v20424_v14  ;;  %v20428_v20 = vcombine.low %v2284_v43, %v2291_v23  ;;  %v20446_v15 = vcombine.low %v10775_v50, %v10782_v3  ;;  %v10673_v63 = vrot.slane %v20042_v9, %v19962_v25  ;;  %v20450_v43 = vcombine.low %v2326_v16, %v2333_v11  ;;  %v269_v11 = vld [vmem:[%s27461_s0 + $0x7e8] sm:$0xff] }
 0x1ed   :  { %27939 = vst [vmem:[#allocation167_spill] sm:$0xff] %v20392_v56  ;;  %27940 = vst [vmem:[#allocation168_spill] sm:$0xff] %v20396_v12  ;;  %v1087_v56 = vsel %vm339_vm0, %v265_v57, 0.0  ;;  %v20436_v7 = vcombine.low %v2242_v1, %v2249_v19  ;;  %v20438_v45 = vcombine.low %v2256_v30, %v2263_v22  ;;  %v20452_v23 = vcombine.low %v2340_v39, %v2347_v26  ;;  %v268_v39 = vld [vmem:[%s27461_s0 + $0x7e0] sm:$0xff] }
 0x1ee   :  { %27944 = vst [vmem:[#allocation172_spill] sm:$0xff] %v20446_v15  ;;  %v2382_v1 = vrot.slane %v19182_v40, %v19918_v55  ;;  %v20460_v19 = vcombine.low %v2298_v42, %v2305_v13  ;;  %v10680_v9 = vrot.slane %v20044_v21, %v19962_v25  ;;  %v2389_v50 = vrot.slane %v19182_v40, %v19921_v47 }
 0x1ef   :  { %1082 = vadd.xlane.f32.xlu1 %v1081_v24  ;;  %1079 = vadd.xlane.f32.xlu0 %v1078_v8  ;;  %v2312_v24 = vrot.slane %v19174_v35, %v19930_v4  ;;  %v2319_v8 = vrot.slane %v19174_v35, %v19933_v38  ;;  %v2396_v3 = vrot.slane %v19182_v40, %v19930_v4  ;;  %v1093_v35 = vsel %vm339_vm0, %v267_v51, 0.0 }
 0x1f0   :  { %v20430_v12 = vpop.xlane.xlu1 %872  ;;  %v20434_v17 = vpop.xlane.xlu0 %869  ;;  %v1090_v22 = vsel %vm339_vm0, %v266_v61, 0.0  ;;  %v2354_v21 = vrot.slane %v19186_v44, %v19918_v55  ;;  %v2361_v6 = vrot.slane %v19186_v44, %v19921_v47  ;;  %v2368_v16 = vrot.slane %v19186_v44, %v19930_v4 }
 0x1f1   :  { %27942 = vst [vmem:[#allocation170_spill] sm:$0xff] %v20430_v12  ;;  %27943 = vst [vmem:[#allocation171_spill] sm:$0xff] %v20434_v17  ;;  %v2445_v26 = vrot.slane %v19194_v49, %v19921_v47  ;;  %v2452_v42 = vrot.slane %v19194_v49, %v19930_v4  ;;  %v2375_v13 = vrot.slane %v19186_v44, %v19933_v38  ;;  %v1099_v44 = vsel %vm339_vm0, %v269_v11, 0.0 }
 0x1f2   :  { %v2410_v51 = vrot.slane %v19198_v53, %v19918_v55  ;;  %v2417_v61 = vrot.slane %v19198_v53, %v19921_v47  ;;  %v20512_v15 = vcombine.low %v2382_v1, %v2389_v50  ;;  %v10809_v11 = vrot.slane %v20208_v36, %v19962_v25 }
 0x1f3   :  { %1088 = vadd.xlane.f32.xlu1 %v1087_v56  ;;  %1085 = vadd.xlane.f32.xlu0 %v1084_v31  ;;  %v2403_v56 = vrot.slane %v19182_v40, %v19933_v38  ;;  %v2438_v40 = vrot.slane %v19194_v49, %v19918_v55  ;;  %v2459_v31 = vrot.slane %v19194_v49, %v19933_v38  ;;  %v1096_v49 = vsel %vm339_vm0, %v268_v39, 0.0 }
 0x1f4   :  { %v20468_v30 = vpop.xlane.xlu1 %878  ;;  %v20472_v57 = vpop.xlane.xlu0 %875  ;;  %v20526_v39 = vcombine.low %v2354_v21, %v2361_v6  ;;  %v20530_v1 = vcombine.low %v10673_v63, %v10680_v9  ;;  %v2494_v36 = vrot.slane %v19206_v58, %v19918_v55  ;;  %v2501_v6 = vrot.slane %v19206_v58, %v19921_v47 }
 0x1f5   :  { %27945 = vst [vmem:[#allocation173_spill] sm:$0xff] %v20468_v30  ;;  %27946 = vst [vmem:[#allocation174_spill] sm:$0xff] %v20472_v57  ;;  %v2424_v57 = vrot.slane %v19198_v53, %v19930_v4  ;;  %v2431_v30 = vrot.slane %v19198_v53, %v19933_v38  ;;  %v20514_v14 = vcombine.low %v2396_v3, %v2403_v56  ;;  %v270_v53 = vld [vmem:[%s27461_s0 + $0x7f0] sm:$0xff] }
 0x1f6   :  { %27950 = vst [vmem:[#allocation178_spill] sm:$0xff] %v20526_v39  ;;  %27952 = vst [vmem:[#allocation180_spill] sm:$0xff] %v20530_v1  ;;  %v20536_v50 = vcombine.low %v2452_v42, %v2459_v31  ;;  %v20538_v3 = vcombine.low %v2410_v51, %v2417_v61  ;;  %v1102_v9 = vsel %vm339_vm0, %v270_v53, 0.0  ;;  %v27957_v42 = vld [vmem:[#allocation6_spill] sm:$0xff]  ;;  %v2473_v31 = vrot.slane %v19210_v62, %v19921_v47 }
 0x1f7   :  { %1094 = vadd.xlane.f32.xlu1 %v1093_v35  ;;  %1091 = vadd.xlane.f32.xlu0 %v1090_v22  ;;  %v20516_v35 = vcombine.low %v2312_v24, %v2319_v8  ;;  %v271_v22 = vld [vmem:[%s27461_s0 + $0x7f8] sm:$0xff]  ;;  %v10816_v24 = vrot.slane %v20210_v27, %v19962_v25  ;;  %v20534_v8 = vcombine.low %v2438_v40, %v2445_v26  ;;  %v272_v26 = vld [vmem:[%s27461_s0 + $0x800] sm:$0xff] }
 0x1f8   :  { %v20506_v17 = vpop.xlane.xlu1 %884  ;;  %v20510_v12 = vpop.xlane.xlu0 %881  ;;  %27953 = vst [vmem:[#allocation181_spill] sm:$0xff] %v20538_v3  ;;  %v20542_v56 = vcombine.low %v2424_v57, %v2431_v30  ;;  %v1105_v63 = vsel %vm339_vm0, %v271_v22, 0.0  ;;  %v2515_v40 = vrot.slane %v19206_v58, %v19933_v38  ;;  %v2466_v30 = vrot.slane %v19210_v62, %v19918_v55  ;;  %v273_v57 = vld [vmem:[%s27461_s0 + $0x808] sm:$0xff]  ;;  %v27958_v22 = vld [vmem:[#allocation7_spill] sm:$0xff] }
 0x1f9   :  { %27947 = vst [vmem:[#allocation175_spill] sm:$0xff] %v20506_v17  ;;  %27948 = vst [vmem:[#allocation176_spill] sm:$0xff] %v20510_v12  ;;  %v20528_v12 = vcombine.low %v2368_v16, %v2375_v13  ;;  %v2508_v16 = vrot.slane %v19206_v58, %v19930_v4  ;;  %v2550_v13 = vrot.slane %v27957_v42, %v19918_v55  ;;  %v1108_v17 = vsel %vm339_vm0, %v272_v26, 0.0 }
 0x1fa   :  { %27949 = vst [vmem:[#allocation177_spill] sm:$0xff] %v20516_v35  ;;  %27954 = vst [vmem:[#allocation182_spill] sm:$0xff] %v20542_v56  ;;  %v2480_v58 = vrot.slane %v19210_v62, %v19930_v4  ;;  %v2487_v51 = vrot.slane %v19210_v62, %v19933_v38  ;;  %v2557_v61 = vrot.slane %v27957_v42, %v19921_v47  ;;  %v1111_v62 = vsel %vm339_vm0, %v273_v57, 0.0 }
 0x1fb   :  { %27951 = vst [vmem:[#allocation179_spill] sm:$0xff] %v20528_v12  ;;  %1100 = vadd.xlane.f32.xlu1 %v1099_v44  ;;  %1097 = vadd.xlane.f32.xlu0 %v1096_v49  ;;  %v2564_v44 = vrot.slane %v27957_v42, %v19930_v4  ;;  %v2571_v49 = vrot.slane %v27957_v42, %v19933_v38 }
 0x1fc   :  { %v20544_v21 = vpop.xlane.xlu1 %890  ;;  %v20548_v27 = vpop.xlane.xlu0 %887  ;;  %v2522_v53 = vrot.slane %v27958_v22, %v19918_v55  ;;  %v20588_v56 = vcombine.low %v2494_v36, %v2501_v6  ;;  %v20590_v3 = vcombine.low %v2508_v16, %v2515_v40  ;;  %v20598_v42 = vcombine.low %v10809_v11, %v10816_v24 }
 0x1fd   :  { %27955 = vst [vmem:[#allocation183_spill] sm:$0xff] %v20544_v21  ;;  %27956 = vst [vmem:[#allocation184_spill] sm:$0xff] %v20548_v27  ;;  %v2529_v27 = vrot.slane %v27958_v22, %v19921_v47  ;;  %v10690_v57 = vrot.slane %v20110_v37, %v19962_v25  ;;  %v20602_v26 = vcombine.low %v2466_v30, %v2473_v31 }
 0x1fe   :  { %27961 = vst [vmem:[#allocation185_spill] sm:$0xff] %v20598_v42  ;;  %v2536_v36 = vrot.slane %v27958_v22, %v19930_v4  ;;  %v2543_v6 = vrot.slane %v27958_v22, %v19933_v38  ;;  %v10697_v16 = vrot.slane %v20112_v10, %v19962_v25  ;;  %v20610_v40 = vcombine.low %v2550_v13, %v2557_v61  ;;  %v27967_v13 = vld [vmem:[#allocation8_spill] sm:$0xff]  ;;  %v276_v61 = vld [vmem:[%s27461_s0 + $0x820] sm:$0xff] }
 0x1ff   :  { %1106 = vadd.xlane.f32.xlu1 %v1105_v63  ;;  %1103 = vadd.xlane.f32.xlu0 %v1102_v9  ;;  %v275_v63 = vld [vmem:[%s27461_s0 + $0x818] sm:$0xff]  ;;  %v274_v9 = vld [vmem:[%s27461_s0 + $0x810] sm:$0xff]  ;;  %27962 = vst [vmem:[#allocation186_spill] sm:$0xff] %v20602_v26  ;;  %v10843_v37 = vrot.slane %v20260_v33, %v19962_v25  ;;  %v20616_v11 = vcombine.low %v2564_v44, %v2571_v49  ;;  %v27969_v49 = vld [vmem:[#allocation9_spill] sm:$0xff] }
 0x200   :  { %v20582_v21 = vpop.xlane.xlu1 %896  ;;  %v20586_v1 = vpop.xlane.xlu0 %893  ;;  %v20618_v24 = vcombine.low %v2522_v53, %v2529_v27  ;;  %v1117_v31 = vsel %vm339_vm0, %v275_v63, 0.0  ;;  %v1114_v22 = vsel %vm339_vm0, %v274_v9, 0.0  ;;  %v2620_v33 = vrot.slane %v27967_v13, %v19930_v4 }
 0x201   :  { %27959 = vst [vmem:[#allocation6_spill] sm:$0xff] %v20582_v21  ;;  %27960 = vst [vmem:[#allocation7_spill] sm:$0xff] %v20586_v1  ;;  %v20612_v1 = vcombine.low %v2480_v58, %v2487_v51  ;;  %v2606_v58 = vrot.slane %v27967_v13, %v19918_v55  ;;  %v2627_v27 = vrot.slane %v27967_v13, %v19933_v38  ;;  %v277_v51 = vld [vmem:[%s27461_s0 + $0x828] sm:$0xff] }
 0x202   :  { %27964 = vst [vmem:[#allocation188_spill] sm:$0xff] %v20618_v24  ;;  %v20640_v44 = vcombine.low %v2536_v36, %v2543_v6  ;;  %v2578_v53 = vrot.slane %v27969_v49, %v19918_v55  ;;  %v10850_v63 = vrot.slane %v20268_v2, %v19962_v25  ;;  %v2585_v9 = vrot.slane %v27969_v49, %v19921_v47  ;;  %v27971_v36 = vld [vmem:[#allocation10_spill] sm:$0xff] }
 0x203   :  { %27963 = vst [vmem:[#allocation187_spill] sm:$0xff] %v20612_v1  ;;  %1112 = vadd.xlane.f32.xlu1 %v1111_v62  ;;  %1109 = vadd.xlane.f32.xlu0 %v1108_v17  ;;  %v2613_v17 = vrot.slane %v27967_v13, %v19921_v47  ;;  %v20644_v62 = vcombine.low %v10690_v57, %v10697_v16  ;;  %v1123_v2 = vsel %vm339_vm0, %v277_v51, 0.0  ;;  %v278_v51 = vld [vmem:[%s27461_s0 + $0x830] sm:$0xff] }
 0x204   :  { %v20620_v30 = vpop.xlane.xlu1 %902  ;;  %v20624_v10 = vpop.xlane.xlu0 %899  ;;  %27968 = vst [vmem:[#allocation8_spill] sm:$0xff] %v20640_v44  ;;  %v2592_v13 = vrot.slane %v27969_v49, %v19930_v4  ;;  %v2662_v6 = vrot.slane %v27971_v36, %v19918_v55  ;;  %v2669_v57 = vrot.slane %v27971_v36, %v19921_v47  ;;  %v20666_v24 = vcombine.low %v2620_v33, %v2627_v27 }
 0x205   :  { %27965 = vst [vmem:[#allocation189_spill] sm:$0xff] %v20620_v30  ;;  %27966 = vst [vmem:[#allocation190_spill] sm:$0xff] %v20624_v10  ;;  %v2599_v10 = vrot.slane %v27969_v49, %v19933_v38  ;;  %v1120_v30 = vsel %vm339_vm0, %v276_v61, 0.0  ;;  %v20664_v44 = vcombine.low %v2606_v58, %v2613_v17  ;;  %v279_v49 = vld [vmem:[%s27461_s0 + $0x838] sm:$0xff]  ;;  %v27976_v61 = vld [vmem:[#allocation11_spill] sm:$0xff]  ;;  %v1126_v26 = vsel %vm339_vm0, %v278_v51, 0.0 }
 0x206   :  { %27970 = vst [vmem:[#allocation9_spill] sm:$0xff] %v20644_v62  ;;  %27975 = vst [vmem:[#allocation193_spill] sm:$0xff] %v20666_v24  ;;  %v2634_v58 = vrot.slane %v27976_v61, %v19918_v55  ;;  %v2641_v17 = vrot.slane %v27976_v61, %v19921_v47  ;;  %v2648_v33 = vrot.slane %v27976_v61, %v19930_v4  ;;  %v1129_v1 = vsel %vm339_vm0, %v279_v49, 0.0  ;;  %v27988_v51 = vld [vmem:[#allocation140_spill] sm:$0xff] }
 0x207   :  { %1118 = vadd.xlane.f32.xlu1 %v1117_v31  ;;  %1115 = vadd.xlane.f32.xlu0 %v1114_v22  ;;  %27974 = vst [vmem:[#allocation192_spill] sm:$0xff] %v20664_v44  ;;  %v2676_v31 = vrot.slane %v27971_v36, %v19930_v4  ;;  %v2683_v22 = vrot.slane %v27971_v36, %v19933_v38 }
 0x208   :  { %v20658_v16 = vpop.xlane.xlu1 %908  ;;  %v20662_v21 = vpop.xlane.xlu0 %905  ;;  %v2655_v27 = vrot.slane %v27976_v61, %v19933_v38  ;;  %v20686_v36 = vcombine.low %v2578_v53, %v2585_v9  ;;  %v20692_v62 = vcombine.low %v2662_v6, %v2669_v57  ;;  %v27983_v61 = vld [vmem:[#allocation139_spill] sm:$0xff]  ;;  %v280_v6 = vld [vmem:[%s27461_s0 + $0x840] sm:$0xff] }
 0x209   :  { %27972 = vst [vmem:[#allocation10_spill] sm:$0xff] %v20658_v16  ;;  %27973 = vst [vmem:[#allocation191_spill] sm:$0xff] %v20662_v21  ;;  %v20688_v21 = vcombine.low %v2592_v13, %v2599_v10  ;;  %v20690_v16 = vcombine.low %v10843_v37, %v10850_v63  ;;  %v10707_v53 = vrot.slane %v27983_v61, %v19962_v25  ;;  %v27984_v10 = vld [vmem:[#allocation12_spill] sm:$0xff]  ;;  %v281_v13 = vld [vmem:[%s27461_s0 + $0x848] sm:$0xff] }
 0x20a   :  { %27977 = vst [vmem:[#allocation11_spill] sm:$0xff] %v20686_v36  ;;  %27980 = vst [vmem:[#allocation196_spill] sm:$0xff] %v20692_v62  ;;  %v2718_v9 = vrot.slane %v27984_v10, %v19918_v55  ;;  %v2725_v37 = vrot.slane %v27984_v10, %v19921_v47  ;;  %v2739_v63 = vrot.slane %v27984_v10, %v19933_v38  ;;  %v28000_v62 = vld [vmem:[#allocation16_spill] sm:$0xff] }
 0x20b   :  { %27978 = vst [vmem:[#allocation194_spill] sm:$0xff] %v20688_v21  ;;  %1124 = vadd.xlane.f32.xlu1 %v1123_v2  ;;  %1121 = vadd.xlane.f32.xlu0 %v1120_v30  ;;  %27979 = vst [vmem:[#allocation195_spill] sm:$0xff] %v20690_v16  ;;  %v2732_v30 = vrot.slane %v27984_v10, %v19930_v4  ;;  %v20716_v57 = vcombine.low %v2676_v31, %v2683_v22 }
 0x20c   :  { %v20694_v42 = vpop.xlane.xlu1 %914  ;;  %v20698_v12 = vpop.xlane.xlu0 %911  ;;  %v20718_v2 = vcombine.low %v2634_v58, %v2641_v17  ;;  %v20720_v49 = vcombine.low %v2648_v33, %v2655_v27  ;;  %v10714_v61 = vrot.slane %v27988_v51, %v19962_v25  ;;  %v10877_v21 = vrot.slane %v20284_v59, %v19962_v25 }
 0x20d   :  { %27981 = vst [vmem:[#allocation197_spill] sm:$0xff] %v20694_v42  ;;  %27982 = vst [vmem:[#allocation198_spill] sm:$0xff] %v20698_v12  ;;  %v27989_v12 = vld [vmem:[#allocation13_spill] sm:$0xff]  ;;  %v1135_v17 = vsel %vm339_vm0, %v281_v13, 0.0  ;;  %v1132_v33 = vsel %vm339_vm0, %v280_v6, 0.0  ;;  %v18719_v51 = vmov 0   ;;  %v20742_v59 = vcombine.low %v2732_v30, %v2739_v63 }
 0x20e   :  { %27985 = vst [vmem:[#allocation139_spill] sm:$0xff] %v20716_v57  ;;  %27986 = vst [vmem:[#allocation12_spill] sm:$0xff] %v20718_v2  ;;  %v2690_v10 = vrot.slane %v27989_v12, %v19918_v55  ;;  %v2697_v42 = vrot.slane %v27989_v12, %v19921_v47  ;;  %v2704_v31 = vrot.slane %v27989_v12, %v19930_v4  ;;  %18689 = vset.pattern.permute.xlu1 %v18719_v51  ;;  %v283_v13 = vld [vmem:[%s27461_s0 + $0x858] sm:$0xff]  ;;  %v282_v6 = vld [vmem:[%s27461_s0 + $0x850] sm:$0xff] }
 0x20f   :  { %27987 = vst [vmem:[#allocation199_spill] sm:$0xff] %v20720_v49  ;;  %1130 = vadd.xlane.f32.xlu1 %v1129_v1  ;;  %1127 = vadd.xlane.f32.xlu0 %v1126_v26  ;;  %v2711_v22 = vrot.slane %v27989_v12, %v19933_v38  ;;  %v20740_v1 = vcombine.low %v2718_v9, %v2725_v37  ;;  %27993 = vst [vmem:[#allocation201_spill] sm:$0xff] %v20742_v59  ;;  %v27994_v26 = vld [vmem:[#allocation14_spill] sm:$0xff]  ;;  %v27995_v30 = vld [vmem:[#allocation15_spill] sm:$0xff]  ;;  %v1141_v59 = vsel %vm339_vm0, %v283_v13, 0.0 }
 0x210   :  { %v20734_v58 = vpop.xlane.xlu1 %920  ;;  %v20738_v27 = vpop.xlane.xlu0 %917  ;;  %18688 = vset.pattern.permute.xlu0 %v18719_v51  ;;  %v2774_v49 = vrot.slane %v27994_v26, %v19918_v55  ;;  %v2781_v12 = vrot.slane %v27994_v26, %v19921_v47  ;;  %v2788_v9 = vrot.slane %v27994_v26, %v19930_v4  ;;  %v2795_v37 = vrot.slane %v27994_v26, %v19933_v38 }
 0x211   :  { %27990 = vst [vmem:[#allocation140_spill] sm:$0xff] %v20734_v58  ;;  %27991 = vst [vmem:[#allocation13_spill] sm:$0xff] %v20738_v27  ;;  %v2746_v63 = vrot.slane %v27995_v30, %v19918_v55  ;;  %v2753_v51 = vrot.slane %v27995_v30, %v19921_v47  ;;  %v2760_v27 = vrot.slane %v27995_v30, %v19930_v4 }
 0x212   :  { %27992 = vst [vmem:[#allocation200_spill] sm:$0xff] %v20740_v1  ;;  %v2767_v58 = vrot.slane %v27995_v30, %v19933_v38  ;;  %v10884_v2 = vrot.slane %v20286_v0, %v19962_v25  ;;  %v20768_v36 = vcombine.low %v2690_v10, %v2697_v42  ;;  %v20770_v26 = vcombine.low %v2704_v31, %v2711_v22  ;;  %v285_v10 = vld [vmem:[%s27461_s0 + $0x868] sm:$0xff]  ;;  %v284_v31 = vld [vmem:[%s27461_s0 + $0x860] sm:$0xff] }
 0x213   :  { %1136 = vadd.xlane.f32.xlu1 %v1135_v17  ;;  %1133 = vadd.xlane.f32.xlu0 %v1132_v33  ;;  %v1138_v1 = vsel %vm339_vm0, %v282_v6, 0.0  ;;  %v2830_v30 = vrot.slane %v28000_v62, %v19918_v55  ;;  %v2837_v17 = vrot.slane %v28000_v62, %v19921_v47  ;;  %v2844_v0 = vrot.slane %v28000_v62, %v19930_v4 }
 0x214   :  { %27996 = vst [vmem:[#allocation14_spill] sm:$0xff] %v20768_v36  ;;  %27997 = vst [vmem:[#allocation15_spill] sm:$0xff] %v20770_v26  ;;  %v20772_v16 = vpop.xlane.xlu1 %926  ;;  %v20776_v57 = vpop.xlane.xlu0 %923  ;;  %v2851_v42 = vrot.slane %v28000_v62, %v19933_v38  ;;  %v20792_v22 = vcombine.low %v2774_v49, %v2781_v12  ;;  %v20794_v33 = vcombine.low %v2788_v9, %v2795_v37  ;;  %v28008_v36 = vld [vmem:[#allocation17_spill] sm:$0xff]  ;;  %v28013_v9 = vld [vmem:[#allocation18_spill] sm:$0xff] }
 0x215   :  { %27998 = vst [vmem:[#allocation202_spill] sm:$0xff] %v20772_v16  ;;  %27999 = vst [vmem:[#allocation203_spill] sm:$0xff] %v20776_v57  ;;  %v20796_v13 = vcombine.low %v2746_v63, %v2753_v51  ;;  %v20798_v6 = vcombine.low %v10707_v53, %v10714_v61  ;;  %v20800_v57 = vcombine.low %v2760_v27, %v2767_v58  ;;  %v28007_v16 = vld [vmem:[#allocation145_spill] sm:$0xff]  ;;  %v1147_v53 = vsel %vm339_vm0, %v285_v10, 0.0 }
 0x216   :  { %28001 = vst [vmem:[#allocation16_spill] sm:$0xff] %v20792_v22  ;;  %28002 = vst [vmem:[#allocation204_spill] sm:$0xff] %v20794_v33  ;;  %v20802_v62 = vcombine.low %v10877_v21, %v10884_v2  ;;  %v10724_v26 = vrot.slane %v28007_v16, %v19962_v25  ;;  %v2802_v39 = vrot.slane %v28008_v36, %v19918_v55  ;;  %v1144_v61 = vsel %vm339_vm0, %v284_v31, 0.0 }
 0x217   :  { %28003 = vst [vmem:[#allocation205_spill] sm:$0xff] %v20796_v13  ;;  %28004 = vst [vmem:[#allocation206_spill] sm:$0xff] %v20798_v6  ;;  %1142 = vadd.xlane.f32.xlu1 %v1141_v59  ;;  %1139 = vadd.xlane.f32.xlu0 %v1138_v1  ;;  %v2809_v49 = vrot.slane %v28008_v36, %v19921_v47  ;;  %v20816_v27 = vcombine.low %v2830_v30, %v2837_v17  ;;  %v287_v1 = vld [vmem:[%s27461_s0 + $0x878] sm:$0xff]  ;;  %v286_v59 = vld [vmem:[%s27461_s0 + $0x870] sm:$0xff] }
 0x218   :  { %28005 = vst [vmem:[#allocation207_spill] sm:$0xff] %v20800_v57  ;;  %28006 = vst [vmem:[#allocation208_spill] sm:$0xff] %v20802_v62  ;;  %v20810_v12 = vpop.xlane.xlu1 %932  ;;  %v20814_v58 = vpop.xlane.xlu0 %929  ;;  %v20818_v21 = vcombine.low %v2844_v0, %v2851_v42  ;;  %v2816_v16 = vrot.slane %v28008_v36, %v19930_v4  ;;  %v2823_v2 = vrot.slane %v28008_v36, %v19933_v38  ;;  %v28014_v17 = vld [vmem:[#allocation19_spill] sm:$0xff]  ;;  %v28017_v57 = vld [vmem:[#allocation20_spill] sm:$0xff] }
 0x219   :  { %28009 = vst [vmem:[#allocation145_spill] sm:$0xff] %v20810_v12  ;;  %28010 = vst [vmem:[#allocation17_spill] sm:$0xff] %v20814_v58  ;;  %v2886_v37 = vrot.slane %v28013_v9, %v19918_v55  ;;  %v2893_v63 = vrot.slane %v28013_v9, %v19921_v47  ;;  %v2900_v51 = vrot.slane %v28013_v9, %v19930_v4 }
 0x21a   :  { %28011 = vst [vmem:[#allocation209_spill] sm:$0xff] %v20816_v27  ;;  %28012 = vst [vmem:[#allocation210_spill] sm:$0xff] %v20818_v21  ;;  %v10731_v36 = vrot.slane %v20188_v34, %v19962_v25  ;;  %v2907_v30 = vrot.slane %v28013_v9, %v19933_v38  ;;  %v2858_v0 = vrot.slane %v28014_v17, %v19918_v55  ;;  %v1153_v34 = vsel %vm339_vm0, %v287_v1, 0.0  ;;  %v289_v1 = vld [vmem:[%s27461_s0 + $0x888] sm:$0xff] }
 0x21b   :  { %v2865_v42 = vrot.slane %v28014_v17, %v19921_v47  ;;  %1148 = vadd.xlane.f32.xlu1 %v1147_v53  ;;  %1145 = vadd.xlane.f32.xlu0 %v1144_v61  ;;  %v2872_v10 = vrot.slane %v28014_v17, %v19930_v4  ;;  %v2879_v31 = vrot.slane %v28014_v17, %v19933_v38  ;;  %v1150_v9 = vsel %vm339_vm0, %v286_v59, 0.0  ;;  %v288_v59 = vld [vmem:[%s27461_s0 + $0x880] sm:$0xff] }
 0x21c   :  { %v20848_v58 = vpop.xlane.xlu1 %938  ;;  %v20852_v12 = vpop.xlane.xlu0 %935  ;;  %v2942_v13 = vrot.slane %v28017_v57, %v19918_v55  ;;  %v2949_v53 = vrot.slane %v28017_v57, %v19921_v47  ;;  %v2956_v61 = vrot.slane %v28017_v57, %v19930_v4  ;;  %v2963_v17 = vrot.slane %v28017_v57, %v19933_v38 }
 0x21d   :  { %28015 = vst [vmem:[#allocation18_spill] sm:$0xff] %v20848_v58  ;;  %28016 = vst [vmem:[#allocation19_spill] sm:$0xff] %v20852_v12  ;;  %v28018_v12 = vld [vmem:[#allocation21_spill] sm:$0xff]  ;;  %v20876_v62 = vcombine.low %v2802_v39, %v2809_v49  ;;  %v10911_v6 = vrot.slane %v20350_v29, %v19962_v25  ;;  %v10918_v33 = vrot.slane %v20352_v46, %v19962_v25  ;;  %v1159_v35 = vsel %vm339_vm0, %v289_v1, 0.0  ;;  %v291_v46 = vld [vmem:[%s27461_s0 + $0x898] sm:$0xff] }
 0x21e   :  { %v2914_v58 = vrot.slane %v28018_v12, %v19918_v55  ;;  %v2921_v21 = vrot.slane %v28018_v12, %v19921_v47  ;;  %v2928_v27 = vrot.slane %v28018_v12, %v19930_v4  ;;  %v2935_v57 = vrot.slane %v28018_v12, %v19933_v38  ;;  %v28034_v1 = vld [vmem:[#allocation24_spill] sm:$0xff] }
 0x21f   :  { %28019 = vst [vmem:[#allocation20_spill] sm:$0xff] %v20876_v62  ;;  %1154 = vadd.xlane.f32.xlu1 %v1153_v34  ;;  %1151 = vadd.xlane.f32.xlu0 %v1150_v9  ;;  %v20882_v22 = vcombine.low %v2886_v37, %v2893_v63  ;;  %v20884_v24 = vcombine.low %v2816_v16, %v2823_v2  ;;  %v1156_v12 = vsel %vm339_vm0, %v288_v59, 0.0  ;;  %v290_v16 = vld [vmem:[%s27461_s0 + $0x890] sm:$0xff] }
 0x220   :  { %v20886_v44 = vpop.xlane.xlu1 %944  ;;  %v20890_v39 = vpop.xlane.xlu0 %941  ;;  %v20892_v49 = vcombine.low %v2900_v51, %v2907_v30  ;;  %v20894_v34 = vcombine.low %v2858_v0, %v2865_v42  ;;  %v20896_v29 = vcombine.low %v2872_v10, %v2879_v31  ;;  %v20904_v2 = vcombine.low %v10724_v26, %v10731_v36  ;;  %v28030_v0 = vld [vmem:[#allocation22_spill] sm:$0xff]  ;;  %v28033_v9 = vld [vmem:[#allocation23_spill] sm:$0xff] }
 0x221   :  { %28020 = vst [vmem:[#allocation21_spill] sm:$0xff] %v20884_v24  ;;  %28021 = vst [vmem:[#allocation211_spill] sm:$0xff] %v20886_v44  ;;  %v20906_v37 = vcombine.low %v2942_v13, %v2949_v53  ;;  %v20908_v63 = vcombine.low %v2956_v61, %v2963_v17  ;;  %v20910_v51 = vcombine.low %v2914_v58, %v2921_v21  ;;  %v1162_v21 = vsel %vm339_vm0, %v290_v16, 0.0  ;;  %v293_v61 = vld [vmem:[%s27461_s0 + $0x8a8] sm:$0xff]  ;;  %v292_v17 = vld [vmem:[%s27461_s0 + $0x8a0] sm:$0xff] }
 0x222   :  { %28022 = vst [vmem:[#allocation212_spill] sm:$0xff] %v20890_v39  ;;  %28023 = vst [vmem:[#allocation213_spill] sm:$0xff] %v20892_v49  ;;  %v20912_v30 = vcombine.low %v2928_v27, %v2935_v57  ;;  %v2998_v42 = vrot.slane %v28030_v0, %v19918_v55  ;;  %v3005_v10 = vrot.slane %v28030_v0, %v19921_v47  ;;  %v1165_v27 = vsel %vm339_vm0, %v291_v46, 0.0  ;;  %v28035_v16 = vld [vmem:[#allocation25_spill] sm:$0xff] }
 0x223   :  { %28024 = vst [vmem:[#allocation214_spill] sm:$0xff] %v20894_v34  ;;  %28025 = vst [vmem:[#allocation215_spill] sm:$0xff] %v20896_v29  ;;  %1160 = vadd.xlane.f32.xlu1 %v1159_v35  ;;  %1157 = vadd.xlane.f32.xlu0 %v1156_v12  ;;  %v20918_v31 = vcombine.low %v10911_v6, %v10918_v33  ;;  %v3012_v26 = vrot.slane %v28030_v0, %v19930_v4 }
 0x224   :  { %28026 = vst [vmem:[#allocation216_spill] sm:$0xff] %v20906_v37  ;;  %28027 = vst [vmem:[#allocation217_spill] sm:$0xff] %v20908_v63  ;;  %v3019_v13 = vrot.slane %v28030_v0, %v19933_v38  ;;  %v20924_v58 = vpop.xlane.xlu1 %950  ;;  %v20928_v36 = vpop.xlane.xlu0 %947  ;;  %v2970_v35 = vrot.slane %v28033_v9, %v19918_v55  ;;  %v2977_v33 = vrot.slane %v28033_v9, %v19921_v47 }
 0x225   :  { %28028 = vst [vmem:[#allocation218_spill] sm:$0xff] %v20910_v51  ;;  %28029 = vst [vmem:[#allocation219_spill] sm:$0xff] %v20912_v30  ;;  %v2984_v6 = vrot.slane %v28033_v9, %v19930_v4  ;;  %v2991_v53 = vrot.slane %v28033_v9, %v19933_v38  ;;  %v3054_v59 = vrot.slane %v28034_v1, %v19918_v55  ;;  %v1171_v30 = vsel %vm339_vm0, %v293_v61, 0.0 }
 0x226   :  { %28031 = vst [vmem:[#allocation22_spill] sm:$0xff] %v20924_v58  ;;  %28032 = vst [vmem:[#allocation220_spill] sm:$0xff] %v20928_v36  ;;  %v3061_v57 = vrot.slane %v28034_v1, %v19921_v47  ;;  %v3068_v12 = vrot.slane %v28034_v1, %v19930_v4  ;;  %v3075_v46 = vrot.slane %v28034_v1, %v19933_v38  ;;  %v1168_v1 = vsel %vm339_vm0, %v292_v17, 0.0 }
 0x227   :  { %v3026_v0 = vrot.slane %v28035_v16, %v19918_v55  ;;  %v3033_v9 = vrot.slane %v28035_v16, %v19921_v47  ;;  %1166 = vadd.xlane.f32.xlu1 %v1165_v27  ;;  %1163 = vadd.xlane.f32.xlu0 %v1162_v21  ;;  %v10758_v36 = vrot.slane %v20190_v54, %v19962_v25  ;;  %v295_v54 = vld [vmem:[%s27461_s0 + $0x8b8] sm:$0xff] }
 0x228   :  { %v20958_v58 = vcombine.low %v2998_v42, %v3005_v10  ;;  %v20960_v39 = vcombine.low %v3012_v26, %v3019_v13  ;;  %v20962_v44 = vpop.xlane.xlu1 %956  ;;  %v20966_v51 = vpop.xlane.xlu0 %953  ;;  %v20968_v29 = vcombine.low %v2970_v35, %v2977_v33  ;;  %v20970_v34 = vcombine.low %v2984_v6, %v2991_v53  ;;  %v294_v42 = vld [vmem:[%s27461_s0 + $0x8b0] sm:$0xff]  ;;  %v28042_v10 = vld [vmem:[#allocation148_spill] sm:$0xff]  ;;  %v28045_v6 = vld [vmem:[#allocation26_spill] sm:$0xff] }
 0x229   :  { %28038 = vst [vmem:[#allocation25_spill] sm:$0xff] %v20962_v44  ;;  %28039 = vst [vmem:[#allocation221_spill] sm:$0xff] %v20966_v51  ;;  %v10765_v26 = vrot.slane %v28042_v10, %v19962_v25  ;;  %v10945_v13 = vrot.slane %v20374_v41, %v19962_v25  ;;  %v20982_v27 = vcombine.low %v3054_v59, %v3061_v57  ;;  %v28049_v10 = vld [vmem:[#allocation27_spill] sm:$0xff] }
 0x22a   :  { %28036 = vst [vmem:[#allocation23_spill] sm:$0xff] %v20958_v58  ;;  %28037 = vst [vmem:[#allocation24_spill] sm:$0xff] %v20960_v39  ;;  %v20984_v21 = vcombine.low %v3068_v12, %v3075_v46  ;;  %v3040_v35 = vrot.slane %v28035_v16, %v19930_v4  ;;  %v3047_v33 = vrot.slane %v28035_v16, %v19933_v38  ;;  %v1177_v12 = vsel %vm339_vm0, %v295_v54, 0.0  ;;  %v297_v54 = vld [vmem:[%s27461_s0 + $0x8c8] sm:$0xff] }
 0x22b   :  { %28040 = vst [vmem:[#allocation222_spill] sm:$0xff] %v20968_v29  ;;  %28041 = vst [vmem:[#allocation223_spill] sm:$0xff] %v20970_v34  ;;  %v3110_v53 = vrot.slane %v28045_v6, %v19918_v55  ;;  %v3117_v61 = vrot.slane %v28045_v6, %v19921_v47  ;;  %v20994_v17 = vcombine.low %v3026_v0, %v3033_v9  ;;  %1172 = vadd.xlane.f32.xlu1 %v1171_v30 }
 0x22c   :  { %28043 = vst [vmem:[#allocation148_spill] sm:$0xff] %v20982_v27  ;;  %28044 = vst [vmem:[#allocation224_spill] sm:$0xff] %v20984_v21  ;;  %1169 = vadd.xlane.f32.xlu0 %v1168_v1  ;;  %v3124_v41 = vrot.slane %v28045_v6, %v19930_v4  ;;  %v3131_v59 = vrot.slane %v28045_v6, %v19933_v38  ;;  %v21000_v57 = vpop.xlane.xlu1 %962  ;;  %v1174_v46 = vsel %vm339_vm0, %v294_v42, 0.0  ;;  %v21004_v16 = vpop.xlane.xlu0 %959  ;;  %v296_v42 = vld [vmem:[%s27461_s0 + $0x8c0] sm:$0xff]  ;;  %v28050_v6 = vld [vmem:[#allocation28_spill] sm:$0xff]  ;;  %v1183_v21 = vsel %vm339_vm0, %v297_v54, 0.0 }
 0x22d   :  { %28046 = vst [vmem:[#allocation26_spill] sm:$0xff] %v20994_v17  ;;  %28047 = vst [vmem:[#allocation225_spill] sm:$0xff] %v21000_v57  ;;  %v3082_v0 = vrot.slane %v28049_v10, %v19918_v55  ;;  %v3089_v30 = vrot.slane %v28049_v10, %v19921_v47  ;;  %v3096_v9 = vrot.slane %v28049_v10, %v19930_v4  ;;  %v28051_v17 = vld [vmem:[#allocation29_spill] sm:$0xff]  ;;  %v1180_v27 = vsel %vm339_vm0, %v296_v42, 0.0 }
 0x22e   :  { %28048 = vst [vmem:[#allocation226_spill] sm:$0xff] %v21004_v16  ;;  %v3103_v1 = vrot.slane %v28049_v10, %v19933_v38  ;;  %v3166_v16 = vrot.slane %v28050_v6, %v19918_v55  ;;  %v3173_v57 = vrot.slane %v28050_v6, %v19921_v47  ;;  %v3180_v51 = vrot.slane %v28050_v6, %v19930_v4  ;;  %v300_v42 = vld [vmem:[%s27461_s0 + $0x8e0] sm:$0xff] }
 0x22f   :  { %v10952_v10 = vrot.slane %v20376_v60, %v19962_v25  ;;  %v3187_v44 = vrot.slane %v28050_v6, %v19933_v38  ;;  %v3138_v34 = vrot.slane %v28051_v17, %v19918_v55  ;;  %v3145_v29 = vrot.slane %v28051_v17, %v19921_v47  ;;  %1178 = vadd.xlane.f32.xlu1 %v1177_v12 }
 0x230   :  { %1175 = vadd.xlane.f32.xlu0 %v1174_v46  ;;  %v21034_v24 = vcombine.low %v3040_v35, %v3047_v33  ;;  %v21036_v62 = vpop.xlane.xlu1 %968  ;;  %v21040_v60 = vpop.xlane.xlu0 %965  ;;  %v21042_v39 = vcombine.low %v10758_v36, %v10765_v26  ;;  %v21044_v6 = vcombine.low %v3110_v53, %v3117_v61  ;;  %v21046_v58 = vcombine.low %v3124_v41, %v3131_v59  ;;  %v299_v35 = vld [vmem:[%s27461_s0 + $0x8d8] sm:$0xff]  ;;  %v298_v33 = vld [vmem:[%s27461_s0 + $0x8d0] sm:$0xff] }
 0x231   :  { %28053 = vst [vmem:[#allocation28_spill] sm:$0xff] %v21036_v62  ;;  %28054 = vst [vmem:[#allocation29_spill] sm:$0xff] %v21040_v60  ;;  %v21048_v63 = vcombine.low %v3082_v0, %v3089_v30  ;;  %v21050_v12 = vcombine.low %v3096_v9, %v3103_v1  ;;  %v3152_v36 = vrot.slane %v28051_v17, %v19930_v4  ;;  %v28059_v61 = vld [vmem:[#allocation152_spill] sm:$0xff]  ;;  %v28063_v30 = vld [vmem:[#allocation30_spill] sm:$0xff] }
 0x232   :  { %28052 = vst [vmem:[#allocation27_spill] sm:$0xff] %v21034_v24  ;;  %28055 = vst [vmem:[#allocation227_spill] sm:$0xff] %v21044_v6  ;;  %v3159_v26 = vrot.slane %v28051_v17, %v19933_v38  ;;  %v21062_v53 = vcombine.low %v10945_v13, %v10952_v10  ;;  %v10792_v41 = vrot.slane %v28059_v61, %v19962_v25  ;;  %v1189_v17 = vsel %vm339_vm0, %v299_v35, 0.0  ;;  %v28068_v10 = vld [vmem:[#allocation32_spill] sm:$0xff]  ;;  %v28069_v60 = vld [vmem:[#allocation33_spill] sm:$0xff] }
 0x233   :  { %28056 = vst [vmem:[#allocation228_spill] sm:$0xff] %v21046_v58  ;;  %28057 = vst [vmem:[#allocation229_spill] sm:$0xff] %v21048_v63  ;;  %v21066_v59 = vcombine.low %v3166_v16, %v3173_v57  ;;  %v21068_v46 = vcombine.low %v3180_v51, %v3187_v44  ;;  %v21070_v0 = vcombine.low %v3138_v34, %v3145_v29  ;;  %1184 = vadd.xlane.f32.xlu1 %v1183_v21  ;;  %v28066_v57 = vld [vmem:[#allocation153_spill] sm:$0xff]  ;;  %v28067_v51 = vld [vmem:[#allocation31_spill] sm:$0xff] }
 0x234   :  { %28058 = vst [vmem:[#allocation230_spill] sm:$0xff] %v21050_v12  ;;  %1181 = vadd.xlane.f32.xlu0 %v1180_v27  ;;  %v3222_v9 = vrot.slane %v28063_v30, %v19918_v55  ;;  %v21074_v1 = vpop.xlane.xlu1 %974  ;;  %v1186_v13 = vsel %vm339_vm0, %v298_v33, 0.0  ;;  %v21078_v54 = vpop.xlane.xlu0 %971  ;;  %v10799_v16 = vrot.slane %v28066_v57, %v19962_v25  ;;  %v3229_v44 = vrot.slane %v28063_v30, %v19921_v47  ;;  %v301_v21 = vld [vmem:[%s27461_s0 + $0x8e8] sm:$0xff] }
 0x235   :  { %28060 = vst [vmem:[#allocation152_spill] sm:$0xff] %v21066_v59  ;;  %28061 = vst [vmem:[#allocation231_spill] sm:$0xff] %v21068_v46  ;;  %v3236_v34 = vrot.slane %v28063_v30, %v19930_v4  ;;  %v3243_v29 = vrot.slane %v28063_v30, %v19933_v38  ;;  %v3194_v27 = vrot.slane %v28067_v51, %v19918_v55  ;;  %v1192_v63 = vsel %vm339_vm0, %v300_v42, 0.0 }
 0x236   :  { %28062 = vst [vmem:[#allocation232_spill] sm:$0xff] %v21070_v0  ;;  %28064 = vst [vmem:[#allocation30_spill] sm:$0xff] %v21074_v1  ;;  %v3278_v35 = vrot.slane %v28068_v10, %v19918_v55  ;;  %v3201_v33 = vrot.slane %v28067_v51, %v19921_v47  ;;  %v3208_v61 = vrot.slane %v28067_v51, %v19930_v4 }
 0x237   :  { %28065 = vst [vmem:[#allocation233_spill] sm:$0xff] %v21078_v54  ;;  %v3215_v30 = vrot.slane %v28067_v51, %v19933_v38  ;;  %v3285_v57 = vrot.slane %v28068_v10, %v19921_v47  ;;  %v3292_v54 = vrot.slane %v28068_v10, %v19930_v4  ;;  %v3299_v1 = vrot.slane %v28068_v10, %v19933_v38  ;;  %v302_v10 = vld [vmem:[%s27461_s0 + $0x8f0] sm:$0xff] }
 0x238   :  { %1190 = vadd.xlane.f32.xlu1 %v1189_v17  ;;  %1187 = vadd.xlane.f32.xlu0 %v1186_v13  ;;  %v3250_v62 = vrot.slane %v28069_v60, %v19918_v55  ;;  %v3257_v0 = vrot.slane %v28069_v60, %v19921_v47  ;;  %v21114_v12 = vpop.xlane.xlu1 %980  ;;  %v1195_v51 = vsel %vm339_vm0, %v301_v21, 0.0  ;;  %v21118_v24 = vpop.xlane.xlu0 %977  ;;  %v3264_v46 = vrot.slane %v28069_v60, %v19930_v4  ;;  %v303_v13 = vld [vmem:[%s27461_s0 + $0x8f8] sm:$0xff] }
 0x239   :  { %28070 = vst [vmem:[#allocation153_spill] sm:$0xff] %v21114_v12  ;;  %28071 = vst [vmem:[#allocation31_spill] sm:$0xff] %v21118_v24  ;;  %v3271_v17 = vrot.slane %v28069_v60, %v19933_v38  ;;  %v10979_v21 = vrot.slane %v20426_v28, %v19962_v25  ;;  %v10986_v42 = vrot.slane %v20428_v20, %v19962_v25 }
 0x23a   :  { %v21134_v24 = vcombine.low %v3222_v9, %v3229_v44  ;;  %v21136_v12 = vcombine.low %v3236_v34, %v3243_v29  ;;  %v21138_v59 = vcombine.low %v3152_v36, %v3159_v26  ;;  %v21140_v60 = vcombine.low %v3194_v27, %v3201_v33  ;;  %v28082_v44 = vld [vmem:[#allocation34_spill] sm:$0xff]  ;;  %v28084_v29 = vld [vmem:[#allocation35_spill] sm:$0xff]  ;;  %v28085_v27 = vld [vmem:[#allocation156_spill] sm:$0xff] }
 0x23b   :  { %v21142_v58 = vcombine.low %v3278_v35, %v3285_v57  ;;  %v21144_v6 = vcombine.low %v3208_v61, %v3215_v30  ;;  %v21146_v37 = vcombine.low %v10792_v41, %v10799_v16  ;;  %v21148_v28 = vcombine.low %v3292_v54, %v3299_v1  ;;  %v28086_v57 = vld [vmem:[#allocation36_spill] sm:$0xff] }
 0x23c   :  { %28072 = vst [vmem:[#allocation32_spill] sm:$0xff] %v21134_v24  ;;  %28073 = vst [vmem:[#allocation33_spill] sm:$0xff] %v21136_v12  ;;  %1196 = vadd.xlane.f32.xlu1 %v1195_v51  ;;  %1193 = vadd.xlane.f32.xlu0 %v1192_v63  ;;  %v21150_v49 = vcombine.low %v3250_v62, %v3257_v0  ;;  %v21152_v20 = vpop.xlane.xlu1 %986  ;;  %v1201_v9 = vsel %vm339_vm0, %v303_v13, 0.0  ;;  %v1198_v36 = vsel %vm339_vm0, %v302_v10, 0.0  ;;  %v21156_v26 = vpop.xlane.xlu0 %983  ;;  %v305_v62 = vld [vmem:[%s27461_s0 + $0x908] sm:$0xff]  ;;  %v304_v0 = vld [vmem:[%s27461_s0 + $0x900] sm:$0xff] }
 0x23d   :  { %28074 = vst [vmem:[#allocation234_spill] sm:$0xff] %v21138_v59  ;;  %28075 = vst [vmem:[#allocation235_spill] sm:$0xff] %v21140_v60  ;;  %v3334_v34 = vrot.slane %v28082_v44, %v19918_v55  ;;  %v3341_v63 = vrot.slane %v28082_v44, %v19921_v47  ;;  %v21162_v41 = vcombine.low %v3264_v46, %v3271_v17  ;;  %v1207_v10 = vsel %vm339_vm0, %v305_v62, 0.0  ;;  %v306_v62 = vld [vmem:[%s27461_s0 + $0x910] sm:$0xff] }
 0x23e   :  { %28076 = vst [vmem:[#allocation236_spill] sm:$0xff] %v21142_v58  ;;  %28077 = vst [vmem:[#allocation237_spill] sm:$0xff] %v21144_v6  ;;  %v21170_v1 = vcombine.low %v10979_v21, %v10986_v42  ;;  %v3348_v54 = vrot.slane %v28082_v44, %v19930_v4  ;;  %v3355_v16 = vrot.slane %v28082_v44, %v19933_v38  ;;  %v1204_v21 = vsel %vm339_vm0, %v304_v0, 0.0  ;;  %v28090_v0 = vld [vmem:[#allocation157_spill] sm:$0xff] }
 0x23f   :  { %28078 = vst [vmem:[#allocation238_spill] sm:$0xff] %v21148_v28  ;;  %28079 = vst [vmem:[#allocation239_spill] sm:$0xff] %v21150_v49  ;;  %v3306_v46 = vrot.slane %v28084_v29, %v19918_v55  ;;  %v10826_v35 = vrot.slane %v28085_v27, %v19962_v25  ;;  %v3313_v33 = vrot.slane %v28084_v29, %v19921_v47  ;;  %v1210_v60 = vsel %vm339_vm0, %v306_v62, 0.0  ;;  %v28102_v62 = vld [vmem:[#allocation39_spill] sm:$0xff] }
 0x240   :  { %28080 = vst [vmem:[#allocation240_spill] sm:$0xff] %v21152_v20  ;;  %28081 = vst [vmem:[#allocation241_spill] sm:$0xff] %v21156_v26  ;;  %v3320_v61 = vrot.slane %v28084_v29, %v19930_v4  ;;  %v3327_v30 = vrot.slane %v28084_v29, %v19933_v38  ;;  %1202 = vadd.xlane.f32.xlu1 %v1201_v9  ;;  %1199 = vadd.xlane.f32.xlu0 %v1198_v36  ;;  %v21190_v13 = vpop.xlane.xlu1 %992  ;;  %v21194_v42 = vpop.xlane.xlu0 %989  ;;  %v307_v29 = vld [vmem:[%s27461_s0 + $0x918] sm:$0xff] }
 0x241   :  { %28083 = vst [vmem:[#allocation34_spill] sm:$0xff] %v21162_v41  ;;  %v3390_v51 = vrot.slane %v28086_v57, %v19918_v55  ;;  %v3397_v17 = vrot.slane %v28086_v57, %v19921_v47  ;;  %28087 = vst [vmem:[#allocation35_spill] sm:$0xff] %v21190_v13  ;;  %v21196_v44 = vcombine.low %v3334_v34, %v3341_v63  ;;  %v28091_v34 = vld [vmem:[#allocation37_spill] sm:$0xff]  ;;  %v1213_v6 = vsel %vm339_vm0, %v307_v29, 0.0 }
 0x242   :  { %28088 = vst [vmem:[#allocation156_spill] sm:$0xff] %v21194_v42  ;;  %v3404_v9 = vrot.slane %v28086_v57, %v19930_v4  ;;  %v3411_v36 = vrot.slane %v28086_v57, %v19933_v38  ;;  %v10833_v27 = vrot.slane %v28090_v0, %v19962_v25  ;;  %v3362_v63 = vrot.slane %v28091_v34, %v19918_v55 }
 0x243   :  { %28089 = vst [vmem:[#allocation36_spill] sm:$0xff] %v21196_v44  ;;  %v3369_v42 = vrot.slane %v28091_v34, %v19921_v47  ;;  %v3376_v57 = vrot.slane %v28091_v34, %v19930_v4  ;;  %v3383_v13 = vrot.slane %v28091_v34, %v19933_v38  ;;  %v21218_v26 = vcombine.low %v3348_v54, %v3355_v16  ;;  %v28098_v16 = vld [vmem:[#allocation38_spill] sm:$0xff] }
 0x244   :  { %v21220_v20 = vcombine.low %v3306_v46, %v3313_v33  ;;  %v21222_v41 = vcombine.low %v3320_v61, %v3327_v30  ;;  %1208 = vadd.xlane.f32.xlu1 %v1207_v10  ;;  %1205 = vadd.xlane.f32.xlu0 %v1204_v21  ;;  %v21224_v0 = vcombine.low %v3390_v51, %v3397_v17  ;;  %v21226_v49 = vpop.xlane.xlu1 %998  ;;  %v21230_v59 = vpop.xlane.xlu0 %995  ;;  %v309_v51 = vld [vmem:[%s27461_s0 + $0x928] sm:$0xff] }
 0x245   :  { %28092 = vst [vmem:[#allocation157_spill] sm:$0xff] %v21218_v26  ;;  %28096 = vst [vmem:[#allocation244_spill] sm:$0xff] %v21226_v49  ;;  %v11013_v54 = vrot.slane %v20450_v43, %v19962_v25  ;;  %v3446_v46 = vrot.slane %v28098_v16, %v19918_v55  ;;  %v3453_v33 = vrot.slane %v28098_v16, %v19921_v47  ;;  %v308_v43 = vld [vmem:[%s27461_s0 + $0x920] sm:$0xff] }
 0x246   :  { %28093 = vst [vmem:[#allocation37_spill] sm:$0xff] %v21220_v20  ;;  %28094 = vst [vmem:[#allocation242_spill] sm:$0xff] %v21222_v41  ;;  %v3460_v61 = vrot.slane %v28098_v16, %v19930_v4  ;;  %v3467_v30 = vrot.slane %v28098_v16, %v19933_v38  ;;  %v21248_v17 = vcombine.low %v3404_v9, %v3411_v36  ;;  %v1216_v36 = vsel %vm339_vm0, %v308_v43, 0.0 }
 0x247   :  { %28095 = vst [vmem:[#allocation243_spill] sm:$0xff] %v21224_v0  ;;  %28097 = vst [vmem:[#allocation245_spill] sm:$0xff] %v21230_v59  ;;  %v21250_v10 = vcombine.low %v3362_v63, %v3369_v42  ;;  %v21252_v21 = vcombine.low %v3376_v57, %v3383_v13  ;;  %v21254_v29 = vcombine.low %v10826_v35, %v10833_v27  ;;  %v1219_v35 = vsel %vm339_vm0, %v309_v51, 0.0  ;;  %v310_v51 = vld [vmem:[%s27461_s0 + $0x930] sm:$0xff] }
 0x248   :  { %28099 = vst [vmem:[#allocation38_spill] sm:$0xff] %v21248_v17  ;;  %v3418_v34 = vrot.slane %v28102_v62, %v19918_v55  ;;  %v3425_v16 = vrot.slane %v28102_v62, %v19921_v47  ;;  %1214 = vadd.xlane.f32.xlu1 %v1213_v6  ;;  %1211 = vadd.xlane.f32.xlu0 %v1210_v60  ;;  %v21266_v42 = vpop.xlane.xlu1 %1004  ;;  %v21270_v27 = vpop.xlane.xlu0 %1001  ;;  %v1222_v41 = vsel %vm339_vm0, %v310_v51, 0.0  ;;  %v28118_v51 = vld [vmem:[#allocation161_spill] sm:$0xff] }
 0x249   :  { %28100 = vst [vmem:[#allocation246_spill] sm:$0xff] %v21250_v10  ;;  %28101 = vst [vmem:[#allocation247_spill] sm:$0xff] %v21252_v21  ;;  %v11020_v59 = vrot.slane %v20452_v23, %v19962_v25  ;;  %v3432_v9 = vrot.slane %v28102_v62, %v19930_v4  ;;  %v3439_v13 = vrot.slane %v28102_v62, %v19933_v38  ;;  %v28107_v23 = vld [vmem:[#allocation40_spill] sm:$0xff] }
 0x24a   :  { %28103 = vst [vmem:[#allocation39_spill] sm:$0xff] %v21266_v42  ;;  %28104 = vst [vmem:[#allocation248_spill] sm:$0xff] %v21270_v27  ;;  %v21272_v63 = vcombine.low %v3446_v46, %v3453_v33  ;;  %v21274_v6 = vcombine.low %v3460_v61, %v3467_v30  ;;  %v3502_v60 = vrot.slane %v28107_v23, %v19918_v55  ;;  %v311_v62 = vld [vmem:[%s27461_s0 + $0x938] sm:$0xff]  ;;  %v28108_v61 = vld [vmem:[#allocation41_spill] sm:$0xff] }
 0x24b   :  { %v3509_v57 = vrot.slane %v28107_v23, %v19921_v47  ;;  %v3516_v46 = vrot.slane %v28107_v23, %v19930_v4  ;;  %v3523_v33 = vrot.slane %v28107_v23, %v19933_v38  ;;  %v3474_v30 = vrot.slane %v28108_v61, %v19918_v55 }
 0x24c   :  { %28105 = vst [vmem:[#allocation249_spill] sm:$0xff] %v21272_v63  ;;  %28106 = vst [vmem:[#allocation250_spill] sm:$0xff] %v21274_v6  ;;  %v3481_v43 = vrot.slane %v28108_v61, %v19921_v47  ;;  %v21294_v27 = vcombine.low %v3418_v34, %v3425_v16  ;;  %v3488_v42 = vrot.slane %v28108_v61, %v19930_v4  ;;  %1220 = vadd.xlane.f32.xlu1 %v1219_v35  ;;  %v21302_v10 = vpop.xlane.xlu1 %1010  ;;  %v21306_v20 = vpop.xlane.xlu0 %1007  ;;  %v28114_v16 = vld [vmem:[#allocation42_spill] sm:$0xff] }
 0x24d   :  { %v3495_v49 = vrot.slane %v28108_v61, %v19933_v38  ;;  %1217 = vadd.xlane.f32.xlu0 %v1216_v36  ;;  %v21300_v21 = vcombine.low %v3432_v9, %v3439_v13  ;;  %28111 = vst [vmem:[#allocation251_spill] sm:$0xff] %v21302_v10  ;;  %v1225_v23 = vsel %vm339_vm0, %v311_v62, 0.0  ;;  %28112 = vst [vmem:[#allocation252_spill] sm:$0xff] %v21306_v20  ;;  %v313_v35 = vld [vmem:[%s27461_s0 + $0x948] sm:$0xff] }
 0x24e   :  { %28109 = vst [vmem:[#allocation40_spill] sm:$0xff] %v21294_v27  ;;  %v21308_v34 = vcombine.low %v11013_v54, %v11020_v59  ;;  %v3558_v27 = vrot.slane %v28114_v16, %v19918_v55  ;;  %v3565_v61 = vrot.slane %v28114_v16, %v19921_v47  ;;  %v3572_v9 = vrot.slane %v28114_v16, %v19930_v4  ;;  %v312_v59 = vld [vmem:[%s27461_s0 + $0x940] sm:$0xff] }
 0x24f   :  { %28110 = vst [vmem:[#allocation41_spill] sm:$0xff] %v21300_v21  ;;  %v3579_v13 = vrot.slane %v28114_v16, %v19933_v38  ;;  %v21324_v54 = vcombine.low %v3502_v60, %v3509_v57  ;;  %v21326_v36 = vcombine.low %v3516_v46, %v3523_v33  ;;  %v21328_v62 = vcombine.low %v3474_v30, %v3481_v43  ;;  %v28120_v60 = vld [vmem:[#allocation43_spill] sm:$0xff] }
 0x250   :  { %28113 = vst [vmem:[#allocation253_spill] sm:$0xff] %v21308_v34  ;;  %v10860_v20 = vrot.slane %v28118_v51, %v19962_v25  ;;  %v21332_v10 = vcombine.low %v3488_v42, %v3495_v49  ;;  %1226 = vadd.xlane.f32.xlu1 %v1225_v23  ;;  %v10867_v16 = vrot.slane %v20344_v52, %v19962_v25  ;;  %v21342_v33 = vpop.xlane.xlu1 %1016  ;;  %v1231_v30 = vsel %vm339_vm0, %v313_v35, 0.0  ;;  %v21346_v42 = vpop.xlane.xlu0 %1013  ;;  %v315_v23 = vld [vmem:[%s27461_s0 + $0x958] sm:$0xff]  ;;  %v314_v35 = vld [vmem:[%s27461_s0 + $0x950] sm:$0xff] }
 0x251   :  { %28115 = vst [vmem:[#allocation42_spill] sm:$0xff] %v21324_v54  ;;  %28116 = vst [vmem:[#allocation254_spill] sm:$0xff] %v21326_v36  ;;  %1223 = vadd.xlane.f32.xlu0 %v1222_v41  ;;  %v11047_v21 = vrot.slane %v20512_v15, %v19962_v25  ;;  %v3530_v57 = vrot.slane %v28120_v60, %v19918_v55  ;;  %v3537_v46 = vrot.slane %v28120_v60, %v19921_v47  ;;  %v28129_v36 = vld [vmem:[#allocation46_spill] sm:$0xff] }
 0x252   :  { %28117 = vst [vmem:[#allocation255_spill] sm:$0xff] %v21328_v62  ;;  %28119 = vst [vmem:[#allocation161_spill] sm:$0xff] %v21332_v10  ;;  %v1228_v49 = vsel %vm339_vm0, %v312_v59, 0.0  ;;  %v21348_v41 = vcombine.low %v3558_v27, %v3565_v61  ;;  %v21350_v52 = vcombine.low %v3572_v9, %v3579_v13  ;;  %v3544_v15 = vrot.slane %v28120_v60, %v19930_v4  ;;  %v28125_v59 = vld [vmem:[#allocation44_spill] sm:$0xff] }
 0x253   :  { %28121 = vst [vmem:[#allocation43_spill] sm:$0xff] %v21342_v33  ;;  %28122 = vst [vmem:[#allocation256_spill] sm:$0xff] %v21346_v42  ;;  %v3551_v43 = vrot.slane %v28120_v60, %v19933_v38  ;;  %v3614_v27 = vrot.slane %v28125_v59, %v19918_v55  ;;  %v3621_v61 = vrot.slane %v28125_v59, %v19921_v47  ;;  %v28126_v60 = vld [vmem:[#allocation45_spill] sm:$0xff] }
 0x254   :  { %28123 = vst [vmem:[#allocation257_spill] sm:$0xff] %v21348_v41  ;;  %28124 = vst [vmem:[#allocation258_spill] sm:$0xff] %v21350_v52  ;;  %v3628_v9 = vrot.slane %v28125_v59, %v19930_v4  ;;  %v11054_v13 = vrot.slane %v20514_v14, %v19962_v25  ;;  %v3635_v51 = vrot.slane %v28125_v59, %v19933_v38  ;;  %1232 = vadd.xlane.f32.xlu1 %v1231_v30  ;;  %v21380_v52 = vpop.xlane.xlu1 %1022  ;;  %v21384_v41 = vpop.xlane.xlu0 %1019 }
 0x255   :  { %v3586_v42 = vrot.slane %v28126_v60, %v19918_v55  ;;  %v3593_v33 = vrot.slane %v28126_v60, %v19921_v47  ;;  %1229 = vadd.xlane.f32.xlu0 %v1228_v49  ;;  %v3600_v10 = vrot.slane %v28126_v60, %v19930_v4  ;;  %v3607_v62 = vrot.slane %v28126_v60, %v19933_v38 }
 0x256   :  { %28127 = vst [vmem:[#allocation44_spill] sm:$0xff] %v21380_v52  ;;  %v1237_v14 = vsel %vm339_vm0, %v315_v23, 0.0  ;;  %v1234_v59 = vsel %vm339_vm0, %v314_v35, 0.0  ;;  %28128 = vst [vmem:[#allocation45_spill] sm:$0xff] %v21384_v41  ;;  %v3670_v54 = vrot.slane %v28129_v36, %v19918_v55  ;;  %v3677_v30 = vrot.slane %v28129_v36, %v19921_v47  ;;  %v317_v23 = vld [vmem:[%s27461_s0 + $0x968] sm:$0xff]  ;;  %v316_v35 = vld [vmem:[%s27461_s0 + $0x960] sm:$0xff] }
 0x257   :  { %v3684_v49 = vrot.slane %v28129_v36, %v19930_v4  ;;  %v3691_v60 = vrot.slane %v28129_v36, %v19933_v38  ;;  %v28130_v41 = vld [vmem:[#allocation47_spill] sm:$0xff]  ;;  %v21408_v17 = vcombine.low %v3530_v57, %v3537_v46  ;;  %v21410_v0 = vcombine.low %v3544_v15, %v3551_v43 }
 0x258   :  { %v3642_v52 = vrot.slane %v28130_v41, %v19918_v55  ;;  %v3649_v6 = vrot.slane %v28130_v41, %v19921_v47  ;;  %v3656_v63 = vrot.slane %v28130_v41, %v19930_v4  ;;  %v3663_v36 = vrot.slane %v28130_v41, %v19933_v38  ;;  %1238 = vadd.xlane.f32.xlu1 %v1237_v14  ;;  %v21418_v58 = vpop.xlane.xlu1 %1028  ;;  %v21422_v34 = vpop.xlane.xlu0 %1025  ;;  %v321_v14 = vld [vmem:[%s27461_s0 + $0x988] sm:$0xff] }
 0x259   :  { %28131 = vst [vmem:[#allocation46_spill] sm:$0xff] %v21408_v17  ;;  %28132 = vst [vmem:[#allocation47_spill] sm:$0xff] %v21410_v0  ;;  %1235 = vadd.xlane.f32.xlu0 %v1234_v59  ;;  %v21412_v26 = vcombine.low %v10860_v20, %v10867_v16  ;;  %v21414_v44 = vcombine.low %v3614_v27, %v3621_v61  ;;  %v21416_v28 = vcombine.low %v3628_v9, %v3635_v51  ;;  %v319_v20 = vld [vmem:[%s27461_s0 + $0x978] sm:$0xff]  ;;  %v318_v16 = vld [vmem:[%s27461_s0 + $0x970] sm:$0xff] }
 0x25a   :  { %28135 = vst [vmem:[#allocation261_spill] sm:$0xff] %v21418_v58  ;;  %v1243_v12 = vsel %vm339_vm0, %v317_v23, 0.0  ;;  %v1240_v24 = vsel %vm339_vm0, %v316_v35, 0.0  ;;  %28136 = vst [vmem:[#allocation262_spill] sm:$0xff] %v21422_v34  ;;  %v21424_v57 = vcombine.low %v3586_v42, %v3593_v33  ;;  %v21426_v46 = vcombine.low %v3600_v10, %v3607_v62  ;;  %v28143_v62 = vld [vmem:[#allocation48_spill] sm:$0xff]  ;;  %v320_v59 = vld [vmem:[%s27461_s0 + $0x980] sm:$0xff] }
 0x25b   :  { %28133 = vst [vmem:[#allocation259_spill] sm:$0xff] %v21414_v44  ;;  %28134 = vst [vmem:[#allocation260_spill] sm:$0xff] %v21416_v28  ;;  %v21434_v41 = vcombine.low %v11047_v21, %v11054_v13  ;;  %v10894_v15 = vrot.slane %v20360_v48, %v19962_v25  ;;  %v21438_v43 = vcombine.low %v3670_v54, %v3677_v30  ;;  %v28147_v30 = vld [vmem:[#allocation50_spill] sm:$0xff]  ;;  %v1255_v34 = vsel %vm339_vm0, %v321_v14, 0.0 }
 0x25c   :  { %28137 = vst [vmem:[#allocation263_spill] sm:$0xff] %v21424_v57  ;;  %28138 = vst [vmem:[#allocation264_spill] sm:$0xff] %v21426_v46  ;;  %v21440_v27 = vcombine.low %v3684_v49, %v3691_v60  ;;  %v21442_v33 = vcombine.low %v3642_v52, %v3649_v6  ;;  %v21444_v10 = vcombine.low %v3656_v63, %v3663_v36  ;;  %1244 = vadd.xlane.f32.xlu1 %v1243_v12  ;;  %v21456_v54 = vpop.xlane.xlu1 %1034  ;;  %v21460_v9 = vpop.xlane.xlu0 %1031  ;;  %v28146_v12 = vld [vmem:[#allocation49_spill] sm:$0xff]  ;;  %v28148_v36 = vld [vmem:[#allocation51_spill] sm:$0xff] }
 0x25d   :  { %28139 = vst [vmem:[#allocation265_spill] sm:$0xff] %v21438_v43  ;;  %v3726_v42 = vrot.slane %v28143_v62, %v19918_v55  ;;  %v3733_v61 = vrot.slane %v28143_v62, %v19921_v47  ;;  %1241 = vadd.xlane.f32.xlu0 %v1240_v24  ;;  %v10901_v21 = vrot.slane %v20362_v32, %v19962_v25  ;;  %28144 = vst [vmem:[#allocation48_spill] sm:$0xff] %v21456_v54  ;;  %v28318_v43 = vld [vmem:[#allocation195_spill] sm:$0xff] }
 0x25e   :  { %28140 = vst [vmem:[#allocation266_spill] sm:$0xff] %v21440_v27  ;;  %28141 = vst [vmem:[#allocation267_spill] sm:$0xff] %v21442_v33  ;;  %v3740_v48 = vrot.slane %v28143_v62, %v19930_v4  ;;  %v3747_v6 = vrot.slane %v28143_v62, %v19933_v38  ;;  %v1249_v63 = vsel %vm339_vm0, %v319_v20, 0.0  ;;  %v1246_v52 = vsel %vm339_vm0, %v318_v16, 0.0 }
 0x25f   :  { %28142 = vst [vmem:[#allocation268_spill] sm:$0xff] %v21444_v10  ;;  %28145 = vst [vmem:[#allocation269_spill] sm:$0xff] %v21460_v9  ;;  %v3698_v24 = vrot.slane %v28146_v12, %v19918_v55  ;;  %v3705_v32 = vrot.slane %v28146_v12, %v19921_v47  ;;  %v3712_v13 = vrot.slane %v28146_v12, %v19930_v4 }
 0x260   :  { %v3719_v51 = vrot.slane %v28146_v12, %v19933_v38  ;;  %v3782_v49 = vrot.slane %v28147_v30, %v19918_v55  ;;  %v3789_v60 = vrot.slane %v28147_v30, %v19921_v47  ;;  %v3796_v23 = vrot.slane %v28147_v30, %v19930_v4  ;;  %1250 = vadd.xlane.f32.xlu1 %v1249_v63  ;;  %v21494_v54 = vpop.xlane.xlu1 %1040  ;;  %v21498_v58 = vpop.xlane.xlu0 %1037 }
 0x261   :  { %v3803_v35 = vrot.slane %v28147_v30, %v19933_v38  ;;  %v3754_v20 = vrot.slane %v28148_v36, %v19918_v55  ;;  %v3761_v16 = vrot.slane %v28148_v36, %v19921_v47  ;;  %1247 = vadd.xlane.f32.xlu0 %v1246_v52  ;;  %v11081_v62 = vrot.slane %v20534_v8, %v19962_v25  ;;  %v323_v8 = vld [vmem:[%s27461_s0 + $0x998] sm:$0xff] }
 0x262   :  { %v21490_v12 = vcombine.low %v3726_v42, %v3733_v61  ;;  %v21492_v9 = vcombine.low %v3740_v48, %v3747_v6  ;;  %28151 = vst [vmem:[#allocation51_spill] sm:$0xff] %v21494_v54  ;;  %v1252_v30 = vsel %vm339_vm0, %v320_v59, 0.0  ;;  %28152 = vst [vmem:[#allocation270_spill] sm:$0xff] %v21498_v58  ;;  %v21500_v10 = vcombine.low %v3698_v24, %v3705_v32  ;;  %v322_v42 = vld [vmem:[%s27461_s0 + $0x990] sm:$0xff]  ;;  %v28157_v32 = vld [vmem:[#allocation52_spill] sm:$0xff] }
 0x263   :  { %v21502_v33 = vcombine.low %v3712_v13, %v3719_v51  ;;  %v21510_v61 = vcombine.low %v10894_v15, %v10901_v21  ;;  %v11088_v48 = vrot.slane %v20536_v50, %v19962_v25  ;;  %v21514_v6 = vcombine.low %v3782_v49, %v3789_v60  ;;  %v28164_v58 = vld [vmem:[#allocation55_spill] sm:$0xff] }
 0x264   :  { %28149 = vst [vmem:[#allocation49_spill] sm:$0xff] %v21490_v12  ;;  %28150 = vst [vmem:[#allocation50_spill] sm:$0xff] %v21492_v9  ;;  %v21516_v63 = vcombine.low %v3796_v23, %v3803_v35  ;;  %v3768_v52 = vrot.slane %v28148_v36, %v19930_v4  ;;  %v3775_v24 = vrot.slane %v28148_v36, %v19933_v38  ;;  %1256 = vadd.xlane.f32.xlu1 %v1255_v34  ;;  %v21532_v14 = vpop.xlane.xlu1 %1046  ;;  %v21536_v60 = vpop.xlane.xlu0 %1043  ;;  %v28161_v23 = vld [vmem:[#allocation53_spill] sm:$0xff] }
 0x265   :  { %28153 = vst [vmem:[#allocation271_spill] sm:$0xff] %v21500_v10  ;;  %28154 = vst [vmem:[#allocation272_spill] sm:$0xff] %v21502_v33  ;;  %v3838_v13 = vrot.slane %v28157_v32, %v19918_v55  ;;  %v3845_v15 = vrot.slane %v28157_v32, %v19921_v47  ;;  %v21526_v21 = vcombine.low %v3754_v20, %v3761_v16  ;;  %1253 = vadd.xlane.f32.xlu0 %v1252_v30  ;;  %v325_v16 = vld [vmem:[%s27461_s0 + $0x9a8] sm:$0xff]  ;;  %v324_v30 = vld [vmem:[%s27461_s0 + $0x9a0] sm:$0xff] }
 0x266   :  { %28155 = vst [vmem:[#allocation273_spill] sm:$0xff] %v21514_v6  ;;  %28156 = vst [vmem:[#allocation274_spill] sm:$0xff] %v21516_v63  ;;  %v3852_v50 = vrot.slane %v28157_v32, %v19930_v4  ;;  %v3859_v51 = vrot.slane %v28157_v32, %v19933_v38  ;;  %v1261_v59 = vsel %vm339_vm0, %v323_v8, 0.0  ;;  %v1258_v49 = vsel %vm339_vm0, %v322_v42, 0.0  ;;  %v28163_v42 = vld [vmem:[#allocation54_spill] sm:$0xff] }
 0x267   :  { %28158 = vst [vmem:[#allocation52_spill] sm:$0xff] %v21526_v21  ;;  %28159 = vst [vmem:[#allocation275_spill] sm:$0xff] %v21532_v14  ;;  %v3810_v35 = vrot.slane %v28161_v23, %v19918_v55  ;;  %v3817_v34 = vrot.slane %v28161_v23, %v19921_v47  ;;  %v3824_v36 = vrot.slane %v28161_v23, %v19930_v4 }
 0x268   :  { %28160 = vst [vmem:[#allocation276_spill] sm:$0xff] %v21536_v60  ;;  %v3831_v20 = vrot.slane %v28161_v23, %v19933_v38  ;;  %v21552_v8 = vcombine.low %v3768_v52, %v3775_v24  ;;  %v3894_v32 = vrot.slane %v28163_v42, %v19918_v55  ;;  %v3901_v60 = vrot.slane %v28163_v42, %v19921_v47  ;;  %v21566_v52 = vpop.xlane.xlu1 %1052  ;;  %v21570_v33 = vpop.xlane.xlu0 %1049 }
 0x269   :  { %v3908_v14 = vrot.slane %v28163_v42, %v19930_v4  ;;  %v3915_v23 = vrot.slane %v28163_v42, %v19933_v38  ;;  %v3866_v54 = vrot.slane %v28164_v58, %v19918_v55  ;;  %v3873_v21 = vrot.slane %v28164_v58, %v19921_v47  ;;  %1262 = vadd.xlane.f32.xlu1 %v1261_v59 }
 0x26a   :  { %28162 = vst [vmem:[#allocation53_spill] sm:$0xff] %v21552_v8  ;;  %1259 = vadd.xlane.f32.xlu0 %v1258_v49  ;;  %28165 = vst [vmem:[#allocation54_spill] sm:$0xff] %v21566_v52  ;;  %v1267_v24 = vsel %vm339_vm0, %v325_v16, 0.0  ;;  %v1264_v8 = vsel %vm339_vm0, %v324_v30, 0.0  ;;  %v21572_v10 = vcombine.low %v11081_v62, %v11088_v48  ;;  %v10928_v42 = vrot.slane %v20378_v5, %v19962_v25  ;;  %v327_v49 = vld [vmem:[%s27461_s0 + $0x9b8] sm:$0xff]  ;;  %v326_v62 = vld [vmem:[%s27461_s0 + $0x9b0] sm:$0xff] }
 0x26b   :  { %28166 = vst [vmem:[#allocation55_spill] sm:$0xff] %v21570_v33  ;;  %v21576_v46 = vcombine.low %v3838_v13, %v3845_v15  ;;  %v21578_v57 = vcombine.low %v3852_v50, %v3859_v51  ;;  %v21580_v0 = vcombine.low %v3810_v35, %v3817_v34  ;;  %v21582_v59 = vcombine.low %v3824_v36, %v3831_v20  ;;  %v28174_v34 = vld [vmem:[#allocation56_spill] sm:$0xff]  ;;  %v28179_v33 = vld [vmem:[#allocation59_spill] sm:$0xff] }
 0x26c   :  { %v3880_v48 = vrot.slane %v28164_v58, %v19930_v4  ;;  %v3887_v5 = vrot.slane %v28164_v58, %v19933_v38  ;;  %v10935_v13 = vrot.slane %v20380_v18, %v19962_v25  ;;  %v11115_v15 = vrot.slane %v20588_v56, %v19962_v25  ;;  %v21606_v20 = vpop.xlane.xlu1 %1058  ;;  %v21610_v16 = vpop.xlane.xlu0 %1055 }
 0x26d   :  { %28167 = vst [vmem:[#allocation277_spill] sm:$0xff] %v21576_v46  ;;  %28168 = vst [vmem:[#allocation278_spill] sm:$0xff] %v21578_v57  ;;  %v21598_v50 = vcombine.low %v3894_v32, %v3901_v60  ;;  %v21600_v51 = vcombine.low %v3908_v14, %v3915_v23  ;;  %v21602_v35 = vcombine.low %v3866_v54, %v3873_v21  ;;  %1268 = vadd.xlane.f32.xlu1 %v1267_v24  ;;  %v28177_v60 = vld [vmem:[#allocation57_spill] sm:$0xff]  ;;  %v28178_v32 = vld [vmem:[#allocation58_spill] sm:$0xff] }
 0x26e   :  { %28169 = vst [vmem:[#allocation279_spill] sm:$0xff] %v21580_v0  ;;  %28170 = vst [vmem:[#allocation280_spill] sm:$0xff] %v21582_v59  ;;  %1265 = vadd.xlane.f32.xlu0 %v1264_v8  ;;  %v3950_v36 = vrot.slane %v28174_v34, %v19918_v55  ;;  %v1273_v58 = vsel %vm339_vm0, %v327_v49, 0.0  ;;  %v1270_v18 = vsel %vm339_vm0, %v326_v62, 0.0  ;;  %v11122_v56 = vrot.slane %v20590_v3, %v19962_v25  ;;  %v329_v8 = vld [vmem:[%s27461_s0 + $0x9c8] sm:$0xff]  ;;  %v328_v3 = vld [vmem:[%s27461_s0 + $0x9c0] sm:$0xff] }
 0x26f   :  { %28171 = vst [vmem:[#allocation281_spill] sm:$0xff] %v21598_v50  ;;  %28172 = vst [vmem:[#allocation282_spill] sm:$0xff] %v21600_v51  ;;  %v3957_v54 = vrot.slane %v28174_v34, %v19921_v47  ;;  %v3964_v21 = vrot.slane %v28174_v34, %v19930_v4  ;;  %v3971_v14 = vrot.slane %v28174_v34, %v19933_v38  ;;  %v1276_v0 = vsel %vm339_vm0, %v328_v3, 0.0 }
 0x270   :  { %28173 = vst [vmem:[#allocation283_spill] sm:$0xff] %v21602_v35  ;;  %28175 = vst [vmem:[#allocation56_spill] sm:$0xff] %v21606_v20  ;;  %v3922_v30 = vrot.slane %v28177_v60, %v19918_v55  ;;  %v4006_v23 = vrot.slane %v28178_v32, %v19918_v55  ;;  %v3929_v24 = vrot.slane %v28177_v60, %v19921_v47  ;;  %v21646_v59 = vpop.xlane.xlu1 %1064  ;;  %v21650_v51 = vpop.xlane.xlu0 %1061 }
 0x271   :  { %28176 = vst [vmem:[#allocation284_spill] sm:$0xff] %v21610_v16  ;;  %v3936_v49 = vrot.slane %v28177_v60, %v19930_v4  ;;  %v3943_v62 = vrot.slane %v28177_v60, %v19933_v38  ;;  %v4013_v34 = vrot.slane %v28178_v32, %v19921_v47  ;;  %v4020_v16 = vrot.slane %v28178_v32, %v19930_v4 }
 0x272   :  { %v4027_v20 = vrot.slane %v28178_v32, %v19933_v38  ;;  %1274 = vadd.xlane.f32.xlu1 %v1273_v58  ;;  %1271 = vadd.xlane.f32.xlu0 %v1270_v18  ;;  %v3978_v52 = vrot.slane %v28179_v33, %v19918_v55  ;;  %v3985_v35 = vrot.slane %v28179_v33, %v19921_v47  ;;  %v1279_v60 = vsel %vm339_vm0, %v329_v8, 0.0  ;;  %v331_v32 = vld [vmem:[%s27461_s0 + $0x9d8] sm:$0xff]  ;;  %v330_v8 = vld [vmem:[%s27461_s0 + $0x9d0] sm:$0xff] }
 0x273   :  { %28180 = vst [vmem:[#allocation57_spill] sm:$0xff] %v21646_v59  ;;  %28181 = vst [vmem:[#allocation58_spill] sm:$0xff] %v21650_v51  ;;  %v21652_v50 = vcombine.low %v3880_v48, %v3887_v5  ;;  %v3992_v58 = vrot.slane %v28179_v33, %v19930_v4  ;;  %v3999_v18 = vrot.slane %v28179_v33, %v19933_v38 }
 0x274   :  { %v21664_v59 = vcombine.low %v10928_v42, %v10935_v13  ;;  %v21666_v3 = vcombine.low %v3950_v36, %v3957_v54  ;;  %v21668_v48 = vcombine.low %v3964_v21, %v3971_v14  ;;  %v21670_v5 = vcombine.low %v3922_v30, %v3929_v24  ;;  %v21684_v13 = vpop.xlane.xlu1 %1070  ;;  %v21688_v21 = vpop.xlane.xlu0 %1067  ;;  %v28192_v14 = vld [vmem:[#allocation60_spill] sm:$0xff] }
 0x275   :  { %28182 = vst [vmem:[#allocation59_spill] sm:$0xff] %v21652_v50  ;;  %v21672_v51 = vcombine.low %v3936_v49, %v3943_v62  ;;  %v21674_v50 = vcombine.low %v4006_v23, %v4013_v34  ;;  %v21676_v33 = vcombine.low %v11115_v15, %v11122_v56  ;;  %v10962_v57 = vrot.slane %v20436_v7, %v19962_v25  ;;  %v333_v7 = vld [vmem:[%s27461_s0 + $0x9e8] sm:$0xff]  ;;  %v28194_v23 = vld [vmem:[#allocation61_spill] sm:$0xff] }
 0x276   :  { %28183 = vst [vmem:[#allocation285_spill] sm:$0xff] %v21666_v3  ;;  %28184 = vst [vmem:[#allocation286_spill] sm:$0xff] %v21668_v48  ;;  %1280 = vadd.xlane.f32.xlu1 %v1279_v60  ;;  %1277 = vadd.xlane.f32.xlu0 %v1276_v0  ;;  %v21680_v46 = vcombine.low %v4020_v16, %v4027_v20  ;;  %v21682_v42 = vcombine.low %v3978_v52, %v3985_v35  ;;  %v1285_v36 = vsel %vm339_vm0, %v331_v32, 0.0  ;;  %v332_v52 = vld [vmem:[%s27461_s0 + $0x9e0] sm:$0xff]  ;;  %v28195_v62 = vld [vmem:[#allocation62_spill] sm:$0xff] }
 0x277   :  { %28185 = vst [vmem:[#allocation287_spill] sm:$0xff] %v21670_v5  ;;  %28186 = vst [vmem:[#allocation288_spill] sm:$0xff] %v21672_v51  ;;  %v1282_v54 = vsel %vm339_vm0, %v330_v8, 0.0  ;;  %v4062_v0 = vrot.slane %v28192_v14, %v19918_v55  ;;  %v21692_v15 = vcombine.low %v3992_v58, %v3999_v18  ;;  %v10969_v35 = vrot.slane %v20438_v45, %v19962_v25 }
 0x278   :  { %28187 = vst [vmem:[#allocation289_spill] sm:$0xff] %v21674_v50  ;;  %28188 = vst [vmem:[#allocation290_spill] sm:$0xff] %v21680_v46  ;;  %v11149_v20 = vrot.slane %v20610_v40, %v19962_v25  ;;  %v4069_v16 = vrot.slane %v28192_v14, %v19921_v47  ;;  %v4076_v56 = vrot.slane %v28192_v14, %v19930_v4  ;;  %v21722_v58 = vpop.xlane.xlu1 %1076  ;;  %v1291_v18 = vsel %vm339_vm0, %v333_v7, 0.0  ;;  %v21726_v8 = vpop.xlane.xlu0 %1073  ;;  %v335_v7 = vld [vmem:[%s27461_s0 + $0x9f8] sm:$0xff]  ;;  %v28224_v50 = vld [vmem:[#allocation193_spill] sm:$0xff] }
 0x279   :  { %28189 = vst [vmem:[#allocation291_spill] sm:$0xff] %v21682_v42  ;;  %28190 = vst [vmem:[#allocation292_spill] sm:$0xff] %v21684_v13  ;;  %v4083_v30 = vrot.slane %v28192_v14, %v19933_v38  ;;  %v4034_v24 = vrot.slane %v28194_v23, %v19918_v55  ;;  %v4041_v49 = vrot.slane %v28194_v23, %v19921_v47  ;;  %v1288_v32 = vsel %vm339_vm0, %v332_v52, 0.0  ;;  %v334_v52 = vld [vmem:[%s27461_s0 + $0x9f0] sm:$0xff]  ;;  %s18721_s0 = smov [#allocation3]  }
 0x27a   :  { %28191 = vst [vmem:[#allocation293_spill] sm:$0xff] %v21688_v21  ;;  %28193 = vst [vmem:[#allocation60_spill] sm:$0xff] %v21692_v15  ;;  %v4048_v45 = vrot.slane %v28194_v23, %v19930_v4  ;;  %v4055_v40 = vrot.slane %v28194_v23, %v19933_v38  ;;  %1286 = vadd.xlane.f32.xlu1 %v1285_v36  ;;  %1283 = vadd.xlane.f32.xlu0 %v1282_v54  ;;  %v28198_v54 = vld [vmem:[#allocation63_spill] sm:$0xff]  ;;  %s18672_s8 = sshll.u32 %s18721_s0, 4  ;;  %s18673_s8 = int_to_ptr.vmem [resolvable:$true] %s18672_s8 }
 0x27b   :  { %v4118_v34 = vrot.slane %v28195_v62, %v19918_v55  ;;  %v4125_v60 = vrot.slane %v28195_v62, %v19921_v47  ;;  %28196 = vst [vmem:[#allocation61_spill] sm:$0xff] %v21722_v58  ;;  %28197 = vst [vmem:[#allocation62_spill] sm:$0xff] %v21726_v8  ;;  %v4132_v14 = vrot.slane %v28195_v62, %v19930_v4  ;;  %s18690_s9 = scalar_lea.vmem %s18673_s8, 320  ;;  %p18695_p1 = scmp.lt.s32.totalorder %s18673_s8, %s18673_s8 }
 0x27c   :  { %v4139_v36 = vrot.slane %v28195_v62, %v19933_v38  ;;  %v4090_v23 = vrot.slane %v28198_v54, %v19918_v55  ;;  %v4097_v21 = vrot.slane %v28198_v54, %v19921_v47  ;;  %v21742_v8 = vcombine.low %v4062_v0, %v4069_v16  ;;  %v28203_v0 = vld [vmem:[#allocation64_spill] sm:$0xff]  ;;  %p18691_p0 = scmp.ne.s32.totalorder %s18673_s8, %s18690_s9  ;;  %p18696_p2 = scmp.lt.s32.totalorder %s18690_s9, %s18690_s9 }
 0x27d   :  { %v4104_v58 = vrot.slane %v28198_v54, %v19930_v4  ;;  %v4111_v62 = vrot.slane %v28198_v54, %v19933_v38  ;;  %v11156_v13 = vrot.slane %v20616_v11, %v19962_v25  ;;  %v21750_v15 = vcombine.low %v4076_v56, %v4083_v30  ;;  %v21764_v56 = vpop.xlane.xlu0 %1079 }
 0x27e   :  { %28199 = vst [vmem:[#allocation63_spill] sm:$0xff] %v21742_v8  ;;  %v21752_v42 = vcombine.low %v4034_v24, %v4041_v49  ;;  %v21754_v51 = vcombine.low %v4048_v45, %v4055_v40  ;;  %1292 = vadd.xlane.f32.xlu1 %v1291_v18  ;;  %1289 = vadd.xlane.f32.xlu0 %v1288_v32  ;;  %v21760_v8 = vpop.xlane.xlu1 %1082  ;;  %v1297_v54 = vsel %vm339_vm0, %v335_v7, 0.0  ;;  %v1294_v11 = vsel %vm339_vm0, %v334_v52, 0.0  ;;  %p18697_p3 = por %p18696_p2, %p18695_p1 }
 0x27f   :  { %28200 = vst [vmem:[#allocation294_spill] sm:$0xff] %v21750_v15  ;;  %v4174_v16 = vrot.slane %v28203_v0, %v19918_v55  ;;  %v4181_v5 = vrot.slane %v28203_v0, %v19921_v47  ;;  %28204 = vst [vmem:[#allocation64_spill] sm:$0xff] %v21760_v8  ;;  %v21766_v30 = vcombine.low %v4118_v34, %v4125_v60  ;;  %v28210_v60 = vld [vmem:[#allocation65_spill] sm:$0xff]  ;;  %vm18592_vm0 = vcmask 1041409  }
 0x280   :  { %28201 = vst [vmem:[#allocation295_spill] sm:$0xff] %v21752_v42  ;;  %28202 = vst [vmem:[#allocation296_spill] sm:$0xff] %v21754_v51  ;;  %v21768_v24 = vcombine.low %v4132_v14, %v4139_v36  ;;  %v21770_v49 = vcombine.low %v4090_v23, %v4097_v21  ;;  %v21772_v45 = vcombine.low %v10962_v57, %v10969_v35  ;;  %v28215_v23 = vld [vmem:[#allocation66_spill] sm:$0xff]  ;;  %p18698_p4 = pnand %p18697_p3, %p18691_p0 }
 0x281   :  { %28205 = vst [vmem:[#allocation297_spill] sm:$0xff] %v21764_v56  ;;  %28206 = vst [vmem:[#allocation298_spill] sm:$0xff] %v21766_v30  ;;  %v4188_v40 = vrot.slane %v28203_v0, %v19930_v4  ;;  %v21776_v18 = vcombine.low %v4104_v58, %v4111_v62  ;;  %v21778_v32 = vcombine.low %v11149_v20, %v11156_v13  ;;  %v21796_v20 = vpop.xlane.xlu0 %1085  ;;  %v28214_v58 = vld [vmem:[#allocation177_spill] sm:$0xff] }
 0x282   :  { %28207 = vst [vmem:[#allocation299_spill] sm:$0xff] %v21768_v24  ;;  %28208 = vst [vmem:[#allocation300_spill] sm:$0xff] %v21770_v49  ;;  %v10996_v7 = vrot.slane %v20460_v19, %v19962_v25  ;;  %v4195_v34 = vrot.slane %v28203_v0, %v19933_v38  ;;  %v4146_v14 = vrot.slane %v28210_v60, %v19918_v55  ;;  %1298 = vadd.xlane.f32.xlu1 %v1297_v54  ;;  %v21794_v19 = vpop.xlane.xlu1 %1088 }
 0x283   :  { %28209 = vst [vmem:[#allocation301_spill] sm:$0xff] %v21776_v18  ;;  %v4153_v57 = vrot.slane %v28210_v60, %v19921_v47  ;;  %1295 = vadd.xlane.f32.xlu0 %v1294_v11  ;;  %v21788_v21 = vcombine.low %v4174_v16, %v4181_v5  ;;  %v4160_v13 = vrot.slane %v28210_v60, %v19930_v4  ;;  %28212 = vst [vmem:[#allocation302_spill] sm:$0xff] %v21794_v19  ;;  %v28216_v16 = vld [vmem:[#allocation67_spill] sm:$0xff]  ;;  %v28218_v18 = vld [vmem:[#allocation69_spill] sm:$0xff] }
 0x284   :  { %v4167_v35 = vrot.slane %v28210_v60, %v19933_v38  ;;  %28213 = vst [vmem:[#allocation303_spill] sm:$0xff] %v21796_v20  ;;  %v11003_v36 = vrot.slane %v28214_v58, %v19962_v25  ;;  %v4230_v52 = vrot.slane %v28215_v23, %v19918_v55  ;;  %v4237_v5 = vrot.slane %v28215_v23, %v19921_v47  ;;  %v28217_v20 = vld [vmem:[#allocation68_spill] sm:$0xff] }
 0x285   :  { %28211 = vst [vmem:[#allocation65_spill] sm:$0xff] %v21788_v21  ;;  %v4244_v62 = vrot.slane %v28215_v23, %v19930_v4  ;;  %v4251_v0 = vrot.slane %v28215_v23, %v19933_v38  ;;  %v4202_v54 = vrot.slane %v28216_v16, %v19918_v55  ;;  %v4209_v11 = vrot.slane %v28216_v16, %v19921_v47  ;;  %v21834_v24 = vpop.xlane.xlu0 %1091 }
 0x286   :  { %v4216_v60 = vrot.slane %v28216_v16, %v19930_v4  ;;  %v4223_v58 = vrot.slane %v28216_v16, %v19933_v38  ;;  %v4286_v19 = vrot.slane %v28217_v20, %v19918_v55  ;;  %v4293_v56 = vrot.slane %v28217_v20, %v19921_v47  ;;  %v21832_v21 = vpop.xlane.xlu1 %1094  ;;  %28220 = vst [vmem:[#allocation66_spill] sm:$0xff] %v21834_v24  ;;  %v28246_v24 = vld [vmem:[#allocation139_spill] sm:$0xff] }
 0x287   :  { %v4300_v23 = vrot.slane %v28217_v20, %v19930_v4  ;;  %v4307_v8 = vrot.slane %v28217_v20, %v19933_v38  ;;  %v4258_v49 = vrot.slane %v28218_v18, %v19918_v55  ;;  %v4265_v51 = vrot.slane %v28218_v18, %v19921_v47  ;;  %28219 = vst [vmem:[#allocation177_spill] sm:$0xff] %v21832_v21  ;;  %v28223_v20 = vld [vmem:[#allocation192_spill] sm:$0xff] }
 0x288   :  { %v4272_v16 = vrot.slane %v28218_v18, %v19930_v4  ;;  %v4279_v42 = vrot.slane %v28218_v18, %v19933_v38  ;;  %v21836_v30 = vcombine.low %v4188_v40, %v4195_v34  ;;  %v21838_v15 = vcombine.low %v4146_v14, %v4153_v57  ;;  %v28230_v40 = vld [vmem:[#allocation70_spill] sm:$0xff] }
 0x289   :  { %v11183_v46 = vrot.slane %v28223_v20, %v19962_v25  ;;  %v11190_v48 = vrot.slane %v28224_v50, %v19962_v25  ;;  %v21844_v3 = vcombine.low %v4230_v52, %v4237_v5  ;;  %v21846_v17 = vcombine.low %v4244_v62, %v4251_v0  ;;  %v21870_v5 = vpop.xlane.xlu0 %1097 }
 0x28a   :  { %28221 = vst [vmem:[#allocation67_spill] sm:$0xff] %v21836_v30  ;;  %28222 = vst [vmem:[#allocation68_spill] sm:$0xff] %v21838_v15  ;;  %v21848_v63 = vcombine.low %v4160_v13, %v4167_v35  ;;  %v21850_v18 = vcombine.low %v4202_v54, %v4209_v11  ;;  %v21852_v21 = vcombine.low %v4216_v60, %v4223_v58  ;;  %v21868_v35 = vpop.xlane.xlu1 %1100  ;;  %v28241_v11 = vld [vmem:[#allocation179_spill] sm:$0xff]  ;;  %v28242_v58 = vld [vmem:[#allocation196_spill] sm:$0xff] }
 0x28b   :  { %28225 = vst [vmem:[#allocation69_spill] sm:$0xff] %v21844_v3  ;;  %28226 = vst [vmem:[#allocation192_spill] sm:$0xff] %v21846_v17  ;;  %v4342_v34 = vrot.slane %v28230_v40, %v19918_v55  ;;  %v4349_v14 = vrot.slane %v28230_v40, %v19921_v47  ;;  %v21858_v57 = vcombine.low %v10996_v7, %v11003_v36  ;;  %v28254_v3 = vld [vmem:[#allocation141_spill] sm:$0xff] }
 0x28c   :  { %28227 = vst [vmem:[#allocation193_spill] sm:$0xff] %v21848_v63  ;;  %28228 = vst [vmem:[#allocation304_spill] sm:$0xff] %v21850_v18  ;;  %v21860_v20 = vcombine.low %v4286_v19, %v4293_v56  ;;  %v21862_v50 = vcombine.low %v4300_v23, %v4307_v8  ;;  %v21864_v52 = vcombine.low %v4258_v49, %v4265_v51  ;;  %v28237_v56 = vld [vmem:[#allocation178_spill] sm:$0xff]  ;;  %v28238_v51 = vld [vmem:[#allocation71_spill] sm:$0xff] }
 0x28d   :  { %28229 = vst [vmem:[#allocation305_spill] sm:$0xff] %v21852_v21  ;;  %v21866_v13 = vcombine.low %v4272_v16, %v4279_v42  ;;  %28235 = vst [vmem:[#allocation309_spill] sm:$0xff] %v21868_v35  ;;  %v4356_v62 = vrot.slane %v28230_v40, %v19930_v4  ;;  %v4363_v0 = vrot.slane %v28230_v40, %v19933_v38  ;;  %v28248_v18 = vld [vmem:[#allocation75_spill] sm:$0xff] }
 0x28e   :  { %28231 = vst [vmem:[#allocation70_spill] sm:$0xff] %v21860_v20  ;;  %28232 = vst [vmem:[#allocation306_spill] sm:$0xff] %v21862_v50  ;;  %v21876_v7 = vcombine.low %v11183_v46, %v11190_v48  ;;  %v11030_v8 = vrot.slane %v28237_v56, %v19962_v25  ;;  %v4314_v49 = vrot.slane %v28238_v51, %v19918_v55  ;;  %v28240_v46 = vld [vmem:[#allocation72_spill] sm:$0xff] }
 0x28f   :  { %28233 = vst [vmem:[#allocation307_spill] sm:$0xff] %v21864_v52  ;;  %28234 = vst [vmem:[#allocation308_spill] sm:$0xff] %v21866_v13  ;;  %v4321_v42 = vrot.slane %v28238_v51, %v19921_v47  ;;  %v4328_v19 = vrot.slane %v28238_v51, %v19930_v4  ;;  %v4335_v36 = vrot.slane %v28238_v51, %v19933_v38  ;;  %v21904_v51 = vpop.xlane.xlu1 %1106 }
 0x290   :  { %28236 = vst [vmem:[#allocation310_spill] sm:$0xff] %v21870_v5  ;;  %v21888_v54 = vcombine.low %v4342_v34, %v4349_v14  ;;  %v4398_v48 = vrot.slane %v28240_v46, %v19918_v55  ;;  %v11037_v60 = vrot.slane %v28241_v11, %v19962_v25  ;;  %v11217_v23 = vrot.slane %v28242_v58, %v19962_v25  ;;  %v28243_v34 = vld [vmem:[#allocation73_spill] sm:$0xff]  ;;  %v21906_v5 = vpop.xlane.xlu0 %1103 }
 0x291   :  { %v4405_v16 = vrot.slane %v28240_v46, %v19921_v47  ;;  %v4412_v40 = vrot.slane %v28240_v46, %v19930_v4  ;;  %v4419_v56 = vrot.slane %v28240_v46, %v19933_v38  ;;  %v4370_v14 = vrot.slane %v28243_v34, %v19918_v55  ;;  %28244 = vst [vmem:[#allocation71_spill] sm:$0xff] %v21904_v51  ;;  %v28247_v46 = vld [vmem:[#allocation74_spill] sm:$0xff] }
 0x292   :  { %28239 = vst [vmem:[#allocation178_spill] sm:$0xff] %v21888_v54  ;;  %28245 = vst [vmem:[#allocation72_spill] sm:$0xff] %v21906_v5  ;;  %v4377_v11 = vrot.slane %v28243_v34, %v19921_v47  ;;  %v4384_v58 = vrot.slane %v28243_v34, %v19930_v4  ;;  %v4391_v35 = vrot.slane %v28243_v34, %v19933_v38 }
 0x293   :  { %v11224_v13 = vrot.slane %v28246_v24, %v19962_v25  ;;  %v4454_v52 = vrot.slane %v28247_v46, %v19918_v55  ;;  %v4461_v51 = vrot.slane %v28247_v46, %v19921_v47  ;;  %v4468_v5 = vrot.slane %v28247_v46, %v19930_v4  ;;  %16024 = vperm.xlu1 %18689, %v28254_v3  }
 0x294   :  { %v4475_v21 = vrot.slane %v28247_v46, %v19933_v38  ;;  %v4426_v63 = vrot.slane %v28248_v18, %v19918_v55  ;;  %v4433_v34 = vrot.slane %v28248_v18, %v19921_v47  ;;  %v4440_v24 = vrot.slane %v28248_v18, %v19930_v4  ;;  %v21940_v46 = vpop.xlane.xlu1 %1112  ;;  %v21943_v30 = vpop.xlane.xlu0 %1109 }
 0x295   :  { %v4447_v15 = vrot.slane %v28248_v18, %v19933_v38  ;;  %v21932_v54 = vcombine.low %v4356_v62, %v4363_v0  ;;  %v21934_v50 = vcombine.low %v4398_v48, %v4405_v16  ;;  %v21936_v20 = vcombine.low %v4314_v49, %v4321_v42  ;;  %28253 = vst [vmem:[#allocation74_spill] sm:$0xff] %v21940_v46  ;;  %v28258_v18 = vld [vmem:[#allocation76_spill] sm:$0xff] }
 0x296   :  { %v21938_v17 = vcombine.low %v4328_v19, %v4335_v36  ;;  %28255 = vst [vmem:[#allocation75_spill] sm:$0xff] %v21943_v30  ;;  %v21945_v6 = vcombine.low %v4412_v40, %v4419_v56  ;;  %v21947_v9 = vcombine.low %v4370_v14, %v4377_v11  ;;  %v4510_v62 = vrot.slane %v28258_v18, %v19918_v55  ;;  %v28264_v40 = vld [vmem:[#allocation181_spill] sm:$0xff]  ;;  %v28271_v11 = vld [vmem:[#allocation182_spill] sm:$0xff] }
 0x297   :  { %28249 = vst [vmem:[#allocation179_spill] sm:$0xff] %v21932_v54  ;;  %28250 = vst [vmem:[#allocation196_spill] sm:$0xff] %v21934_v50  ;;  %v4517_v0 = vrot.slane %v28258_v18, %v19921_v47  ;;  %v21953_v49 = vcombine.low %v4454_v52, %v4461_v51  ;;  %v21955_v42 = vcombine.low %v4468_v5, %v4475_v21  ;;  %v28265_v52 = vld [vmem:[#allocation77_spill] sm:$0xff] }
 0x298   :  { %28251 = vst [vmem:[#allocation73_spill] sm:$0xff] %v21936_v20  ;;  %28252 = vst [vmem:[#allocation139_spill] sm:$0xff] %v21938_v17  ;;  %v21957_v19 = vcombine.low %v4384_v58, %v4391_v35  ;;  %v21959_v36 = vcombine.low %v11030_v8, %v11037_v60  ;;  %v21961_v3 = vcombine.low %v4426_v63, %v4433_v34  ;;  %v21977_v5 = vpop.xlane.xlu1 %1118  ;;  %v28270_v51 = vld [vmem:[#allocation149_spill] sm:$0xff]  ;;  %v28272_v34 = vld [vmem:[#allocation78_spill] sm:$0xff] }
 0x299   :  { %28256 = vst [vmem:[#allocation141_spill] sm:$0xff] %v21945_v6  ;;  %28257 = vst [vmem:[#allocation311_spill] sm:$0xff] %v21947_v9  ;;  %v21963_v48 = vcombine.low %v4440_v24, %v4447_v15  ;;  %v21965_v16 = vcombine.low %v11217_v23, %v11224_v13  ;;  %v11064_v56 = vrot.slane %v28264_v40, %v19962_v25  ;;  %v28267_v15 = vld [vmem:[#allocation142_spill] sm:$0xff]  ;;  %v21980_v13 = vpop.xlane.xlu0 %1115  ;;  %16021 = vperm.xlu0 %18688, %v28270_v51   ;;  %v28273_v40 = vld [vmem:[#allocation79_spill] sm:$0xff] }
 0x29a   :  { %28259 = vst [vmem:[#allocation76_spill] sm:$0xff] %v21953_v49  ;;  %28260 = vst [vmem:[#allocation312_spill] sm:$0xff] %v21955_v42  ;;  %v4524_v14 = vrot.slane %v28258_v18, %v19930_v4  ;;  %v4531_v21 = vrot.slane %v28258_v18, %v19933_v38  ;;  %v4482_v35 = vrot.slane %v28265_v52, %v19918_v55  ;;  %16027 = vperm.xlu1 %18689, %v28267_v15   ;;  %v28279_v42 = vld [vmem:[#allocation164_spill] sm:$0xff]  ;;  %v28283_v49 = vld [vmem:[#allocation201_spill] sm:$0xff] }
 0x29b   :  { %28261 = vst [vmem:[#allocation313_spill] sm:$0xff] %v21957_v19  ;;  %28262 = vst [vmem:[#allocation314_spill] sm:$0xff] %v21961_v3  ;;  %v4489_v63 = vrot.slane %v28265_v52, %v19921_v47  ;;  %v21982_v8 = vcombine.low %v4510_v62, %v4517_v0  ;;  %v4496_v60 = vrot.slane %v28265_v52, %v19930_v4  ;;  %v28276_v3 = vld [vmem:[#allocation160_spill] sm:$0xff] }
 0x29c   :  { %28263 = vst [vmem:[#allocation315_spill] sm:$0xff] %v21963_v48  ;;  %28266 = vst [vmem:[#allocation181_spill] sm:$0xff] %v21977_v5  ;;  %v4503_v23 = vrot.slane %v28265_v52, %v19933_v38  ;;  %v11071_v58 = vrot.slane %v28271_v11, %v19962_v25  ;;  %v4566_v24 = vrot.slane %v28272_v34, %v19918_v55  ;;  %v22015_v48 = vpop.xlane.xlu1 %1124 }
 0x29d   :  { %28268 = vst [vmem:[#allocation77_spill] sm:$0xff] %v21980_v13  ;;  %28269 = vst [vmem:[#allocation142_spill] sm:$0xff] %v21982_v8  ;;  %v4573_v18 = vrot.slane %v28272_v34, %v19921_v47  ;;  %v4580_v62 = vrot.slane %v28272_v34, %v19930_v4  ;;  %v4587_v0 = vrot.slane %v28272_v34, %v19933_v38  ;;  %v28274_v13 = vld [vmem:[#allocation80_spill] sm:$0xff]  ;;  %v22018_v19 = vpop.xlane.xlu0 %1121  ;;  %16048 = vperm.xlu0 %18688, %v28279_v42   ;;  %v28289_v42 = vld [vmem:[#allocation82_spill] sm:$0xff] }
 0x29e   :  { %v4538_v52 = vrot.slane %v28273_v40, %v19918_v55  ;;  %v4545_v15 = vrot.slane %v28273_v40, %v19921_v47  ;;  %v4552_v51 = vrot.slane %v28273_v40, %v19930_v4  ;;  %v4559_v11 = vrot.slane %v28273_v40, %v19933_v38  ;;  %28275 = vst [vmem:[#allocation149_spill] sm:$0xff] %v22015_v48  ;;  %v28278_v40 = vld [vmem:[#allocation81_spill] sm:$0xff] }
 0x29f   :  { %v4622_v5 = vrot.slane %v28274_v13, %v19918_v55  ;;  %v4629_v30 = vrot.slane %v28274_v13, %v19921_v47  ;;  %v4636_v34 = vrot.slane %v28274_v13, %v19930_v4  ;;  %v4643_v46 = vrot.slane %v28274_v13, %v19933_v38  ;;  %16030 = vperm.xlu1 %18689, %v28276_v3   ;;  %v28282_v3 = vld [vmem:[#allocation200_spill] sm:$0xff] }
 0x2a0   :  { %28277 = vst [vmem:[#allocation182_spill] sm:$0xff] %v22018_v19  ;;  %v4594_v9 = vrot.slane %v28278_v40, %v19918_v55  ;;  %v4601_v17 = vrot.slane %v28278_v40, %v19921_v47  ;;  %v4608_v20 = vrot.slane %v28278_v40, %v19930_v4  ;;  %v4615_v8 = vrot.slane %v28278_v40, %v19933_v38 }
 0x2a1   :  { %v22029_v13 = vcombine.low %v4524_v14, %v4531_v21  ;;  %v22031_v48 = vcombine.low %v4482_v35, %v4489_v63  ;;  %v11251_v19 = vrot.slane %v28282_v3, %v19962_v25  ;;  %v11258_v6 = vrot.slane %v28283_v49, %v19962_v25  ;;  %v22051_v35 = vpop.xlane.xlu1 %1130  ;;  %v28291_v63 = vld [vmem:[#allocation169_spill] sm:$0xff]  ;;  %v22054_v49 = vpop.xlane.xlu0 %1127  ;;  %v28305_v3 = vld [vmem:[#allocation187_spill] sm:$0xff] }
 0x2a2   :  { %v22037_v50 = vcombine.low %v4566_v24, %v4573_v18  ;;  %v22039_v54 = vcombine.low %v4580_v62, %v4587_v0  ;;  %v22041_v12 = vcombine.low %v4496_v60, %v4503_v23  ;;  %v22043_v27 = vcombine.low %v4538_v52, %v4545_v15  ;;  %28290 = vst [vmem:[#allocation201_spill] sm:$0xff] %v22051_v35  ;;  %v28297_v0 = vld [vmem:[#allocation172_spill] sm:$0xff] }
 0x2a3   :  { %28280 = vst [vmem:[#allocation78_spill] sm:$0xff] %v22029_v13  ;;  %28281 = vst [vmem:[#allocation79_spill] sm:$0xff] %v22031_v48  ;;  %v22045_v40 = vcombine.low %v4552_v51, %v4559_v11  ;;  %v4678_v14 = vrot.slane %v28289_v42, %v19918_v55  ;;  %v4685_v21 = vrot.slane %v28289_v42, %v19921_v47  ;;  %16033 = vperm.xlu1 %18689, %v28291_v63   ;;  %v28303_v11 = vld [vmem:[#allocation180_spill] sm:$0xff] }
 0x2a4   :  { %28284 = vst [vmem:[#allocation80_spill] sm:$0xff] %v22037_v50  ;;  %28285 = vst [vmem:[#allocation160_spill] sm:$0xff] %v22039_v54  ;;  %v22056_v24 = vcombine.low %v11064_v56, %v11071_v58  ;;  %v22058_v60 = vcombine.low %v4622_v5, %v4629_v30  ;;  %v22060_v23 = vcombine.low %v4636_v34, %v4643_v46  ;;  %16054 = vperm.xlu0 %18688, %v28297_v0   ;;  %v28298_v56 = vld [vmem:[#allocation186_spill] sm:$0xff]  ;;  %v28299_v46 = vld [vmem:[#allocation83_spill] sm:$0xff] }
 0x2a5   :  { %28286 = vst [vmem:[#allocation81_spill] sm:$0xff] %v22041_v12  ;;  %28287 = vst [vmem:[#allocation164_spill] sm:$0xff] %v22043_v27  ;;  %v22062_v18 = vcombine.low %v4594_v9, %v4601_v17  ;;  %v22064_v62 = vcombine.low %v4608_v20, %v4615_v8  ;;  %v4692_v52 = vrot.slane %v28289_v42, %v19930_v4  ;;  %v22087_v58 = vpop.xlane.xlu1 %1136  ;;  %v22090_v34 = vpop.xlane.xlu0 %1133  ;;  %v28306_v63 = vld [vmem:[#allocation16_spill] sm:$0xff]  ;;  %v28311_v27 = vld [vmem:[#allocation87_spill] sm:$0xff] }
 0x2a6   :  { %28288 = vst [vmem:[#allocation200_spill] sm:$0xff] %v22045_v40  ;;  %28292 = vst [vmem:[#allocation82_spill] sm:$0xff] %v22054_v49  ;;  %v4699_v15 = vrot.slane %v28289_v42, %v19933_v38  ;;  %v22071_v51 = vcombine.low %v11251_v19, %v11258_v6  ;;  %v11098_v30 = vrot.slane %v28298_v56, %v19962_v25  ;;  %v28301_v6 = vld [vmem:[#allocation84_spill] sm:$0xff] }
 0x2a7   :  { %28293 = vst [vmem:[#allocation169_spill] sm:$0xff] %v22058_v60  ;;  %28294 = vst [vmem:[#allocation316_spill] sm:$0xff] %v22060_v23  ;;  %v4650_v5 = vrot.slane %v28299_v46, %v19918_v55  ;;  %v4657_v17 = vrot.slane %v28299_v46, %v19921_v47  ;;  %v4664_v9 = vrot.slane %v28299_v46, %v19930_v4  ;;  %16036 = vperm.xlu1 %18689, %v28303_v11   ;;  %v28309_v49 = vld [vmem:[#allocation204_spill] sm:$0xff]  ;;  %v28313_v23 = vld [vmem:[#allocation9_spill] sm:$0xff] }
 0x2a8   :  { %28295 = vst [vmem:[#allocation317_spill] sm:$0xff] %v22062_v18  ;;  %28296 = vst [vmem:[#allocation318_spill] sm:$0xff] %v22064_v62  ;;  %v4671_v20 = vrot.slane %v28299_v46, %v19933_v38  ;;  %v22083_v8 = vcombine.low %v4678_v14, %v4685_v21  ;;  %v4734_v19 = vrot.slane %v28301_v6, %v19918_v55  ;;  %v28307_v46 = vld [vmem:[#allocation85_spill] sm:$0xff]  ;;  %v28310_v62 = vld [vmem:[#allocation86_spill] sm:$0xff] }
 0x2a9   :  { %28302 = vst [vmem:[#allocation186_spill] sm:$0xff] %v22087_v58  ;;  %28304 = vst [vmem:[#allocation83_spill] sm:$0xff] %v22090_v34  ;;  %v11105_v42 = vrot.slane %v28305_v3, %v19962_v25  ;;  %v11285_v0 = vrot.slane %v28306_v63, %v19962_v25  ;;  %v4741_v56 = vrot.slane %v28301_v6, %v19921_v47  ;;  %v28308_v58 = vld [vmem:[#allocation185_spill] sm:$0xff]  ;;  %v22132_v60 = vpop.xlane.xlu0 %1139 }
 0x2aa   :  { %28300 = vst [vmem:[#allocation172_spill] sm:$0xff] %v22083_v8  ;;  %v4748_v14 = vrot.slane %v28301_v6, %v19930_v4  ;;  %v4755_v21 = vrot.slane %v28301_v6, %v19933_v38  ;;  %v4706_v11 = vrot.slane %v28307_v46, %v19918_v55  ;;  %16060 = vperm.xlu0 %18688, %v28308_v58   ;;  %v22129_v8 = vpop.xlane.xlu1 %1142  ;;  %28314 = vst [vmem:[#allocation180_spill] sm:$0xff] %v22132_v60 }
 0x2ab   :  { %v4713_v3 = vrot.slane %v28307_v46, %v19921_v47  ;;  %v4720_v63 = vrot.slane %v28307_v46, %v19930_v4  ;;  %v4727_v34 = vrot.slane %v28307_v46, %v19933_v38  ;;  %v11292_v35 = vrot.slane %v28309_v49, %v19962_v25  ;;  %28312 = vst [vmem:[#allocation84_spill] sm:$0xff] %v22129_v8 }
 0x2ac   :  { %v4790_v6 = vrot.slane %v28310_v62, %v19918_v55  ;;  %v4797_v18 = vrot.slane %v28310_v62, %v19921_v47  ;;  %v4804_v58 = vrot.slane %v28310_v62, %v19930_v4  ;;  %v4811_v40 = vrot.slane %v28310_v62, %v19933_v38  ;;  %16039 = vperm.xlu1 %18689, %v28313_v23  }
 0x2ad   :  { %v4762_v12 = vrot.slane %v28311_v27, %v19918_v55  ;;  %v4769_v46 = vrot.slane %v28311_v27, %v19921_v47  ;;  %v4776_v49 = vrot.slane %v28311_v27, %v19930_v4  ;;  %v4783_v48 = vrot.slane %v28311_v27, %v19933_v38  ;;  %v28321_v27 = vld [vmem:[#allocation88_spill] sm:$0xff] }
 0x2ae   :  { %v22134_v54 = vcombine.low %v4692_v52, %v4699_v15  ;;  %v22136_v62 = vcombine.low %v4734_v19, %v4741_v56  ;;  %v22138_v50 = vcombine.low %v4650_v5, %v4657_v17  ;;  %v22140_v13 = vcombine.low %v4664_v9, %v4671_v20  ;;  %16066 = vperm.xlu0 %18688, %v28318_v43   ;;  %v22163_v20 = vpop.xlane.xlu1 %1148  ;;  %v28328_v19 = vld [vmem:[#allocation206_spill] sm:$0xff]  ;;  %v22166_v56 = vpop.xlane.xlu0 %1145 }
 0x2af   :  { %v22143_v28 = vcombine.low %v4748_v14, %v4755_v21  ;;  %v22145_v44 = vcombine.low %v4706_v11, %v4713_v3  ;;  %v4846_v8 = vrot.slane %v28321_v27, %v19918_v55  ;;  %v4853_v23 = vrot.slane %v28321_v27, %v19921_v47  ;;  %28327 = vst [vmem:[#allocation319_spill] sm:$0xff] %v22163_v20  ;;  %v28332_v21 = vld [vmem:[#allocation208_spill] sm:$0xff] }
 0x2b0   :  { %28315 = vst [vmem:[#allocation187_spill] sm:$0xff] %v22136_v62  ;;  %28316 = vst [vmem:[#allocation16_spill] sm:$0xff] %v22138_v50  ;;  %v22151_v52 = vcombine.low %v4790_v6, %v4797_v18  ;;  %v22153_v15 = vcombine.low %v4804_v58, %v4811_v40  ;;  %v22155_v5 = vcombine.low %v4720_v63, %v4727_v34  ;;  %16042 = vperm.xlu1 %18689, %v28328_v19   ;;  %v28330_v18 = vld [vmem:[#allocation188_spill] sm:$0xff]  ;;  %v28335_v6 = vld [vmem:[#allocation90_spill] sm:$0xff] }
 0x2b1   :  { %28317 = vst [vmem:[#allocation85_spill] sm:$0xff] %v22140_v13  ;;  %28319 = vst [vmem:[#allocation185_spill] sm:$0xff] %v22143_v28  ;;  %v22157_v17 = vcombine.low %v11098_v30, %v11105_v42  ;;  %v22159_v9 = vcombine.low %v4762_v12, %v4769_v46  ;;  %v22161_v43 = vcombine.low %v4776_v49, %v4783_v48  ;;  %v28331_v48 = vld [vmem:[#allocation89_spill] sm:$0xff]  ;;  %v28334_v3 = vld [vmem:[#allocation8_spill] sm:$0xff] }
 0x2b2   :  { %28320 = vst [vmem:[#allocation204_spill] sm:$0xff] %v22145_v44  ;;  %28322 = vst [vmem:[#allocation86_spill] sm:$0xff] %v22151_v52  ;;  %v22168_v14 = vcombine.low %v11285_v0, %v11292_v35  ;;  %v11132_v40 = vrot.slane %v28330_v18, %v19962_v25  ;;  %v4860_v34 = vrot.slane %v28321_v27, %v19930_v4  ;;  %16072 = vperm.xlu0 %18688, %v28332_v21   ;;  %v22205_v21 = vpop.xlane.xlu1 %1154 }
 0x2b3   :  { %28323 = vst [vmem:[#allocation87_spill] sm:$0xff] %v22153_v15  ;;  %28324 = vst [vmem:[#allocation9_spill] sm:$0xff] %v22155_v5  ;;  %v4867_v12 = vrot.slane %v28321_v27, %v19933_v38  ;;  %v4818_v30 = vrot.slane %v28331_v48, %v19918_v55  ;;  %v4825_v42 = vrot.slane %v28331_v48, %v19921_v47  ;;  %v28336_v27 = vld [vmem:[#allocation91_spill] sm:$0xff] }
 0x2b4   :  { %28325 = vst [vmem:[#allocation195_spill] sm:$0xff] %v22159_v9  ;;  %28326 = vst [vmem:[#allocation88_spill] sm:$0xff] %v22161_v43  ;;  %v22181_v11 = vcombine.low %v4846_v8, %v4853_v23  ;;  %v4832_v35 = vrot.slane %v28331_v48, %v19930_v4  ;;  %v4839_v0 = vrot.slane %v28331_v48, %v19933_v38  ;;  %16045 = vperm.xlu1 %18689, %v20904_v2  }
 0x2b5   :  { %28329 = vst [vmem:[#allocation206_spill] sm:$0xff] %v22166_v56  ;;  %v11139_v63 = vrot.slane %v28334_v3, %v19962_v25  ;;  %v4902_v58 = vrot.slane %v28335_v6, %v19918_v55  ;;  %v4909_v46 = vrot.slane %v28335_v6, %v19921_v47  ;;  %v4916_v49 = vrot.slane %v28335_v6, %v19930_v4  ;;  %v22208_v3 = vpop.xlane.xlu0 %1151 }
 0x2b6   :  { %28333 = vst [vmem:[#allocation188_spill] sm:$0xff] %v22181_v11  ;;  %v4923_v8 = vrot.slane %v28335_v6, %v19933_v38  ;;  %v4874_v23 = vrot.slane %v28336_v27, %v19918_v55  ;;  %v4881_v19 = vrot.slane %v28336_v27, %v19921_v47  ;;  %v4888_v18 = vrot.slane %v28336_v27, %v19930_v4  ;;  %v28339_v6 = vld [vmem:[#allocation92_spill] sm:$0xff]  ;;  %v22243_v62 = vpop.xlane.xlu1 %1160 }
 0x2b7   :  { %v4895_v48 = vrot.slane %v28336_v27, %v19933_v38  ;;  %28337 = vst [vmem:[#allocation89_spill] sm:$0xff] %v22205_v21  ;;  %28338 = vst [vmem:[#allocation208_spill] sm:$0xff] %v22208_v3  ;;  %v4958_v56 = vrot.slane %v28339_v6, %v19918_v55  ;;  %v4965_v20 = vrot.slane %v28339_v6, %v19921_v47  ;;  %16078 = vperm.xlu0 %18688, %v20918_v31   ;;  %v28340_v27 = vld [vmem:[#allocation93_spill] sm:$0xff]  ;;  %v28343_v31 = vld [vmem:[#allocation210_spill] sm:$0xff] }
 0x2b8   :  { %v4972_v60 = vrot.slane %v28339_v6, %v19930_v4  ;;  %v4979_v43 = vrot.slane %v28339_v6, %v19933_v38  ;;  %v4930_v21 = vrot.slane %v28340_v27, %v19918_v55  ;;  %v4937_v2 = vrot.slane %v28340_v27, %v19921_v47  ;;  %v28342_v6 = vld [vmem:[#allocation209_spill] sm:$0xff]  ;;  %28346 = vst [vmem:[#allocation92_spill] sm:$0xff] %v22243_v62 }
 0x2b9   :  { %v4944_v3 = vrot.slane %v28340_v27, %v19930_v4  ;;  %v4951_v9 = vrot.slane %v28340_v27, %v19933_v38  ;;  %v22227_v5 = vcombine.low %v4860_v34, %v4867_v12  ;;  %v22229_v44 = vcombine.low %v4818_v30, %v4825_v42  ;;  %16051 = vperm.xlu1 %18689, %v21042_v39   ;;  %v22246_v34 = vpop.xlane.xlu0 %1157  ;;  %v28349_v30 = vld [vmem:[#allocation94_spill] sm:$0xff] }
 0x2ba   :  { %v11319_v13 = vrot.slane %v28342_v6, %v19962_v25  ;;  %v11326_v50 = vrot.slane %v28343_v31, %v19962_v25  ;;  %v22235_v11 = vcombine.low %v4902_v58, %v4909_v46  ;;  %v22237_v15 = vcombine.low %v4916_v49, %v4923_v8  ;;  %28347 = vst [vmem:[#allocation93_spill] sm:$0xff] %v22246_v34  ;;  %v28361_v31 = vld [vmem:[#allocation97_spill] sm:$0xff] }
 0x2bb   :  { %28341 = vst [vmem:[#allocation8_spill] sm:$0xff] %v22229_v44  ;;  %v22239_v52 = vcombine.low %v4832_v35, %v4839_v0  ;;  %v22241_v28 = vcombine.low %v4874_v23, %v4881_v19  ;;  %v22248_v12 = vcombine.low %v4888_v18, %v4895_v48  ;;  %v5014_v42 = vrot.slane %v28349_v30, %v19918_v55  ;;  %v28359_v18 = vld [vmem:[#allocation96_spill] sm:$0xff] }
 0x2bc   :  { %v5021_v58 = vrot.slane %v28349_v30, %v19921_v47  ;;  %16084 = vperm.xlu0 %18688, %v21062_v53   ;;  %v22255_v35 = vcombine.low %v11132_v40, %v11139_v63  ;;  %v22257_v0 = vcombine.low %v4958_v56, %v4965_v20  ;;  %v22259_v46 = vcombine.low %v4972_v60, %v4979_v43  ;;  %v28354_v53 = vld [vmem:[#allocation11_spill] sm:$0xff]  ;;  %v22281_v63 = vpop.xlane.xlu1 %1166 }
 0x2bd   :  { %28344 = vst [vmem:[#allocation90_spill] sm:$0xff] %v22239_v52  ;;  %28345 = vst [vmem:[#allocation91_spill] sm:$0xff] %v22241_v28  ;;  %v22261_v49 = vcombine.low %v4930_v21, %v4937_v2  ;;  %v22263_v39 = vcombine.low %v4944_v3, %v4951_v9  ;;  %v5028_v8 = vrot.slane %v28349_v30, %v19930_v4  ;;  %v28355_v20 = vld [vmem:[#allocation95_spill] sm:$0xff]  ;;  %16057 = vperm.xlu1 %18689, %v21146_v37   ;;  %v28360_v21 = vld [vmem:[#allocation194_spill] sm:$0xff] }
 0x2be   :  { %28348 = vst [vmem:[#allocation209_spill] sm:$0xff] %v22248_v12  ;;  %28350 = vst [vmem:[#allocation210_spill] sm:$0xff] %v22257_v0  ;;  %v5035_v23 = vrot.slane %v28349_v30, %v19933_v38  ;;  %v22269_v19 = vcombine.low %v11319_v13, %v11326_v50  ;;  %v11166_v40 = vrot.slane %v28354_v53, %v19962_v25  ;;  %v22284_v50 = vpop.xlane.xlu0 %1163  ;;  %v28367_v28 = vld [vmem:[#allocation253_spill] sm:$0xff] }
 0x2bf   :  { %28351 = vst [vmem:[#allocation94_spill] sm:$0xff] %v22259_v46  ;;  %28352 = vst [vmem:[#allocation320_spill] sm:$0xff] %v22261_v49  ;;  %v4986_v56 = vrot.slane %v28355_v20, %v19918_v55  ;;  %v4993_v60 = vrot.slane %v28355_v20, %v19921_v47  ;;  %v5000_v9 = vrot.slane %v28355_v20, %v19930_v4 }
 0x2c0   :  { %28353 = vst [vmem:[#allocation321_spill] sm:$0xff] %v22263_v39  ;;  %v5007_v43 = vrot.slane %v28355_v20, %v19933_v38  ;;  %28356 = vst [vmem:[#allocation11_spill] sm:$0xff] %v22281_v63  ;;  %v22286_v13 = vcombine.low %v5014_v42, %v5021_v58  ;;  %v5070_v48 = vrot.slane %v28359_v18, %v19918_v55  ;;  %16090 = vperm.xlu0 %18688, %v21170_v1   ;;  %v28362_v58 = vld [vmem:[#allocation213_spill] sm:$0xff]  ;;  %v28363_v20 = vld [vmem:[#allocation98_spill] sm:$0xff]  ;;  %v22319_v34 = vpop.xlane.xlu1 %1172 }
 0x2c1   :  { %28357 = vst [vmem:[#allocation95_spill] sm:$0xff] %v22284_v50  ;;  %v11173_v3 = vrot.slane %v28360_v21, %v19962_v25  ;;  %v11353_v27 = vrot.slane %v20882_v22, %v19962_v25  ;;  %v5077_v2 = vrot.slane %v28359_v18, %v19921_v47  ;;  %v5084_v37 = vrot.slane %v28359_v18, %v19930_v4 }
 0x2c2   :  { %28358 = vst [vmem:[#allocation322_spill] sm:$0xff] %v22286_v13  ;;  %v5091_v6 = vrot.slane %v28359_v18, %v19933_v38  ;;  %v5042_v30 = vrot.slane %v28361_v31, %v19918_v55  ;;  %v5049_v1 = vrot.slane %v28361_v31, %v19921_v47  ;;  %v5056_v42 = vrot.slane %v28361_v31, %v19930_v4  ;;  %v28371_v13 = vld [vmem:[#allocation100_spill] sm:$0xff] }
 0x2c3   :  { %v5063_v22 = vrot.slane %v28361_v31, %v19933_v38  ;;  %v11360_v53 = vrot.slane %v28362_v58, %v19962_v25  ;;  %v5126_v21 = vrot.slane %v28363_v20, %v19918_v55  ;;  %v5133_v18 = vrot.slane %v28363_v20, %v19921_v47  ;;  %28364 = vst [vmem:[#allocation96_spill] sm:$0xff] %v22319_v34  ;;  %v22322_v31 = vpop.xlane.xlu0 %1169  ;;  %v28366_v58 = vld [vmem:[#allocation99_spill] sm:$0xff] }
 0x2c4   :  { %v5140_v50 = vrot.slane %v28363_v20, %v19930_v4  ;;  %v5147_v63 = vrot.slane %v28363_v20, %v19933_v38  ;;  %16063 = vperm.xlu1 %18689, %v21254_v29   ;;  %28365 = vst [vmem:[#allocation194_spill] sm:$0xff] %v22322_v31  ;;  %v5098_v62 = vrot.slane %v28366_v58, %v19918_v55 }
 0x2c5   :  { %v5105_v39 = vrot.slane %v28366_v58, %v19921_v47  ;;  %v5112_v49 = vrot.slane %v28366_v58, %v19930_v4  ;;  %v5119_v12 = vrot.slane %v28366_v58, %v19933_v38  ;;  %16096 = vperm.xlu0 %18688, %v28367_v28   ;;  %v22333_v20 = vcombine.low %v5028_v8, %v5035_v23  ;;  %v22355_v23 = vpop.xlane.xlu1 %1178 }
 0x2c6   :  { %v22335_v34 = vcombine.low %v5070_v48, %v5077_v2  ;;  %v22337_v29 = vcombine.low %v4986_v56, %v4993_v60  ;;  %v22339_v31 = vcombine.low %v5000_v9, %v5007_v43  ;;  %v22341_v52 = vcombine.low %v5084_v37, %v5091_v6  ;;  %28374 = vst [vmem:[#allocation100_spill] sm:$0xff] %v22355_v23  ;;  %v28382_v37 = vld [vmem:[#allocation102_spill] sm:$0xff] }
 0x2c7   :  { %v22343_v44 = vcombine.low %v5042_v30, %v5049_v1  ;;  %v5182_v46 = vrot.slane %v28371_v13, %v19918_v55  ;;  %v5189_v58 = vrot.slane %v28371_v13, %v19921_v47  ;;  %v22349_v0 = vcombine.low %v5126_v21, %v5133_v18  ;;  %v22358_v56 = vpop.xlane.xlu0 %1175 }
 0x2c8   :  { %28368 = vst [vmem:[#allocation97_spill] sm:$0xff] %v22337_v29  ;;  %28369 = vst [vmem:[#allocation213_spill] sm:$0xff] %v22339_v31  ;;  %v22351_v28 = vcombine.low %v5140_v50, %v5147_v63  ;;  %v22353_v8 = vcombine.low %v5056_v42, %v5063_v22  ;;  %16069 = vperm.xlu1 %18689, %v21412_v26   ;;  %v22360_v60 = vcombine.low %v11166_v40, %v11173_v3  ;;  %v28378_v63 = vld [vmem:[#allocation12_spill] sm:$0xff]  ;;  %v28379_v40 = vld [vmem:[#allocation101_spill] sm:$0xff] }
 0x2c9   :  { %28370 = vst [vmem:[#allocation98_spill] sm:$0xff] %v22343_v44  ;;  %28375 = vst [vmem:[#allocation323_spill] sm:$0xff] %v22358_v56  ;;  %v22362_v9 = vcombine.low %v5098_v62, %v5105_v39  ;;  %v22364_v43 = vcombine.low %v5112_v49, %v5119_v12  ;;  %16102 = vperm.xlu0 %18688, %v21434_v41   ;;  %v22367_v48 = vcombine.low %v11353_v27, %v11360_v53  ;;  %v28381_v39 = vld [vmem:[#allocation199_spill] sm:$0xff]  ;;  %v22395_v1 = vpop.xlane.xlu1 %1184  ;;  %v28392_v31 = vld [vmem:[#allocation217_spill] sm:$0xff] }
 0x2ca   :  { %28372 = vst [vmem:[#allocation99_spill] sm:$0xff] %v22351_v28  ;;  %28373 = vst [vmem:[#allocation253_spill] sm:$0xff] %v22353_v8  ;;  %v11200_v50 = vrot.slane %v28378_v63, %v19962_v25  ;;  %v5196_v2 = vrot.slane %v28371_v13, %v19930_v4  ;;  %v5203_v26 = vrot.slane %v28371_v13, %v19933_v38  ;;  %v28385_v22 = vld [vmem:[#allocation103_spill] sm:$0xff]  ;;  %v28386_v63 = vld [vmem:[#allocation104_spill] sm:$0xff] }
 0x2cb   :  { %28376 = vst [vmem:[#allocation324_spill] sm:$0xff] %v22362_v9  ;;  %28377 = vst [vmem:[#allocation325_spill] sm:$0xff] %v22364_v43  ;;  %v5154_v3 = vrot.slane %v28379_v40, %v19918_v55  ;;  %v5161_v62 = vrot.slane %v28379_v40, %v19921_v47  ;;  %v22379_v12 = vcombine.low %v5182_v46, %v5189_v58  ;;  %v22398_v42 = vpop.xlane.xlu0 %1181  ;;  %v28391_v8 = vld [vmem:[#allocation216_spill] sm:$0xff] }
 0x2cc   :  { %v5168_v41 = vrot.slane %v28379_v40, %v19930_v4  ;;  %v5175_v49 = vrot.slane %v28379_v40, %v19933_v38  ;;  %v11207_v27 = vrot.slane %v28381_v39, %v19962_v25  ;;  %v5238_v13 = vrot.slane %v28382_v37, %v19918_v55  ;;  %28383 = vst [vmem:[#allocation101_spill] sm:$0xff] %v22395_v1 }
 0x2cd   :  { %28380 = vst [vmem:[#allocation12_spill] sm:$0xff] %v22379_v12  ;;  %v5245_v6 = vrot.slane %v28382_v37, %v19921_v47  ;;  %v5252_v30 = vrot.slane %v28382_v37, %v19930_v4  ;;  %v5259_v46 = vrot.slane %v28382_v37, %v19933_v38  ;;  %16075 = vperm.xlu1 %18689, %v21510_v61   ;;  %28384 = vst [vmem:[#allocation199_spill] sm:$0xff] %v22398_v42  ;;  %v28387_v42 = vld [vmem:[#allocation105_spill] sm:$0xff]  ;;  %v22429_v9 = vpop.xlane.xlu1 %1190 }
 0x2ce   :  { %v5210_v53 = vrot.slane %v28385_v22, %v19918_v55  ;;  %v5217_v21 = vrot.slane %v28385_v22, %v19921_v47  ;;  %v5224_v18 = vrot.slane %v28385_v22, %v19930_v4  ;;  %v5231_v58 = vrot.slane %v28385_v22, %v19933_v38  ;;  %16108 = vperm.xlu0 %18688, %v21572_v10  }
 0x2cf   :  { %v5294_v40 = vrot.slane %v28386_v63, %v19918_v55  ;;  %v5301_v61 = vrot.slane %v28386_v63, %v19921_v47  ;;  %v5308_v39 = vrot.slane %v28386_v63, %v19930_v4  ;;  %v5315_v37 = vrot.slane %v28386_v63, %v19933_v38  ;;  %28389 = vst [vmem:[#allocation103_spill] sm:$0xff] %v22429_v9  ;;  %v22432_v63 = vpop.xlane.xlu0 %1187 }
 0x2d0   :  { %v5266_v1 = vrot.slane %v28387_v42, %v19918_v55  ;;  %v5273_v22 = vrot.slane %v28387_v42, %v19921_v47  ;;  %v5280_v10 = vrot.slane %v28387_v42, %v19930_v4  ;;  %v5287_v56 = vrot.slane %v28387_v42, %v19933_v38  ;;  %28390 = vst [vmem:[#allocation104_spill] sm:$0xff] %v22432_v63 }
 0x2d1   :  { %v22425_v23 = vcombine.low %v5196_v2, %v5203_v26  ;;  %v22427_v43 = vcombine.low %v5154_v3, %v5161_v62  ;;  %16081 = vperm.xlu1 %18689, %v21664_v59   ;;  %v11387_v44 = vrot.slane %v28391_v8, %v19962_v25  ;;  %v11394_v29 = vrot.slane %v28392_v31, %v19962_v25  ;;  %v28397_v59 = vld [vmem:[#allocation106_spill] sm:$0xff] }
 0x2d2   :  { %v22438_v12 = vcombine.low %v5238_v13, %v5245_v6  ;;  %v22440_v28 = vcombine.low %v5252_v30, %v5259_v46  ;;  %v22442_v2 = vcombine.low %v5168_v41, %v5175_v49  ;;  %v22444_v26 = vcombine.low %v5210_v53, %v5217_v21  ;;  %16114 = vperm.xlu0 %18688, %v21676_v33   ;;  %v22467_v30 = vpop.xlane.xlu1 %1196  ;;  %v28404_v46 = vld [vmem:[#allocation14_spill] sm:$0xff] }
 0x2d3   :  { %28388 = vst [vmem:[#allocation102_spill] sm:$0xff] %v22427_v43  ;;  %v22447_v3 = vcombine.low %v5224_v18, %v5231_v58  ;;  %v5350_v62 = vrot.slane %v28397_v59, %v19918_v55  ;;  %v5357_v8 = vrot.slane %v28397_v59, %v19921_v47  ;;  %v22453_v42 = vcombine.low %v11200_v50, %v11207_v27  ;;  %v22470_v50 = vpop.xlane.xlu0 %1193 }
 0x2d4   :  { %28393 = vst [vmem:[#allocation105_spill] sm:$0xff] %v22440_v28  ;;  %28394 = vst [vmem:[#allocation216_spill] sm:$0xff] %v22442_v2  ;;  %v22455_v31 = vcombine.low %v5294_v40, %v5301_v61  ;;  %v22457_v13 = vcombine.low %v5308_v39, %v5315_v37  ;;  %v22459_v41 = vcombine.low %v5266_v1, %v5273_v22  ;;  %v28408_v40 = vld [vmem:[#allocation15_spill] sm:$0xff] }
 0x2d5   :  { %28395 = vst [vmem:[#allocation217_spill] sm:$0xff] %v22444_v26  ;;  %28396 = vst [vmem:[#allocation326_spill] sm:$0xff] %v22447_v3  ;;  %v22461_v49 = vcombine.low %v5280_v10, %v5287_v56  ;;  %v5364_v33 = vrot.slane %v28397_v59, %v19930_v4  ;;  %v5371_v6 = vrot.slane %v28397_v59, %v19933_v38  ;;  %16087 = vperm.xlu1 %18689, %v21772_v45   ;;  %v28405_v56 = vld [vmem:[#allocation107_spill] sm:$0xff]  ;;  %v28410_v59 = vld [vmem:[#allocation109_spill] sm:$0xff] }
 0x2d6   :  { %28398 = vst [vmem:[#allocation106_spill] sm:$0xff] %v22455_v31  ;;  %28399 = vst [vmem:[#allocation327_spill] sm:$0xff] %v22457_v13  ;;  %v22472_v27 = vcombine.low %v11387_v44, %v11394_v29  ;;  %v11234_v1 = vrot.slane %v28404_v46, %v19962_v25  ;;  %v5322_v53 = vrot.slane %v28405_v56, %v19918_v55  ;;  %16120 = vperm.xlu0 %18688, %v21778_v32   ;;  %v28407_v44 = vld [vmem:[#allocation108_spill] sm:$0xff]  ;;  %v28409_v39 = vld [vmem:[#allocation23_spill] sm:$0xff] }
 0x2d7   :  { %28400 = vst [vmem:[#allocation328_spill] sm:$0xff] %v22459_v41  ;;  %28401 = vst [vmem:[#allocation329_spill] sm:$0xff] %v22461_v49  ;;  %v5329_v21 = vrot.slane %v28405_v56, %v19921_v47  ;;  %v5336_v18 = vrot.slane %v28405_v56, %v19930_v4  ;;  %v5343_v58 = vrot.slane %v28405_v56, %v19933_v38 }
 0x2d8   :  { %28402 = vst [vmem:[#allocation330_spill] sm:$0xff] %v22467_v30  ;;  %28403 = vst [vmem:[#allocation331_spill] sm:$0xff] %v22470_v50  ;;  %v22485_v45 = vcombine.low %v5350_v62, %v5357_v8  ;;  %v5406_v29 = vrot.slane %v28407_v44, %v19918_v55  ;;  %v11241_v61 = vrot.slane %v28408_v40, %v19962_v25  ;;  %v22507_v40 = vpop.xlane.xlu1 %1202  ;;  %v28414_v30 = vld [vmem:[#allocation110_spill] sm:$0xff] }
 0x2d9   :  { %v11421_v37 = vrot.slane %v28409_v39, %v19962_v25  ;;  %v5413_v22 = vrot.slane %v28407_v44, %v19921_v47  ;;  %v5420_v10 = vrot.slane %v28407_v44, %v19930_v4  ;;  %v5427_v32 = vrot.slane %v28407_v44, %v19933_v38  ;;  %28411 = vst [vmem:[#allocation107_spill] sm:$0xff] %v22507_v40  ;;  %v22510_v39 = vpop.xlane.xlu0 %1199  ;;  %v28413_v44 = vld [vmem:[#allocation24_spill] sm:$0xff] }
 0x2da   :  { %28406 = vst [vmem:[#allocation14_spill] sm:$0xff] %v22485_v45  ;;  %v5378_v62 = vrot.slane %v28410_v59, %v19918_v55  ;;  %v5385_v8 = vrot.slane %v28410_v59, %v19921_v47  ;;  %v5392_v46 = vrot.slane %v28410_v59, %v19930_v4  ;;  %v5399_v56 = vrot.slane %v28410_v59, %v19933_v38  ;;  %v28419_v45 = vld [vmem:[#allocation112_spill] sm:$0xff] }
 0x2db   :  { %16093 = vperm.xlu1 %18689, %v21858_v57   ;;  %28412 = vst [vmem:[#allocation108_spill] sm:$0xff] %v22510_v39  ;;  %v11428_v50 = vrot.slane %v28413_v44, %v19962_v25  ;;  %v5462_v63 = vrot.slane %v28414_v30, %v19918_v55  ;;  %v5469_v9 = vrot.slane %v28414_v30, %v19921_v47  ;;  %v28415_v57 = vld [vmem:[#allocation111_spill] sm:$0xff] }
 0x2dc   :  { %v5476_v49 = vrot.slane %v28414_v30, %v19930_v4  ;;  %v5483_v59 = vrot.slane %v28414_v30, %v19933_v38  ;;  %16126 = vperm.xlu0 %18688, %v21876_v7   ;;  %v5434_v39 = vrot.slane %v28415_v57, %v19918_v55  ;;  %v5441_v44 = vrot.slane %v28415_v57, %v19921_v47  ;;  %v22547_v28 = vpop.xlane.xlu1 %1208 }
 0x2dd   :  { %v5448_v40 = vrot.slane %v28415_v57, %v19930_v4  ;;  %v5455_v41 = vrot.slane %v28415_v57, %v19933_v38  ;;  %v22531_v3 = vcombine.low %v5364_v33, %v5371_v6  ;;  %v22533_v26 = vcombine.low %v5406_v29, %v5413_v22  ;;  %28420 = vst [vmem:[#allocation24_spill] sm:$0xff] %v22547_v28  ;;  %v22550_v33 = vpop.xlane.xlu0 %1205 }
 0x2de   :  { %v22535_v2 = vcombine.low %v5322_v53, %v5329_v21  ;;  %v22537_v30 = vcombine.low %v5336_v18, %v5343_v58  ;;  %v22539_v7 = vcombine.low %v5420_v10, %v5427_v32  ;;  %v22541_v43 = vcombine.low %v5378_v62, %v5385_v8  ;;  %28421 = vst [vmem:[#allocation110_spill] sm:$0xff] %v22550_v33  ;;  %v28431_v8 = vld [vmem:[#allocation114_spill] sm:$0xff] }
 0x2df   :  { %v5518_v13 = vrot.slane %v28419_v45, %v19918_v55  ;;  %v5525_v31 = vrot.slane %v28419_v45, %v19921_v47  ;;  %16099 = vperm.xlu1 %18689, %v21959_v36   ;;  %v22552_v6 = vcombine.low %v5462_v63, %v5469_v9  ;;  %v22554_v53 = vcombine.low %v5476_v49, %v5483_v59  ;;  %v28425_v36 = vld [vmem:[#allocation205_spill] sm:$0xff] }
 0x2e0   :  { %28416 = vst [vmem:[#allocation15_spill] sm:$0xff] %v22535_v2  ;;  %28417 = vst [vmem:[#allocation23_spill] sm:$0xff] %v22537_v30  ;;  %v22556_v21 = vcombine.low %v5392_v46, %v5399_v56  ;;  %16132 = vperm.xlu0 %18688, %v21965_v16   ;;  %v22559_v18 = vcombine.low %v11234_v1, %v11241_v61  ;;  %v22561_v58 = vcombine.low %v5434_v39, %v5441_v44  ;;  %v28426_v49 = vld [vmem:[#allocation113_spill] sm:$0xff]  ;;  %v28433_v44 = vld [vmem:[#allocation116_spill] sm:$0xff] }
 0x2e1   :  { %28418 = vst [vmem:[#allocation109_spill] sm:$0xff] %v22541_v43  ;;  %v22563_v29 = vcombine.low %v5448_v40, %v5455_v41  ;;  %v22565_v22 = vcombine.low %v11421_v37, %v11428_v50  ;;  %v11268_v10 = vrot.slane %v28425_v36, %v19962_v25  ;;  %v5532_v9 = vrot.slane %v28419_v45, %v19930_v4  ;;  %v22583_v37 = vpop.xlane.xlu1 %1214  ;;  %v22586_v32 = vpop.xlane.xlu0 %1211  ;;  %v28439_v30 = vld [vmem:[#allocation224_spill] sm:$0xff] }
 0x2e2   :  { %28422 = vst [vmem:[#allocation111_spill] sm:$0xff] %v22556_v21  ;;  %28423 = vst [vmem:[#allocation112_spill] sm:$0xff] %v22561_v58  ;;  %v5539_v63 = vrot.slane %v28419_v45, %v19933_v38  ;;  %v5490_v16 = vrot.slane %v28426_v49, %v19918_v55  ;;  %v5497_v1 = vrot.slane %v28426_v49, %v19921_v47  ;;  %v28430_v45 = vld [vmem:[#allocation207_spill] sm:$0xff]  ;;  %v28438_v21 = vld [vmem:[#allocation148_spill] sm:$0xff] }
 0x2e3   :  { %28424 = vst [vmem:[#allocation332_spill] sm:$0xff] %v22563_v29  ;;  %v22577_v61 = vcombine.low %v5518_v13, %v5525_v31  ;;  %v5504_v41 = vrot.slane %v28426_v49, %v19930_v4  ;;  %v5511_v50 = vrot.slane %v28426_v49, %v19933_v38  ;;  %28428 = vst [vmem:[#allocation113_spill] sm:$0xff] %v22583_v37  ;;  %16105 = vperm.xlu1 %18689, %v22056_v24   ;;  %v28432_v24 = vld [vmem:[#allocation115_spill] sm:$0xff] }
 0x2e4   :  { %28429 = vst [vmem:[#allocation333_spill] sm:$0xff] %v22586_v32  ;;  %v11275_v62 = vrot.slane %v28430_v45, %v19962_v25  ;;  %v5574_v46 = vrot.slane %v28431_v8, %v19918_v55  ;;  %v5581_v31 = vrot.slane %v28431_v8, %v19921_v47  ;;  %v5588_v13 = vrot.slane %v28431_v8, %v19930_v4 }
 0x2e5   :  { %28427 = vst [vmem:[#allocation205_spill] sm:$0xff] %v22577_v61  ;;  %v5595_v56 = vrot.slane %v28431_v8, %v19933_v38  ;;  %16138 = vperm.xlu0 %18688, %v22071_v51   ;;  %v5546_v40 = vrot.slane %v28432_v24, %v19918_v55  ;;  %v5553_v39 = vrot.slane %v28432_v24, %v19921_v47  ;;  %v28434_v8 = vld [vmem:[#allocation117_spill] sm:$0xff]  ;;  %v22623_v28 = vpop.xlane.xlu1 %1220  ;;  %v22626_v29 = vpop.xlane.xlu0 %1217 }
 0x2e6   :  { %v5560_v59 = vrot.slane %v28432_v24, %v19930_v4  ;;  %v5567_v57 = vrot.slane %v28432_v24, %v19933_v38  ;;  %v5630_v36 = vrot.slane %v28433_v44, %v19918_v55  ;;  %v5637_v49 = vrot.slane %v28433_v44, %v19921_v47  ;;  %28435 = vst [vmem:[#allocation207_spill] sm:$0xff] %v22623_v28 }
 0x2e7   :  { %v5644_v51 = vrot.slane %v28433_v44, %v19930_v4  ;;  %v5651_v45 = vrot.slane %v28433_v44, %v19933_v38  ;;  %v5602_v32 = vrot.slane %v28434_v8, %v19918_v55  ;;  %v5609_v37 = vrot.slane %v28434_v8, %v19921_v47  ;;  %16111 = vperm.xlu1 %18689, %v22157_v17  }
 0x2e8   :  { %v5616_v24 = vrot.slane %v28434_v8, %v19930_v4  ;;  %v5623_v33 = vrot.slane %v28434_v8, %v19933_v38  ;;  %28436 = vst [vmem:[#allocation114_spill] sm:$0xff] %v22626_v29  ;;  %v22628_v58 = vcombine.low %v5532_v9, %v5539_v63  ;;  %v22630_v44 = vcombine.low %v5490_v16, %v5497_v1  ;;  %v28443_v63 = vld [vmem:[#allocation118_spill] sm:$0xff] }
 0x2e9   :  { %16144 = vperm.xlu0 %18688, %v22168_v14   ;;  %v11455_v43 = vrot.slane %v28438_v21, %v19962_v25  ;;  %v11462_v2 = vrot.slane %v28439_v30, %v19962_v25  ;;  %v22637_v61 = vcombine.low %v5574_v46, %v5581_v31  ;;  %v22639_v8 = vcombine.low %v5588_v13, %v5595_v56  ;;  %v22664_v31 = vpop.xlane.xlu0 %1223 }
 0x2ea   :  { %28437 = vst [vmem:[#allocation115_spill] sm:$0xff] %v22630_v44  ;;  %v22641_v28 = vcombine.low %v5504_v41, %v5511_v50  ;;  %v22643_v17 = vcombine.low %v5546_v40, %v5553_v39  ;;  %v22645_v9 = vcombine.low %v5560_v59, %v5567_v57  ;;  %v5686_v16 = vrot.slane %v28443_v63, %v19918_v55  ;;  %v22661_v50 = vpop.xlane.xlu1 %1226 }
 0x2eb   :  { %v5693_v14 = vrot.slane %v28443_v63, %v19921_v47  ;;  %v22651_v21 = vcombine.low %v11268_v10, %v11275_v62  ;;  %v22653_v1 = vcombine.low %v5630_v36, %v5637_v49  ;;  %v22655_v30 = vcombine.low %v5644_v51, %v5651_v45  ;;  %28448 = vst [vmem:[#allocation336_spill] sm:$0xff] %v22661_v50  ;;  %v28455_v36 = vld [vmem:[#allocation227_spill] sm:$0xff] }
 0x2ec   :  { %28440 = vst [vmem:[#allocation116_spill] sm:$0xff] %v22641_v28  ;;  %28441 = vst [vmem:[#allocation117_spill] sm:$0xff] %v22643_v17  ;;  %v22657_v46 = vcombine.low %v5602_v32, %v5609_v37  ;;  %v22659_v41 = vcombine.low %v5616_v24, %v5623_v33  ;;  %16117 = vperm.xlu1 %18689, %v22255_v35   ;;  %v5700_v13 = vrot.slane %v28443_v63, %v19930_v4  ;;  %v28450_v37 = vld [vmem:[#allocation20_spill] sm:$0xff]  ;;  %v28451_v32 = vld [vmem:[#allocation119_spill] sm:$0xff] }
 0x2ed   :  { %28442 = vst [vmem:[#allocation148_spill] sm:$0xff] %v22645_v9  ;;  %28444 = vst [vmem:[#allocation224_spill] sm:$0xff] %v22653_v1  ;;  %v5707_v10 = vrot.slane %v28443_v63, %v19933_v38  ;;  %16150 = vperm.xlu0 %18688, %v22269_v19   ;;  %v22671_v62 = vcombine.low %v11455_v43, %v11462_v2  ;;  %v11302_v33 = vrot.slane %v28450_v37, %v19962_v25  ;;  %v28453_v19 = vld [vmem:[#allocation121_spill] sm:$0xff]  ;;  %v28456_v63 = vld [vmem:[#allocation122_spill] sm:$0xff]  ;;  %v22702_v37 = vpop.xlane.xlu0 %1229 }
 0x2ee   :  { %28445 = vst [vmem:[#allocation118_spill] sm:$0xff] %v22655_v30  ;;  %28446 = vst [vmem:[#allocation334_spill] sm:$0xff] %v22657_v46  ;;  %v5658_v56 = vrot.slane %v28451_v32, %v19918_v55  ;;  %v5665_v35 = vrot.slane %v28451_v32, %v19921_v47  ;;  %v5672_v40 = vrot.slane %v28451_v32, %v19930_v4  ;;  %v28454_v2 = vld [vmem:[#allocation21_spill] sm:$0xff] }
 0x2ef   :  { %28447 = vst [vmem:[#allocation335_spill] sm:$0xff] %v22659_v41  ;;  %28449 = vst [vmem:[#allocation337_spill] sm:$0xff] %v22664_v31  ;;  %v5679_v39 = vrot.slane %v28451_v32, %v19933_v38  ;;  %v22683_v59 = vcombine.low %v5686_v16, %v5693_v14  ;;  %v5742_v43 = vrot.slane %v28453_v19, %v19918_v55  ;;  %v22699_v14 = vpop.xlane.xlu1 %1232  ;;  %v28461_v41 = vld [vmem:[#allocation126_spill] sm:$0xff] }
 0x2f0   :  { %v11309_v57 = vrot.slane %v28454_v2, %v19962_v25  ;;  %v11489_v49 = vrot.slane %v28455_v36, %v19962_v25  ;;  %v5749_v51 = vrot.slane %v28453_v19, %v19921_v47  ;;  %v5756_v45 = vrot.slane %v28453_v19, %v19930_v4  ;;  %28457 = vst [vmem:[#allocation119_spill] sm:$0xff] %v22699_v14  ;;  %v28460_v14 = vld [vmem:[#allocation125_spill] sm:$0xff] }
 0x2f1   :  { %28452 = vst [vmem:[#allocation20_spill] sm:$0xff] %v22683_v59  ;;  %v5763_v24 = vrot.slane %v28453_v19, %v19933_v38  ;;  %v5714_v16 = vrot.slane %v28456_v63, %v19918_v55  ;;  %16123 = vperm.xlu1 %18689, %v22360_v60   ;;  %28458 = vst [vmem:[#allocation121_spill] sm:$0xff] %v22702_v37  ;;  %v5721_v32 = vrot.slane %v28456_v63, %v19921_v47  ;;  %v28459_v19 = vld [vmem:[#allocation228_spill] sm:$0xff]  ;;  %v22740_v59 = vpop.xlane.xlu0 %1235 }
 0x2f2   :  { %v5728_v2 = vrot.slane %v28456_v63, %v19930_v4  ;;  %v5735_v36 = vrot.slane %v28456_v63, %v19933_v38  ;;  %16156 = vperm.xlu0 %18688, %v22367_v48   ;;  %v11496_v31 = vrot.slane %v28459_v19, %v19962_v25  ;;  %v5798_v50 = vrot.slane %v28460_v14, %v19918_v55 }
 0x2f3   :  { %v5805_v60 = vrot.slane %v28460_v14, %v19921_v47  ;;  %v5812_v37 = vrot.slane %v28460_v14, %v19930_v4  ;;  %v5819_v29 = vrot.slane %v28460_v14, %v19933_v38  ;;  %v5770_v63 = vrot.slane %v28461_v41, %v19918_v55  ;;  %v22737_v14 = vpop.xlane.xlu1 %1238  ;;  %28465 = vst [vmem:[#allocation228_spill] sm:$0xff] %v22740_v59 }
 0x2f4   :  { %v5777_v48 = vrot.slane %v28461_v41, %v19921_v47  ;;  %v5784_v19 = vrot.slane %v28461_v41, %v19930_v4  ;;  %v5791_v46 = vrot.slane %v28461_v41, %v19933_v38  ;;  %v22729_v9 = vcombine.low %v5700_v13, %v5707_v10  ;;  %28464 = vst [vmem:[#allocation122_spill] sm:$0xff] %v22737_v14  ;;  %v28467_v41 = vld [vmem:[#allocation129_spill] sm:$0xff] }
 0x2f5   :  { %v22731_v17 = vcombine.low %v5742_v43, %v5749_v51  ;;  %v22733_v28 = vcombine.low %v5658_v56, %v5665_v35  ;;  %v22735_v44 = vcombine.low %v5672_v40, %v5679_v39  ;;  %16129 = vperm.xlu1 %18689, %v22453_v42   ;;  %v22742_v30 = vcombine.low %v5756_v45, %v5763_v24  ;;  %v28473_v45 = vld [vmem:[#allocation214_spill] sm:$0xff] }
 0x2f6   :  { %v22744_v1 = vcombine.low %v5714_v16, %v5721_v32  ;;  %v5854_v13 = vrot.slane %v28467_v41, %v19918_v55  ;;  %v5861_v10 = vrot.slane %v28467_v41, %v19921_v47  ;;  %16162 = vperm.xlu0 %18688, %v22472_v27   ;;  %v22751_v56 = vcombine.low %v5798_v50, %v5805_v60  ;;  %v28478_v32 = vld [vmem:[#allocation215_spill] sm:$0xff] }
 0x2f7   :  { %28462 = vst [vmem:[#allocation21_spill] sm:$0xff] %v22733_v28  ;;  %28463 = vst [vmem:[#allocation227_spill] sm:$0xff] %v22735_v44  ;;  %v22753_v35 = vcombine.low %v5812_v37, %v5819_v29  ;;  %v22755_v40 = vcombine.low %v5728_v2, %v5735_v36  ;;  %v11310_v42 = vcombine.low %v11302_v33, %v11309_v57  ;;  %v28474_v29 = vld [vmem:[#allocation130_spill] sm:$0xff]  ;;  %v22771_v57 = vpop.xlane.xlu1 %1244  ;;  %v28479_v36 = vld [vmem:[#allocation131_spill] sm:$0xff] }
 0x2f8   :  { %28466 = vst [vmem:[#allocation125_spill] sm:$0xff] %v22744_v1  ;;  %28468 = vst [vmem:[#allocation126_spill] sm:$0xff] %v22751_v56  ;;  %v22757_v39 = vcombine.low %v5770_v63, %v5777_v48  ;;  %v22759_v43 = vcombine.low %v5784_v19, %v5791_v46  ;;  %v11497_v51 = vcombine.low %v11489_v49, %v11496_v31  ;;  %v22774_v46 = vpop.xlane.xlu0 %1241  ;;  %v28480_v19 = vld [vmem:[#allocation132_spill] sm:$0xff]  ;;  %v28486_v1 = vld [vmem:[#allocation231_spill] sm:$0xff] }
 0x2f9   :  { %28469 = vst [vmem:[#allocation129_spill] sm:$0xff] %v22753_v35  ;;  %28470 = vst [vmem:[#allocation338_spill] sm:$0xff] %v22755_v40  ;;  %v11336_v24 = vrot.slane %v28473_v45, %v19962_v25  ;;  %v5868_v16 = vrot.slane %v28467_v41, %v19930_v4  ;;  %v5875_v27 = vrot.slane %v28467_v41, %v19933_v38  ;;  %16135 = vperm.xlu1 %18689, %v22559_v18   ;;  %v28481_v45 = vld [vmem:[#allocation133_spill] sm:$0xff] }
 0x2fa   :  { %28471 = vst [vmem:[#allocation339_spill] sm:$0xff] %v22757_v39  ;;  %28472 = vst [vmem:[#allocation340_spill] sm:$0xff] %v22759_v43  ;;  %v5826_v50 = vrot.slane %v28474_v29, %v19918_v55  ;;  %v5833_v33 = vrot.slane %v28474_v29, %v19921_v47  ;;  %v22776_v31 = vcombine.low %v5854_v13, %v5861_v10  ;;  %16168 = vperm.xlu0 %18688, %v22565_v22   ;;  %v28485_v39 = vld [vmem:[#allocation152_spill] sm:$0xff] }
 0x2fb   :  { %28475 = vst [vmem:[#allocation214_spill] sm:$0xff] %v22771_v57  ;;  %28476 = vst [vmem:[#allocation130_spill] sm:$0xff] %v22774_v46  ;;  %v5840_v49 = vrot.slane %v28474_v29, %v19930_v4  ;;  %v5847_v37 = vrot.slane %v28474_v29, %v19933_v38  ;;  %v11343_v2 = vrot.slane %v28478_v32, %v19962_v25  ;;  %v22809_v57 = vpop.xlane.xlu1 %1250 }
 0x2fc   :  { %28477 = vst [vmem:[#allocation341_spill] sm:$0xff] %v22776_v31  ;;  %v5910_v60 = vrot.slane %v28479_v36, %v19918_v55  ;;  %v5917_v18 = vrot.slane %v28479_v36, %v19921_v47  ;;  %v5924_v63 = vrot.slane %v28479_v36, %v19930_v4  ;;  %v5931_v48 = vrot.slane %v28479_v36, %v19933_v38  ;;  %v22812_v59 = vpop.xlane.xlu0 %1247 }
 0x2fd   :  { %v5882_v41 = vrot.slane %v28480_v19, %v19918_v55  ;;  %v5889_v22 = vrot.slane %v28480_v19, %v19921_v47  ;;  %v5896_v13 = vrot.slane %v28480_v19, %v19930_v4  ;;  %v5903_v10 = vrot.slane %v28480_v19, %v19933_v38  ;;  %28482 = vst [vmem:[#allocation215_spill] sm:$0xff] %v22809_v57  ;;  %v28484_v19 = vld [vmem:[#allocation134_spill] sm:$0xff] }
 0x2fe   :  { %v5966_v29 = vrot.slane %v28481_v45, %v19918_v55  ;;  %v5973_v32 = vrot.slane %v28481_v45, %v19921_v47  ;;  %v5980_v36 = vrot.slane %v28481_v45, %v19930_v4  ;;  %v5987_v46 = vrot.slane %v28481_v45, %v19933_v38  ;;  %16141 = vperm.xlu1 %18689, %v22651_v21  }
 0x2ff   :  { %28483 = vst [vmem:[#allocation131_spill] sm:$0xff] %v22812_v59  ;;  %v5938_v14 = vrot.slane %v28484_v19, %v19918_v55  ;;  %v5945_v43 = vrot.slane %v28484_v19, %v19921_v47  ;;  %16174 = vperm.xlu0 %18688, %v22671_v62   ;;  %v11523_v40 = vrot.slane %v28485_v39, %v19962_v25 }
 0x300   :  { %v11530_v45 = vrot.slane %v28486_v1, %v19962_v25  ;;  %v22823_v44 = vcombine.low %v5868_v16, %v5875_v27  ;;  %v22825_v57 = vcombine.low %v5910_v60, %v5917_v18  ;;  %v22827_v21 = vcombine.low %v5826_v50, %v5833_v33  ;;  %v22845_v27 = vpop.xlane.xlu1 %1256  ;;  %v22847_v50 = vpop.xlane.xlu0 %1253  ;;  %v28495_v33 = vld [vmem:[#allocation135_spill] sm:$0xff] }
 0x301   :  { %v22829_v59 = vcombine.low %v5840_v49, %v5847_v37  ;;  %v22831_v28 = vcombine.low %v5924_v63, %v5931_v48  ;;  %v22833_v31 = vcombine.low %v5882_v41, %v5889_v22  ;;  %v22835_v35 = vcombine.low %v5896_v13, %v5903_v10  ;;  %28493 = vst [vmem:[#allocation343_spill] sm:$0xff] %v22845_v27  ;;  %v28498_v63 = vld [vmem:[#allocation219_spill] sm:$0xff]  ;;  %v28501_v22 = vld [vmem:[#allocation33_spill] sm:$0xff] }
 0x302   :  { %28487 = vst [vmem:[#allocation132_spill] sm:$0xff] %v22827_v21  ;;  %v11344_v62 = vcombine.low %v11336_v24, %v11343_v2  ;;  %v22837_v56 = vcombine.low %v5966_v29, %v5973_v32  ;;  %v22839_v39 = vcombine.low %v5980_v36, %v5987_v46  ;;  %v5952_v1 = vrot.slane %v28484_v19, %v19930_v4  ;;  %v28497_v46 = vld [vmem:[#allocation218_spill] sm:$0xff]  ;;  %v28502_v10 = vld [vmem:[#allocation137_spill] sm:$0xff] }
 0x303   :  { %28488 = vst [vmem:[#allocation133_spill] sm:$0xff] %v22829_v59  ;;  %28489 = vst [vmem:[#allocation134_spill] sm:$0xff] %v22833_v31  ;;  %v5959_v16 = vrot.slane %v28484_v19, %v19933_v38  ;;  %16147 = vperm.xlu1 %18689, %v11310_v42   ;;  %v6022_v49 = vrot.slane %v28495_v33, %v19918_v55  ;;  %v22851_v37 = vcombine.low %v5938_v14, %v5945_v43  ;;  %v28499_v14 = vld [vmem:[#allocation136_spill] sm:$0xff]  ;;  %v28511_v21 = vld [vmem:[#allocation238_spill] sm:$0xff] }
 0x304   :  { %28490 = vst [vmem:[#allocation152_spill] sm:$0xff] %v22835_v35  ;;  %28491 = vst [vmem:[#allocation231_spill] sm:$0xff] %v22837_v56  ;;  %16180 = vperm.xlu0 %18688, %v11497_v51   ;;  %v11531_v24 = vcombine.low %v11523_v40, %v11530_v45  ;;  %v11370_v2 = vrot.slane %v28497_v46, %v19962_v25  ;;  %v6029_v60 = vrot.slane %v28495_v33, %v19921_v47  ;;  %v28500_v51 = vld [vmem:[#allocation32_spill] sm:$0xff]  ;;  %v22879_v45 = vpop.xlane.xlu1 %1262 }
 0x305   :  { %28492 = vst [vmem:[#allocation342_spill] sm:$0xff] %v22839_v39  ;;  %28494 = vst [vmem:[#allocation344_spill] sm:$0xff] %v22847_v50  ;;  %v6036_v18 = vrot.slane %v28495_v33, %v19930_v4  ;;  %v6043_v42 = vrot.slane %v28495_v33, %v19933_v38  ;;  %v11377_v48 = vrot.slane %v28498_v63, %v19962_v25  ;;  %v22881_v33 = vpop.xlane.xlu0 %1259 }
 0x306   :  { %28496 = vst [vmem:[#allocation135_spill] sm:$0xff] %v22851_v37  ;;  %v5994_v43 = vrot.slane %v28499_v14, %v19918_v55  ;;  %v6001_v40 = vrot.slane %v28499_v14, %v19921_v47  ;;  %v11557_v41 = vrot.slane %v28500_v51, %v19962_v25  ;;  %v11564_v13 = vrot.slane %v28501_v22, %v19962_v25  ;;  %v28505_v51 = vld [vmem:[#allocation138_spill] sm:$0xff] }
 0x307   :  { %v6078_v29 = vrot.slane %v28502_v10, %v19918_v55  ;;  %v6085_v32 = vrot.slane %v28502_v10, %v19921_v47  ;;  %v6008_v36 = vrot.slane %v28499_v14, %v19930_v4  ;;  %v6015_v19 = vrot.slane %v28499_v14, %v19933_v38  ;;  %28503 = vst [vmem:[#allocation218_spill] sm:$0xff] %v22879_v45 }
 0x308   :  { %16153 = vperm.xlu1 %18689, %v11344_v62   ;;  %28504 = vst [vmem:[#allocation219_spill] sm:$0xff] %v22881_v33  ;;  %v6092_v46 = vrot.slane %v28502_v10, %v19930_v4  ;;  %v6099_v63 = vrot.slane %v28502_v10, %v19933_v38  ;;  %v6050_v22 = vrot.slane %v28505_v51, %v19918_v55  ;;  %v28507_v62 = vld [vmem:[#allocation222_spill] sm:$0xff]  ;;  %v28508_v33 = vld [vmem:[#allocation223_spill] sm:$0xff]  ;;  %v28510_v10 = vld [vmem:[#allocation236_spill] sm:$0xff] }
 0x309   :  { %v6057_v50 = vrot.slane %v28505_v51, %v19921_v47  ;;  %16186 = vperm.xlu0 %18688, %v11531_v24   ;;  %v22891_v27 = vcombine.low %v5952_v1, %v5959_v16  ;;  %v11378_v14 = vcombine.low %v11370_v2, %v11377_v48  ;;  %v11404_v45 = vrot.slane %v28507_v62, %v19962_v25  ;;  %v22911_v2 = vpop.xlane.xlu1 %1268 }
 0x30a   :  { %v11411_v37 = vrot.slane %v28508_v33, %v19962_v25  ;;  %v22897_v35 = vcombine.low %v6022_v49, %v6029_v60  ;;  %v11565_v31 = vcombine.low %v11557_v41, %v11564_v13  ;;  %v11591_v59 = vrot.slane %v28510_v10, %v19962_v25  ;;  %28515 = vst [vmem:[#allocation222_spill] sm:$0xff] %v22911_v2  ;;  %v22913_v49 = vpop.xlane.xlu0 %1265  ;;  %v28521_v41 = vld [vmem:[#allocation26_spill] sm:$0xff]  ;;  %v28523_v33 = vld [vmem:[#allocation36_spill] sm:$0xff] }
 0x30b   :  { %28506 = vst [vmem:[#allocation136_spill] sm:$0xff] %v22891_v27  ;;  %v11598_v39 = vrot.slane %v28511_v21, %v19962_v25  ;;  %v22903_v56 = vcombine.low %v6036_v18, %v6043_v42  ;;  %v22905_v1 = vcombine.low %v5994_v43, %v6001_v40  ;;  %v22907_v16 = vcombine.low %v6008_v36, %v6015_v19  ;;  %v28520_v42 = vld [vmem:[#allocation143_spill] sm:$0xff] }
 0x30c   :  { %28509 = vst [vmem:[#allocation32_spill] sm:$0xff] %v22897_v35  ;;  %v6064_v24 = vrot.slane %v28505_v51, %v19930_v4  ;;  %16159 = vperm.xlu1 %18689, %v11378_v14   ;;  %28516 = vst [vmem:[#allocation223_spill] sm:$0xff] %v22913_v49  ;;  %v22915_v60 = vcombine.low %v6078_v29, %v6085_v32  ;;  %v22917_v48 = vcombine.low %v6092_v46, %v6099_v63  ;;  %v28522_v36 = vld [vmem:[#allocation27_spill] sm:$0xff] }
 0x30d   :  { %28512 = vst [vmem:[#allocation33_spill] sm:$0xff] %v22903_v56  ;;  %28513 = vst [vmem:[#allocation137_spill] sm:$0xff] %v22905_v1  ;;  %v6071_v21 = vrot.slane %v28505_v51, %v19933_v38  ;;  %v22921_v18 = vcombine.low %v6050_v22, %v6057_v50  ;;  %16192 = vperm.xlu0 %18688, %v11565_v31   ;;  %v6134_v43 = vrot.slane %v28520_v42, %v19918_v55  ;;  %v28524_v50 = vld [vmem:[#allocation157_spill] sm:$0xff]  ;;  %v22943_v14 = vpop.xlane.xlu1 %1274  ;;  %v28533_v1 = vld [vmem:[#allocation147_spill] sm:$0xff] }
 0x30e   :  { %28514 = vst [vmem:[#allocation138_spill] sm:$0xff] %v22907_v16  ;;  %28517 = vst [vmem:[#allocation236_spill] sm:$0xff] %v22915_v60  ;;  %v11412_v40 = vcombine.low %v11404_v45, %v11411_v37  ;;  %v11438_v13 = vrot.slane %v28521_v41, %v19962_v25  ;;  %v11445_v19 = vrot.slane %v28522_v36, %v19962_v25  ;;  %v28525_v45 = vld [vmem:[#allocation144_spill] sm:$0xff] }
 0x30f   :  { %28518 = vst [vmem:[#allocation238_spill] sm:$0xff] %v22917_v48  ;;  %28519 = vst [vmem:[#allocation345_spill] sm:$0xff] %v22921_v18  ;;  %v6141_v29 = vrot.slane %v28520_v42, %v19921_v47  ;;  %v11599_v32 = vcombine.low %v11591_v59, %v11598_v39  ;;  %v11625_v46 = vrot.slane %v28523_v33, %v19962_v25  ;;  %v22945_v59 = vpop.xlane.xlu0 %1271  ;;  %v28528_v39 = vld [vmem:[#allocation146_spill] sm:$0xff]  ;;  %v28531_v18 = vld [vmem:[#allocation243_spill] sm:$0xff] }
 0x310   :  { %v11632_v31 = vrot.slane %v28524_v50, %v19962_v25  ;;  %v6148_v63 = vrot.slane %v28520_v42, %v19930_v4  ;;  %v6155_v37 = vrot.slane %v28520_v42, %v19933_v38  ;;  %v6106_v51 = vrot.slane %v28525_v45, %v19918_v55  ;;  %28526 = vst [vmem:[#allocation143_spill] sm:$0xff] %v22943_v14  ;;  %v28541_v56 = vld [vmem:[#allocation232_spill] sm:$0xff] }
 0x311   :  { %v6113_v22 = vrot.slane %v28525_v45, %v19921_v47  ;;  %16165 = vperm.xlu1 %18689, %v11412_v40   ;;  %28527 = vst [vmem:[#allocation26_spill] sm:$0xff] %v22945_v59  ;;  %v6190_v62 = vrot.slane %v28528_v39, %v19918_v55  ;;  %v6197_v10 = vrot.slane %v28528_v39, %v19921_v47  ;;  %v28529_v40 = vld [vmem:[#allocation229_spill] sm:$0xff]  ;;  %v28530_v59 = vld [vmem:[#allocation230_spill] sm:$0xff] }
 0x312   :  { %v6120_v42 = vrot.slane %v28525_v45, %v19930_v4  ;;  %v6127_v41 = vrot.slane %v28525_v45, %v19933_v38  ;;  %16198 = vperm.xlu0 %18688, %v11599_v32   ;;  %v6204_v36 = vrot.slane %v28528_v39, %v19930_v4  ;;  %v11446_v33 = vcombine.low %v11438_v13, %v11445_v19  ;;  %v28532_v45 = vld [vmem:[#allocation38_spill] sm:$0xff] }
 0x313   :  { %v11472_v50 = vrot.slane %v28529_v40, %v19962_v25  ;;  %v11479_v14 = vrot.slane %v28530_v59, %v19962_v25  ;;  %v6211_v49 = vrot.slane %v28528_v39, %v19933_v38  ;;  %v11633_v2 = vcombine.low %v11625_v46, %v11632_v31  ;;  %v22975_v39 = vpop.xlane.xlu1 %1280  ;;  %v22977_v46 = vpop.xlane.xlu0 %1277 }
 0x314   :  { %v11659_v16 = vrot.slane %v28531_v18, %v19962_v25  ;;  %v11666_v32 = vrot.slane %v28532_v45, %v19962_v25  ;;  %v6162_v27 = vrot.slane %v28533_v1, %v19918_v55  ;;  %v6169_v13 = vrot.slane %v28533_v1, %v19921_v47  ;;  %28534 = vst [vmem:[#allocation27_spill] sm:$0xff] %v22975_v39  ;;  %v28542_v39 = vld [vmem:[#allocation234_spill] sm:$0xff] }
 0x315   :  { %v6176_v19 = vrot.slane %v28533_v1, %v19930_v4  ;;  %v6183_v59 = vrot.slane %v28533_v1, %v19933_v38  ;;  %16171 = vperm.xlu1 %18689, %v11446_v33   ;;  %28535 = vst [vmem:[#allocation36_spill] sm:$0xff] %v22977_v46  ;;  %v22979_v18 = vcombine.low %v6134_v43, %v6141_v29  ;;  %v28544_v29 = vld [vmem:[#allocation249_spill] sm:$0xff] }
 0x316   :  { %v22981_v31 = vcombine.low %v6148_v63, %v6155_v37  ;;  %v22983_v40 = vcombine.low %v6064_v24, %v6071_v21  ;;  %v22985_v45 = vcombine.low %v6106_v51, %v6113_v22  ;;  %16204 = vperm.xlu0 %18688, %v11633_v2   ;;  %v22987_v48 = vcombine.low %v6120_v42, %v6127_v41  ;;  %v28545_v24 = vld [vmem:[#allocation250_spill] sm:$0xff]  ;;  %v28552_v42 = vld [vmem:[#allocation151_spill] sm:$0xff] }
 0x317   :  { %28536 = vst [vmem:[#allocation157_spill] sm:$0xff] %v22979_v18  ;;  %v11480_v60 = vcombine.low %v11472_v50, %v11479_v14  ;;  %v11506_v1 = vrot.slane %v28541_v56, %v19962_v25  ;;  %v11513_v33 = vrot.slane %v28542_v39, %v19962_v25  ;;  %v22993_v35 = vcombine.low %v6190_v62, %v6197_v10  ;;  %v28547_v2 = vld [vmem:[#allocation150_spill] sm:$0xff]  ;;  %v23007_v14 = vpop.xlane.xlu1 %1286  ;;  %v23009_v62 = vpop.xlane.xlu0 %1283 }
 0x318   :  { %28537 = vst [vmem:[#allocation144_spill] sm:$0xff] %v22981_v31  ;;  %28538 = vst [vmem:[#allocation146_spill] sm:$0xff] %v22983_v40  ;;  %v11667_v43 = vcombine.low %v11659_v16, %v11666_v32  ;;  %v11693_v63 = vrot.slane %v28544_v29, %v19962_v25  ;;  %v11700_v21 = vrot.slane %v28545_v24, %v19962_v25  ;;  %v28554_v32 = vld [vmem:[#allocation237_spill] sm:$0xff]  ;;  %v28555_v39 = vld [vmem:[#allocation42_spill] sm:$0xff] }
 0x319   :  { %28539 = vst [vmem:[#allocation229_spill] sm:$0xff] %v22985_v45  ;;  %28540 = vst [vmem:[#allocation230_spill] sm:$0xff] %v22987_v48  ;;  %v22999_v37 = vcombine.low %v6204_v36, %v6211_v49  ;;  %v6246_v51 = vrot.slane %v28547_v2, %v19918_v55  ;;  %v23003_v22 = vcombine.low %v6162_v27, %v6169_v13  ;;  %16177 = vperm.xlu1 %18689, %v11480_v60   ;;  %v28553_v60 = vld [vmem:[#allocation235_spill] sm:$0xff]  ;;  %v28556_v24 = vld [vmem:[#allocation254_spill] sm:$0xff] }
 0x31a   :  { %28543 = vst [vmem:[#allocation243_spill] sm:$0xff] %v22993_v35  ;;  %v23005_v56 = vcombine.low %v6176_v19, %v6183_v59  ;;  %28550 = vst [vmem:[#allocation234_spill] sm:$0xff] %v23007_v14  ;;  %v6253_v16 = vrot.slane %v28547_v2, %v19921_v47  ;;  %v6260_v10 = vrot.slane %v28547_v2, %v19930_v4  ;;  %16210 = vperm.xlu0 %18688, %v11667_v43   ;;  %v28564_v45 = vld [vmem:[#allocation257_spill] sm:$0xff] }
 0x31b   :  { %28546 = vst [vmem:[#allocation38_spill] sm:$0xff] %v22999_v37  ;;  %28548 = vst [vmem:[#allocation147_spill] sm:$0xff] %v23003_v22  ;;  %v6267_v49 = vrot.slane %v28547_v2, %v19933_v38  ;;  %v6218_v27 = vrot.slane %v28552_v42, %v19918_v55  ;;  %v6225_v41 = vrot.slane %v28552_v42, %v19921_v47  ;;  %v28557_v2 = vld [vmem:[#allocation154_spill] sm:$0xff] }
 0x31c   :  { %28549 = vst [vmem:[#allocation232_spill] sm:$0xff] %v23005_v56  ;;  %28551 = vst [vmem:[#allocation249_spill] sm:$0xff] %v23009_v62  ;;  %v11514_v36 = vcombine.low %v11506_v1, %v11513_v33  ;;  %v11540_v50 = vrot.slane %v28553_v60, %v19962_v25  ;;  %v11547_v13 = vrot.slane %v28554_v32, %v19962_v25  ;;  %v23039_v32 = vpop.xlane.xlu1 %1292  ;;  %v28562_v56 = vld [vmem:[#allocation34_spill] sm:$0xff] }
 0x31d   :  { %v6232_v19 = vrot.slane %v28552_v42, %v19930_v4  ;;  %v11701_v59 = vcombine.low %v11693_v63, %v11700_v21  ;;  %v11727_v29 = vrot.slane %v28555_v39, %v19962_v25  ;;  %v11734_v43 = vrot.slane %v28556_v24, %v19962_v25  ;;  %28558 = vst [vmem:[#allocation250_spill] sm:$0xff] %v23039_v32  ;;  %v23041_v63 = vpop.xlane.xlu0 %1289  ;;  %v28560_v39 = vld [vmem:[#allocation155_spill] sm:$0xff]  ;;  %v28565_v37 = vld [vmem:[#allocation258_spill] sm:$0xff] }
 0x31e   :  { %v6302_v62 = vrot.slane %v28557_v2, %v19918_v55  ;;  %v6309_v1 = vrot.slane %v28557_v2, %v19921_v47  ;;  %v6316_v33 = vrot.slane %v28557_v2, %v19930_v4  ;;  %v6239_v60 = vrot.slane %v28552_v42, %v19933_v38  ;;  %16183 = vperm.xlu1 %18689, %v11514_v36   ;;  %v28561_v36 = vld [vmem:[#allocation239_spill] sm:$0xff] }
 0x31f   :  { %28559 = vst [vmem:[#allocation150_spill] sm:$0xff] %v23041_v63  ;;  %v6323_v21 = vrot.slane %v28557_v2, %v19933_v38  ;;  %v6274_v24 = vrot.slane %v28560_v39, %v19918_v55  ;;  %v6281_v14 = vrot.slane %v28560_v39, %v19921_v47  ;;  %v6288_v46 = vrot.slane %v28560_v39, %v19930_v4 }
 0x320   :  { %16216 = vperm.xlu0 %18688, %v11701_v59   ;;  %v6295_v42 = vrot.slane %v28560_v39, %v19933_v38  ;;  %v11548_v32 = vcombine.low %v11540_v50, %v11547_v13  ;;  %v11574_v63 = vrot.slane %v28561_v36, %v19962_v25  ;;  %v11581_v2 = vrot.slane %v28562_v56, %v19962_v25  ;;  %v23071_v39 = vpop.xlane.xlu1 %1298  ;;  %v28572_v56 = vld [vmem:[#allocation158_spill] sm:$0xff] }
 0x321   :  { %v23057_v22 = vcombine.low %v6246_v51, %v6253_v16  ;;  %v11735_v48 = vcombine.low %v11727_v29, %v11734_v43  ;;  %v11761_v40 = vrot.slane %v28564_v45, %v19962_v25  ;;  %v11768_v35 = vrot.slane %v28565_v37, %v19962_v25  ;;  %28570 = vst [vmem:[#allocation154_spill] sm:$0xff] %v23071_v39 }
 0x322   :  { %v23063_v59 = vcombine.low %v6260_v10, %v6267_v49  ;;  %v23065_v31 = vcombine.low %v6302_v62, %v6309_v1  ;;  %v23067_v50 = vcombine.low %v6218_v27, %v6225_v41  ;;  %v23069_v13 = vcombine.low %v6232_v19, %v6239_v60  ;;  %16189 = vperm.xlu1 %18689, %v11548_v32   ;;  %v23083_v49 = vpop.xlane.xlu0 %1295  ;;  %v28576_v27 = vld [vmem:[#allocation37_spill] sm:$0xff]  ;;  %v28577_v19 = vld [vmem:[#allocation242_spill] sm:$0xff]  ;;  %v28580_v32 = vld [vmem:[#allocation159_spill] sm:$0xff] }
 0x323   :  { %28563 = vst [vmem:[#allocation151_spill] sm:$0xff] %v23057_v22  ;;  %v23073_v51 = vcombine.low %v6316_v33, %v6323_v21  ;;  %v6358_v16 = vrot.slane %v28572_v56, %v19918_v55  ;;  %v6365_v45 = vrot.slane %v28572_v56, %v19921_v47  ;;  %v23079_v37 = vcombine.low %v6274_v24, %v6281_v14  ;;  %v28578_v33 = vld [vmem:[#allocation259_spill] sm:$0xff] }
 0x324   :  { %28566 = vst [vmem:[#allocation235_spill] sm:$0xff] %v23063_v59  ;;  %28567 = vst [vmem:[#allocation237_spill] sm:$0xff] %v23065_v31  ;;  %16222 = vperm.xlu0 %18688, %v11735_v48   ;;  %v23081_v62 = vcombine.low %v6288_v46, %v6295_v42  ;;  %v11582_v10 = vcombine.low %v11574_v63, %v11581_v2  ;;  %v11608_v41 = vrot.slane %v28576_v27, %v19962_v25  ;;  %v28579_v48 = vld [vmem:[#allocation260_spill] sm:$0xff]  ;;  %v23103_v42 = vpop.permute.xlu1 %16024 }
 0x325   :  { %28568 = vst [vmem:[#allocation42_spill] sm:$0xff] %v23067_v50  ;;  %28569 = vst [vmem:[#allocation254_spill] sm:$0xff] %v23069_v13  ;;  %v11615_v29 = vrot.slane %v28577_v19, %v19962_v25  ;;  %v6372_v43 = vrot.slane %v28572_v56, %v19930_v4  ;;  %v11769_v1 = vcombine.low %v11761_v40, %v11768_v35  ;;  %v28583_v40 = vld [vmem:[#allocation162_spill] sm:$0xff]  ;;  %v28595_v13 = vld [vmem:[#allocation165_spill] sm:$0xff] }
 0x326   :  { %28571 = vst [vmem:[#allocation155_spill] sm:$0xff] %v23073_v51  ;;  %28573 = vst [vmem:[#allocation239_spill] sm:$0xff] %v23079_v37  ;;  %v11795_v14 = vrot.slane %v28578_v33, %v19962_v25  ;;  %v11802_v46 = vrot.slane %v28579_v48, %v19962_v25  ;;  %v6379_v60 = vrot.slane %v28572_v56, %v19933_v38  ;;  %16195 = vperm.xlu1 %18689, %v11582_v10   ;;  %v28584_v33 = vld [vmem:[#allocation246_spill] sm:$0xff] }
 0x327   :  { %28574 = vst [vmem:[#allocation34_spill] sm:$0xff] %v23081_v62  ;;  %28575 = vst [vmem:[#allocation257_spill] sm:$0xff] %v23083_v49  ;;  %v6330_v63 = vrot.slane %v28580_v32, %v19918_v55  ;;  %v6337_v21 = vrot.slane %v28580_v32, %v19921_v47  ;;  %v6344_v24 = vrot.slane %v28580_v32, %v19930_v4  ;;  %v28586_v49 = vld [vmem:[#allocation265_spill] sm:$0xff]  ;;  %v28588_v62 = vld [vmem:[#allocation163_spill] sm:$0xff] }
 0x328   :  { %28581 = vst [vmem:[#allocation258_spill] sm:$0xff] %v23103_v42  ;;  %v23105_v35 = vcombine.low %v6358_v16, %v6365_v45  ;;  %v6414_v36 = vrot.slane %v28583_v40, %v19918_v55  ;;  %v6421_v2 = vrot.slane %v28583_v40, %v19921_v47  ;;  %v6351_v56 = vrot.slane %v28580_v32, %v19933_v38  ;;  %v28585_v16 = vld [vmem:[#allocation247_spill] sm:$0xff]  ;;  %v28587_v32 = vld [vmem:[#allocation266_spill] sm:$0xff] }
 0x329   :  { %16228 = vperm.xlu0 %18688, %v11769_v1   ;;  %v6428_v27 = vrot.slane %v28583_v40, %v19930_v4  ;;  %v11616_v19 = vcombine.low %v11608_v41, %v11615_v29  ;;  %v11642_v48 = vrot.slane %v28584_v33, %v19962_v25  ;;  %v11649_v45 = vrot.slane %v28585_v16, %v19962_v25 }
 0x32a   :  { %28582 = vst [vmem:[#allocation158_spill] sm:$0xff] %v23105_v35  ;;  %v6435_v10 = vrot.slane %v28583_v40, %v19933_v38  ;;  %v11803_v39 = vcombine.low %v11795_v14, %v11802_v46  ;;  %v11829_v42 = vrot.slane %v28586_v49, %v19962_v25  ;;  %v11836_v1 = vrot.slane %v28587_v32, %v19962_v25  ;;  %v23133_v40 = vpop.permute.xlu1 %16027  ;;  %v23135_v14 = vpop.permute.xlu0 %16021 }
 0x32b   :  { %v6386_v37 = vrot.slane %v28588_v62, %v19918_v55  ;;  %v6393_v41 = vrot.slane %v28588_v62, %v19921_v47  ;;  %v6400_v29 = vrot.slane %v28588_v62, %v19930_v4  ;;  %v6407_v33 = vrot.slane %v28588_v62, %v19933_v38  ;;  %28589 = vst [vmem:[#allocation37_spill] sm:$0xff] %v23133_v40  ;;  %v28596_v62 = vld [vmem:[#allocation40_spill] sm:$0xff] }
 0x32c   :  { %16201 = vperm.xlu1 %18689, %v11616_v19   ;;  %28590 = vst [vmem:[#allocation242_spill] sm:$0xff] %v23135_v14  ;;  %v23137_v49 = vcombine.low %v6372_v43, %v6379_v60  ;;  %v23139_v46 = vcombine.low %v6414_v36, %v6421_v2  ;;  %v23141_v16 = vcombine.low %v6330_v63, %v6337_v21  ;;  %v28597_v19 = vld [vmem:[#allocation41_spill] sm:$0xff]  ;;  %v28610_v14 = vld [vmem:[#allocation274_spill] sm:$0xff] }
 0x32d   :  { %v23143_v32 = vcombine.low %v6344_v24, %v6351_v56  ;;  %16234 = vperm.xlu0 %18688, %v11803_v39   ;;  %v6470_v50 = vrot.slane %v28595_v13, %v19918_v55  ;;  %v11650_v35 = vcombine.low %v11642_v48, %v11649_v45  ;;  %v11676_v51 = vrot.slane %v28596_v62, %v19962_v25  ;;  %v28598_v63 = vld [vmem:[#allocation49_spill] sm:$0xff]  ;;  %v28599_v24 = vld [vmem:[#allocation50_spill] sm:$0xff] }
 0x32e   :  { %28591 = vst [vmem:[#allocation259_spill] sm:$0xff] %v23137_v49  ;;  %28592 = vst [vmem:[#allocation260_spill] sm:$0xff] %v23139_v46  ;;  %v11683_v40 = vrot.slane %v28597_v19, %v19962_v25  ;;  %v6477_v43 = vrot.slane %v28595_v13, %v19921_v47  ;;  %v11837_v60 = vcombine.low %v11829_v42, %v11836_v1  ;;  %v23165_v45 = vpop.permute.xlu1 %16030  ;;  %v23167_v62 = vpop.permute.xlu0 %16048  ;;  %v28605_v1 = vld [vmem:[#allocation166_spill] sm:$0xff] }
 0x32f   :  { %28593 = vst [vmem:[#allocation159_spill] sm:$0xff] %v23141_v16  ;;  %28594 = vst [vmem:[#allocation162_spill] sm:$0xff] %v23143_v32  ;;  %v11863_v21 = vrot.slane %v28598_v63, %v19962_v25  ;;  %v11870_v39 = vrot.slane %v28599_v24, %v19962_v25  ;;  %v23157_v36 = vcombine.low %v6428_v27, %v6435_v10  ;;  %v28620_v49 = vld [vmem:[#allocation278_spill] sm:$0xff] }
 0x330   :  { %v6484_v2 = vrot.slane %v28595_v13, %v19930_v4  ;;  %v23161_v56 = vcombine.low %v6386_v37, %v6393_v41  ;;  %v23163_v48 = vcombine.low %v6400_v29, %v6407_v33  ;;  %28603 = vst [vmem:[#allocation266_spill] sm:$0xff] %v23165_v45  ;;  %16207 = vperm.xlu1 %18689, %v11650_v35   ;;  %28604 = vst [vmem:[#allocation163_spill] sm:$0xff] %v23167_v62  ;;  %v28606_v35 = vld [vmem:[#allocation255_spill] sm:$0xff]  ;;  %v28607_v33 = vld [vmem:[#allocation161_spill] sm:$0xff] }
 0x331   :  { %28600 = vst [vmem:[#allocation246_spill] sm:$0xff] %v23157_v36  ;;  %v6491_v42 = vrot.slane %v28595_v13, %v19933_v38  ;;  %v6442_v19 = vrot.slane %v28605_v1, %v19918_v55  ;;  %v6449_v27 = vrot.slane %v28605_v1, %v19921_v47  ;;  %v6456_v37 = vrot.slane %v28605_v1, %v19930_v4  ;;  %v28609_v62 = vld [vmem:[#allocation273_spill] sm:$0xff] }
 0x332   :  { %28601 = vst [vmem:[#allocation247_spill] sm:$0xff] %v23161_v56  ;;  %28602 = vst [vmem:[#allocation265_spill] sm:$0xff] %v23163_v48  ;;  %16240 = vperm.xlu0 %18688, %v11837_v60   ;;  %v6463_v10 = vrot.slane %v28605_v1, %v19933_v38  ;;  %v11684_v41 = vcombine.low %v11676_v51, %v11683_v40  ;;  %v11710_v29 = vrot.slane %v28606_v35, %v19962_v25  ;;  %v28611_v60 = vld [vmem:[#allocation167_spill] sm:$0xff]  ;;  %v28619_v36 = vld [vmem:[#allocation277_spill] sm:$0xff] }
 0x333   :  { %v11717_v13 = vrot.slane %v28607_v33, %v19962_v25  ;;  %v23183_v63 = vcombine.low %v6470_v50, %v6477_v43  ;;  %v11871_v24 = vcombine.low %v11863_v21, %v11870_v39  ;;  %v11897_v45 = vrot.slane %v28609_v62, %v19962_v25  ;;  %v23197_v43 = vpop.permute.xlu1 %16033  ;;  %v23199_v21 = vpop.permute.xlu0 %16054  ;;  %v28614_v39 = vld [vmem:[#allocation168_spill] sm:$0xff] }
 0x334   :  { %v11904_v48 = vrot.slane %v28610_v14, %v19962_v25  ;;  %v6526_v56 = vrot.slane %v28611_v60, %v19918_v55  ;;  %v6533_v51 = vrot.slane %v28611_v60, %v19921_v47  ;;  %v6540_v40 = vrot.slane %v28611_v60, %v19930_v4  ;;  %28612 = vst [vmem:[#allocation40_spill] sm:$0xff] %v23197_v43 }
 0x335   :  { %28608 = vst [vmem:[#allocation165_spill] sm:$0xff] %v23183_v63  ;;  %v6547_v50 = vrot.slane %v28611_v60, %v19933_v38  ;;  %16213 = vperm.xlu1 %18689, %v11684_v41   ;;  %28613 = vst [vmem:[#allocation41_spill] sm:$0xff] %v23199_v21  ;;  %v6498_v14 = vrot.slane %v28614_v39, %v19918_v55  ;;  %v6505_v62 = vrot.slane %v28614_v39, %v19921_v47  ;;  %v28616_v41 = vld [vmem:[#allocation46_spill] sm:$0xff]  ;;  %v28617_v21 = vld [vmem:[#allocation47_spill] sm:$0xff] }
 0x336   :  { %v6512_v1 = vrot.slane %v28614_v39, %v19930_v4  ;;  %v6519_v35 = vrot.slane %v28614_v39, %v19933_v38  ;;  %16246 = vperm.xlu0 %18688, %v11871_v24   ;;  %v23209_v33 = vcombine.low %v6484_v2, %v6491_v42  ;;  %v11718_v60 = vcombine.low %v11710_v29, %v11717_v13  ;;  %v28623_v42 = vld [vmem:[#allocation170_spill] sm:$0xff] }
 0x337   :  { %v11744_v43 = vrot.slane %v28616_v41, %v19962_v25  ;;  %v11751_v32 = vrot.slane %v28617_v21, %v19962_v25  ;;  %v23215_v16 = vcombine.low %v6442_v19, %v6449_v27  ;;  %v11905_v63 = vcombine.low %v11897_v45, %v11904_v48  ;;  %v23229_v24 = vpop.permute.xlu1 %16036  ;;  %v23231_v48 = vpop.permute.xlu0 %16060 }
 0x338   :  { %28615 = vst [vmem:[#allocation49_spill] sm:$0xff] %v23209_v33  ;;  %v11931_v46 = vrot.slane %v28619_v36, %v19962_v25  ;;  %v11938_v31 = vrot.slane %v28620_v49, %v19962_v25  ;;  %v23221_v39 = vcombine.low %v6526_v56, %v6533_v51  ;;  %v23223_v2 = vcombine.low %v6456_v37, %v6463_v10  ;;  %v28629_v37 = vld [vmem:[#allocation263_spill] sm:$0xff]  ;;  %v28630_v51 = vld [vmem:[#allocation264_spill] sm:$0xff] }
 0x339   :  { %28618 = vst [vmem:[#allocation50_spill] sm:$0xff] %v23215_v16  ;;  %v6582_v29 = vrot.slane %v28623_v42, %v19918_v55  ;;  %v6589_v13 = vrot.slane %v28623_v42, %v19921_v47  ;;  %28624 = vst [vmem:[#allocation161_spill] sm:$0xff] %v23229_v24  ;;  %16219 = vperm.xlu1 %18689, %v11718_v60   ;;  %v23233_v45 = vcombine.low %v6540_v40, %v6547_v50  ;;  %v28631_v40 = vld [vmem:[#allocation171_spill] sm:$0xff] }
 0x33a   :  { %28621 = vst [vmem:[#allocation166_spill] sm:$0xff] %v23221_v39  ;;  %28622 = vst [vmem:[#allocation255_spill] sm:$0xff] %v23223_v2  ;;  %v6596_v49 = vrot.slane %v28623_v42, %v19930_v4  ;;  %v23237_v36 = vcombine.low %v6498_v14, %v6505_v62  ;;  %v23239_v56 = vcombine.low %v6512_v1, %v6519_v35  ;;  %16252 = vperm.xlu0 %18688, %v11905_v63   ;;  %v28632_v14 = vld [vmem:[#allocation281_spill] sm:$0xff]  ;;  %v28633_v1 = vld [vmem:[#allocation282_spill] sm:$0xff] }
 0x33b   :  { %28625 = vst [vmem:[#allocation273_spill] sm:$0xff] %v23231_v48  ;;  %28626 = vst [vmem:[#allocation274_spill] sm:$0xff] %v23233_v45  ;;  %v6603_v19 = vrot.slane %v28623_v42, %v19933_v38  ;;  %v11752_v27 = vcombine.low %v11744_v43, %v11751_v32  ;;  %v11778_v10 = vrot.slane %v28629_v37, %v19962_v25  ;;  %v23261_v42 = vpop.permute.xlu1 %16039  ;;  %v28640_v48 = vld [vmem:[#allocation268_spill] sm:$0xff] }
 0x33c   :  { %28627 = vst [vmem:[#allocation167_spill] sm:$0xff] %v23237_v36  ;;  %28628 = vst [vmem:[#allocation168_spill] sm:$0xff] %v23239_v56  ;;  %v11785_v21 = vrot.slane %v28630_v51, %v19962_v25  ;;  %v6554_v50 = vrot.slane %v28631_v40, %v19918_v55  ;;  %v11939_v60 = vcombine.low %v11931_v46, %v11938_v31  ;;  %v23263_v31 = vpop.permute.xlu0 %16066  ;;  %v28637_v46 = vld [vmem:[#allocation173_spill] sm:$0xff] }
 0x33d   :  { %v11965_v62 = vrot.slane %v28632_v14, %v19962_v25  ;;  %v11972_v63 = vrot.slane %v28633_v1, %v19962_v25  ;;  %v23253_v35 = vcombine.low %v6582_v29, %v6589_v13  ;;  %v6561_v32 = vrot.slane %v28631_v40, %v19921_v47  ;;  %28635 = vst [vmem:[#allocation47_spill] sm:$0xff] %v23261_v42  ;;  %v28641_v36 = vld [vmem:[#allocation285_spill] sm:$0xff] }
 0x33e   :  { %v6568_v43 = vrot.slane %v28631_v40, %v19930_v4  ;;  %v6575_v41 = vrot.slane %v28631_v40, %v19933_v38  ;;  %16225 = vperm.xlu1 %18689, %v11752_v27   ;;  %28636 = vst [vmem:[#allocation277_spill] sm:$0xff] %v23263_v31  ;;  %v6638_v37 = vrot.slane %v28637_v46, %v19918_v55  ;;  %v28638_v40 = vld [vmem:[#allocation174_spill] sm:$0xff]  ;;  %v28639_v27 = vld [vmem:[#allocation267_spill] sm:$0xff] }
 0x33f   :  { %28634 = vst [vmem:[#allocation46_spill] sm:$0xff] %v23253_v35  ;;  %v6645_v29 = vrot.slane %v28637_v46, %v19921_v47  ;;  %v6652_v13 = vrot.slane %v28637_v46, %v19930_v4  ;;  %v6659_v51 = vrot.slane %v28637_v46, %v19933_v38  ;;  %16258 = vperm.xlu0 %18688, %v11939_v60   ;;  %v28642_v46 = vld [vmem:[#allocation286_spill] sm:$0xff] }
 0x340   :  { %v6610_v14 = vrot.slane %v28638_v40, %v19918_v55  ;;  %v11786_v1 = vcombine.low %v11778_v10, %v11785_v21  ;;  %v11812_v31 = vrot.slane %v28639_v27, %v19962_v25  ;;  %v11819_v42 = vrot.slane %v28640_v48, %v19962_v25  ;;  %v23293_v21 = vpop.permute.xlu1 %16042 }
 0x341   :  { %v6617_v24 = vrot.slane %v28638_v40, %v19921_v47  ;;  %v11973_v56 = vcombine.low %v11965_v62, %v11972_v63  ;;  %v11999_v2 = vrot.slane %v28641_v36, %v19962_v25  ;;  %v12006_v60 = vrot.slane %v28642_v46, %v19962_v25  ;;  %28645 = vst [vmem:[#allocation263_spill] sm:$0xff] %v23293_v21  ;;  %v23295_v62 = vpop.permute.xlu0 %16072  ;;  %v28655_v21 = vld [vmem:[#allocation290_spill] sm:$0xff] }
 0x342   :  { %v23285_v16 = vcombine.low %v6596_v49, %v6603_v19  ;;  %v23287_v35 = vcombine.low %v6554_v50, %v6561_v32  ;;  %v6624_v10 = vrot.slane %v28638_v40, %v19930_v4  ;;  %v6631_v48 = vrot.slane %v28638_v40, %v19933_v38  ;;  %16231 = vperm.xlu1 %18689, %v11786_v1   ;;  %v28649_v49 = vld [vmem:[#allocation175_spill] sm:$0xff]  ;;  %v28652_v1 = vld [vmem:[#allocation272_spill] sm:$0xff] }
 0x343   :  { %28646 = vst [vmem:[#allocation264_spill] sm:$0xff] %v23295_v62  ;;  %v23297_v63 = vcombine.low %v6638_v37, %v6645_v29  ;;  %v23299_v36 = vcombine.low %v6568_v43, %v6575_v41  ;;  %v6694_v19 = vrot.slane %v28649_v49, %v19918_v55  ;;  %v6701_v50 = vrot.slane %v28649_v49, %v19921_v47  ;;  %v28651_v40 = vld [vmem:[#allocation271_spill] sm:$0xff]  ;;  %v28654_v41 = vld [vmem:[#allocation289_spill] sm:$0xff] }
 0x344   :  { %28643 = vst [vmem:[#allocation278_spill] sm:$0xff] %v23285_v16  ;;  %28644 = vst [vmem:[#allocation170_spill] sm:$0xff] %v23287_v35  ;;  %16264 = vperm.xlu0 %18688, %v11973_v56   ;;  %v23305_v32 = vcombine.low %v6652_v13, %v6659_v51  ;;  %v11820_v27 = vcombine.low %v11812_v31, %v11819_v42  ;;  %v11846_v46 = vrot.slane %v28651_v40, %v19962_v25  ;;  %v28657_v13 = vld [vmem:[#allocation176_spill] sm:$0xff] }
 0x345   :  { %28647 = vst [vmem:[#allocation171_spill] sm:$0xff] %v23297_v63  ;;  %28648 = vst [vmem:[#allocation281_spill] sm:$0xff] %v23299_v36  ;;  %v11853_v62 = vrot.slane %v28652_v1, %v19962_v25  ;;  %v23311_v37 = vcombine.low %v6610_v14, %v6617_v24  ;;  %v12007_v43 = vcombine.low %v11999_v2, %v12006_v60  ;;  %v23325_v24 = vpop.permute.xlu1 %16045  ;;  %v23327_v2 = vpop.permute.xlu0 %16078  ;;  %v28672_v63 = vld [vmem:[#allocation279_spill] sm:$0xff]  ;;  %v28698_v16 = vld [vmem:[#allocation192_spill] sm:$0xff] }
 0x346   :  { %28650 = vst [vmem:[#allocation282_spill] sm:$0xff] %v23305_v32  ;;  %v12033_v29 = vrot.slane %v28654_v41, %v19962_v25  ;;  %v12040_v36 = vrot.slane %v28655_v21, %v19962_v25  ;;  %v6708_v56 = vrot.slane %v28649_v49, %v19930_v4  ;;  %v6715_v42 = vrot.slane %v28649_v49, %v19933_v38 }
 0x347   :  { %28653 = vst [vmem:[#allocation173_spill] sm:$0xff] %v23311_v37  ;;  %v23321_v31 = vcombine.low %v6624_v10, %v6631_v48  ;;  %v6666_v51 = vrot.slane %v28657_v13, %v19918_v55  ;;  %28658 = vst [vmem:[#allocation267_spill] sm:$0xff] %v23325_v24  ;;  %16237 = vperm.xlu1 %18689, %v11820_v27   ;;  %v23329_v14 = vcombine.low %v6694_v19, %v6701_v50  ;;  %v28661_v48 = vld [vmem:[#allocation183_spill] sm:$0xff]  ;;  %v28662_v27 = vld [vmem:[#allocation52_spill] sm:$0xff] }
 0x348   :  { %28659 = vst [vmem:[#allocation268_spill] sm:$0xff] %v23327_v2  ;;  %v6673_v60 = vrot.slane %v28657_v13, %v19921_v47  ;;  %v6680_v21 = vrot.slane %v28657_v13, %v19930_v4  ;;  %v6687_v10 = vrot.slane %v28657_v13, %v19933_v38  ;;  %16270 = vperm.xlu0 %18688, %v12007_v43   ;;  %v28663_v19 = vld [vmem:[#allocation53_spill] sm:$0xff]  ;;  %v28664_v24 = vld [vmem:[#allocation63_spill] sm:$0xff]  ;;  %v28665_v13 = vld [vmem:[#allocation294_spill] sm:$0xff] }
 0x349   :  { %28656 = vst [vmem:[#allocation174_spill] sm:$0xff] %v23321_v31  ;;  %28660 = vst [vmem:[#allocation285_spill] sm:$0xff] %v23329_v14  ;;  %v6750_v49 = vrot.slane %v28661_v48, %v19918_v55  ;;  %v11854_v40 = vcombine.low %v11846_v46, %v11853_v62  ;;  %v11880_v1 = vrot.slane %v28662_v27, %v19962_v25  ;;  %v28666_v46 = vld [vmem:[#allocation184_spill] sm:$0xff]  ;;  %v23357_v35 = vpop.permute.xlu1 %16051 }
 0x34a   :  { %v11887_v50 = vrot.slane %v28663_v19, %v19962_v25  ;;  %v6757_v41 = vrot.slane %v28661_v48, %v19921_v47  ;;  %v12041_v2 = vcombine.low %v12033_v29, %v12040_v36  ;;  %v12067_v31 = vrot.slane %v28664_v24, %v19962_v25  ;;  %28667 = vst [vmem:[#allocation286_spill] sm:$0xff] %v23357_v35  ;;  %v23359_v36 = vpop.permute.xlu0 %16084 }
 0x34b   :  { %v12074_v43 = vrot.slane %v28665_v13, %v19962_v25  ;;  %v6764_v37 = vrot.slane %v28661_v48, %v19930_v4  ;;  %v6771_v62 = vrot.slane %v28661_v48, %v19933_v38  ;;  %v6722_v27 = vrot.slane %v28666_v46, %v19918_v55  ;;  %16243 = vperm.xlu1 %18689, %v11854_v40   ;;  %v28673_v40 = vld [vmem:[#allocation280_spill] sm:$0xff] }
 0x34c   :  { %v6729_v19 = vrot.slane %v28666_v46, %v19921_v47  ;;  %28668 = vst [vmem:[#allocation175_spill] sm:$0xff] %v23359_v36  ;;  %v23361_v29 = vcombine.low %v6708_v56, %v6715_v42  ;;  %v23363_v24 = vcombine.low %v6666_v51, %v6673_v60  ;;  %v6736_v13 = vrot.slane %v28666_v46, %v19930_v4  ;;  %v28675_v51 = vld [vmem:[#allocation298_spill] sm:$0xff] }
 0x34d   :  { %v6743_v48 = vrot.slane %v28666_v46, %v19933_v38  ;;  %16276 = vperm.xlu0 %18688, %v12041_v2   ;;  %v23369_v14 = vcombine.low %v6680_v21, %v6687_v10  ;;  %v11888_v32 = vcombine.low %v11880_v1, %v11887_v50  ;;  %v11914_v35 = vrot.slane %v28672_v63, %v19962_v25  ;;  %v28678_v2 = vld [vmem:[#allocation6_spill] sm:$0xff]  ;;  %v23389_v1 = vpop.permute.xlu1 %16057 }
 0x34e   :  { %28669 = vst [vmem:[#allocation271_spill] sm:$0xff] %v23361_v29  ;;  %28670 = vst [vmem:[#allocation272_spill] sm:$0xff] %v23363_v24  ;;  %v11921_v36 = vrot.slane %v28673_v40, %v19962_v25  ;;  %v23375_v56 = vcombine.low %v6750_v49, %v6757_v41  ;;  %v12075_v42 = vcombine.low %v12067_v31, %v12074_v43  ;;  %v28676_v24 = vld [vmem:[#allocation299_spill] sm:$0xff]  ;;  %v23391_v31 = vpop.permute.xlu0 %16090 }
 0x34f   :  { %28671 = vst [vmem:[#allocation289_spill] sm:$0xff] %v23369_v14  ;;  %v12101_v60 = vrot.slane %v28675_v51, %v19962_v25  ;;  %v12108_v29 = vrot.slane %v28676_v24, %v19962_v25  ;;  %v23381_v46 = vcombine.low %v6764_v37, %v6771_v62  ;;  %v6806_v21 = vrot.slane %v28678_v2, %v19918_v55  ;;  %v28683_v41 = vld [vmem:[#allocation7_spill] sm:$0xff] }
 0x350   :  { %28674 = vst [vmem:[#allocation290_spill] sm:$0xff] %v23375_v56  ;;  %v6813_v63 = vrot.slane %v28678_v2, %v19921_v47  ;;  %v23387_v10 = vcombine.low %v6722_v27, %v6729_v19  ;;  %28680 = vst [vmem:[#allocation52_spill] sm:$0xff] %v23389_v1  ;;  %16249 = vperm.xlu1 %18689, %v11888_v32   ;;  %v6820_v49 = vrot.slane %v28678_v2, %v19930_v4  ;;  %v28684_v32 = vld [vmem:[#allocation283_spill] sm:$0xff] }
 0x351   :  { %28677 = vst [vmem:[#allocation176_spill] sm:$0xff] %v23381_v46  ;;  %28681 = vst [vmem:[#allocation53_spill] sm:$0xff] %v23391_v31  ;;  %v6827_v37 = vrot.slane %v28678_v2, %v19933_v38  ;;  %v23397_v50 = vcombine.low %v6736_v13, %v6743_v48  ;;  %v6778_v43 = vrot.slane %v28683_v41, %v19918_v55  ;;  %16282 = vperm.xlu0 %18688, %v12075_v42   ;;  %v28685_v24 = vld [vmem:[#allocation59_spill] sm:$0xff]  ;;  %v28686_v13 = vld [vmem:[#allocation65_spill] sm:$0xff] }
 0x352   :  { %28679 = vst [vmem:[#allocation183_spill] sm:$0xff] %v23387_v10  ;;  %v6785_v62 = vrot.slane %v28683_v41, %v19921_v47  ;;  %v11922_v27 = vcombine.low %v11914_v35, %v11921_v36  ;;  %v11948_v19 = vrot.slane %v28684_v32, %v19962_v25  ;;  %v11955_v40 = vrot.slane %v28685_v24, %v19962_v25  ;;  %v28687_v31 = vld [vmem:[#allocation67_spill] sm:$0xff]  ;;  %v28689_v35 = vld [vmem:[#allocation189_spill] sm:$0xff] }
 0x353   :  { %28682 = vst [vmem:[#allocation63_spill] sm:$0xff] %v23397_v50  ;;  %v6792_v51 = vrot.slane %v28683_v41, %v19930_v4  ;;  %v12109_v2 = vcombine.low %v12101_v60, %v12108_v29  ;;  %v12135_v48 = vrot.slane %v28686_v13, %v19962_v25  ;;  %v12142_v42 = vrot.slane %v28687_v31, %v19962_v25  ;;  %v23421_v50 = vpop.permute.xlu1 %16063  ;;  %v23423_v29 = vpop.permute.xlu0 %16096 }
 0x354   :  { %v23413_v1 = vcombine.low %v6806_v21, %v6813_v63  ;;  %v6862_v36 = vrot.slane %v28689_v35, %v19918_v55  ;;  %v6869_v32 = vrot.slane %v28689_v35, %v19921_v47  ;;  %v6799_v24 = vrot.slane %v28683_v41, %v19933_v38  ;;  %28690 = vst [vmem:[#allocation184_spill] sm:$0xff] %v23421_v50  ;;  %v28692_v63 = vld [vmem:[#allocation190_spill] sm:$0xff] }
 0x355   :  { %16255 = vperm.xlu1 %18689, %v11922_v27   ;;  %28691 = vst [vmem:[#allocation279_spill] sm:$0xff] %v23423_v29  ;;  %v6876_v60 = vrot.slane %v28689_v35, %v19930_v4  ;;  %v6883_v21 = vrot.slane %v28689_v35, %v19933_v38  ;;  %v6834_v31 = vrot.slane %v28692_v63, %v19918_v55  ;;  %v28694_v27 = vld [vmem:[#allocation287_spill] sm:$0xff]  ;;  %v28695_v29 = vld [vmem:[#allocation288_spill] sm:$0xff]  ;;  %v28697_v35 = vld [vmem:[#allocation69_spill] sm:$0xff] }
 0x356   :  { %28688 = vst [vmem:[#allocation294_spill] sm:$0xff] %v23413_v1  ;;  %v6841_v13 = vrot.slane %v28692_v63, %v19921_v47  ;;  %16288 = vperm.xlu0 %18688, %v12109_v2   ;;  %v23433_v10 = vcombine.low %v6820_v49, %v6827_v37  ;;  %v11956_v41 = vcombine.low %v11948_v19, %v11955_v40  ;;  %v28704_v2 = vld [vmem:[#allocation10_spill] sm:$0xff] }
 0x357   :  { %v11982_v50 = vrot.slane %v28694_v27, %v19962_v25  ;;  %v11989_v14 = vrot.slane %v28695_v29, %v19962_v25  ;;  %v23439_v1 = vcombine.low %v6778_v43, %v6785_v62  ;;  %v12143_v46 = vcombine.low %v12135_v48, %v12142_v42  ;;  %v23453_v40 = vpop.permute.xlu1 %16069  ;;  %v23455_v43 = vpop.permute.xlu0 %16102  ;;  %v28707_v29 = vld [vmem:[#allocation60_spill] sm:$0xff] }
 0x358   :  { %28693 = vst [vmem:[#allocation280_spill] sm:$0xff] %v23433_v10  ;;  %v12169_v56 = vrot.slane %v28697_v35, %v19962_v25  ;;  %v12176_v45 = vrot.slane %v28698_v16, %v19962_v25  ;;  %v23445_v39 = vcombine.low %v6862_v36, %v6869_v32  ;;  %v23447_v49 = vcombine.low %v6792_v51, %v6799_v24  ;;  %v28706_v32 = vld [vmem:[#allocation291_spill] sm:$0xff] }
 0x359   :  { %28696 = vst [vmem:[#allocation298_spill] sm:$0xff] %v23439_v1  ;;  %v6848_v37 = vrot.slane %v28692_v63, %v19930_v4  ;;  %v6855_v19 = vrot.slane %v28692_v63, %v19933_v38  ;;  %28701 = vst [vmem:[#allocation7_spill] sm:$0xff] %v23453_v40  ;;  %16261 = vperm.xlu1 %18689, %v11956_v41   ;;  %v23457_v62 = vcombine.low %v6876_v60, %v6883_v21  ;;  %v28708_v41 = vld [vmem:[#allocation70_spill] sm:$0xff] }
 0x35a   :  { %28699 = vst [vmem:[#allocation299_spill] sm:$0xff] %v23445_v39  ;;  %28700 = vst [vmem:[#allocation6_spill] sm:$0xff] %v23447_v49  ;;  %v6918_v16 = vrot.slane %v28704_v2, %v19918_v55  ;;  %v6925_v51 = vrot.slane %v28704_v2, %v19921_v47  ;;  %v23463_v48 = vcombine.low %v6834_v31, %v6841_v13  ;;  %16294 = vperm.xlu0 %18688, %v12143_v46   ;;  %v28709_v31 = vld [vmem:[#allocation306_spill] sm:$0xff]  ;;  %v28710_v13 = vld [vmem:[#allocation191_spill] sm:$0xff] }
 0x35b   :  { %28702 = vst [vmem:[#allocation283_spill] sm:$0xff] %v23455_v43  ;;  %28703 = vst [vmem:[#allocation59_spill] sm:$0xff] %v23457_v62  ;;  %v6932_v42 = vrot.slane %v28704_v2, %v19930_v4  ;;  %v11990_v36 = vcombine.low %v11982_v50, %v11989_v14  ;;  %v12016_v24 = vrot.slane %v28706_v32, %v19962_v25  ;;  %v28717_v39 = vld [vmem:[#allocation178_spill] sm:$0xff] }
 0x35c   :  { %28705 = vst [vmem:[#allocation65_spill] sm:$0xff] %v23463_v48  ;;  %v12023_v60 = vrot.slane %v28707_v29, %v19962_v25  ;;  %v6939_v21 = vrot.slane %v28704_v2, %v19933_v38  ;;  %v12177_v63 = vcombine.low %v12169_v56, %v12176_v45  ;;  %v12203_v27 = vrot.slane %v28708_v41, %v19962_v25  ;;  %v23485_v2 = vpop.permute.xlu1 %16075  ;;  %v23487_v45 = vpop.permute.xlu0 %16108  ;;  %v28713_v56 = vld [vmem:[#allocation197_spill] sm:$0xff]  ;;  %v28716_v48 = vld [vmem:[#allocation296_spill] sm:$0xff] }
 0x35d   :  { %v12210_v46 = vrot.slane %v28709_v31, %v19962_v25  ;;  %v6890_v35 = vrot.slane %v28710_v13, %v19918_v55  ;;  %v6897_v14 = vrot.slane %v28710_v13, %v19921_v47  ;;  %v6904_v50 = vrot.slane %v28710_v13, %v19930_v4  ;;  %28711 = vst [vmem:[#allocation67_spill] sm:$0xff] %v23485_v2 }
 0x35e   :  { %v6911_v32 = vrot.slane %v28710_v13, %v19933_v38  ;;  %16267 = vperm.xlu1 %18689, %v11990_v36   ;;  %28712 = vst [vmem:[#allocation189_spill] sm:$0xff] %v23487_v45  ;;  %v6974_v29 = vrot.slane %v28713_v56, %v19918_v55  ;;  %v6981_v41 = vrot.slane %v28713_v56, %v19921_v47  ;;  %v28714_v13 = vld [vmem:[#allocation198_spill] sm:$0xff]  ;;  %v28715_v36 = vld [vmem:[#allocation295_spill] sm:$0xff] }
 0x35f   :  { %v6988_v31 = vrot.slane %v28713_v56, %v19930_v4  ;;  %v6995_v43 = vrot.slane %v28713_v56, %v19933_v38  ;;  %16300 = vperm.xlu0 %18688, %v12177_v63   ;;  %v6946_v40 = vrot.slane %v28714_v13, %v19918_v55  ;;  %v12024_v2 = vcombine.low %v12016_v24, %v12023_v60  ;;  %v28718_v56 = vld [vmem:[#allocation179_spill] sm:$0xff] }
 0x360   :  { %v12050_v45 = vrot.slane %v28715_v36, %v19962_v25  ;;  %v12057_v49 = vrot.slane %v28716_v48, %v19962_v25  ;;  %v6953_v1 = vrot.slane %v28714_v13, %v19921_v47  ;;  %v12211_v62 = vcombine.low %v12203_v27, %v12210_v46  ;;  %v23517_v36 = vpop.permute.xlu1 %16081  ;;  %v23519_v48 = vpop.permute.xlu0 %16114 }
 0x361   :  { %v12237_v10 = vrot.slane %v28717_v39, %v19962_v25  ;;  %v12244_v63 = vrot.slane %v28718_v56, %v19962_v25  ;;  %v23509_v33 = vcombine.low %v6918_v16, %v6925_v51  ;;  %v23511_v59 = vcombine.low %v6932_v42, %v6939_v21  ;;  %28723 = vst [vmem:[#allocation192_spill] sm:$0xff] %v23517_v36  ;;  %v28728_v51 = vld [vmem:[#allocation300_spill] sm:$0xff]  ;;  %v28729_v21 = vld [vmem:[#allocation301_spill] sm:$0xff] }
 0x362   :  { %v23513_v24 = vcombine.low %v6848_v37, %v6855_v19  ;;  %v23515_v60 = vcombine.low %v6890_v35, %v6897_v14  ;;  %16273 = vperm.xlu1 %18689, %v12024_v2   ;;  %28724 = vst [vmem:[#allocation10_spill] sm:$0xff] %v23519_v48  ;;  %v23521_v27 = vcombine.low %v6974_v29, %v6981_v41  ;;  %v28732_v29 = vld [vmem:[#allocation141_spill] sm:$0xff] }
 0x363   :  { %28719 = vst [vmem:[#allocation190_spill] sm:$0xff] %v23509_v33  ;;  %28720 = vst [vmem:[#allocation287_spill] sm:$0xff] %v23511_v59  ;;  %v23523_v46 = vcombine.low %v6904_v50, %v6911_v32  ;;  %v6960_v39 = vrot.slane %v28714_v13, %v19930_v4  ;;  %v6967_v16 = vrot.slane %v28714_v13, %v19933_v38  ;;  %16306 = vperm.xlu0 %18688, %v12211_v62   ;;  %v28731_v32 = vld [vmem:[#allocation196_spill] sm:$0xff]  ;;  %v28739_v48 = vld [vmem:[#allocation193_spill] sm:$0xff] }
 0x364   :  { %28721 = vst [vmem:[#allocation288_spill] sm:$0xff] %v23513_v24  ;;  %28722 = vst [vmem:[#allocation69_spill] sm:$0xff] %v23515_v60  ;;  %v23529_v37 = vcombine.low %v6988_v31, %v6995_v43  ;;  %v12058_v19 = vcombine.low %v12050_v45, %v12057_v49  ;;  %v12084_v42 = vrot.slane %v28728_v51, %v19962_v25  ;;  %v28733_v62 = vld [vmem:[#allocation140_spill] sm:$0xff]  ;;  %v28736_v31 = vld [vmem:[#allocation13_spill] sm:$0xff] }
 0x365   :  { %28725 = vst [vmem:[#allocation291_spill] sm:$0xff] %v23521_v27  ;;  %28726 = vst [vmem:[#allocation60_spill] sm:$0xff] %v23523_v46  ;;  %v12091_v35 = vrot.slane %v28729_v21, %v19962_v25  ;;  %v23535_v14 = vcombine.low %v6946_v40, %v6953_v1  ;;  %v12245_v50 = vcombine.low %v12237_v10, %v12244_v63  ;;  %v23549_v40 = vpop.permute.xlu1 %16087  ;;  %v23551_v10 = vpop.permute.xlu0 %16120  ;;  %v28737_v21 = vld [vmem:[#allocation202_spill] sm:$0xff]  ;;  %v28750_v59 = vld [vmem:[#allocation304_spill] sm:$0xff] }
 0x366   :  { %28727 = vst [vmem:[#allocation70_spill] sm:$0xff] %v23529_v37  ;;  %v12271_v2 = vrot.slane %v28731_v32, %v19962_v25  ;;  %v12278_v41 = vrot.slane %v28732_v29, %v19962_v25  ;;  %v7030_v43 = vrot.slane %v28733_v62, %v19918_v55  ;;  %v7037_v49 = vrot.slane %v28733_v62, %v19921_v47 }
 0x367   :  { %28730 = vst [vmem:[#allocation306_spill] sm:$0xff] %v23535_v14  ;;  %v7044_v45 = vrot.slane %v28733_v62, %v19930_v4  ;;  %v7051_v1 = vrot.slane %v28733_v62, %v19933_v38  ;;  %28734 = vst [vmem:[#allocation191_spill] sm:$0xff] %v23549_v40  ;;  %16279 = vperm.xlu1 %18689, %v12058_v19   ;;  %v7002_v13 = vrot.slane %v28736_v31, %v19918_v55  ;;  %v28738_v19 = vld [vmem:[#allocation68_spill] sm:$0xff] }
 0x368   :  { %28735 = vst [vmem:[#allocation197_spill] sm:$0xff] %v23551_v10  ;;  %v7009_v56 = vrot.slane %v28736_v31, %v19921_v47  ;;  %v7016_v63 = vrot.slane %v28736_v31, %v19930_v4  ;;  %v7023_v51 = vrot.slane %v28736_v31, %v19933_v38  ;;  %16312 = vperm.xlu0 %18688, %v12245_v50   ;;  %v28740_v14 = vld [vmem:[#allocation76_spill] sm:$0xff] }
 0x369   :  { %v7086_v32 = vrot.slane %v28737_v21, %v19918_v55  ;;  %v12092_v29 = vcombine.low %v12084_v42, %v12091_v35  ;;  %v12118_v62 = vrot.slane %v28738_v19, %v19962_v25  ;;  %v12125_v10 = vrot.slane %v28739_v48, %v19962_v25  ;;  %v28741_v31 = vld [vmem:[#allocation312_spill] sm:$0xff]  ;;  %v28742_v35 = vld [vmem:[#allocation203_spill] sm:$0xff]  ;;  %v23581_v24 = vpop.permute.xlu1 %16093 }
 0x36a   :  { %v7093_v40 = vrot.slane %v28737_v21, %v19921_v47  ;;  %v12279_v36 = vcombine.low %v12271_v2, %v12278_v41  ;;  %v12305_v46 = vrot.slane %v28740_v14, %v19962_v25  ;;  %v12312_v50 = vrot.slane %v28741_v31, %v19962_v25  ;;  %28743 = vst [vmem:[#allocation198_spill] sm:$0xff] %v23581_v24  ;;  %v23583_v2 = vpop.permute.xlu0 %16126  ;;  %v28751_v24 = vld [vmem:[#allocation305_spill] sm:$0xff] }
 0x36b   :  { %v7100_v60 = vrot.slane %v28737_v21, %v19930_v4  ;;  %v7107_v42 = vrot.slane %v28737_v21, %v19933_v38  ;;  %v7058_v19 = vrot.slane %v28742_v35, %v19918_v55  ;;  %v7065_v48 = vrot.slane %v28742_v35, %v19921_v47  ;;  %16285 = vperm.xlu1 %18689, %v12092_v29  }
 0x36c   :  { %28744 = vst [vmem:[#allocation295_spill] sm:$0xff] %v23583_v2  ;;  %v23585_v14 = vcombine.low %v7030_v43, %v7037_v49  ;;  %v23587_v41 = vcombine.low %v7044_v45, %v7051_v1  ;;  %v23589_v31 = vcombine.low %v6960_v39, %v6967_v16  ;;  %v23591_v37 = vcombine.low %v7002_v13, %v7009_v56  ;;  %v28752_v45 = vld [vmem:[#allocation142_spill] sm:$0xff] }
 0x36d   :  { %16318 = vperm.xlu0 %18688, %v12279_v36   ;;  %v23593_v21 = vcombine.low %v7016_v63, %v7023_v51  ;;  %v12126_v27 = vcombine.low %v12118_v62, %v12125_v10  ;;  %v12152_v33 = vrot.slane %v28750_v59, %v19962_v25  ;;  %v12159_v29 = vrot.slane %v28751_v24, %v19962_v25  ;;  %v28753_v16 = vld [vmem:[#allocation78_spill] sm:$0xff]  ;;  %v23613_v24 = vpop.permute.xlu1 %16099 }
 0x36e   :  { %28745 = vst [vmem:[#allocation296_spill] sm:$0xff] %v23585_v14  ;;  %28746 = vst [vmem:[#allocation178_spill] sm:$0xff] %v23587_v41  ;;  %v7072_v43 = vrot.slane %v28742_v35, %v19930_v4  ;;  %v12313_v49 = vcombine.low %v12305_v46, %v12312_v50  ;;  %v12339_v39 = vrot.slane %v28752_v45, %v19962_v25  ;;  %v23615_v56 = vpop.permute.xlu0 %16132  ;;  %v28759_v46 = vld [vmem:[#allocation145_spill] sm:$0xff]  ;;  %v28773_v14 = vld [vmem:[#allocation316_spill] sm:$0xff] }
 0x36f   :  { %28747 = vst [vmem:[#allocation179_spill] sm:$0xff] %v23589_v31  ;;  %28748 = vst [vmem:[#allocation300_spill] sm:$0xff] %v23591_v37  ;;  %v12346_v1 = vrot.slane %v28753_v16, %v19962_v25  ;;  %v23605_v36 = vcombine.low %v7086_v32, %v7093_v40  ;;  %v23607_v13 = vcombine.low %v7100_v60, %v7107_v42  ;;  %16291 = vperm.xlu1 %18689, %v12126_v27   ;;  %v28760_v32 = vld [vmem:[#allocation17_spill] sm:$0xff]  ;;  %v28761_v27 = vld [vmem:[#allocation307_spill] sm:$0xff] }
 0x370   :  { %28749 = vst [vmem:[#allocation301_spill] sm:$0xff] %v23593_v21  ;;  %v7079_v59 = vrot.slane %v28742_v35, %v19933_v38  ;;  %v23611_v10 = vcombine.low %v7058_v19, %v7065_v48  ;;  %28757 = vst [vmem:[#allocation13_spill] sm:$0xff] %v23613_v24  ;;  %v7142_v63 = vrot.slane %v28759_v46, %v19918_v55  ;;  %v28762_v35 = vld [vmem:[#allocation308_spill] sm:$0xff] }
 0x371   :  { %28754 = vst [vmem:[#allocation196_spill] sm:$0xff] %v23605_v36  ;;  %28755 = vst [vmem:[#allocation141_spill] sm:$0xff] %v23607_v13  ;;  %v7149_v51 = vrot.slane %v28759_v46, %v19921_v47  ;;  %v7156_v60 = vrot.slane %v28759_v46, %v19930_v4  ;;  %v7163_v40 = vrot.slane %v28759_v46, %v19933_v38  ;;  %16324 = vperm.xlu0 %18688, %v12313_v49   ;;  %v28763_v16 = vld [vmem:[#allocation80_spill] sm:$0xff] }
 0x372   :  { %28756 = vst [vmem:[#allocation140_spill] sm:$0xff] %v23611_v10  ;;  %28758 = vst [vmem:[#allocation202_spill] sm:$0xff] %v23615_v56  ;;  %v7114_v62 = vrot.slane %v28760_v32, %v19918_v55  ;;  %v12160_v50 = vcombine.low %v12152_v33, %v12159_v29  ;;  %v12186_v42 = vrot.slane %v28761_v27, %v19962_v25  ;;  %v28764_v46 = vld [vmem:[#allocation160_spill] sm:$0xff]  ;;  %v28765_v56 = vld [vmem:[#allocation18_spill] sm:$0xff] }
 0x373   :  { %v12193_v19 = vrot.slane %v28762_v35, %v19962_v25  ;;  %v7121_v48 = vrot.slane %v28760_v32, %v19921_v47  ;;  %v12347_v45 = vcombine.low %v12339_v39, %v12346_v1  ;;  %v12373_v24 = vrot.slane %v28763_v16, %v19962_v25  ;;  %v23645_v35 = vpop.permute.xlu1 %16105  ;;  %v23647_v39 = vpop.permute.xlu0 %16138 }
 0x374   :  { %v12380_v49 = vrot.slane %v28764_v46, %v19962_v25  ;;  %v7198_v2 = vrot.slane %v28765_v56, %v19918_v55  ;;  %v7205_v33 = vrot.slane %v28765_v56, %v19921_v47  ;;  %v7128_v29 = vrot.slane %v28760_v32, %v19930_v4  ;;  %28766 = vst [vmem:[#allocation68_spill] sm:$0xff] %v23645_v35  ;;  %v28768_v46 = vld [vmem:[#allocation19_spill] sm:$0xff] }
 0x375   :  { %v7135_v27 = vrot.slane %v28760_v32, %v19933_v38  ;;  %16297 = vperm.xlu1 %18689, %v12160_v50   ;;  %28767 = vst [vmem:[#allocation193_spill] sm:$0xff] %v23647_v39  ;;  %v7212_v1 = vrot.slane %v28765_v56, %v19930_v4  ;;  %v7219_v16 = vrot.slane %v28765_v56, %v19933_v38  ;;  %v28770_v50 = vld [vmem:[#allocation73_spill] sm:$0xff]  ;;  %v28771_v39 = vld [vmem:[#allocation139_spill] sm:$0xff] }
 0x376   :  { %v7170_v10 = vrot.slane %v28768_v46, %v19918_v55  ;;  %v7177_v21 = vrot.slane %v28768_v46, %v19921_v47  ;;  %16330 = vperm.xlu0 %18688, %v12347_v45   ;;  %v23657_v37 = vcombine.low %v7072_v43, %v7079_v59  ;;  %v12194_v32 = vcombine.low %v12186_v42, %v12193_v19  ;;  %v28772_v56 = vld [vmem:[#allocation169_spill] sm:$0xff]  ;;  %v28783_v45 = vld [vmem:[#allocation311_spill] sm:$0xff] }
 0x377   :  { %v12220_v35 = vrot.slane %v28770_v50, %v19962_v25  ;;  %v12227_v31 = vrot.slane %v28771_v39, %v19962_v25  ;;  %v23663_v13 = vcombine.low %v7142_v63, %v7149_v51  ;;  %v12381_v36 = vcombine.low %v12373_v24, %v12380_v49  ;;  %v23677_v19 = vpop.permute.xlu1 %16111  ;;  %v23679_v63 = vpop.permute.xlu0 %16144  ;;  %v28785_v39 = vld [vmem:[#allocation172_spill] sm:$0xff] }
 0x378   :  { %28769 = vst [vmem:[#allocation76_spill] sm:$0xff] %v23657_v37  ;;  %v12407_v41 = vrot.slane %v28772_v56, %v19962_v25  ;;  %v12414_v22 = vrot.slane %v28773_v14, %v19962_v25  ;;  %v23669_v18 = vcombine.low %v7156_v60, %v7163_v40  ;;  %v23671_v43 = vcombine.low %v7114_v62, %v7121_v48  ;;  %v28782_v40 = vld [vmem:[#allocation211_spill] sm:$0xff] }
 0x379   :  { %v23673_v59 = vcombine.low %v7128_v29, %v7135_v27  ;;  %v7184_v42 = vrot.slane %v28768_v46, %v19930_v4  ;;  %28777 = vst [vmem:[#allocation305_spill] sm:$0xff] %v23677_v19  ;;  %16303 = vperm.xlu1 %18689, %v12194_v32   ;;  %28778 = vst [vmem:[#allocation142_spill] sm:$0xff] %v23679_v63  ;;  %v23681_v24 = vcombine.low %v7198_v2, %v7205_v33  ;;  %v28784_v29 = vld [vmem:[#allocation313_spill] sm:$0xff] }
 0x37a   :  { %28774 = vst [vmem:[#allocation312_spill] sm:$0xff] %v23669_v18  ;;  %28775 = vst [vmem:[#allocation203_spill] sm:$0xff] %v23671_v43  ;;  %v23683_v51 = vcombine.low %v7212_v1, %v7219_v16  ;;  %v7191_v14 = vrot.slane %v28768_v46, %v19933_v38  ;;  %v23687_v60 = vcombine.low %v7170_v10, %v7177_v21  ;;  %16336 = vperm.xlu0 %18688, %v12381_v36   ;;  %v28786_v10 = vld [vmem:[#allocation212_spill] sm:$0xff] }
 0x37b   :  { %28776 = vst [vmem:[#allocation304_spill] sm:$0xff] %v23673_v59  ;;  %28779 = vst [vmem:[#allocation78_spill] sm:$0xff] %v23681_v24  ;;  %v7254_v62 = vrot.slane %v28782_v40, %v19918_v55  ;;  %v12228_v48 = vcombine.low %v12220_v35, %v12227_v31  ;;  %v12254_v49 = vrot.slane %v28783_v45, %v19962_v25  ;;  %v23709_v46 = vpop.permute.xlu1 %16117  ;;  %v28794_v59 = vld [vmem:[#allocation220_spill] sm:$0xff]  ;;  %v28800_v24 = vld [vmem:[#allocation79_spill] sm:$0xff] }
 0x37c   :  { %28780 = vst [vmem:[#allocation145_spill] sm:$0xff] %v23683_v51  ;;  %28781 = vst [vmem:[#allocation17_spill] sm:$0xff] %v23687_v60  ;;  %v12261_v27 = vrot.slane %v28784_v29, %v19962_v25  ;;  %v7261_v2 = vrot.slane %v28782_v40, %v19921_v47  ;;  %v12415_v33 = vcombine.low %v12407_v41, %v12414_v22  ;;  %v23711_v22 = vpop.permute.xlu0 %16150  ;;  %v28789_v41 = vld [vmem:[#allocation22_spill] sm:$0xff] }
 0x37d   :  { %v12441_v1 = vrot.slane %v28785_v39, %v19962_v25  ;;  %v12448_v21 = vrot.slane %v22134_v54, %v19962_v25  ;;  %v7268_v36 = vrot.slane %v28782_v40, %v19930_v4  ;;  %v7275_v31 = vrot.slane %v28782_v40, %v19933_v38  ;;  %28787 = vst [vmem:[#allocation307_spill] sm:$0xff] %v23709_v46  ;;  %v28791_v39 = vld [vmem:[#allocation315_spill] sm:$0xff] }
 0x37e   :  { %v7226_v35 = vrot.slane %v28786_v10, %v19918_v55  ;;  %v7233_v16 = vrot.slane %v28786_v10, %v19921_v47  ;;  %16309 = vperm.xlu1 %18689, %v12228_v48   ;;  %28788 = vst [vmem:[#allocation308_spill] sm:$0xff] %v23711_v22  ;;  %v7310_v54 = vrot.slane %v28789_v41, %v19918_v55  ;;  %v28790_v48 = vld [vmem:[#allocation314_spill] sm:$0xff]  ;;  %v28792_v46 = vld [vmem:[#allocation187_spill] sm:$0xff] }
 0x37f   :  { %v7317_v32 = vrot.slane %v28789_v41, %v19921_v47  ;;  %v7240_v50 = vrot.slane %v28786_v10, %v19930_v4  ;;  %v7247_v56 = vrot.slane %v28786_v10, %v19933_v38  ;;  %16342 = vperm.xlu0 %18688, %v12415_v33   ;;  %v7324_v40 = vrot.slane %v28789_v41, %v19930_v4  ;;  %v28793_v10 = vld [vmem:[#allocation185_spill] sm:$0xff] }
 0x380   :  { %v12262_v45 = vcombine.low %v12254_v49, %v12261_v27  ;;  %v12288_v29 = vrot.slane %v28790_v48, %v19962_v25  ;;  %v12295_v19 = vrot.slane %v28791_v39, %v19962_v25  ;;  %v7331_v22 = vrot.slane %v28789_v41, %v19933_v38  ;;  %v23741_v41 = vpop.permute.xlu1 %16123 }
 0x381   :  { %v12449_v63 = vcombine.low %v12441_v1, %v12448_v21  ;;  %v12475_v60 = vrot.slane %v28792_v46, %v19962_v25  ;;  %v12482_v33 = vrot.slane %v28793_v10, %v19962_v25  ;;  %v7282_v43 = vrot.slane %v28794_v59, %v19918_v55  ;;  %28795 = vst [vmem:[#allocation80_spill] sm:$0xff] %v23741_v41  ;;  %v23743_v1 = vpop.permute.xlu0 %16156  ;;  %v28801_v41 = vld [vmem:[#allocation81_spill] sm:$0xff] }
 0x382   :  { %v7289_v49 = vrot.slane %v28794_v59, %v19921_v47  ;;  %v7296_v27 = vrot.slane %v28794_v59, %v19930_v4  ;;  %v7303_v48 = vrot.slane %v28794_v59, %v19933_v38  ;;  %16315 = vperm.xlu1 %18689, %v12262_v45   ;;  %28796 = vst [vmem:[#allocation160_spill] sm:$0xff] %v23743_v1 }
 0x383   :  { %v23745_v21 = vcombine.low %v7254_v62, %v7261_v2  ;;  %v23747_v46 = vcombine.low %v7268_v36, %v7275_v31  ;;  %v23749_v39 = vcombine.low %v7184_v42, %v7191_v14  ;;  %v23751_v10 = vcombine.low %v7226_v35, %v7233_v16  ;;  %16348 = vperm.xlu0 %18688, %v12449_v63   ;;  %v28802_v2 = vld [vmem:[#allocation86_spill] sm:$0xff]  ;;  %v28803_v42 = vld [vmem:[#allocation87_spill] sm:$0xff]  ;;  %v28804_v63 = vld [vmem:[#allocation25_spill] sm:$0xff] }
 0x384   :  { %v23753_v37 = vcombine.low %v7240_v50, %v7247_v56  ;;  %v12296_v51 = vcombine.low %v12288_v29, %v12295_v19  ;;  %v12322_v59 = vrot.slane %v28800_v24, %v19962_v25  ;;  %v12329_v45 = vrot.slane %v28801_v41, %v19962_v25  ;;  %v23773_v16 = vpop.permute.xlu1 %16129  ;;  %v28809_v50 = vld [vmem:[#allocation221_spill] sm:$0xff]  ;;  %v28812_v41 = vld [vmem:[#allocation188_spill] sm:$0xff] }
 0x385   :  { %28797 = vst [vmem:[#allocation18_spill] sm:$0xff] %v23749_v39  ;;  %28798 = vst [vmem:[#allocation19_spill] sm:$0xff] %v23751_v10  ;;  %v23759_v18 = vcombine.low %v7310_v54, %v7317_v32  ;;  %v12483_v62 = vcombine.low %v12475_v60, %v12482_v33  ;;  %v12509_v36 = vrot.slane %v28802_v2, %v19962_v25  ;;  %v23775_v54 = vpop.permute.xlu0 %16162  ;;  %v28811_v33 = vld [vmem:[#allocation200_spill] sm:$0xff] }
 0x386   :  { %28799 = vst [vmem:[#allocation73_spill] sm:$0xff] %v23753_v37  ;;  %v12516_v14 = vrot.slane %v28803_v42, %v19962_v25  ;;  %v23765_v31 = vcombine.low %v7324_v40, %v7331_v22  ;;  %v7366_v19 = vrot.slane %v28804_v63, %v19918_v55  ;;  %v23769_v35 = vcombine.low %v7282_v43, %v7289_v49  ;;  %v28813_v42 = vld [vmem:[#allocation225_spill] sm:$0xff] }
 0x387   :  { %v23771_v24 = vcombine.low %v7296_v27, %v7303_v48  ;;  %28807 = vst [vmem:[#allocation316_spill] sm:$0xff] %v23773_v16  ;;  %16321 = vperm.xlu1 %18689, %v12296_v51   ;;  %28808 = vst [vmem:[#allocation211_spill] sm:$0xff] %v23775_v54  ;;  %v7373_v60 = vrot.slane %v28804_v63, %v19921_v47  ;;  %v7380_v32 = vrot.slane %v28804_v63, %v19930_v4  ;;  %v28810_v51 = vld [vmem:[#allocation164_spill] sm:$0xff]  ;;  %v28818_v16 = vld [vmem:[#allocation318_spill] sm:$0xff] }
 0x388   :  { %28805 = vst [vmem:[#allocation139_spill] sm:$0xff] %v23769_v35  ;;  %v7387_v22 = vrot.slane %v28804_v63, %v19933_v38  ;;  %v7338_v43 = vrot.slane %v28809_v50, %v19918_v55  ;;  %16354 = vperm.xlu0 %18688, %v12483_v62   ;;  %v7345_v56 = vrot.slane %v28809_v50, %v19921_v47 }
 0x389   :  { %28806 = vst [vmem:[#allocation169_spill] sm:$0xff] %v23771_v24  ;;  %v12330_v40 = vcombine.low %v12322_v59, %v12329_v45  ;;  %v12356_v29 = vrot.slane %v28810_v51, %v19962_v25  ;;  %v12363_v49 = vrot.slane %v28811_v33, %v19962_v25  ;;  %v7352_v27 = vrot.slane %v28809_v50, %v19930_v4  ;;  %v23805_v33 = vpop.permute.xlu1 %16135 }
 0x38a   :  { %v12517_v48 = vcombine.low %v12509_v36, %v12516_v14  ;;  %v12543_v2 = vrot.slane %v28812_v41, %v19962_v25  ;;  %v12550_v62 = vrot.slane %v22227_v5, %v19962_v25  ;;  %v7422_v63 = vrot.slane %v28813_v42, %v19918_v55  ;;  %28814 = vst [vmem:[#allocation311_spill] sm:$0xff] %v23805_v33  ;;  %v23807_v36 = vpop.permute.xlu0 %16168  ;;  %v28816_v14 = vld [vmem:[#allocation226_spill] sm:$0xff] }
 0x38b   :  { %v7429_v59 = vrot.slane %v28813_v42, %v19921_v47  ;;  %v7436_v45 = vrot.slane %v28813_v42, %v19930_v4  ;;  %v7359_v51 = vrot.slane %v28809_v50, %v19933_v38  ;;  %16327 = vperm.xlu1 %18689, %v12330_v40   ;;  %28815 = vst [vmem:[#allocation313_spill] sm:$0xff] %v23807_v36  ;;  %v28817_v40 = vld [vmem:[#allocation317_spill] sm:$0xff] }
 0x38c   :  { %v7443_v5 = vrot.slane %v28813_v42, %v19933_v38  ;;  %v7394_v41 = vrot.slane %v28816_v14, %v19918_v55  ;;  %v7401_v54 = vrot.slane %v28816_v14, %v19921_v47  ;;  %v7408_v1 = vrot.slane %v28816_v14, %v19930_v4  ;;  %16360 = vperm.xlu0 %18688, %v12517_v48  }
 0x38d   :  { %v7415_v50 = vrot.slane %v28816_v14, %v19933_v38  ;;  %v12364_v33 = vcombine.low %v12356_v29, %v12363_v49  ;;  %v12390_v36 = vrot.slane %v28817_v40, %v19962_v25  ;;  %v12397_v42 = vrot.slane %v28818_v16, %v19962_v25  ;;  %v23837_v14 = vpop.permute.xlu1 %16141  ;;  %v28834_v40 = vld [vmem:[#allocation30_spill] sm:$0xff] }
 0x38e   :  { %v23823_v24 = vcombine.low %v7366_v19, %v7373_v60  ;;  %v12551_v35 = vcombine.low %v12543_v2, %v12550_v62  ;;  %v12577_v37 = vrot.slane %v22235_v11, %v19962_v25  ;;  %v12584_v10 = vrot.slane %v22237_v15, %v19962_v25  ;;  %28821 = vst [vmem:[#allocation22_spill] sm:$0xff] %v23837_v14  ;;  %v23839_v19 = vpop.permute.xlu0 %16174  ;;  %v28823_v11 = vld [vmem:[#allocation28_spill] sm:$0xff]  ;;  %v28827_v2 = vld [vmem:[#allocation85_spill] sm:$0xff] }
 0x38f   :  { %v23829_v48 = vcombine.low %v7380_v32, %v7387_v22  ;;  %v23831_v39 = vcombine.low %v7422_v63, %v7429_v59  ;;  %v23833_v29 = vcombine.low %v7338_v43, %v7345_v56  ;;  %v23835_v49 = vcombine.low %v7352_v27, %v7359_v51  ;;  %16333 = vperm.xlu1 %18689, %v12364_v33   ;;  %v28826_v56 = vld [vmem:[#allocation16_spill] sm:$0xff] }
 0x390   :  { %28822 = vst [vmem:[#allocation314_spill] sm:$0xff] %v23839_v19  ;;  %v23841_v16 = vcombine.low %v7436_v45, %v7443_v5  ;;  %v7478_v60 = vrot.slane %v28823_v11, %v19918_v55  ;;  %v7485_v15 = vrot.slane %v28823_v11, %v19921_v47  ;;  %v23847_v32 = vcombine.low %v7394_v41, %v7401_v54  ;;  %v28828_v45 = vld [vmem:[#allocation210_spill] sm:$0xff] }
 0x391   :  { %28819 = vst [vmem:[#allocation172_spill] sm:$0xff] %v23833_v29  ;;  %28820 = vst [vmem:[#allocation212_spill] sm:$0xff] %v23835_v49  ;;  %16366 = vperm.xlu0 %18688, %v12551_v35   ;;  %v23849_v22 = vcombine.low %v7408_v1, %v7415_v50  ;;  %v12398_v43 = vcombine.low %v12390_v36, %v12397_v42  ;;  %v12424_v27 = vrot.slane %v28826_v56, %v19962_v25  ;;  %v28829_v54 = vld [vmem:[#allocation94_spill] sm:$0xff]  ;;  %v28830_v35 = vld [vmem:[#allocation29_spill] sm:$0xff]  ;;  %v23869_v50 = vpop.permute.xlu1 %16147 }
 0x392   :  { %28824 = vst [vmem:[#allocation315_spill] sm:$0xff] %v23847_v32  ;;  %v12431_v62 = vrot.slane %v28827_v2, %v19962_v25  ;;  %v7492_v63 = vrot.slane %v28823_v11, %v19930_v4  ;;  %v12585_v59 = vcombine.low %v12577_v37, %v12584_v10  ;;  %v12611_v51 = vrot.slane %v28828_v45, %v19962_v25  ;;  %v23871_v37 = vpop.permute.xlu0 %16180  ;;  %v28837_v19 = vld [vmem:[#allocation322_spill] sm:$0xff]  ;;  %v28843_v32 = vld [vmem:[#allocation153_spill] sm:$0xff] }
 0x393   :  { %28825 = vst [vmem:[#allocation187_spill] sm:$0xff] %v23849_v22  ;;  %v12618_v33 = vrot.slane %v28829_v54, %v19962_v25  ;;  %v7499_v1 = vrot.slane %v28823_v11, %v19933_v38  ;;  %v7450_v36 = vrot.slane %v28830_v35, %v19918_v55  ;;  %v7457_v5 = vrot.slane %v28830_v35, %v19921_v47 }
 0x394   :  { %v7464_v41 = vrot.slane %v28830_v35, %v19930_v4  ;;  %28831 = vst [vmem:[#allocation185_spill] sm:$0xff] %v23869_v50  ;;  %16339 = vperm.xlu1 %18689, %v12398_v43   ;;  %28832 = vst [vmem:[#allocation220_spill] sm:$0xff] %v23871_v37  ;;  %v23873_v10 = vcombine.low %v7478_v60, %v7485_v15  ;;  %v7534_v42 = vrot.slane %v28834_v40, %v19918_v55  ;;  %v28835_v43 = vld [vmem:[#allocation204_spill] sm:$0xff]  ;;  %v28836_v60 = vld [vmem:[#allocation9_spill] sm:$0xff] }
 0x395   :  { %v7541_v11 = vrot.slane %v28834_v40, %v19921_v47  ;;  %v7471_v56 = vrot.slane %v28830_v35, %v19933_v38  ;;  %16372 = vperm.xlu0 %18688, %v12585_v59   ;;  %v7548_v2 = vrot.slane %v28834_v40, %v19930_v4  ;;  %v12432_v45 = vcombine.low %v12424_v27, %v12431_v62  ;;  %v28838_v35 = vld [vmem:[#allocation233_spill] sm:$0xff] }
 0x396   :  { %28833 = vst [vmem:[#allocation79_spill] sm:$0xff] %v23873_v10  ;;  %v12458_v54 = vrot.slane %v28835_v43, %v19962_v25  ;;  %v12465_v15 = vrot.slane %v28836_v60, %v19962_v25  ;;  %v7555_v50 = vrot.slane %v28834_v40, %v19933_v38  ;;  %v12619_v37 = vcombine.low %v12611_v51, %v12618_v33  ;;  %v23901_v40 = vpop.permute.xlu1 %16153  ;;  %v23903_v51 = vpop.permute.xlu0 %16186 }
 0x397   :  { %v12645_v14 = vrot.slane %v28837_v19, %v19962_v25  ;;  %v12652_v59 = vrot.slane %v22333_v20, %v19962_v25  ;;  %v7506_v22 = vrot.slane %v28838_v35, %v19918_v55  ;;  %v7513_v27 = vrot.slane %v28838_v35, %v19921_v47  ;;  %28839 = vst [vmem:[#allocation81_spill] sm:$0xff] %v23901_v40 }
 0x398   :  { %v7520_v62 = vrot.slane %v28838_v35, %v19930_v4  ;;  %v7527_v43 = vrot.slane %v28838_v35, %v19933_v38  ;;  %16345 = vperm.xlu1 %18689, %v12432_v45   ;;  %28840 = vst [vmem:[#allocation86_spill] sm:$0xff] %v23903_v51  ;;  %v23905_v19 = vcombine.low %v7492_v63, %v7499_v1  ;;  %v28844_v35 = vld [vmem:[#allocation195_spill] sm:$0xff]  ;;  %v28845_v45 = vld [vmem:[#allocation88_spill] sm:$0xff] }
 0x399   :  { %v23907_v20 = vcombine.low %v7534_v42, %v7541_v11  ;;  %v23909_v33 = vcombine.low %v7450_v36, %v7457_v5  ;;  %v23911_v60 = vcombine.low %v7464_v41, %v7471_v56  ;;  %16378 = vperm.xlu0 %18688, %v12619_v37   ;;  %v7590_v49 = vrot.slane %v28843_v32, %v19918_v55 }
 0x39a   :  { %v12466_v29 = vcombine.low %v12458_v54, %v12465_v15  ;;  %v12492_v10 = vrot.slane %v28844_v35, %v19962_v25  ;;  %v12499_v40 = vrot.slane %v28845_v45, %v19962_v25  ;;  %v7597_v63 = vrot.slane %v28843_v32, %v19921_v47  ;;  %v23933_v56 = vpop.permute.xlu1 %16159  ;;  %v23935_v54 = vpop.permute.xlu0 %16192  ;;  %v28854_v45 = vld [vmem:[#allocation99_spill] sm:$0xff] }
 0x39b   :  { %28841 = vst [vmem:[#allocation87_spill] sm:$0xff] %v23909_v33  ;;  %28842 = vst [vmem:[#allocation25_spill] sm:$0xff] %v23911_v60  ;;  %v12653_v1 = vcombine.low %v12645_v14, %v12652_v59  ;;  %v12679_v36 = vrot.slane %v22335_v34, %v19962_v25  ;;  %v12686_v5 = vrot.slane %v22341_v52, %v19962_v25  ;;  %v28850_v14 = vld [vmem:[#allocation31_spill] sm:$0xff]  ;;  %v28862_v60 = vld [vmem:[#allocation12_spill] sm:$0xff] }
 0x39c   :  { %v23925_v41 = vcombine.low %v7548_v2, %v7555_v50  ;;  %v7604_v37 = vrot.slane %v28843_v32, %v19930_v4  ;;  %v23929_v42 = vcombine.low %v7506_v22, %v7513_v27  ;;  %v23931_v11 = vcombine.low %v7520_v62, %v7527_v43  ;;  %28848 = vst [vmem:[#allocation200_spill] sm:$0xff] %v23933_v56  ;;  %v28852_v27 = vld [vmem:[#allocation90_spill] sm:$0xff] }
 0x39d   :  { %16351 = vperm.xlu1 %18689, %v12466_v29   ;;  %28849 = vst [vmem:[#allocation188_spill] sm:$0xff] %v23935_v54  ;;  %v7611_v34 = vrot.slane %v28843_v32, %v19933_v38  ;;  %v7562_v52 = vrot.slane %v28850_v14, %v19918_v55  ;;  %v7569_v50 = vrot.slane %v28850_v14, %v19921_v47  ;;  %v28851_v29 = vld [vmem:[#allocation8_spill] sm:$0xff] }
 0x39e   :  { %28846 = vst [vmem:[#allocation221_spill] sm:$0xff] %v23929_v42  ;;  %28847 = vst [vmem:[#allocation164_spill] sm:$0xff] %v23931_v11  ;;  %v7576_v22 = vrot.slane %v28850_v14, %v19930_v4  ;;  %16384 = vperm.xlu0 %18688, %v12653_v1   ;;  %v7583_v2 = vrot.slane %v28850_v14, %v19933_v38  ;;  %v12500_v15 = vcombine.low %v12492_v10, %v12499_v40  ;;  %v28855_v1 = vld [vmem:[#allocation240_spill] sm:$0xff] }
 0x39f   :  { %v12526_v59 = vrot.slane %v28851_v29, %v19962_v25  ;;  %v12533_v32 = vrot.slane %v28852_v27, %v19962_v25  ;;  %v23951_v62 = vcombine.low %v7590_v49, %v7597_v63  ;;  %v12687_v43 = vcombine.low %v12679_v36, %v12686_v5  ;;  %v23965_v63 = vpop.permute.xlu1 %16165  ;;  %v23967_v36 = vpop.permute.xlu0 %16198 }
 0x3a0   :  { %v12713_v35 = vrot.slane %v22349_v0, %v19962_v25  ;;  %v12720_v56 = vrot.slane %v28854_v45, %v19962_v25  ;;  %v7646_v54 = vrot.slane %v28855_v1, %v19918_v55  ;;  %v7653_v10 = vrot.slane %v28855_v1, %v19921_v47  ;;  %28856 = vst [vmem:[#allocation226_spill] sm:$0xff] %v23965_v63  ;;  %v28858_v0 = vld [vmem:[#allocation241_spill] sm:$0xff] }
 0x3a1   :  { %28853 = vst [vmem:[#allocation225_spill] sm:$0xff] %v23951_v62  ;;  %v7660_v40 = vrot.slane %v28855_v1, %v19930_v4  ;;  %v7667_v49 = vrot.slane %v28855_v1, %v19933_v38  ;;  %16357 = vperm.xlu1 %18689, %v12500_v15   ;;  %28857 = vst [vmem:[#allocation317_spill] sm:$0xff] %v23967_v36  ;;  %v7618_v5 = vrot.slane %v28858_v0, %v19918_v55  ;;  %v28859_v15 = vld [vmem:[#allocation91_spill] sm:$0xff]  ;;  %v28860_v36 = vld [vmem:[#allocation209_spill] sm:$0xff] }
 0x3a2   :  { %v7625_v14 = vrot.slane %v28858_v0, %v19921_v47  ;;  %v7632_v29 = vrot.slane %v28858_v0, %v19930_v4  ;;  %v7639_v27 = vrot.slane %v28858_v0, %v19933_v38  ;;  %16390 = vperm.xlu0 %18688, %v12687_v43   ;;  %v23977_v45 = vcombine.low %v7604_v37, %v7611_v34  ;;  %v28864_v34 = vld [vmem:[#allocation35_spill] sm:$0xff] }
 0x3a3   :  { %v12534_v1 = vcombine.low %v12526_v59, %v12533_v32  ;;  %v12560_v51 = vrot.slane %v28859_v15, %v19962_v25  ;;  %v12567_v63 = vrot.slane %v28860_v36, %v19962_v25  ;;  %v23983_v11 = vcombine.low %v7562_v52, %v7569_v50  ;;  %v23997_v43 = vpop.permute.xlu1 %16171 }
 0x3a4   :  { %v12721_v42 = vcombine.low %v12713_v35, %v12720_v56  ;;  %v12747_v33 = vrot.slane %v28862_v60, %v19962_v25  ;;  %v12754_v62 = vrot.slane %v22425_v23, %v19962_v25  ;;  %v23989_v0 = vcombine.low %v7646_v54, %v7653_v10  ;;  %28865 = vst [vmem:[#allocation16_spill] sm:$0xff] %v23997_v43  ;;  %v23999_v56 = vpop.permute.xlu0 %16204  ;;  %v28870_v10 = vld [vmem:[#allocation321_spill] sm:$0xff] }
 0x3a5   :  { %28861 = vst [vmem:[#allocation318_spill] sm:$0xff] %v23983_v11  ;;  %v23991_v37 = vcombine.low %v7576_v22, %v7583_v2  ;;  %v7702_v59 = vrot.slane %v28864_v34, %v19918_v55  ;;  %v7709_v32 = vrot.slane %v28864_v34, %v19921_v47  ;;  %16363 = vperm.xlu1 %18689, %v12534_v1   ;;  %28866 = vst [vmem:[#allocation85_spill] sm:$0xff] %v23999_v56  ;;  %v28869_v2 = vld [vmem:[#allocation320_spill] sm:$0xff] }
 0x3a6   :  { %v24001_v52 = vcombine.low %v7660_v40, %v7667_v49  ;;  %v7716_v23 = vrot.slane %v28864_v34, %v19930_v4  ;;  %v24005_v60 = vcombine.low %v7618_v5, %v7625_v14  ;;  %v24007_v54 = vcombine.low %v7632_v29, %v7639_v27  ;;  %16396 = vperm.xlu0 %18688, %v12721_v42   ;;  %v28871_v40 = vld [vmem:[#allocation156_spill] sm:$0xff]  ;;  %v28872_v14 = vld [vmem:[#allocation105_spill] sm:$0xff] }
 0x3a7   :  { %28863 = vst [vmem:[#allocation28_spill] sm:$0xff] %v23991_v37  ;;  %v7723_v50 = vrot.slane %v28864_v34, %v19933_v38  ;;  %v12568_v22 = vcombine.low %v12560_v51, %v12567_v63  ;;  %v12594_v35 = vrot.slane %v28869_v2, %v19962_v25  ;;  %v12601_v36 = vrot.slane %v28870_v10, %v19962_v25  ;;  %v24029_v15 = vpop.permute.xlu1 %16177  ;;  %v28876_v2 = vld [vmem:[#allocation245_spill] sm:$0xff] }
 0x3a8   :  { %28867 = vst [vmem:[#allocation210_spill] sm:$0xff] %v24005_v60  ;;  %28868 = vst [vmem:[#allocation94_spill] sm:$0xff] %v24007_v54  ;;  %v7674_v49 = vrot.slane %v28871_v40, %v19918_v55  ;;  %v12755_v1 = vcombine.low %v12747_v33, %v12754_v62  ;;  %v12781_v5 = vrot.slane %v22438_v12, %v19962_v25  ;;  %v24031_v33 = vpop.permute.xlu0 %16210  ;;  %v28875_v12 = vld [vmem:[#allocation244_spill] sm:$0xff]  ;;  %v28879_v54 = vld [vmem:[#allocation106_spill] sm:$0xff] }
 0x3a9   :  { %v12788_v42 = vrot.slane %v28872_v14, %v19962_v25  ;;  %v24021_v29 = vcombine.low %v7702_v59, %v7709_v32  ;;  %v7681_v51 = vrot.slane %v28871_v40, %v19921_v47  ;;  %v7688_v63 = vrot.slane %v28871_v40, %v19930_v4  ;;  %28873 = vst [vmem:[#allocation29_spill] sm:$0xff] %v24029_v15 }
 0x3aa   :  { %v7695_v27 = vrot.slane %v28871_v40, %v19933_v38  ;;  %16369 = vperm.xlu1 %18689, %v12568_v22   ;;  %28874 = vst [vmem:[#allocation30_spill] sm:$0xff] %v24031_v33  ;;  %v7758_v62 = vrot.slane %v28875_v12, %v19918_v55  ;;  %v7765_v34 = vrot.slane %v28875_v12, %v19921_v47  ;;  %v28877_v22 = vld [vmem:[#allocation97_spill] sm:$0xff] }
 0x3ab   :  { %v7772_v59 = vrot.slane %v28875_v12, %v19930_v4  ;;  %v7779_v32 = vrot.slane %v28875_v12, %v19933_v38  ;;  %16402 = vperm.xlu0 %18688, %v12755_v1   ;;  %v7730_v10 = vrot.slane %v28876_v2, %v19918_v55  ;;  %v12602_v40 = vcombine.low %v12594_v35, %v12601_v36  ;;  %v28878_v33 = vld [vmem:[#allocation213_spill] sm:$0xff]  ;;  %v28880_v12 = vld [vmem:[#allocation327_spill] sm:$0xff] }
 0x3ac   :  { %v12628_v14 = vrot.slane %v28877_v22, %v19962_v25  ;;  %v12635_v56 = vrot.slane %v28878_v33, %v19962_v25  ;;  %v7737_v15 = vrot.slane %v28876_v2, %v19921_v47  ;;  %v12789_v43 = vcombine.low %v12781_v5, %v12788_v42  ;;  %v24061_v33 = vpop.permute.xlu1 %16183  ;;  %v24063_v5 = vpop.permute.xlu0 %16216 }
 0x3ad   :  { %v12815_v60 = vrot.slane %v28879_v54, %v19962_v25  ;;  %v12822_v1 = vrot.slane %v28880_v12, %v19962_v25  ;;  %v24053_v37 = vcombine.low %v7716_v23, %v7723_v50  ;;  %v24055_v11 = vcombine.low %v7674_v49, %v7681_v51  ;;  %28882 = vst [vmem:[#allocation9_spill] sm:$0xff] %v24061_v33  ;;  %v28885_v23 = vld [vmem:[#allocation39_spill] sm:$0xff] }
 0x3ae   :  { %v7744_v35 = vrot.slane %v28876_v2, %v19930_v4  ;;  %v7751_v36 = vrot.slane %v28876_v2, %v19933_v38  ;;  %16375 = vperm.xlu1 %18689, %v12602_v40   ;;  %28883 = vst [vmem:[#allocation322_spill] sm:$0xff] %v24063_v5  ;;  %v24065_v42 = vcombine.low %v7758_v62, %v7765_v34  ;;  %v28886_v2 = vld [vmem:[#allocation98_spill] sm:$0xff]  ;;  %v28887_v40 = vld [vmem:[#allocation253_spill] sm:$0xff] }
 0x3af   :  { %28881 = vst [vmem:[#allocation204_spill] sm:$0xff] %v24055_v11  ;;  %v24067_v54 = vcombine.low %v7688_v63, %v7695_v27  ;;  %v7814_v50 = vrot.slane %v28885_v23, %v19918_v55  ;;  %v7821_v49 = vrot.slane %v28885_v23, %v19921_v47  ;;  %16408 = vperm.xlu0 %18688, %v12789_v43   ;;  %v28889_v27 = vld [vmem:[#allocation14_spill] sm:$0xff] }
 0x3b0   :  { %v24073_v51 = vcombine.low %v7772_v59, %v7779_v32  ;;  %v12636_v22 = vcombine.low %v12628_v14, %v12635_v56  ;;  %v12662_v12 = vrot.slane %v28886_v2, %v19962_v25  ;;  %v12669_v5 = vrot.slane %v28887_v40, %v19962_v25  ;;  %v28891_v32 = vld [vmem:[#allocation248_spill] sm:$0xff]  ;;  %v28902_v11 = vld [vmem:[#allocation102_spill] sm:$0xff] }
 0x3b1   :  { %28884 = vst [vmem:[#allocation233_spill] sm:$0xff] %v24067_v54  ;;  %v24079_v62 = vcombine.low %v7730_v10, %v7737_v15  ;;  %v12823_v63 = vcombine.low %v12815_v60, %v12822_v1  ;;  %v12849_v34 = vrot.slane %v28889_v27, %v19962_v25  ;;  %v12856_v33 = vrot.slane %v22531_v3, %v19962_v25  ;;  %v24093_v15 = vpop.permute.xlu1 %16189  ;;  %v24095_v60 = vpop.permute.xlu0 %16222 }
 0x3b2   :  { %v7828_v43 = vrot.slane %v28885_v23, %v19930_v4  ;;  %v7835_v56 = vrot.slane %v28885_v23, %v19933_v38  ;;  %v24089_v59 = vcombine.low %v7744_v35, %v7751_v36  ;;  %v7786_v14 = vrot.slane %v28891_v32, %v19918_v55  ;;  %28892 = vst [vmem:[#allocation88_spill] sm:$0xff] %v24093_v15  ;;  %v28894_v36 = vld [vmem:[#allocation251_spill] sm:$0xff] }
 0x3b3   :  { %28888 = vst [vmem:[#allocation153_spill] sm:$0xff] %v24079_v62  ;;  %16381 = vperm.xlu1 %18689, %v12636_v22   ;;  %28893 = vst [vmem:[#allocation31_spill] sm:$0xff] %v24095_v60  ;;  %v24097_v10 = vcombine.low %v7814_v50, %v7821_v49  ;;  %v7793_v3 = vrot.slane %v28891_v32, %v19921_v47  ;;  %v7800_v1 = vrot.slane %v28891_v32, %v19930_v4  ;;  %v28895_v22 = vld [vmem:[#allocation324_spill] sm:$0xff]  ;;  %v28896_v50 = vld [vmem:[#allocation325_spill] sm:$0xff] }
 0x3b4   :  { %28890 = vst [vmem:[#allocation195_spill] sm:$0xff] %v24089_v59  ;;  %v7807_v35 = vrot.slane %v28891_v32, %v19933_v38  ;;  %16414 = vperm.xlu0 %18688, %v12823_v63   ;;  %v7870_v23 = vrot.slane %v28894_v36, %v19918_v55  ;;  %v12670_v2 = vcombine.low %v12662_v12, %v12669_v5  ;;  %v28897_v12 = vld [vmem:[#allocation252_spill] sm:$0xff] }
 0x3b5   :  { %v12696_v40 = vrot.slane %v28895_v22, %v19962_v25  ;;  %v12703_v49 = vrot.slane %v28896_v50, %v19962_v25  ;;  %v7877_v27 = vrot.slane %v28894_v36, %v19921_v47  ;;  %v12857_v60 = vcombine.low %v12849_v34, %v12856_v33  ;;  %v24125_v59 = vpop.permute.xlu1 %16195  ;;  %v24127_v33 = vpop.permute.xlu0 %16228 }
 0x3b6   :  { %v12883_v15 = vrot.slane %v22533_v26, %v19962_v25  ;;  %v12890_v63 = vrot.slane %v22539_v7, %v19962_v25  ;;  %v7884_v32 = vrot.slane %v28894_v36, %v19930_v4  ;;  %v7891_v5 = vrot.slane %v28894_v36, %v19933_v38  ;;  %28898 = vst [vmem:[#allocation8_spill] sm:$0xff] %v24125_v59 }
 0x3b7   :  { %v7842_v22 = vrot.slane %v28897_v12, %v19918_v55  ;;  %v7849_v50 = vrot.slane %v28897_v12, %v19921_v47  ;;  %16387 = vperm.xlu1 %18689, %v12670_v2   ;;  %28899 = vst [vmem:[#allocation90_spill] sm:$0xff] %v24127_v33  ;;  %v24129_v26 = vcombine.low %v7828_v43, %v7835_v56  ;;  %v28903_v2 = vld [vmem:[#allocation216_spill] sm:$0xff] }
 0x3b8   :  { %v24131_v7 = vcombine.low %v7786_v14, %v7793_v3  ;;  %v7856_v34 = vrot.slane %v28897_v12, %v19930_v4  ;;  %v7863_v36 = vrot.slane %v28897_v12, %v19933_v38  ;;  %16420 = vperm.xlu0 %18688, %v12857_v60   ;;  %v24137_v62 = vcombine.low %v7800_v1, %v7807_v35  ;;  %v28906_v60 = vld [vmem:[#allocation43_spill] sm:$0xff] }
 0x3b9   :  { %v12704_v54 = vcombine.low %v12696_v40, %v12703_v49  ;;  %v12730_v59 = vrot.slane %v28902_v11, %v19962_v25  ;;  %v12737_v33 = vrot.slane %v28903_v2, %v19962_v25  ;;  %v24143_v43 = vcombine.low %v7870_v23, %v7877_v27  ;;  %v24157_v40 = vpop.permute.xlu1 %16201  ;;  %v28911_v49 = vld [vmem:[#allocation256_spill] sm:$0xff] }
 0x3ba   :  { %28900 = vst [vmem:[#allocation99_spill] sm:$0xff] %v24131_v7  ;;  %28901 = vst [vmem:[#allocation240_spill] sm:$0xff] %v24137_v62  ;;  %v12891_v56 = vcombine.low %v12883_v15, %v12890_v63  ;;  %v12917_v14 = vrot.slane %v22552_v6, %v19962_v25  ;;  %v12924_v3 = vrot.slane %v22554_v53, %v19962_v25  ;;  %v24159_v15 = vpop.permute.xlu0 %16234 }
 0x3bb   :  { %28904 = vst [vmem:[#allocation241_spill] sm:$0xff] %v24143_v43  ;;  %v24149_v12 = vcombine.low %v7884_v32, %v7891_v5  ;;  %v7926_v1 = vrot.slane %v28906_v60, %v19918_v55  ;;  %v7933_v11 = vrot.slane %v28906_v60, %v19921_v47  ;;  %v24155_v35 = vcombine.low %v7842_v22, %v7849_v50  ;;  %v28913_v22 = vld [vmem:[#allocation326_spill] sm:$0xff] }
 0x3bc   :  { %28908 = vst [vmem:[#allocation12_spill] sm:$0xff] %v24157_v40  ;;  %16393 = vperm.xlu1 %18689, %v12704_v54   ;;  %28909 = vst [vmem:[#allocation35_spill] sm:$0xff] %v24159_v15  ;;  %v7940_v6 = vrot.slane %v28906_v60, %v19930_v4  ;;  %v7947_v53 = vrot.slane %v28906_v60, %v19933_v38  ;;  %v24165_v23 = vcombine.low %v7856_v34, %v7863_v36  ;;  %v28912_v54 = vld [vmem:[#allocation217_spill] sm:$0xff] }
 0x3bd   :  { %28905 = vst [vmem:[#allocation91_spill] sm:$0xff] %v24149_v12  ;;  %28907 = vst [vmem:[#allocation209_spill] sm:$0xff] %v24155_v35  ;;  %v7898_v27 = vrot.slane %v28911_v49, %v19918_v55  ;;  %16426 = vperm.xlu0 %18688, %v12891_v56   ;;  %v7905_v63 = vrot.slane %v28911_v49, %v19921_v47  ;;  %v12738_v32 = vcombine.low %v12730_v59, %v12737_v33  ;;  %v28914_v34 = vld [vmem:[#allocation205_spill] sm:$0xff]  ;;  %v28916_v59 = vld [vmem:[#allocation44_spill] sm:$0xff]  ;;  %v24189_v40 = vpop.permute.xlu1 %16207 }
 0x3be   :  { %28910 = vst [vmem:[#allocation320_spill] sm:$0xff] %v24165_v23  ;;  %v12764_v5 = vrot.slane %v28912_v54, %v19962_v25  ;;  %v12771_v50 = vrot.slane %v28913_v22, %v19962_v25  ;;  %v7912_v2 = vrot.slane %v28911_v49, %v19930_v4  ;;  %v12925_v60 = vcombine.low %v12917_v14, %v12924_v3  ;;  %v24191_v14 = vpop.permute.xlu0 %16240 }
 0x3bf   :  { %v12951_v36 = vrot.slane %v28914_v34, %v19962_v25  ;;  %v12958_v56 = vrot.slane %v22628_v58, %v19962_v25  ;;  %v24181_v15 = vcombine.low %v7926_v1, %v7933_v11  ;;  %v7982_v33 = vrot.slane %v28916_v59, %v19918_v55  ;;  %28917 = vst [vmem:[#allocation156_spill] sm:$0xff] %v24189_v40  ;;  %v28919_v1 = vld [vmem:[#allocation45_spill] sm:$0xff] }
 0x3c0   :  { %v7989_v54 = vrot.slane %v28916_v59, %v19921_v47  ;;  %v7919_v22 = vrot.slane %v28911_v49, %v19933_v38  ;;  %16399 = vperm.xlu1 %18689, %v12738_v32   ;;  %28918 = vst [vmem:[#allocation105_spill] sm:$0xff] %v24191_v14  ;;  %v7996_v3 = vrot.slane %v28916_v59, %v19930_v4  ;;  %v28921_v32 = vld [vmem:[#allocation328_spill] sm:$0xff]  ;;  %v28922_v14 = vld [vmem:[#allocation329_spill] sm:$0xff] }
 0x3c1   :  { %28915 = vst [vmem:[#allocation321_spill] sm:$0xff] %v24181_v15  ;;  %v8003_v58 = vrot.slane %v28916_v59, %v19933_v38  ;;  %v7954_v11 = vrot.slane %v28919_v1, %v19918_v55  ;;  %v7961_v34 = vrot.slane %v28919_v1, %v19921_v47  ;;  %16432 = vperm.xlu0 %18688, %v12925_v60  }
 0x3c2   :  { %v24201_v23 = vcombine.low %v7940_v6, %v7947_v53  ;;  %v12772_v49 = vcombine.low %v12764_v5, %v12771_v50  ;;  %v12798_v40 = vrot.slane %v28921_v32, %v19962_v25  ;;  %v12805_v35 = vrot.slane %v28922_v14, %v19962_v25  ;;  %v24221_v50 = vpop.permute.xlu1 %16213 }
 0x3c3   :  { %v24207_v62 = vcombine.low %v7898_v27, %v7905_v63  ;;  %v12959_v7 = vcombine.low %v12951_v36, %v12958_v56  ;;  %v12985_v59 = vrot.slane %v22637_v61, %v19962_v25  ;;  %v12992_v15 = vrot.slane %v22639_v8, %v19962_v25  ;;  %28926 = vst [vmem:[#allocation106_spill] sm:$0xff] %v24221_v50  ;;  %v24223_v27 = vpop.permute.xlu0 %16246  ;;  %v28929_v61 = vld [vmem:[#allocation261_spill] sm:$0xff] }
 0x3c4   :  { %28920 = vst [vmem:[#allocation244_spill] sm:$0xff] %v24201_v23  ;;  %v24213_v12 = vcombine.low %v7982_v33, %v7989_v54  ;;  %v24215_v6 = vcombine.low %v7912_v2, %v7919_v22  ;;  %v7968_v53 = vrot.slane %v28919_v1, %v19930_v4  ;;  %v7975_v5 = vrot.slane %v28919_v1, %v19933_v38  ;;  %v28931_v33 = vld [vmem:[#allocation15_spill] sm:$0xff]  ;;  %v28933_v1 = vld [vmem:[#allocation224_spill] sm:$0xff] }
 0x3c5   :  { %28923 = vst [vmem:[#allocation245_spill] sm:$0xff] %v24207_v62  ;;  %16405 = vperm.xlu1 %18689, %v12772_v49   ;;  %28927 = vst [vmem:[#allocation327_spill] sm:$0xff] %v24223_v27  ;;  %v24225_v63 = vcombine.low %v7996_v3, %v8003_v58  ;;  %v8038_v8 = vrot.slane %v28929_v61, %v19918_v55  ;;  %v8045_v2 = vrot.slane %v28929_v61, %v19921_v47  ;;  %v28932_v22 = vld [vmem:[#allocation23_spill] sm:$0xff] }
 0x3c6   :  { %28924 = vst [vmem:[#allocation97_spill] sm:$0xff] %v24213_v12  ;;  %28925 = vst [vmem:[#allocation213_spill] sm:$0xff] %v24215_v6  ;;  %v24231_v60 = vcombine.low %v7954_v11, %v7961_v34  ;;  %16438 = vperm.xlu0 %18688, %v12959_v7   ;;  %v8052_v36 = vrot.slane %v28929_v61, %v19930_v4  ;;  %v12806_v56 = vcombine.low %v12798_v40, %v12805_v35  ;;  %v28934_v11 = vld [vmem:[#allocation118_spill] sm:$0xff]  ;;  %v28942_v12 = vld [vmem:[#allocation20_spill] sm:$0xff] }
 0x3c7   :  { %28928 = vst [vmem:[#allocation39_spill] sm:$0xff] %v24225_v63  ;;  %v12832_v54 = vrot.slane %v28931_v33, %v19962_v25  ;;  %v12839_v14 = vrot.slane %v28932_v22, %v19962_v25  ;;  %v8059_v3 = vrot.slane %v28929_v61, %v19933_v38  ;;  %v12993_v58 = vcombine.low %v12985_v59, %v12992_v15  ;;  %v28935_v34 = vld [vmem:[#allocation262_spill] sm:$0xff]  ;;  %v24253_v61 = vpop.permute.xlu1 %16219  ;;  %v24255_v15 = vpop.permute.xlu0 %16252  ;;  %v28938_v59 = vld [vmem:[#allocation48_spill] sm:$0xff] }
 0x3c8   :  { %28930 = vst [vmem:[#allocation98_spill] sm:$0xff] %v24231_v60  ;;  %v13019_v49 = vrot.slane %v28933_v1, %v19962_v25  ;;  %v13026_v7 = vrot.slane %v28934_v11, %v19962_v25  ;;  %v8010_v32 = vrot.slane %v28935_v34, %v19918_v55  ;;  %v8017_v35 = vrot.slane %v28935_v34, %v19921_v47  ;;  %v28941_v60 = vld [vmem:[#allocation111_spill] sm:$0xff] }
 0x3c9   :  { %v8024_v40 = vrot.slane %v28935_v34, %v19930_v4  ;;  %v8031_v33 = vrot.slane %v28935_v34, %v19933_v38  ;;  %28936 = vst [vmem:[#allocation253_spill] sm:$0xff] %v24253_v61  ;;  %16411 = vperm.xlu1 %18689, %v12806_v56   ;;  %28937 = vst [vmem:[#allocation14_spill] sm:$0xff] %v24255_v15  ;;  %v8094_v22 = vrot.slane %v28938_v59, %v19918_v55  ;;  %v28939_v34 = vld [vmem:[#allocation269_spill] sm:$0xff] }
 0x3ca   :  { %v8101_v1 = vrot.slane %v28938_v59, %v19921_v47  ;;  %v8108_v11 = vrot.slane %v28938_v59, %v19930_v4  ;;  %v8115_v27 = vrot.slane %v28938_v59, %v19933_v38  ;;  %16444 = vperm.xlu0 %18688, %v12993_v58   ;;  %v8066_v50 = vrot.slane %v28939_v34, %v19918_v55  ;;  %v28940_v56 = vld [vmem:[#allocation109_spill] sm:$0xff] }
 0x3cb   :  { %v12840_v61 = vcombine.low %v12832_v54, %v12839_v14  ;;  %v12866_v15 = vrot.slane %v28940_v56, %v19962_v25  ;;  %v12873_v6 = vrot.slane %v28941_v60, %v19962_v25  ;;  %v8073_v62 = vrot.slane %v28939_v34, %v19921_v47  ;;  %v24285_v56 = vpop.permute.xlu1 %16225  ;;  %v24287_v60 = vpop.permute.xlu0 %16258 }
 0x3cc   :  { %v13027_v63 = vcombine.low %v13019_v49, %v13026_v7  ;;  %v13053_v23 = vrot.slane %v28942_v12, %v19962_v25  ;;  %v13060_v58 = vrot.slane %v22729_v9, %v19962_v25  ;;  %v24277_v59 = vcombine.low %v8038_v8, %v8045_v2  ;;  %28945 = vst [vmem:[#allocation324_spill] sm:$0xff] %v24285_v56  ;;  %v28950_v8 = vld [vmem:[#allocation112_spill] sm:$0xff]  ;;  %v28960_v56 = vld [vmem:[#allocation126_spill] sm:$0xff] }
 0x3cd   :  { %v24279_v43 = vcombine.low %v8052_v36, %v8059_v3  ;;  %v24281_v54 = vcombine.low %v7968_v53, %v7975_v5  ;;  %v24283_v14 = vcombine.low %v8010_v32, %v8017_v35  ;;  %16417 = vperm.xlu1 %18689, %v12840_v61   ;;  %28946 = vst [vmem:[#allocation325_spill] sm:$0xff] %v24287_v60  ;;  %v28951_v36 = vld [vmem:[#allocation332_spill] sm:$0xff] }
 0x3ce   :  { %v24289_v49 = vcombine.low %v8094_v22, %v8101_v1  ;;  %v24291_v7 = vcombine.low %v8024_v40, %v8031_v33  ;;  %v8080_v9 = vrot.slane %v28939_v34, %v19930_v4  ;;  %v8087_v12 = vrot.slane %v28939_v34, %v19933_v38  ;;  %16450 = vperm.xlu0 %18688, %v13027_v63   ;;  %v28953_v63 = vld [vmem:[#allocation51_spill] sm:$0xff] }
 0x3cf   :  { %28943 = vst [vmem:[#allocation248_spill] sm:$0xff] %v24281_v54  ;;  %28944 = vst [vmem:[#allocation251_spill] sm:$0xff] %v24283_v14  ;;  %v24297_v53 = vcombine.low %v8108_v11, %v8115_v27  ;;  %v12874_v5 = vcombine.low %v12866_v15, %v12873_v6  ;;  %v12900_v2 = vrot.slane %v28950_v8, %v19962_v25  ;;  %v28957_v11 = vld [vmem:[#allocation275_spill] sm:$0xff] }
 0x3d0   :  { %28947 = vst [vmem:[#allocation252_spill] sm:$0xff] %v24289_v49  ;;  %28948 = vst [vmem:[#allocation102_spill] sm:$0xff] %v24291_v7  ;;  %v12907_v3 = vrot.slane %v28951_v36, %v19962_v25  ;;  %v24303_v32 = vcombine.low %v8066_v50, %v8073_v62  ;;  %v13061_v35 = vcombine.low %v13053_v23, %v13060_v58  ;;  %v24317_v50 = vpop.permute.xlu1 %16231  ;;  %v24319_v23 = vpop.permute.xlu0 %16264  ;;  %v28959_v36 = vld [vmem:[#allocation116_spill] sm:$0xff] }
 0x3d1   :  { %28949 = vst [vmem:[#allocation216_spill] sm:$0xff] %v24297_v53  ;;  %v13087_v40 = vrot.slane %v22731_v17, %v19962_v25  ;;  %v13094_v33 = vrot.slane %v22742_v30, %v19962_v25  ;;  %v8150_v27 = vrot.slane %v28953_v63, %v19918_v55  ;;  %v8157_v6 = vrot.slane %v28953_v63, %v19921_v47  ;;  %v28956_v17 = vld [vmem:[#allocation270_spill] sm:$0xff]  ;;  %v28969_v53 = vld [vmem:[#allocation117_spill] sm:$0xff] }
 0x3d2   :  { %28952 = vst [vmem:[#allocation43_spill] sm:$0xff] %v24303_v32  ;;  %v8164_v61 = vrot.slane %v28953_v63, %v19930_v4  ;;  %v8171_v62 = vrot.slane %v28953_v63, %v19933_v38  ;;  %28954 = vst [vmem:[#allocation256_spill] sm:$0xff] %v24317_v50  ;;  %16423 = vperm.xlu1 %18689, %v12874_v5   ;;  %v8122_v30 = vrot.slane %v28956_v17, %v19918_v55  ;;  %v28958_v5 = vld [vmem:[#allocation115_spill] sm:$0xff] }
 0x3d3   :  { %28955 = vst [vmem:[#allocation217_spill] sm:$0xff] %v24319_v23  ;;  %v8129_v15 = vrot.slane %v28956_v17, %v19921_v47  ;;  %v8136_v22 = vrot.slane %v28956_v17, %v19930_v4  ;;  %v8143_v1 = vrot.slane %v28956_v17, %v19933_v38  ;;  %16456 = vperm.xlu0 %18688, %v13061_v35   ;;  %v28961_v17 = vld [vmem:[#allocation129_spill] sm:$0xff] }
 0x3d4   :  { %v8206_v34 = vrot.slane %v28957_v11, %v19918_v55  ;;  %v12908_v58 = vcombine.low %v12900_v2, %v12907_v3  ;;  %v12934_v8 = vrot.slane %v28958_v5, %v19962_v25  ;;  %v12941_v63 = vrot.slane %v28959_v36, %v19962_v25  ;;  %v28962_v3 = vld [vmem:[#allocation276_spill] sm:$0xff]  ;;  %v24349_v7 = vpop.permute.xlu1 %16237 }
 0x3d5   :  { %v8213_v60 = vrot.slane %v28957_v11, %v19921_v47  ;;  %v13095_v50 = vcombine.low %v13087_v40, %v13094_v33  ;;  %v13121_v23 = vrot.slane %v28960_v56, %v19962_v25  ;;  %v13128_v35 = vrot.slane %v28961_v17, %v19962_v25  ;;  %28963 = vst [vmem:[#allocation326_spill] sm:$0xff] %v24349_v7  ;;  %v24351_v40 = vpop.permute.xlu0 %16270  ;;  %v28970_v7 = vld [vmem:[#allocation148_spill] sm:$0xff] }
 0x3d6   :  { %v8220_v32 = vrot.slane %v28957_v11, %v19930_v4  ;;  %v8227_v2 = vrot.slane %v28957_v11, %v19933_v38  ;;  %v8178_v5 = vrot.slane %v28962_v3, %v19918_v55  ;;  %v8185_v36 = vrot.slane %v28962_v3, %v19921_v47  ;;  %16429 = vperm.xlu1 %18689, %v12908_v58  }
 0x3d7   :  { %28964 = vst [vmem:[#allocation205_spill] sm:$0xff] %v24351_v40  ;;  %v24353_v56 = vcombine.low %v8150_v27, %v8157_v6  ;;  %v24355_v33 = vcombine.low %v8164_v61, %v8171_v62  ;;  %v24357_v17 = vcombine.low %v8080_v9, %v8087_v12  ;;  %v24359_v14 = vcombine.low %v8122_v30, %v8129_v15  ;;  %v28971_v61 = vld [vmem:[#allocation341_spill] sm:$0xff] }
 0x3d8   :  { %16462 = vperm.xlu0 %18688, %v13095_v50   ;;  %v24361_v11 = vcombine.low %v8136_v22, %v8143_v1  ;;  %v12942_v54 = vcombine.low %v12934_v8, %v12941_v63  ;;  %v12968_v49 = vrot.slane %v28969_v53, %v19962_v25  ;;  %v12975_v58 = vrot.slane %v28970_v7, %v19962_v25  ;;  %v24381_v7 = vpop.permute.xlu1 %16243  ;;  %v28978_v1 = vld [vmem:[#allocation55_spill] sm:$0xff] }
 0x3d9   :  { %28965 = vst [vmem:[#allocation44_spill] sm:$0xff] %v24355_v33  ;;  %28966 = vst [vmem:[#allocation45_spill] sm:$0xff] %v24357_v17  ;;  %v8192_v27 = vrot.slane %v28962_v3, %v19930_v4  ;;  %v13129_v6 = vcombine.low %v13121_v23, %v13128_v35  ;;  %v13155_v9 = vrot.slane %v28971_v61, %v19962_v25  ;;  %v24383_v15 = vpop.permute.xlu0 %16276  ;;  %v28977_v23 = vld [vmem:[#allocation54_spill] sm:$0xff]  ;;  %v28980_v35 = vld [vmem:[#allocation335_spill] sm:$0xff] }
 0x3da   :  { %28967 = vst [vmem:[#allocation328_spill] sm:$0xff] %v24359_v14  ;;  %28968 = vst [vmem:[#allocation329_spill] sm:$0xff] %v24361_v11  ;;  %v13162_v12 = vrot.slane %v22823_v44, %v19962_v25  ;;  %v24373_v62 = vcombine.low %v8206_v34, %v8213_v60  ;;  %v24375_v50 = vcombine.low %v8220_v32, %v8227_v2  ;;  %16435 = vperm.xlu1 %18689, %v12942_v54   ;;  %v28979_v54 = vld [vmem:[#allocation334_spill] sm:$0xff]  ;;  %v28981_v61 = vld [vmem:[#allocation56_spill] sm:$0xff] }
 0x3db   :  { %v8199_v53 = vrot.slane %v28962_v3, %v19933_v38  ;;  %v24379_v30 = vcombine.low %v8178_v5, %v8185_v36  ;;  %28975 = vst [vmem:[#allocation224_spill] sm:$0xff] %v24381_v7  ;;  %28976 = vst [vmem:[#allocation118_spill] sm:$0xff] %v24383_v15  ;;  %v8262_v22 = vrot.slane %v28977_v23, %v19918_v55 }
 0x3dc   :  { %28972 = vst [vmem:[#allocation261_spill] sm:$0xff] %v24373_v62  ;;  %28973 = vst [vmem:[#allocation15_spill] sm:$0xff] %v24375_v50  ;;  %v8269_v44 = vrot.slane %v28977_v23, %v19921_v47  ;;  %v8276_v60 = vrot.slane %v28977_v23, %v19930_v4  ;;  %v8283_v32 = vrot.slane %v28977_v23, %v19933_v38  ;;  %16468 = vperm.xlu0 %18688, %v13129_v6   ;;  %v28990_v50 = vld [vmem:[#allocation342_spill] sm:$0xff] }
 0x3dd   :  { %28974 = vst [vmem:[#allocation23_spill] sm:$0xff] %v24379_v30  ;;  %v8234_v34 = vrot.slane %v28978_v1, %v19918_v55  ;;  %v12976_v8 = vcombine.low %v12968_v49, %v12975_v58  ;;  %v13002_v63 = vrot.slane %v28979_v54, %v19962_v25  ;;  %v13009_v2 = vrot.slane %v28980_v35, %v19962_v25  ;;  %v24413_v35 = vpop.permute.xlu1 %16249 }
 0x3de   :  { %v8241_v3 = vrot.slane %v28978_v1, %v19921_v47  ;;  %v13163_v5 = vcombine.low %v13155_v9, %v13162_v12  ;;  %v13189_v36 = vrot.slane %v22825_v57, %v19962_v25  ;;  %v13196_v6 = vrot.slane %v22831_v28, %v19962_v25  ;;  %28982 = vst [vmem:[#allocation262_spill] sm:$0xff] %v24413_v35  ;;  %v24415_v9 = vpop.permute.xlu0 %16282  ;;  %v28984_v12 = vld [vmem:[#allocation284_spill] sm:$0xff] }
 0x3df   :  { %v8318_v23 = vrot.slane %v28981_v61, %v19918_v55  ;;  %v8325_v49 = vrot.slane %v28981_v61, %v19921_v47  ;;  %v8248_v58 = vrot.slane %v28978_v1, %v19930_v4  ;;  %v8255_v54 = vrot.slane %v28978_v1, %v19933_v38  ;;  %16441 = vperm.xlu1 %18689, %v12976_v8   ;;  %v28986_v8 = vld [vmem:[#allocation21_spill] sm:$0xff] }
 0x3e0   :  { %28983 = vst [vmem:[#allocation48_spill] sm:$0xff] %v24415_v9  ;;  %v8332_v28 = vrot.slane %v28981_v61, %v19930_v4  ;;  %v8339_v57 = vrot.slane %v28981_v61, %v19933_v38  ;;  %v8290_v7 = vrot.slane %v28984_v12, %v19918_v55  ;;  %v8297_v15 = vrot.slane %v28984_v12, %v19921_v47  ;;  %v28987_v9 = vld [vmem:[#allocation227_spill] sm:$0xff] }
 0x3e1   :  { %16474 = vperm.xlu0 %18688, %v13163_v5   ;;  %v24425_v40 = vcombine.low %v8192_v27, %v8199_v53  ;;  %v13010_v1 = vcombine.low %v13002_v63, %v13009_v2  ;;  %v13036_v35 = vrot.slane %v28986_v8, %v19962_v25  ;;  %v13043_v30 = vrot.slane %v28987_v9, %v19962_v25  ;;  %v28989_v61 = vld [vmem:[#allocation231_spill] sm:$0xff]  ;;  %v24445_v2 = vpop.permute.xlu1 %16255  ;;  %v29002_v9 = vld [vmem:[#allocation32_spill] sm:$0xff] }
 0x3e2   :  { %v24431_v11 = vcombine.low %v8262_v22, %v8269_v44  ;;  %v13197_v14 = vcombine.low %v13189_v36, %v13196_v6  ;;  %v13223_v17 = vrot.slane %v28989_v61, %v19962_v25  ;;  %v13230_v62 = vrot.slane %v28990_v50, %v19962_v25  ;;  %28994 = vst [vmem:[#allocation332_spill] sm:$0xff] %v24445_v2  ;;  %v24447_v22 = vpop.permute.xlu0 %16288  ;;  %v29000_v36 = vld [vmem:[#allocation125_spill] sm:$0xff]  ;;  %v29009_v2 = vld [vmem:[#allocation340_spill] sm:$0xff] }
 0x3e3   :  { %28985 = vst [vmem:[#allocation269_spill] sm:$0xff] %v24425_v40  ;;  %v24437_v33 = vcombine.low %v8276_v60, %v8283_v32  ;;  %v24439_v27 = vcombine.low %v8234_v34, %v8241_v3  ;;  %v24441_v53 = vcombine.low %v8248_v58, %v8255_v54  ;;  %v8304_v63 = vrot.slane %v28984_v12, %v19930_v4  ;;  %v28999_v32 = vld [vmem:[#allocation57_spill] sm:$0xff]  ;;  %v29001_v58 = vld [vmem:[#allocation338_spill] sm:$0xff] }
 0x3e4   :  { %28988 = vst [vmem:[#allocation109_spill] sm:$0xff] %v24431_v11  ;;  %16447 = vperm.xlu1 %18689, %v13010_v1   ;;  %28995 = vst [vmem:[#allocation51_spill] sm:$0xff] %v24447_v22  ;;  %v24449_v44 = vcombine.low %v8318_v23, %v8325_v49  ;;  %v24451_v5 = vcombine.low %v8332_v28, %v8339_v57  ;;  %v8311_v50 = vrot.slane %v28984_v12, %v19933_v38 }
 0x3e5   :  { %28991 = vst [vmem:[#allocation111_spill] sm:$0xff] %v24437_v33  ;;  %28992 = vst [vmem:[#allocation20_spill] sm:$0xff] %v24439_v27  ;;  %v24455_v60 = vcombine.low %v8290_v7, %v8297_v15  ;;  %16480 = vperm.xlu0 %18688, %v13197_v14   ;;  %v8374_v34 = vrot.slane %v28999_v32, %v19918_v55  ;;  %v13044_v3 = vcombine.low %v13036_v35, %v13043_v30  ;;  %v29003_v7 = vld [vmem:[#allocation33_spill] sm:$0xff]  ;;  %v29004_v35 = vld [vmem:[#allocation58_spill] sm:$0xff]  ;;  %v24477_v1 = vpop.permute.xlu1 %16261 }
 0x3e6   :  { %28993 = vst [vmem:[#allocation112_spill] sm:$0xff] %v24441_v53  ;;  %28996 = vst [vmem:[#allocation270_spill] sm:$0xff] %v24449_v44  ;;  %v13070_v6 = vrot.slane %v29000_v36, %v19962_v25  ;;  %v13077_v54 = vrot.slane %v29001_v58, %v19962_v25  ;;  %v8381_v23 = vrot.slane %v28999_v32, %v19921_v47  ;;  %v29012_v27 = vld [vmem:[#allocation293_spill] sm:$0xff]  ;;  %v29019_v33 = vld [vmem:[#allocation132_spill] sm:$0xff] }
 0x3e7   :  { %28997 = vst [vmem:[#allocation275_spill] sm:$0xff] %v24451_v5  ;;  %28998 = vst [vmem:[#allocation115_spill] sm:$0xff] %v24455_v60  ;;  %v13231_v49 = vcombine.low %v13223_v17, %v13230_v62  ;;  %v13257_v28 = vrot.slane %v29002_v9, %v19962_v25  ;;  %v13264_v14 = vrot.slane %v29003_v7, %v19962_v25  ;;  %v24479_v17 = vpop.permute.xlu0 %16294  ;;  %v29007_v62 = vld [vmem:[#allocation292_spill] sm:$0xff] }
 0x3e8   :  { %v8388_v15 = vrot.slane %v28999_v32, %v19930_v4  ;;  %v8395_v30 = vrot.slane %v28999_v32, %v19933_v38  ;;  %v8346_v57 = vrot.slane %v29004_v35, %v19918_v55  ;;  %v8353_v12 = vrot.slane %v29004_v35, %v19921_v47  ;;  %29005 = vst [vmem:[#allocation116_spill] sm:$0xff] %v24477_v1  ;;  %v29010_v60 = vld [vmem:[#allocation236_spill] sm:$0xff] }
 0x3e9   :  { %16453 = vperm.xlu1 %18689, %v13044_v3   ;;  %29006 = vst [vmem:[#allocation126_spill] sm:$0xff] %v24479_v17  ;;  %v8430_v8 = vrot.slane %v29007_v62, %v19918_v55  ;;  %v8437_v61 = vrot.slane %v29007_v62, %v19921_v47  ;;  %v8360_v32 = vrot.slane %v29004_v35, %v19930_v4  ;;  %v29008_v3 = vld [vmem:[#allocation339_spill] sm:$0xff] }
 0x3ea   :  { %v8367_v36 = vrot.slane %v29004_v35, %v19933_v38  ;;  %16486 = vperm.xlu0 %18688, %v13231_v49   ;;  %v8444_v58 = vrot.slane %v29007_v62, %v19930_v4  ;;  %v13078_v9 = vcombine.low %v13070_v6, %v13077_v54  ;;  %v13104_v7 = vrot.slane %v29008_v3, %v19962_v25  ;;  %v29011_v35 = vld [vmem:[#allocation238_spill] sm:$0xff] }
 0x3eb   :  { %v13111_v17 = vrot.slane %v29009_v2, %v19962_v25  ;;  %v8451_v22 = vrot.slane %v29007_v62, %v19933_v38  ;;  %v13265_v1 = vcombine.low %v13257_v28, %v13264_v14  ;;  %v13291_v53 = vrot.slane %v29010_v60, %v19962_v25  ;;  %v24509_v62 = vpop.permute.xlu1 %16267  ;;  %v24511_v28 = vpop.permute.xlu0 %16300 }
 0x3ec   :  { %v13298_v49 = vrot.slane %v29011_v35, %v19962_v25  ;;  %v8402_v40 = vrot.slane %v29012_v27, %v19918_v55  ;;  %v8409_v6 = vrot.slane %v29012_v27, %v19921_v47  ;;  %v8416_v54 = vrot.slane %v29012_v27, %v19930_v4  ;;  %29013 = vst [vmem:[#allocation129_spill] sm:$0xff] %v24509_v62  ;;  %v29020_v62 = vld [vmem:[#allocation133_spill] sm:$0xff] }
 0x3ed   :  { %v8423_v2 = vrot.slane %v29012_v27, %v19933_v38  ;;  %16459 = vperm.xlu1 %18689, %v13078_v9   ;;  %29014 = vst [vmem:[#allocation276_spill] sm:$0xff] %v24511_v28  ;;  %v24513_v60 = vcombine.low %v8374_v34, %v8381_v23  ;;  %v24515_v14 = vcombine.low %v8388_v15, %v8395_v30  ;;  %v29022_v23 = vld [vmem:[#allocation157_spill] sm:$0xff] }
 0x3ee   :  { %v24517_v3 = vcombine.low %v8304_v63, %v8311_v50  ;;  %v24519_v35 = vcombine.low %v8346_v57, %v8353_v12  ;;  %16492 = vperm.xlu0 %18688, %v13265_v1   ;;  %v24521_v5 = vcombine.low %v8360_v32, %v8367_v36  ;;  %v13112_v44 = vcombine.low %v13104_v7, %v13111_v17  ;;  %v29023_v63 = vld [vmem:[#allocation144_spill] sm:$0xff]  ;;  %v29025_v57 = vld [vmem:[#allocation61_spill] sm:$0xff]  ;;  %v29030_v32 = vld [vmem:[#allocation62_spill] sm:$0xff] }
 0x3ef   :  { %29015 = vst [vmem:[#allocation117_spill] sm:$0xff] %v24515_v14  ;;  %v13138_v27 = vrot.slane %v29019_v33, %v19962_v25  ;;  %v13145_v9 = vrot.slane %v29020_v62, %v19962_v25  ;;  %v24527_v11 = vcombine.low %v8430_v8, %v8437_v61  ;;  %v13299_v34 = vcombine.low %v13291_v53, %v13298_v49  ;;  %v24541_v17 = vpop.permute.xlu1 %16273  ;;  %v24543_v8 = vpop.permute.xlu0 %16306  ;;  %v29032_v49 = vld [vmem:[#allocation152_spill] sm:$0xff]  ;;  %v29033_v62 = vld [vmem:[#allocation243_spill] sm:$0xff] }
 0x3f0   :  { %29016 = vst [vmem:[#allocation148_spill] sm:$0xff] %v24517_v3  ;;  %29017 = vst [vmem:[#allocation341_spill] sm:$0xff] %v24519_v35  ;;  %v13325_v15 = vrot.slane %v29022_v23, %v19962_v25  ;;  %v13332_v50 = vrot.slane %v29023_v63, %v19962_v25  ;;  %v24533_v30 = vcombine.low %v8444_v58, %v8451_v22  ;;  %v29034_v63 = vld [vmem:[#allocation38_spill] sm:$0xff]  ;;  %v29041_v35 = vld [vmem:[#allocation151_spill] sm:$0xff] }
 0x3f1   :  { %29018 = vst [vmem:[#allocation54_spill] sm:$0xff] %v24521_v5  ;;  %29021 = vst [vmem:[#allocation55_spill] sm:$0xff] %v24527_v11  ;;  %v8486_v12 = vrot.slane %v29025_v57, %v19918_v55  ;;  %v24537_v1 = vcombine.low %v8402_v40, %v8409_v6  ;;  %v24539_v33 = vcombine.low %v8416_v54, %v8423_v2  ;;  %16465 = vperm.xlu1 %18689, %v13112_v44   ;;  %v29031_v44 = vld [vmem:[#allocation134_spill] sm:$0xff] }
 0x3f2   :  { %29024 = vst [vmem:[#allocation334_spill] sm:$0xff] %v24533_v30  ;;  %29028 = vst [vmem:[#allocation284_spill] sm:$0xff] %v24541_v17  ;;  %v8493_v53 = vrot.slane %v29025_v57, %v19921_v47  ;;  %v8500_v61 = vrot.slane %v29025_v57, %v19930_v4  ;;  %v8507_v22 = vrot.slane %v29025_v57, %v19933_v38  ;;  %16498 = vperm.xlu0 %18688, %v13299_v34   ;;  %v29035_v57 = vld [vmem:[#allocation64_spill] sm:$0xff]  ;;  %v29042_v30 = vld [vmem:[#allocation235_spill] sm:$0xff] }
 0x3f3   :  { %29026 = vst [vmem:[#allocation335_spill] sm:$0xff] %v24537_v1  ;;  %29027 = vst [vmem:[#allocation56_spill] sm:$0xff] %v24539_v33  ;;  %v8458_v40 = vrot.slane %v29030_v32, %v19918_v55  ;;  %v8465_v36 = vrot.slane %v29030_v32, %v19921_v47  ;;  %v13146_v58 = vcombine.low %v13138_v27, %v13145_v9  ;;  %v29040_v33 = vld [vmem:[#allocation136_spill] sm:$0xff] }
 0x3f4   :  { %29029 = vst [vmem:[#allocation21_spill] sm:$0xff] %v24543_v8  ;;  %v13172_v7 = vrot.slane %v29031_v44, %v19962_v25  ;;  %v13179_v6 = vrot.slane %v29032_v49, %v19962_v25  ;;  %v8472_v54 = vrot.slane %v29030_v32, %v19930_v4  ;;  %v13333_v2 = vcombine.low %v13325_v15, %v13332_v50  ;;  %v24573_v49 = vpop.permute.xlu1 %16279  ;;  %v24575_v15 = vpop.permute.xlu0 %16312 }
 0x3f5   :  { %v13359_v23 = vrot.slane %v29033_v62, %v19962_v25  ;;  %v13366_v34 = vrot.slane %v29034_v63, %v19962_v25  ;;  %v8542_v8 = vrot.slane %v29035_v57, %v19918_v55  ;;  %v8549_v27 = vrot.slane %v29035_v57, %v19921_v47  ;;  %29036 = vst [vmem:[#allocation227_spill] sm:$0xff] %v24573_v49  ;;  %v29038_v62 = vld [vmem:[#allocation297_spill] sm:$0xff] }
 0x3f6   :  { %v8556_v9 = vrot.slane %v29035_v57, %v19930_v4  ;;  %v8479_v44 = vrot.slane %v29030_v32, %v19933_v38  ;;  %16471 = vperm.xlu1 %18689, %v13146_v58   ;;  %29037 = vst [vmem:[#allocation231_spill] sm:$0xff] %v24575_v15  ;;  %v8563_v50 = vrot.slane %v29035_v57, %v19933_v38  ;;  %v29039_v58 = vld [vmem:[#allocation135_spill] sm:$0xff] }
 0x3f7   :  { %v8514_v63 = vrot.slane %v29038_v62, %v19918_v55  ;;  %v8521_v28 = vrot.slane %v29038_v62, %v19921_v47  ;;  %v8528_v17 = vrot.slane %v29038_v62, %v19930_v4  ;;  %16504 = vperm.xlu0 %18688, %v13333_v2   ;;  %v8535_v32 = vrot.slane %v29038_v62, %v19933_v38 }
 0x3f8   :  { %v13180_v49 = vcombine.low %v13172_v7, %v13179_v6  ;;  %v13206_v15 = vrot.slane %v29039_v58, %v19962_v25  ;;  %v13213_v57 = vrot.slane %v29040_v33, %v19962_v25  ;;  %v24591_v1 = vcombine.low %v8486_v12, %v8493_v53  ;;  %v24605_v62 = vpop.permute.xlu1 %16285  ;;  %v24607_v12 = vpop.permute.xlu0 %16318  ;;  %v29059_v58 = vld [vmem:[#allocation177_spill] sm:$0xff] }
 0x3f9   :  { %v13367_v5 = vcombine.low %v13359_v23, %v13366_v34  ;;  %v13393_v3 = vrot.slane %v29041_v35, %v19962_v25  ;;  %v13400_v11 = vrot.slane %v29042_v30, %v19962_v25  ;;  %v24597_v2 = vcombine.low %v8500_v61, %v8507_v22  ;;  %29045 = vst [vmem:[#allocation125_spill] sm:$0xff] %v24605_v62  ;;  %v29048_v35 = vld [vmem:[#allocation302_spill] sm:$0xff] }
 0x3fa   :  { %v24599_v14 = vcombine.low %v8542_v8, %v8549_v27  ;;  %v24601_v7 = vcombine.low %v8458_v40, %v8465_v36  ;;  %v24603_v6 = vcombine.low %v8472_v54, %v8479_v44  ;;  %16477 = vperm.xlu1 %18689, %v13180_v49   ;;  %29046 = vst [vmem:[#allocation338_spill] sm:$0xff] %v24607_v12  ;;  %v29051_v40 = vld [vmem:[#allocation137_spill] sm:$0xff]  ;;  %v29052_v54 = vld [vmem:[#allocation138_spill] sm:$0xff] }
 0x3fb   :  { %v24609_v33 = vcombine.low %v8556_v9, %v8563_v50  ;;  %v8598_v53 = vrot.slane %v29048_v35, %v19918_v55  ;;  %v8605_v30 = vrot.slane %v29048_v35, %v19921_v47  ;;  %v24615_v61 = vcombine.low %v8514_v63, %v8521_v28  ;;  %16510 = vperm.xlu0 %18688, %v13367_v5   ;;  %v29053_v9 = vld [vmem:[#allocation237_spill] sm:$0xff]  ;;  %v29054_v28 = vld [vmem:[#allocation155_spill] sm:$0xff] }
 0x3fc   :  { %29043 = vst [vmem:[#allocation342_spill] sm:$0xff] %v24601_v7  ;;  %29044 = vst [vmem:[#allocation57_spill] sm:$0xff] %v24603_v6  ;;  %v24617_v8 = vcombine.low %v8528_v17, %v8535_v32  ;;  %v13214_v22 = vcombine.low %v13206_v15, %v13213_v57  ;;  %v13240_v36 = vrot.slane %v29051_v40, %v19962_v25  ;;  %v29055_v17 = vld [vmem:[#allocation303_spill] sm:$0xff]  ;;  %v24637_v32 = vpop.permute.xlu1 %16291  ;;  %v29070_v6 = vld [vmem:[#allocation309_spill] sm:$0xff] }
 0x3fd   :  { %29047 = vst [vmem:[#allocation32_spill] sm:$0xff] %v24609_v33  ;;  %29049 = vst [vmem:[#allocation33_spill] sm:$0xff] %v24615_v61  ;;  %v13247_v23 = vrot.slane %v29052_v54, %v19962_v25  ;;  %v8612_v34 = vrot.slane %v29048_v35, %v19930_v4  ;;  %v13401_v27 = vcombine.low %v13393_v3, %v13400_v11  ;;  %v24639_v11 = vpop.permute.xlu0 %16324 }
 0x3fe   :  { %29050 = vst [vmem:[#allocation58_spill] sm:$0xff] %v24617_v8  ;;  %v13427_v44 = vrot.slane %v29053_v9, %v19962_v25  ;;  %v13434_v49 = vrot.slane %v29054_v28, %v19962_v25  ;;  %v8619_v5 = vrot.slane %v29048_v35, %v19933_v38  ;;  %v8570_v15 = vrot.slane %v29055_v17, %v19918_v55  ;;  %v29064_v8 = vld [vmem:[#allocation66_spill] sm:$0xff] }
 0x3ff   :  { %v8577_v50 = vrot.slane %v29055_v17, %v19921_v47  ;;  %v8584_v63 = vrot.slane %v29055_v17, %v19930_v4  ;;  %29056 = vst [vmem:[#allocation292_spill] sm:$0xff] %v24637_v32  ;;  %16483 = vperm.xlu1 %18689, %v13214_v22   ;;  %29057 = vst [vmem:[#allocation339_spill] sm:$0xff] %v24639_v11  ;;  %v24641_v3 = vcombine.low %v8598_v53, %v8605_v30  ;;  %v29060_v22 = vld [vmem:[#allocation345_spill] sm:$0xff]  ;;  %v29061_v53 = vld [vmem:[#allocation146_spill] sm:$0xff] }
 0x400   :  { %v8654_v57 = vrot.slane %v29059_v58, %v19918_v55  ;;  %v8661_v35 = vrot.slane %v29059_v58, %v19921_v47  ;;  %v8591_v40 = vrot.slane %v29055_v17, %v19933_v38  ;;  %16516 = vperm.xlu0 %18688, %v13401_v27   ;;  %v8668_v54 = vrot.slane %v29059_v58, %v19930_v4  ;;  %v29062_v32 = vld [vmem:[#allocation158_spill] sm:$0xff]  ;;  %v29063_v17 = vld [vmem:[#allocation259_spill] sm:$0xff] }
 0x401   :  { %29058 = vst [vmem:[#allocation340_spill] sm:$0xff] %v24641_v3  ;;  %v13248_v9 = vcombine.low %v13240_v36, %v13247_v23  ;;  %v13274_v28 = vrot.slane %v29060_v22, %v19962_v25  ;;  %v13281_v30 = vrot.slane %v29061_v53, %v19962_v25  ;;  %v8675_v11 = vrot.slane %v29059_v58, %v19933_v38  ;;  %v24669_v58 = vpop.permute.xlu1 %16297 }
 0x402   :  { %v13435_v12 = vcombine.low %v13427_v44, %v13434_v49  ;;  %v13461_v62 = vrot.slane %v29062_v32, %v19962_v25  ;;  %v13468_v27 = vrot.slane %v29063_v17, %v19962_v25  ;;  %v8626_v61 = vrot.slane %v29064_v8, %v19918_v55  ;;  %29065 = vst [vmem:[#allocation236_spill] sm:$0xff] %v24669_v58  ;;  %v24671_v44 = vpop.permute.xlu0 %16330 }
 0x403   :  { %v8633_v36 = vrot.slane %v29064_v8, %v19921_v47  ;;  %v8640_v23 = vrot.slane %v29064_v8, %v19930_v4  ;;  %v8647_v22 = vrot.slane %v29064_v8, %v19933_v38  ;;  %16489 = vperm.xlu1 %18689, %v13248_v9   ;;  %29066 = vst [vmem:[#allocation238_spill] sm:$0xff] %v24671_v44  ;;  %v29071_v8 = vld [vmem:[#allocation229_spill] sm:$0xff]  ;;  %v29072_v9 = vld [vmem:[#allocation230_spill] sm:$0xff] }
 0x404   :  { %v24673_v49 = vcombine.low %v8612_v34, %v8619_v5  ;;  %v24675_v32 = vcombine.low %v8654_v57, %v8661_v35  ;;  %v24677_v53 = vcombine.low %v8570_v15, %v8577_v50  ;;  %v24679_v17 = vcombine.low %v8584_v63, %v8591_v40  ;;  %16522 = vperm.xlu0 %18688, %v13435_v12   ;;  %v29073_v15 = vld [vmem:[#allocation260_spill] sm:$0xff]  ;;  %v29074_v63 = vld [vmem:[#allocation246_spill] sm:$0xff] }
 0x405   :  { %v8710_v7 = vrot.slane %v29070_v6, %v19918_v55  ;;  %v13282_v3 = vcombine.low %v13274_v28, %v13281_v30  ;;  %v13308_v33 = vrot.slane %v29071_v8, %v19962_v25  ;;  %v13315_v58 = vrot.slane %v29072_v9, %v19962_v25  ;;  %v24701_v30 = vpop.permute.xlu1 %16303 }
 0x406   :  { %29067 = vst [vmem:[#allocation293_spill] sm:$0xff] %v24675_v32  ;;  %29068 = vst [vmem:[#allocation132_spill] sm:$0xff] %v24677_v53  ;;  %v8717_v34 = vrot.slane %v29070_v6, %v19921_v47  ;;  %v13469_v5 = vcombine.low %v13461_v62, %v13468_v27  ;;  %v13495_v50 = vrot.slane %v29073_v15, %v19962_v25  ;;  %v24703_v8 = vpop.permute.xlu0 %16336  ;;  %v29080_v27 = vld [vmem:[#allocation310_spill] sm:$0xff] }
 0x407   :  { %29069 = vst [vmem:[#allocation133_spill] sm:$0xff] %v24679_v17  ;;  %v13502_v12 = vrot.slane %v29074_v63, %v19962_v25  ;;  %v24693_v57 = vcombine.low %v8668_v54, %v8675_v11  ;;  %v8724_v35 = vrot.slane %v29070_v6, %v19930_v4  ;;  %v24697_v40 = vcombine.low %v8626_v61, %v8633_v36  ;;  %v29095_v17 = vld [vmem:[#allocation274_spill] sm:$0xff] }
 0x408   :  { %v24699_v28 = vcombine.low %v8640_v23, %v8647_v22  ;;  %29078 = vst [vmem:[#allocation62_spill] sm:$0xff] %v24701_v30  ;;  %16495 = vperm.xlu1 %18689, %v13282_v3   ;;  %29079 = vst [vmem:[#allocation134_spill] sm:$0xff] %v24703_v8  ;;  %v8731_v62 = vrot.slane %v29070_v6, %v19933_v38  ;;  %v8682_v9 = vrot.slane %v29080_v27, %v19918_v55  ;;  %v29081_v3 = vld [vmem:[#allocation147_spill] sm:$0xff]  ;;  %v29082_v22 = vld [vmem:[#allocation232_spill] sm:$0xff] }
 0x409   :  { %29075 = vst [vmem:[#allocation157_spill] sm:$0xff] %v24693_v57  ;;  %29076 = vst [vmem:[#allocation144_spill] sm:$0xff] %v24697_v40  ;;  %v8689_v11 = vrot.slane %v29080_v27, %v19921_v47  ;;  %v8696_v61 = vrot.slane %v29080_v27, %v19930_v4  ;;  %16528 = vperm.xlu0 %18688, %v13469_v5   ;;  %v8703_v54 = vrot.slane %v29080_v27, %v19933_v38  ;;  %v29084_v8 = vld [vmem:[#allocation165_spill] sm:$0xff]  ;;  %v29086_v5 = vld [vmem:[#allocation71_spill] sm:$0xff] }
 0x40a   :  { %29077 = vst [vmem:[#allocation61_spill] sm:$0xff] %v24699_v28  ;;  %v13316_v36 = vcombine.low %v13308_v33, %v13315_v58  ;;  %v13342_v23 = vrot.slane %v29081_v3, %v19962_v25  ;;  %v13349_v6 = vrot.slane %v29082_v22, %v19962_v25  ;;  %v24719_v15 = vcombine.low %v8710_v7, %v8717_v34  ;;  %v29085_v30 = vld [vmem:[#allocation49_spill] sm:$0xff]  ;;  %v24733_v34 = vpop.permute.xlu1 %16309 }
 0x40b   :  { %v13503_v63 = vcombine.low %v13495_v50, %v13502_v12  ;;  %v13529_v44 = vrot.slane %v29084_v8, %v19962_v25  ;;  %v13536_v28 = vrot.slane %v29085_v30, %v19962_v25  ;;  %v8766_v40 = vrot.slane %v29086_v5, %v19918_v55  ;;  %29087 = vst [vmem:[#allocation243_spill] sm:$0xff] %v24733_v34  ;;  %v24735_v50 = vpop.permute.xlu0 %16342  ;;  %v29091_v8 = vld [vmem:[#allocation72_spill] sm:$0xff]  ;;  %v29092_v34 = vld [vmem:[#allocation42_spill] sm:$0xff] }
 0x40c   :  { %29083 = vst [vmem:[#allocation152_spill] sm:$0xff] %v24719_v15  ;;  %v8773_v33 = vrot.slane %v29086_v5, %v19921_v47  ;;  %v8780_v58 = vrot.slane %v29086_v5, %v19930_v4  ;;  %v8787_v7 = vrot.slane %v29086_v5, %v19933_v38  ;;  %16501 = vperm.xlu1 %18689, %v13316_v36   ;;  %29088 = vst [vmem:[#allocation38_spill] sm:$0xff] %v24735_v50  ;;  %v29093_v50 = vld [vmem:[#allocation254_spill] sm:$0xff]  ;;  %v29129_v15 = vld [vmem:[#allocation271_spill] sm:$0xff] }
 0x40d   :  { %v24737_v12 = vcombine.low %v8724_v35, %v8731_v62  ;;  %v24739_v30 = vcombine.low %v8682_v9, %v8689_v11  ;;  %v8738_v27 = vrot.slane %v29091_v8, %v19918_v55  ;;  %v8745_v3 = vrot.slane %v29091_v8, %v19921_v47  ;;  %16534 = vperm.xlu0 %18688, %v13503_v63   ;;  %v29094_v11 = vld [vmem:[#allocation166_spill] sm:$0xff] }
 0x40e   :  { %v8752_v22 = vrot.slane %v29091_v8, %v19930_v4  ;;  %v13350_v5 = vcombine.low %v13342_v23, %v13349_v6  ;;  %v13376_v36 = vrot.slane %v29092_v34, %v19962_v25  ;;  %v13383_v35 = vrot.slane %v29093_v50, %v19962_v25  ;;  %v24766_v50 = vpop.permute.xlu1 %16315 }
 0x40f   :  { %29089 = vst [vmem:[#allocation64_spill] sm:$0xff] %v24737_v12  ;;  %29090 = vst [vmem:[#allocation297_spill] sm:$0xff] %v24739_v30  ;;  %v8759_v62 = vrot.slane %v29091_v8, %v19933_v38  ;;  %v13537_v9 = vcombine.low %v13529_v44, %v13536_v28  ;;  %v13563_v30 = vrot.slane %v29094_v11, %v19962_v25  ;;  %v29099_v6 = vlaneseq  ;;  %v24768_v8 = vpop.permute.xlu0 %16348  ;;  %v29102_v44 = vld [vmem:[#allocation74_spill] sm:$0xff] }
 0x410   :  { %v13570_v63 = vrot.slane %v29095_v17, %v19962_v25  ;;  %v24757_v53 = vcombine.low %v8766_v40, %v8773_v33  ;;  %v24759_v12 = vcombine.low %v8780_v58, %v8787_v7  ;;  %v24761_v23 = vcombine.low %v8696_v61, %v8703_v54  ;;  %29100 = vst [vmem:[#allocation235_spill] sm:$0xff] %v24766_v50  ;;  %v29104_v58 = vld [vmem:[#allocation239_spill] sm:$0xff]  ;;  %v29107_v50 = vld [vmem:[#allocation46_spill] sm:$0xff] }
 0x411   :  { %v24764_v34 = vand.u32 127, %v29099_v6  ;;  %16507 = vperm.xlu1 %18689, %v13350_v5   ;;  %29101 = vst [vmem:[#allocation302_spill] sm:$0xff] %v24768_v8  ;;  %v8822_v28 = vrot.slane %v29102_v44, %v19918_v55  ;;  %v8829_v17 = vrot.slane %v29102_v44, %v19921_v47  ;;  %v8836_v40 = vrot.slane %v29102_v44, %v19930_v4  ;;  %v29105_v5 = vld [vmem:[#allocation34_spill] sm:$0xff] }
 0x412   :  { %29096 = vst [vmem:[#allocation135_spill] sm:$0xff] %v24757_v53  ;;  %29097 = vst [vmem:[#allocation136_spill] sm:$0xff] %v24759_v12  ;;  %v8843_v61 = vrot.slane %v29102_v44, %v19933_v38  ;;  %16540 = vperm.xlu0 %18688, %v13537_v9   ;;  %v24778_v54 = vcombine.low %v8738_v27, %v8745_v3  ;;  %v13384_v33 = vcombine.low %v13376_v36, %v13383_v35  ;;  %v29108_v12 = vld [vmem:[#allocation278_spill] sm:$0xff]  ;;  %v29109_v9 = vld [vmem:[#allocation75_spill] sm:$0xff]  ;;  %v24798_v35 = vpop.permute.xlu1 %16321 }
 0x413   :  { %29098 = vst [vmem:[#allocation151_spill] sm:$0xff] %v24761_v23  ;;  %v13410_v7 = vrot.slane %v29104_v58, %v19962_v25  ;;  %v13417_v11 = vrot.slane %v29105_v5, %v19962_v25  ;;  %v24784_v6 = vcombine.low %v8752_v22, %v8759_v62  ;;  %v13571_v8 = vcombine.low %v13563_v30, %v13570_v63  ;;  %v24800_v30 = vpop.permute.xlu0 %16354  ;;  %v29114_v63 = vld [vmem:[#allocation181_spill] sm:$0xff] }
 0x414   :  { %29103 = vst [vmem:[#allocation137_spill] sm:$0xff] %v24778_v54  ;;  %v13597_v23 = vrot.slane %v29107_v50, %v19962_v25  ;;  %v13604_v53 = vrot.slane %v29108_v12, %v19962_v25  ;;  %v8794_v27 = vrot.slane %v29109_v9, %v19918_v55  ;;  %v8801_v3 = vrot.slane %v29109_v9, %v19921_v47 }
 0x415   :  { %29106 = vst [vmem:[#allocation138_spill] sm:$0xff] %v24784_v6  ;;  %v8808_v36 = vrot.slane %v29109_v9, %v19930_v4  ;;  %v8815_v22 = vrot.slane %v29109_v9, %v19933_v38  ;;  %29110 = vst [vmem:[#allocation237_spill] sm:$0xff] %v24798_v35  ;;  %16513 = vperm.xlu1 %18689, %v13384_v33   ;;  %v24802_v62 = vcombine.low %v8822_v28, %v8829_v17  ;;  %v29115_v9 = vld [vmem:[#allocation159_spill] sm:$0xff]  ;;  %v29118_v6 = vld [vmem:[#allocation282_spill] sm:$0xff] }
 0x416   :  { %29111 = vst [vmem:[#allocation155_spill] sm:$0xff] %v24800_v30  ;;  %v24804_v12 = vcombine.low %v8836_v40, %v8843_v61  ;;  %v8878_v50 = vrot.slane %v29114_v63, %v19918_v55  ;;  %v8885_v44 = vrot.slane %v29114_v63, %v19921_v47  ;;  %16546 = vperm.xlu0 %18688, %v13571_v8   ;;  %v29116_v30 = vld [vmem:[#allocation162_spill] sm:$0xff]  ;;  %v29117_v61 = vld [vmem:[#allocation171_spill] sm:$0xff] }
 0x417   :  { %29112 = vst [vmem:[#allocation303_spill] sm:$0xff] %v24802_v62  ;;  %v8892_v58 = vrot.slane %v29114_v63, %v19930_v4  ;;  %v13418_v5 = vcombine.low %v13410_v7, %v13417_v11  ;;  %v13444_v33 = vrot.slane %v29115_v9, %v19962_v25  ;;  %v13451_v28 = vrot.slane %v29116_v30, %v19962_v25  ;;  %v24828_v9 = vpop.permute.xlu1 %16327  ;;  %v24830_v30 = vpop.permute.xlu0 %16360 }
 0x418   :  { %29113 = vst [vmem:[#allocation177_spill] sm:$0xff] %v24804_v12  ;;  %v8899_v17 = vrot.slane %v29114_v63, %v19933_v38  ;;  %v13605_v40 = vcombine.low %v13597_v23, %v13604_v53  ;;  %v13631_v35 = vrot.slane %v29117_v61, %v19962_v25  ;;  %v13638_v8 = vrot.slane %v29118_v6, %v19962_v25  ;;  %v29123_v53 = vld [vmem:[#allocation77_spill] sm:$0xff] }
 0x419   :  { %v24822_v54 = vcombine.low %v8794_v27, %v8801_v3  ;;  %v24824_v12 = vcombine.low %v8808_v36, %v8815_v22  ;;  %v16986_v7 = vadd.s32 4294967288, %v24764_v34  ;;  %v16993_v11 = vadd.s32 4294967280, %v24764_v34  ;;  %29121 = vst [vmem:[#allocation158_spill] sm:$0xff] %v24828_v9  ;;  %16519 = vperm.xlu1 %18689, %v13418_v5   ;;  %29122 = vst [vmem:[#allocation259_spill] sm:$0xff] %v24830_v30  ;;  %v29125_v22 = vld [vmem:[#allocation247_spill] sm:$0xff]  ;;  %v29126_v61 = vld [vmem:[#allocation265_spill] sm:$0xff] }
 0x41a   :  { %v8850_v23 = vrot.slane %v29123_v53, %v19918_v55  ;;  %v8857_v63 = vrot.slane %v29123_v53, %v19921_v47  ;;  %v8864_v6 = vrot.slane %v29123_v53, %v19930_v4  ;;  %v8871_v27 = vrot.slane %v29123_v53, %v19933_v38  ;;  %16552 = vperm.xlu0 %18688, %v13605_v40   ;;  %v29130_v40 = vld [vmem:[#allocation149_spill] sm:$0xff] }
 0x41b   :  { %29119 = vst [vmem:[#allocation345_spill] sm:$0xff] %v24822_v54  ;;  %29120 = vst [vmem:[#allocation146_spill] sm:$0xff] %v24824_v12  ;;  %v24840_v3 = vcombine.low %v8878_v50, %v8885_v44  ;;  %v13452_v36 = vcombine.low %v13444_v33, %v13451_v28  ;;  %v13478_v5 = vrot.slane %v29125_v22, %v19962_v25  ;;  %v29128_v54 = vld [vmem:[#allocation285_spill] sm:$0xff]  ;;  %v29131_v33 = vld [vmem:[#allocation120_spill] sm:$0xff] }
 0x41c   :  { %v13485_v9 = vrot.slane %v29126_v61, %v19962_v25  ;;  %v24846_v30 = vcombine.low %v8892_v58, %v8899_v17  ;;  %v13639_v12 = vcombine.low %v13631_v35, %v13638_v8  ;;  %v13665_v62 = vrot.slane %v29128_v54, %v19962_v25  ;;  %v24862_v58 = vpop.permute.xlu1 %16333  ;;  %v24864_v35 = vpop.permute.xlu0 %16366  ;;  %v29138_v61 = vld [vmem:[#allocation255_spill] sm:$0xff] }
 0x41d   :  { %29124 = vst [vmem:[#allocation66_spill] sm:$0xff] %v24840_v3  ;;  %v13672_v57 = vrot.slane %v29129_v15, %v19962_v25  ;;  %v8934_v50 = vrot.slane %v29130_v40, %v19918_v55  ;;  %v8941_v44 = vrot.slane %v29130_v40, %v19921_v47  ;;  %v24857_v28 = vsub.s32 %v16986_v7, %v29131_v33  ;;  %v29150_v3 = vld [vmem:[#allocation280_spill] sm:$0xff] }
 0x41e   :  { %29127 = vst [vmem:[#allocation309_spill] sm:$0xff] %v24846_v30  ;;  %v24860_v53 = vsub.s32 %v16993_v11, %v29131_v33  ;;  %29133 = vst [vmem:[#allocation230_spill] sm:$0xff] %v24862_v58  ;;  %16525 = vperm.xlu1 %18689, %v13452_v36   ;;  %v8948_v15 = vrot.slane %v29130_v40, %v19930_v4  ;;  %v8955_v54 = vrot.slane %v29130_v40, %v19933_v38  ;;  %v29137_v36 = vld [vmem:[#allocation50_spill] sm:$0xff] }
 0x41f   :  { %29134 = vst [vmem:[#allocation260_spill] sm:$0xff] %v24864_v35  ;;  %v24870_v17 = vcombine.low %v8850_v23, %v8857_v63  ;;  %v24872_v8 = vcombine.low %v8864_v6, %v8871_v27  ;;  %16558 = vperm.xlu0 %18688, %v13639_v12   ;;  %v24876_v7 = vsub.s32 %v24764_v34, %v29131_v33  ;;  %v29139_v35 = vld [vmem:[#allocation182_spill] sm:$0xff]  ;;  %v29141_v12 = vld [vmem:[#allocation176_spill] sm:$0xff] }
 0x420   :  { %29132 = vst [vmem:[#allocation229_spill] sm:$0xff] %v24860_v53  ;;  %v13486_v11 = vcombine.low %v13478_v5, %v13485_v9  ;;  %v13512_v22 = vrot.slane %v29137_v36, %v19962_v25  ;;  %v13519_v58 = vrot.slane %v29138_v61, %v19962_v25  ;;  %v8906_v30 = vrot.slane %v29139_v35, %v19918_v55  ;;  %v29140_v23 = vld [vmem:[#allocation290_spill] sm:$0xff]  ;;  %v24896_v61 = vpop.permute.xlu1 %16339 }
 0x421   :  { %29135 = vst [vmem:[#allocation246_spill] sm:$0xff] %v24870_v17  ;;  %29136 = vst [vmem:[#allocation310_spill] sm:$0xff] %v24872_v8  ;;  %v13673_v40 = vcombine.low %v13665_v62, %v13672_v57  ;;  %v13699_v63 = vrot.slane %v29140_v23, %v19962_v25  ;;  %v13706_v6 = vrot.slane %v29141_v12, %v19962_v25  ;;  %v24898_v57 = vpop.permute.xlu0 %16372  ;;  %v29146_v23 = vld [vmem:[#allocation201_spill] sm:$0xff] }
 0x422   :  { %v24888_v27 = vcombine.low %v8934_v50, %v8941_v44  ;;  %v8913_v9 = vrot.slane %v29139_v35, %v19921_v47  ;;  %v8920_v5 = vrot.slane %v29139_v35, %v19930_v4  ;;  %v8927_v36 = vrot.slane %v29139_v35, %v19933_v38  ;;  %29143 = vst [vmem:[#allocation232_spill] sm:$0xff] %v24896_v61 }
 0x423   :  { %16531 = vperm.xlu1 %18689, %v13486_v11   ;;  %29144 = vst [vmem:[#allocation165_spill] sm:$0xff] %v24898_v57  ;;  %v24900_v62 = vcombine.low %v8948_v15, %v8955_v54  ;;  %v8990_v50 = vrot.slane %v29146_v23, %v19918_v55  ;;  %v8997_v44 = vrot.slane %v29146_v23, %v19921_v47  ;;  %v29147_v11 = vld [vmem:[#allocation167_spill] sm:$0xff]  ;;  %v29148_v15 = vld [vmem:[#allocation168_spill] sm:$0xff]  ;;  %v17000_v57 = vadd.s32 4294967272, %v24764_v34 }
 0x424   :  { %29142 = vst [vmem:[#allocation147_spill] sm:$0xff] %v24888_v27  ;;  %v9004_v12 = vrot.slane %v29146_v23, %v19930_v4  ;;  %16564 = vperm.xlu0 %18688, %v13673_v40   ;;  %v9011_v35 = vrot.slane %v29146_v23, %v19933_v38  ;;  %v13520_v8 = vcombine.low %v13512_v22, %v13519_v58  ;;  %v29153_v58 = vld [vmem:[#allocation82_spill] sm:$0xff]  ;;  %v17042_v23 = vadd.s32 4294967224, %v24764_v34 }
 0x425   :  { %29145 = vst [vmem:[#allocation49_spill] sm:$0xff] %v24900_v62  ;;  %v13546_v61 = vrot.slane %v29147_v11, %v19962_v25  ;;  %v13553_v54 = vrot.slane %v29148_v15, %v19962_v25  ;;  %v13707_v17 = vcombine.low %v13699_v63, %v13706_v6  ;;  %v29149_v62 = vld [vmem:[#allocation294_spill] sm:$0xff]  ;;  %v13740_v32 = vrot.slane %v29150_v3, %v19962_v25  ;;  %v24926_v11 = vpop.permute.xlu1 %16345  ;;  %v24928_v15 = vpop.permute.xlu0 %16378 }
 0x426   :  { %v13733_v27 = vrot.slane %v29149_v62, %v19962_v25  ;;  %v24919_v40 = vcombine.low %v8906_v30, %v8913_v9  ;;  %v24921_v53 = vcombine.low %v8920_v5, %v8927_v36  ;;  %v8962_v22 = vrot.slane %v29153_v58, %v19918_v55  ;;  %29154 = vst [vmem:[#allocation42_spill] sm:$0xff] %v24926_v11  ;;  %v29158_v36 = vld [vmem:[#allocation170_spill] sm:$0xff]  ;;  %v29159_v62 = vld [vmem:[#allocation281_spill] sm:$0xff] }
 0x427   :  { %16537 = vperm.xlu1 %18689, %v13520_v8   ;;  %29155 = vst [vmem:[#allocation254_spill] sm:$0xff] %v24928_v15  ;;  %v24930_v63 = vcombine.low %v8990_v50, %v8997_v44  ;;  %v8969_v6 = vrot.slane %v29153_v58, %v19921_v47  ;;  %v8976_v30 = vrot.slane %v29153_v58, %v19930_v4  ;;  %v29161_v15 = vld [vmem:[#allocation299_spill] sm:$0xff] }
 0x428   :  { %29151 = vst [vmem:[#allocation71_spill] sm:$0xff] %v24919_v40  ;;  %29152 = vst [vmem:[#allocation72_spill] sm:$0xff] %v24921_v53  ;;  %v8983_v3 = vrot.slane %v29153_v58, %v19933_v38  ;;  %16570 = vperm.xlu0 %18688, %v13707_v17   ;;  %v24938_v9 = vcombine.low %v9004_v12, %v9011_v35  ;;  %v13554_v5 = vcombine.low %v13546_v61, %v13553_v54  ;;  %v29162_v40 = vld [vmem:[#allocation59_spill] sm:$0xff]  ;;  %v29163_v17 = vld [vmem:[#allocation186_spill] sm:$0xff] }
 0x429   :  { %29156 = vst [vmem:[#allocation166_spill] sm:$0xff] %v24930_v63  ;;  %v13580_v8 = vrot.slane %v29158_v36, %v19962_v25  ;;  %v13587_v50 = vrot.slane %v29159_v62, %v19962_v25  ;;  %v24945_v44 = vsub.s32 %v17000_v57, %v29131_v33  ;;  %v13741_v11 = vcombine.low %v13733_v27, %v13740_v32  ;;  %v24959_v54 = vpop.permute.xlu1 %16351  ;;  %v24961_v32 = vpop.permute.xlu0 %16384  ;;  %v29169_v62 = vld [vmem:[#allocation83_spill] sm:$0xff] }
 0x42a   :  { %29157 = vst [vmem:[#allocation274_spill] sm:$0xff] %v24938_v9  ;;  %v13767_v53 = vrot.slane %v29161_v15, %v19962_v25  ;;  %v13774_v58 = vrot.slane %v29162_v40, %v19962_v25  ;;  %v9046_v12 = vrot.slane %v29163_v17, %v19918_v55  ;;  %v9053_v61 = vrot.slane %v29163_v17, %v19921_v47 }
 0x42b   :  { %29160 = vst [vmem:[#allocation74_spill] sm:$0xff] %v24945_v44  ;;  %v9060_v35 = vrot.slane %v29163_v17, %v19930_v4  ;;  %v9067_v57 = vrot.slane %v29163_v17, %v19933_v38  ;;  %29164 = vst [vmem:[#allocation239_spill] sm:$0xff] %v24959_v54  ;;  %16543 = vperm.xlu1 %18689, %v13554_v5   ;;  %v24963_v27 = vcombine.low %v8962_v22, %v8969_v6  ;;  %v29170_v17 = vld [vmem:[#allocation173_spill] sm:$0xff]  ;;  %v29171_v5 = vld [vmem:[#allocation174_spill] sm:$0xff] }
 0x42c   :  { %29165 = vst [vmem:[#allocation34_spill] sm:$0xff] %v24961_v32  ;;  %v24965_v40 = vcombine.low %v8976_v30, %v8983_v3  ;;  %v24968_v15 = vsub.s32 %v17042_v23, %v29131_v33  ;;  %v17007_v36 = vadd.s32 4294967264, %v24764_v34  ;;  %16576 = vperm.xlu0 %18688, %v13741_v11   ;;  %v9018_v9 = vrot.slane %v29169_v62, %v19918_v55  ;;  %v29172_v23 = vld [vmem:[#allocation190_spill] sm:$0xff]  ;;  %v29173_v3 = vld [vmem:[#allocation287_spill] sm:$0xff] }
 0x42d   :  { %29166 = vst [vmem:[#allocation46_spill] sm:$0xff] %v24963_v27  ;;  %v13588_v63 = vcombine.low %v13580_v8, %v13587_v50  ;;  %v13614_v54 = vrot.slane %v29170_v17, %v19962_v25  ;;  %v13621_v32 = vrot.slane %v29171_v5, %v19962_v25  ;;  %v9025_v22 = vrot.slane %v29169_v62, %v19921_v47  ;;  %v24991_v17 = vpop.permute.xlu1 %16357  ;;  %v29191_v44 = vld [vmem:[#allocation183_spill] sm:$0xff] }
 0x42e   :  { %29167 = vst [vmem:[#allocation278_spill] sm:$0xff] %v24965_v40  ;;  %29168 = vst [vmem:[#allocation75_spill] sm:$0xff] %v24968_v15  ;;  %v13775_v6 = vcombine.low %v13767_v53, %v13774_v58  ;;  %v13801_v30 = vrot.slane %v29172_v23, %v19962_v25  ;;  %v13808_v11 = vrot.slane %v29173_v3, %v19962_v25  ;;  %v24993_v53 = vpop.permute.xlu0 %16390  ;;  %v29178_v58 = vld [vmem:[#allocation84_spill] sm:$0xff]  ;;  %v29181_v3 = vld [vmem:[#allocation289_spill] sm:$0xff] }
 0x42f   :  { %v24983_v40 = vcombine.low %v9046_v12, %v9053_v61  ;;  %v24985_v27 = vcombine.low %v9060_v35, %v9067_v57  ;;  %v9032_v8 = vrot.slane %v29169_v62, %v19930_v4  ;;  %v9039_v50 = vrot.slane %v29169_v62, %v19933_v38  ;;  %29176 = vst [vmem:[#allocation162_spill] sm:$0xff] %v24991_v17 }
 0x430   :  { %16549 = vperm.xlu1 %18689, %v13588_v63   ;;  %29177 = vst [vmem:[#allocation171_spill] sm:$0xff] %v24993_v53  ;;  %v9102_v5 = vrot.slane %v29178_v58, %v19918_v55  ;;  %v9109_v12 = vrot.slane %v29178_v58, %v19921_v47  ;;  %v9116_v61 = vrot.slane %v29178_v58, %v19930_v4  ;;  %v29180_v63 = vld [vmem:[#allocation272_spill] sm:$0xff]  ;;  %v17056_v17 = vadd.s32 4294967208, %v24764_v34 }
 0x431   :  { %29174 = vst [vmem:[#allocation181_spill] sm:$0xff] %v24983_v40  ;;  %29175 = vst [vmem:[#allocation159_spill] sm:$0xff] %v24985_v27  ;;  %v25002_v35 = vsub.s32 %v17007_v36, %v29131_v33  ;;  %16582 = vperm.xlu0 %18688, %v13775_v6   ;;  %v9123_v57 = vrot.slane %v29178_v58, %v19933_v38  ;;  %v13622_v62 = vcombine.low %v13614_v54, %v13621_v32  ;;  %v29182_v40 = vld [vmem:[#allocation291_spill] sm:$0xff]  ;;  %v29183_v36 = vld [vmem:[#allocation70_spill] sm:$0xff] }
 0x432   :  { %v13648_v23 = vrot.slane %v29180_v63, %v19962_v25  ;;  %v13655_v53 = vrot.slane %v29181_v3, %v19962_v25  ;;  %v13809_v27 = vcombine.low %v13801_v30, %v13808_v11  ;;  %v13835_v15 = vrot.slane %v29182_v40, %v19962_v25  ;;  %v29185_v58 = vld [vmem:[#allocation180_spill] sm:$0xff]  ;;  %v25022_v3 = vpop.permute.xlu1 %16363  ;;  %v25024_v30 = vpop.permute.xlu0 %16396 }
 0x433   :  { %29179 = vst [vmem:[#allocation282_spill] sm:$0xff] %v25002_v35  ;;  %v13842_v35 = vrot.slane %v29183_v36, %v19962_v25  ;;  %v25015_v6 = vcombine.low %v9018_v9, %v9025_v22  ;;  %v9074_v54 = vrot.slane %v29185_v58, %v19918_v55  ;;  %v9081_v32 = vrot.slane %v29185_v58, %v19921_v47 }
 0x434   :  { %v17014_v63 = vadd.s32 4294967256, %v24764_v34  ;;  %29186 = vst [vmem:[#allocation247_spill] sm:$0xff] %v25022_v3  ;;  %16555 = vperm.xlu1 %18689, %v13622_v62   ;;  %29187 = vst [vmem:[#allocation265_spill] sm:$0xff] %v25024_v30  ;;  %v25026_v11 = vcombine.low %v9102_v5, %v9109_v12  ;;  %v25028_v40 = vcombine.low %v9032_v8, %v9039_v50  ;;  %v29192_v62 = vld [vmem:[#allocation63_spill] sm:$0xff]  ;;  %v29194_v50 = vld [vmem:[#allocation296_spill] sm:$0xff] }
 0x435   :  { %29184 = vst [vmem:[#allocation77_spill] sm:$0xff] %v25015_v6  ;;  %v9088_v9 = vrot.slane %v29185_v58, %v19930_v4  ;;  %v9095_v22 = vrot.slane %v29185_v58, %v19933_v38  ;;  %16588 = vperm.xlu0 %18688, %v13809_v27   ;;  %v25034_v36 = vcombine.low %v9116_v61, %v9123_v57  ;;  %v29196_v27 = vld [vmem:[#allocation319_spill] sm:$0xff] }
 0x436   :  { %29188 = vst [vmem:[#allocation285_spill] sm:$0xff] %v25026_v11  ;;  %29189 = vst [vmem:[#allocation271_spill] sm:$0xff] %v25028_v40  ;;  %v13656_v6 = vcombine.low %v13648_v23, %v13655_v53  ;;  %v13682_v3 = vrot.slane %v29191_v44, %v19962_v25  ;;  %v13689_v30 = vrot.slane %v29192_v62, %v19962_v25  ;;  %v29195_v40 = vld [vmem:[#allocation178_spill] sm:$0xff]  ;;  %v17070_v62 = vadd.s32 4294967192, %v24764_v34 }
 0x437   :  { %29190 = vst [vmem:[#allocation149_spill] sm:$0xff] %v25034_v36  ;;  %v25041_v5 = vsub.s32 %v17056_v17, %v29131_v33  ;;  %v13843_v8 = vcombine.low %v13835_v15, %v13842_v35  ;;  %v13869_v12 = vrot.slane %v29194_v50, %v19962_v25  ;;  %v13876_v58 = vrot.slane %v29195_v40, %v19962_v25  ;;  %v25056_v17 = vpop.permute.xlu1 %16369  ;;  %v25058_v15 = vpop.permute.xlu0 %16402 }
 0x438   :  { %v9158_v61 = vrot.slane %v29196_v27, %v19918_v55  ;;  %v9165_v53 = vrot.slane %v29196_v27, %v19921_v47  ;;  %v25051_v44 = vcombine.low %v9074_v54, %v9081_v32  ;;  %v25054_v57 = vsub.s32 %v17014_v63, %v29131_v33  ;;  %29199 = vst [vmem:[#allocation182_spill] sm:$0xff] %v25056_v17  ;;  %v29202_v63 = vld [vmem:[#allocation298_spill] sm:$0xff] }
 0x439   :  { %29193 = vst [vmem:[#allocation120_spill] sm:$0xff] %v25041_v5  ;;  %16561 = vperm.xlu1 %18689, %v13656_v6   ;;  %29200 = vst [vmem:[#allocation290_spill] sm:$0xff] %v25058_v15  ;;  %v9172_v35 = vrot.slane %v29196_v27, %v19930_v4  ;;  %v9179_v23 = vrot.slane %v29196_v27, %v19933_v38  ;;  %v25064_v40 = vcombine.low %v9088_v9, %v9095_v22  ;;  %v29203_v6 = vld [vmem:[#allocation6_spill] sm:$0xff]  ;;  %v29205_v27 = vld [vmem:[#allocation196_spill] sm:$0xff] }
 0x43a   :  { %29197 = vst [vmem:[#allocation50_spill] sm:$0xff] %v25051_v44  ;;  %29198 = vst [vmem:[#allocation255_spill] sm:$0xff] %v25054_v57  ;;  %16594 = vperm.xlu0 %18688, %v13843_v8   ;;  %v17021_v54 = vadd.s32 4294967248, %v24764_v34  ;;  %v13690_v32 = vcombine.low %v13682_v3, %v13689_v30  ;;  %v13716_v50 = vrot.slane %v29202_v63, %v19962_v25  ;;  %v29204_v17 = vld [vmem:[#allocation206_spill] sm:$0xff]  ;;  %v29206_v22 = vld [vmem:[#allocation141_spill] sm:$0xff] }
 0x43b   :  { %29201 = vst [vmem:[#allocation176_spill] sm:$0xff] %v25064_v40  ;;  %v13723_v15 = vrot.slane %v29203_v6, %v19962_v25  ;;  %v9130_v44 = vrot.slane %v29204_v17, %v19918_v55  ;;  %v13877_v36 = vcombine.low %v13869_v12, %v13876_v58  ;;  %v13903_v9 = vrot.slane %v29205_v27, %v19962_v25  ;;  %v25086_v6 = vpop.permute.xlu1 %16375  ;;  %v25088_v12 = vpop.permute.xlu0 %16408  ;;  %v29211_v27 = vld [vmem:[#allocation89_spill] sm:$0xff] }
 0x43c   :  { %v13910_v40 = vrot.slane %v29206_v22, %v19962_v25  ;;  %v25078_v8 = vcombine.low %v9158_v61, %v9165_v53  ;;  %v9137_v3 = vrot.slane %v29204_v17, %v19921_v47  ;;  %v9144_v30 = vrot.slane %v29204_v17, %v19930_v4  ;;  %29208 = vst [vmem:[#allocation167_spill] sm:$0xff] %v25086_v6 }
 0x43d   :  { %v9151_v63 = vrot.slane %v29204_v17, %v19933_v38  ;;  %16567 = vperm.xlu1 %18689, %v13690_v32   ;;  %29209 = vst [vmem:[#allocation168_spill] sm:$0xff] %v25088_v12  ;;  %v25090_v58 = vcombine.low %v9172_v35, %v9179_v23  ;;  %v9214_v61 = vrot.slane %v29211_v27, %v19918_v55  ;;  %v29213_v32 = vld [vmem:[#allocation65_spill] sm:$0xff]  ;;  %v29214_v35 = vld [vmem:[#allocation288_spill] sm:$0xff] }
 0x43e   :  { %29207 = vst [vmem:[#allocation201_spill] sm:$0xff] %v25078_v8  ;;  %v9221_v53 = vrot.slane %v29211_v27, %v19921_v47  ;;  %v25097_v22 = vsub.s32 %v17070_v62, %v29131_v33  ;;  %16600 = vperm.xlu0 %18688, %v13877_v36   ;;  %v9228_v17 = vrot.slane %v29211_v27, %v19930_v4  ;;  %v29215_v62 = vld [vmem:[#allocation312_spill] sm:$0xff] }
 0x43f   :  { %29210 = vst [vmem:[#allocation294_spill] sm:$0xff] %v25090_v58  ;;  %v13724_v8 = vcombine.low %v13716_v50, %v13723_v15  ;;  %v13750_v6 = vrot.slane %v29213_v32, %v19962_v25  ;;  %v13757_v23 = vrot.slane %v29214_v35, %v19962_v25  ;;  %v9235_v12 = vrot.slane %v29211_v27, %v19933_v38  ;;  %v25119_v32 = vpop.permute.xlu1 %16381  ;;  %v25121_v27 = vpop.permute.xlu0 %16414  ;;  %v29224_v35 = vld [vmem:[#allocation60_spill] sm:$0xff] }
 0x440   :  { %29212 = vst [vmem:[#allocation280_spill] sm:$0xff] %v25097_v22  ;;  %v13911_v58 = vcombine.low %v13903_v9, %v13910_v40  ;;  %v13937_v11 = vrot.slane %v23663_v13, %v19962_v25  ;;  %v13944_v36 = vrot.slane %v29215_v62, %v19962_v25  ;;  %v25111_v22 = vcombine.low %v9130_v44, %v9137_v3  ;;  %v29221_v40 = vld [vmem:[#allocation208_spill] sm:$0xff] }
 0x441   :  { %v25113_v5 = vcombine.low %v9144_v30, %v9151_v63  ;;  %v25116_v15 = vsub.s32 %v17021_v54, %v29131_v33  ;;  %v17084_v50 = vadd.s32 4294967176, %v24764_v34  ;;  %29219 = vst [vmem:[#allocation299_spill] sm:$0xff] %v25119_v32  ;;  %16573 = vperm.xlu1 %18689, %v13724_v8   ;;  %29220 = vst [vmem:[#allocation59_spill] sm:$0xff] %v25121_v27  ;;  %v29223_v8 = vld [vmem:[#allocation69_spill] sm:$0xff] }
 0x442   :  { %29216 = vst [vmem:[#allocation82_spill] sm:$0xff] %v25111_v22  ;;  %v9186_v13 = vrot.slane %v29221_v40, %v19918_v55  ;;  %v9193_v9 = vrot.slane %v29221_v40, %v19921_v47  ;;  %v9200_v44 = vrot.slane %v29221_v40, %v19930_v4  ;;  %v9207_v54 = vrot.slane %v29221_v40, %v19933_v38 }
 0x443   :  { %29217 = vst [vmem:[#allocation170_spill] sm:$0xff] %v25113_v5  ;;  %29218 = vst [vmem:[#allocation281_spill] sm:$0xff] %v25116_v15  ;;  %16606 = vperm.xlu0 %18688, %v13911_v58   ;;  %v25131_v3 = vcombine.low %v9214_v61, %v9221_v53  ;;  %v13758_v30 = vcombine.low %v13750_v6, %v13757_v23  ;;  %v13784_v63 = vrot.slane %v29223_v8, %v19962_v25  ;;  %v29226_v5 = vld [vmem:[#allocation78_spill] sm:$0xff]  ;;  %v29227_v15 = vld [vmem:[#allocation145_spill] sm:$0xff] }
 0x444   :  { %v13791_v62 = vrot.slane %v29224_v35, %v19962_v25  ;;  %v25137_v27 = vcombine.low %v9228_v17, %v9235_v12  ;;  %v13945_v32 = vcombine.low %v13937_v11, %v13944_v36  ;;  %v13971_v22 = vrot.slane %v29226_v5, %v19962_v25  ;;  %v29228_v58 = vld [vmem:[#allocation92_spill] sm:$0xff]  ;;  %v25151_v12 = vpop.permute.xlu1 %16387  ;;  %v25153_v11 = vpop.permute.xlu0 %16420  ;;  %v29234_v8 = vld [vmem:[#allocation306_spill] sm:$0xff] }
 0x445   :  { %29222 = vst [vmem:[#allocation186_spill] sm:$0xff] %v25131_v3  ;;  %v13978_v57 = vrot.slane %v29227_v15, %v19962_v25  ;;  %v9270_v61 = vrot.slane %v29228_v58, %v19918_v55  ;;  %v9277_v6 = vrot.slane %v29228_v58, %v19921_v47  ;;  %v25148_v53 = vsub.s32 %v17084_v50, %v29131_v33 }
 0x446   :  { %29225 = vst [vmem:[#allocation83_spill] sm:$0xff] %v25137_v27  ;;  %v17028_v23 = vadd.s32 4294967240, %v24764_v34  ;;  %29230 = vst [vmem:[#allocation174_spill] sm:$0xff] %v25151_v12  ;;  %16579 = vperm.xlu1 %18689, %v13758_v30   ;;  %v9284_v5 = vrot.slane %v29228_v58, %v19930_v4  ;;  %v9291_v17 = vrot.slane %v29228_v58, %v19933_v38  ;;  %v17035_v50 = vadd.s32 4294967232, %v24764_v34  ;;  %v29235_v30 = vld [vmem:[#allocation179_spill] sm:$0xff]  ;;  %v29236_v12 = vld [vmem:[#allocation93_spill] sm:$0xff] }
 0x447   :  { %29229 = vst [vmem:[#allocation173_spill] sm:$0xff] %v25148_v53  ;;  %29231 = vst [vmem:[#allocation190_spill] sm:$0xff] %v25153_v11  ;;  %v25159_v36 = vcombine.low %v9186_v13, %v9193_v9  ;;  %v25161_v15 = vcombine.low %v9200_v44, %v9207_v54  ;;  %16612 = vperm.xlu0 %18688, %v13945_v32   ;;  %v13792_v40 = vcombine.low %v13784_v63, %v13791_v62 }
 0x448   :  { %v13818_v35 = vrot.slane %v29234_v8, %v19962_v25  ;;  %v13825_v11 = vrot.slane %v29235_v30, %v19962_v25  ;;  %v9242_v27 = vrot.slane %v29236_v12, %v19918_v55  ;;  %v13979_v3 = vcombine.low %v13971_v22, %v13978_v57  ;;  %v25182_v62 = vpop.permute.xlu1 %16393  ;;  %v25184_v57 = vpop.permute.xlu0 %16426 }
 0x449   :  { %29232 = vst [vmem:[#allocation287_spill] sm:$0xff] %v25159_v36  ;;  %29233 = vst [vmem:[#allocation84_spill] sm:$0xff] %v25161_v15  ;;  %v14005_v13 = vrot.slane %v23745_v21, %v19962_v25  ;;  %v14012_v9 = vrot.slane %v23747_v46, %v19962_v25  ;;  %v25174_v32 = vcombine.low %v9270_v61, %v9277_v6  ;;  %v29239_v46 = vld [vmem:[#allocation11_spill] sm:$0xff] }
 0x44a   :  { %v9249_v44 = vrot.slane %v29236_v12, %v19921_v47  ;;  %v9256_v54 = vrot.slane %v29236_v12, %v19930_v4  ;;  %v9263_v63 = vrot.slane %v29236_v12, %v19933_v38  ;;  %29237 = vst [vmem:[#allocation272_spill] sm:$0xff] %v25182_v62  ;;  %16585 = vperm.xlu1 %18689, %v13792_v40   ;;  %29238 = vst [vmem:[#allocation289_spill] sm:$0xff] %v25184_v57  ;;  %v29240_v40 = vld [vmem:[#allocation300_spill] sm:$0xff] }
 0x44b   :  { %v25186_v21 = vcombine.low %v9284_v5, %v9291_v17  ;;  %v9326_v22 = vrot.slane %v29239_v46, %v19918_v55  ;;  %v9333_v58 = vrot.slane %v29239_v46, %v19921_v47  ;;  %v9340_v61 = vrot.slane %v29239_v46, %v19930_v4  ;;  %16618 = vperm.xlu0 %18688, %v13979_v3   ;;  %v29241_v5 = vld [vmem:[#allocation301_spill] sm:$0xff] }
 0x44c   :  { %v9347_v6 = vrot.slane %v29239_v46, %v19933_v38  ;;  %v13826_v12 = vcombine.low %v13818_v35, %v13825_v11  ;;  %v13852_v8 = vrot.slane %v29240_v40, %v19962_v25  ;;  %v13859_v17 = vrot.slane %v29241_v5, %v19962_v25  ;;  %v29244_v11 = vld [vmem:[#allocation95_spill] sm:$0xff]  ;;  %v25216_v5 = vpop.permute.xlu1 %16399 }
 0x44d   :  { %v25201_v30 = vsub.s32 %v17028_v23, %v29131_v33  ;;  %v14013_v57 = vcombine.low %v14005_v13, %v14012_v9  ;;  %v14039_v62 = vrot.slane %v23759_v18, %v19962_v25  ;;  %v14046_v3 = vrot.slane %v23765_v31, %v19962_v25  ;;  %29245 = vst [vmem:[#allocation180_spill] sm:$0xff] %v25216_v5  ;;  %v25218_v23 = vpop.permute.xlu0 %16432 }
 0x44e   :  { %v25207_v15 = vcombine.low %v9242_v27, %v9249_v44  ;;  %v25209_v46 = vcombine.low %v9256_v54, %v9263_v63  ;;  %v9298_v35 = vrot.slane %v29244_v11, %v19918_v55  ;;  %v25214_v40 = vsub.s32 %v17035_v50, %v29131_v33  ;;  %16591 = vperm.xlu1 %18689, %v13826_v12   ;;  %v29247_v44 = vld [vmem:[#allocation140_spill] sm:$0xff] }
 0x44f   :  { %29246 = vst [vmem:[#allocation183_spill] sm:$0xff] %v25218_v23  ;;  %v25220_v13 = vcombine.low %v9326_v22, %v9333_v58  ;;  %v9305_v18 = vrot.slane %v29244_v11, %v19921_v47  ;;  %v9312_v31 = vrot.slane %v29244_v11, %v19930_v4  ;;  %v9319_v27 = vrot.slane %v29244_v11, %v19933_v38  ;;  %v29248_v63 = vld [vmem:[#allocation76_spill] sm:$0xff] }
 0x450   :  { %29242 = vst [vmem:[#allocation291_spill] sm:$0xff] %v25207_v15  ;;  %29243 = vst [vmem:[#allocation70_spill] sm:$0xff] %v25209_v46  ;;  %16624 = vperm.xlu0 %18688, %v14013_v57   ;;  %v25228_v9 = vcombine.low %v9340_v61, %v9347_v6  ;;  %v13860_v50 = vcombine.low %v13852_v8, %v13859_v17  ;;  %v13886_v54 = vrot.slane %v29247_v44, %v19962_v25  ;;  %v29249_v57 = vld [vmem:[#allocation96_spill] sm:$0xff]  ;;  %v25247_v11 = vpop.permute.xlu1 %16405 }
 0x451   :  { %v13893_v22 = vrot.slane %v29248_v63, %v19962_v25  ;;  %v17049_v58 = vadd.s32 4294967216, %v24764_v34  ;;  %v14047_v12 = vcombine.low %v14039_v62, %v14046_v3  ;;  %v14073_v23 = vrot.slane %v23823_v24, %v19962_v25  ;;  %29250 = vst [vmem:[#allocation63_spill] sm:$0xff] %v25247_v11  ;;  %v25249_v62 = vpop.permute.xlu0 %16438 }
 0x452   :  { %v14080_v5 = vrot.slane %v23829_v48, %v19962_v25  ;;  %v9382_v61 = vrot.slane %v29249_v57, %v19918_v55  ;;  %v9389_v6 = vrot.slane %v29249_v57, %v19921_v47  ;;  %v9396_v8 = vrot.slane %v29249_v57, %v19930_v4  ;;  %16597 = vperm.xlu1 %18689, %v13860_v50   ;;  %v29253_v48 = vld [vmem:[#allocation194_spill] sm:$0xff]  ;;  %v29256_v50 = vld [vmem:[#allocation304_spill] sm:$0xff] }
 0x453   :  { %v9403_v17 = vrot.slane %v29249_v57, %v19933_v38  ;;  %29251 = vst [vmem:[#allocation296_spill] sm:$0xff] %v25249_v62  ;;  %v25251_v24 = vcombine.low %v9298_v35, %v9305_v18  ;;  %v9354_v3 = vrot.slane %v29253_v48, %v19918_v55  ;;  %v9361_v44 = vrot.slane %v29253_v48, %v19921_v47  ;;  %v29255_v57 = vld [vmem:[#allocation203_spill] sm:$0xff] }
 0x454   :  { %v17063_v63 = vadd.s32 4294967200, %v24764_v34  ;;  %16630 = vperm.xlu0 %18688, %v14047_v12   ;;  %v25258_v46 = vcombine.low %v9312_v31, %v9319_v27  ;;  %v13894_v15 = vcombine.low %v13886_v54, %v13893_v22  ;;  %v13920_v11 = vrot.slane %v29255_v57, %v19962_v25  ;;  %v25279_v22 = vpop.permute.xlu1 %16411 }
 0x455   :  { %29252 = vst [vmem:[#allocation178_spill] sm:$0xff] %v25251_v24  ;;  %v13927_v62 = vrot.slane %v29256_v50, %v19962_v25  ;;  %v9368_v35 = vrot.slane %v29253_v48, %v19930_v4  ;;  %v14081_v18 = vcombine.low %v14073_v23, %v14080_v5  ;;  %v14107_v24 = vrot.slane %v23831_v39, %v19962_v25  ;;  %v25281_v5 = vpop.permute.xlu0 %16444  ;;  %v29259_v39 = vld [vmem:[#allocation100_spill] sm:$0xff] }
 0x456   :  { %29254 = vst [vmem:[#allocation319_spill] sm:$0xff] %v25258_v46  ;;  %v14114_v36 = vrot.slane %v23841_v16, %v19962_v25  ;;  %v25270_v12 = vcombine.low %v9382_v61, %v9389_v6  ;;  %v25272_v31 = vcombine.low %v9396_v8, %v9403_v17  ;;  %v9375_v27 = vrot.slane %v29253_v48, %v19933_v38  ;;  %v29262_v48 = vld [vmem:[#allocation18_spill] sm:$0xff] }
 0x457   :  { %v25277_v54 = vsub.s32 %v17049_v58, %v29131_v33  ;;  %29257 = vst [vmem:[#allocation298_spill] sm:$0xff] %v25279_v22  ;;  %16603 = vperm.xlu1 %18689, %v13894_v15   ;;  %29258 = vst [vmem:[#allocation6_spill] sm:$0xff] %v25281_v5  ;;  %v9438_v23 = vrot.slane %v29259_v39, %v19918_v55  ;;  %v9445_v16 = vrot.slane %v29259_v39, %v19921_v47  ;;  %v29261_v15 = vld [vmem:[#allocation17_spill] sm:$0xff] }
 0x458   :  { %v25287_v61 = vcombine.low %v9354_v3, %v9361_v44  ;;  %v25290_v6 = vsub.s32 %v17063_v63, %v29131_v33  ;;  %16636 = vperm.xlu0 %18688, %v14081_v18   ;;  %v9452_v58 = vrot.slane %v29259_v39, %v19930_v4  ;;  %v13928_v8 = vcombine.low %v13920_v11, %v13927_v62  ;;  %v29263_v3 = vld [vmem:[#allocation79_spill] sm:$0xff] }
 0x459   :  { %v13954_v17 = vrot.slane %v29261_v15, %v19962_v25  ;;  %v13961_v57 = vrot.slane %v29262_v48, %v19962_v25  ;;  %v9459_v50 = vrot.slane %v29259_v39, %v19933_v38  ;;  %v14115_v5 = vcombine.low %v14107_v24, %v14114_v36  ;;  %v29264_v18 = vld [vmem:[#allocation323_spill] sm:$0xff]  ;;  %v25312_v39 = vpop.permute.xlu1 %16417  ;;  %v25314_v36 = vpop.permute.xlu0 %16450  ;;  %v29269_v48 = vld [vmem:[#allocation101_spill] sm:$0xff] }
 0x45a   :  { %29260 = vst [vmem:[#allocation206_spill] sm:$0xff] %v25287_v61  ;;  %v14141_v44 = vrot.slane %v29263_v3, %v19962_v25  ;;  %v14148_v63 = vrot.slane %v23905_v19, %v19962_v25  ;;  %v9410_v22 = vrot.slane %v29264_v18, %v19918_v55  ;;  %v9417_v11 = vrot.slane %v29264_v18, %v19921_v47 }
 0x45b   :  { %v9424_v62 = vrot.slane %v29264_v18, %v19930_v4  ;;  %v9431_v15 = vrot.slane %v29264_v18, %v19933_v38  ;;  %29265 = vst [vmem:[#allocation196_spill] sm:$0xff] %v25312_v39  ;;  %16609 = vperm.xlu1 %18689, %v13928_v8   ;;  %29266 = vst [vmem:[#allocation141_spill] sm:$0xff] %v25314_v36  ;;  %v25316_v24 = vcombine.low %v9438_v23, %v9445_v16  ;;  %v29270_v39 = vld [vmem:[#allocation19_spill] sm:$0xff]  ;;  %v29271_v36 = vld [vmem:[#allocation73_spill] sm:$0xff] }
 0x45c   :  { %v25318_v19 = vcombine.low %v9368_v35, %v9375_v27  ;;  %v9494_v3 = vrot.slane %v29269_v48, %v19918_v55  ;;  %v9501_v61 = vrot.slane %v29269_v48, %v19921_v47  ;;  %16642 = vperm.xlu0 %18688, %v14115_v5   ;;  %v9508_v46 = vrot.slane %v29269_v48, %v19930_v4 }
 0x45d   :  { %29267 = vst [vmem:[#allocation89_spill] sm:$0xff] %v25316_v24  ;;  %v13962_v18 = vcombine.low %v13954_v17, %v13961_v57  ;;  %v13988_v8 = vrot.slane %v29270_v39, %v19962_v25  ;;  %v13995_v23 = vrot.slane %v29271_v36, %v19962_v25  ;;  %v9515_v35 = vrot.slane %v29269_v48, %v19933_v38  ;;  %v25343_v39 = vpop.permute.xlu1 %16423  ;;  %v25345_v36 = vpop.permute.xlu0 %16456 }
 0x45e   :  { %29268 = vst [vmem:[#allocation65_spill] sm:$0xff] %v25318_v19  ;;  %v14149_v27 = vcombine.low %v14141_v44, %v14148_v63  ;;  %v14175_v16 = vrot.slane %v23907_v20, %v19962_v25  ;;  %v14182_v5 = vrot.slane %v23925_v41, %v19962_v25  ;;  %v25336_v19 = vcombine.low %v9452_v58, %v9459_v50  ;;  %v29276_v44 = vld [vmem:[#allocation199_spill] sm:$0xff] }
 0x45f   :  { %v25338_v24 = vcombine.low %v9410_v22, %v9417_v11  ;;  %v25340_v17 = vcombine.low %v9424_v62, %v9431_v15  ;;  %v17077_v57 = vadd.s32 4294967184, %v24764_v34  ;;  %29274 = vst [vmem:[#allocation208_spill] sm:$0xff] %v25343_v39  ;;  %16615 = vperm.xlu1 %18689, %v13962_v18   ;;  %29275 = vst [vmem:[#allocation69_spill] sm:$0xff] %v25345_v36  ;;  %v29278_v50 = vld [vmem:[#allocation139_spill] sm:$0xff]  ;;  %v29279_v62 = vld [vmem:[#allocation169_spill] sm:$0xff] }
 0x460   :  { %v9466_v63 = vrot.slane %v29276_v44, %v19918_v55  ;;  %v9473_v20 = vrot.slane %v29276_v44, %v19921_v47  ;;  %v9480_v41 = vrot.slane %v29276_v44, %v19930_v4  ;;  %v9487_v22 = vrot.slane %v29276_v44, %v19933_v38  ;;  %16648 = vperm.xlu0 %18688, %v14149_v27   ;;  %v29281_v39 = vld [vmem:[#allocation225_spill] sm:$0xff]  ;;  %v29282_v27 = vld [vmem:[#allocation103_spill] sm:$0xff] }
 0x461   :  { %29272 = vst [vmem:[#allocation288_spill] sm:$0xff] %v25338_v24  ;;  %29273 = vst [vmem:[#allocation312_spill] sm:$0xff] %v25340_v17  ;;  %v25355_v58 = vcombine.low %v9494_v3, %v9501_v61  ;;  %v13996_v34 = vcombine.low %v13988_v8, %v13995_v23  ;;  %v14022_v11 = vrot.slane %v29278_v50, %v19962_v25  ;;  %v25375_v23 = vpop.permute.xlu1 %16429 }
 0x462   :  { %v14029_v15 = vrot.slane %v29279_v62, %v19962_v25  ;;  %v25361_v48 = vcombine.low %v9508_v46, %v9515_v35  ;;  %v14183_v18 = vcombine.low %v14175_v16, %v14182_v5  ;;  %v14209_v36 = vrot.slane %v29281_v39, %v19962_v25  ;;  %29283 = vst [vmem:[#allocation145_spill] sm:$0xff] %v25375_v23  ;;  %v25377_v35 = vpop.permute.xlu0 %16462  ;;  %v29285_v16 = vld [vmem:[#allocation104_spill] sm:$0xff] }
 0x463   :  { %29277 = vst [vmem:[#allocation60_spill] sm:$0xff] %v25355_v58  ;;  %v14216_v17 = vrot.slane %v23977_v45, %v19962_v25  ;;  %v9550_v61 = vrot.slane %v29282_v27, %v19918_v55  ;;  %v9557_v3 = vrot.slane %v29282_v27, %v19921_v47  ;;  %v9564_v8 = vrot.slane %v29282_v27, %v19930_v4  ;;  %v29287_v23 = vld [vmem:[#allocation212_spill] sm:$0xff] }
 0x464   :  { %29280 = vst [vmem:[#allocation78_spill] sm:$0xff] %v25361_v48  ;;  %v9571_v46 = vrot.slane %v29282_v27, %v19933_v38  ;;  %16621 = vperm.xlu1 %18689, %v13996_v34   ;;  %29284 = vst [vmem:[#allocation92_spill] sm:$0xff] %v25377_v35  ;;  %v9522_v45 = vrot.slane %v29285_v16, %v19918_v55  ;;  %v9529_v5 = vrot.slane %v29285_v16, %v19921_v47  ;;  %v29286_v34 = vld [vmem:[#allocation172_spill] sm:$0xff] }
 0x465   :  { %v9536_v39 = vrot.slane %v29285_v16, %v19930_v4  ;;  %v9543_v44 = vrot.slane %v29285_v16, %v19933_v38  ;;  %16654 = vperm.xlu0 %18688, %v14183_v18   ;;  %v25388_v50 = vsub.s32 %v17077_v57, %v29131_v33  ;;  %v14030_v62 = vcombine.low %v14022_v11, %v14029_v15  ;;  %v29290_v57 = vld [vmem:[#allocation330_spill] sm:$0xff] }
 0x466   :  { %v14056_v27 = vrot.slane %v29286_v34, %v19962_v25  ;;  %v14063_v35 = vrot.slane %v29287_v23, %v19962_v25  ;;  %v25394_v24 = vcombine.low %v9466_v63, %v9473_v20  ;;  %v14217_v48 = vcombine.low %v14209_v36, %v14216_v17  ;;  %v25408_v23 = vpop.permute.xlu1 %16435  ;;  %v25410_v17 = vpop.permute.xlu0 %16468 }
 0x467   :  { %v14243_v58 = vrot.slane %v23989_v0, %v19962_v25  ;;  %v14250_v16 = vrot.slane %v24001_v52, %v19962_v25  ;;  %v25400_v18 = vcombine.low %v9550_v61, %v9557_v3  ;;  %v25402_v33 = vcombine.low %v9480_v41, %v9487_v22  ;;  %29291 = vst [vmem:[#allocation93_spill] sm:$0xff] %v25408_v23  ;;  %v29295_v22 = vld [vmem:[#allocation315_spill] sm:$0xff] }
 0x468   :  { %29288 = vst [vmem:[#allocation306_spill] sm:$0xff] %v25394_v24  ;;  %v9606_v11 = vrot.slane %v29290_v57, %v19918_v55  ;;  %v9613_v15 = vrot.slane %v29290_v57, %v19921_v47  ;;  %16627 = vperm.xlu1 %18689, %v14030_v62   ;;  %29292 = vst [vmem:[#allocation11_spill] sm:$0xff] %v25410_v17  ;;  %v25412_v36 = vcombine.low %v9564_v8, %v9571_v46  ;;  %v29296_v3 = vld [vmem:[#allocation187_spill] sm:$0xff] }
 0x469   :  { %29289 = vst [vmem:[#allocation179_spill] sm:$0xff] %v25402_v33  ;;  %v9620_v0 = vrot.slane %v29290_v57, %v19930_v4  ;;  %v25416_v52 = vcombine.low %v9522_v45, %v9529_v5  ;;  %v25418_v63 = vcombine.low %v9536_v39, %v9543_v44  ;;  %16660 = vperm.xlu0 %18688, %v14217_v48   ;;  %v29297_v8 = vld [vmem:[#allocation331_spill] sm:$0xff]  ;;  %v29331_v33 = vld [vmem:[#allocation210_spill] sm:$0xff] }
 0x46a   :  { %v9627_v20 = vrot.slane %v29290_v57, %v19933_v38  ;;  %v14064_v41 = vcombine.low %v14056_v27, %v14063_v35  ;;  %v14090_v61 = vrot.slane %v29295_v22, %v19962_v25  ;;  %v14097_v62 = vrot.slane %v29296_v3, %v19962_v25  ;;  %v25440_v27 = vpop.permute.xlu1 %16441 }
 0x46b   :  { %29293 = vst [vmem:[#allocation300_spill] sm:$0xff] %v25416_v52  ;;  %29294 = vst [vmem:[#allocation301_spill] sm:$0xff] %v25418_v63  ;;  %v9578_v46 = vrot.slane %v29297_v8, %v19918_v55  ;;  %v14251_v34 = vcombine.low %v14243_v58, %v14250_v16  ;;  %v14277_v45 = vrot.slane %v24021_v29, %v19962_v25  ;;  %v25442_v58 = vpop.permute.xlu0 %16474  ;;  %v29300_v29 = vld [vmem:[#allocation107_spill] sm:$0xff] }
 0x46c   :  { %v14284_v48 = vrot.slane %v24053_v37, %v19962_v25  ;;  %v25432_v5 = vcombine.low %v9606_v11, %v9613_v15  ;;  %v9585_v35 = vrot.slane %v29297_v8, %v19921_v47  ;;  %v9592_v39 = vrot.slane %v29297_v8, %v19930_v4  ;;  %29298 = vst [vmem:[#allocation95_spill] sm:$0xff] %v25440_v27  ;;  %v29301_v15 = vld [vmem:[#allocation108_spill] sm:$0xff]  ;;  %v29303_v27 = vld [vmem:[#allocation25_spill] sm:$0xff] }
 0x46d   :  { %v9599_v44 = vrot.slane %v29297_v8, %v19933_v38  ;;  %16633 = vperm.xlu1 %18689, %v14064_v41   ;;  %29299 = vst [vmem:[#allocation140_spill] sm:$0xff] %v25442_v58  ;;  %v9662_v16 = vrot.slane %v29300_v29, %v19918_v55  ;;  %v9669_v37 = vrot.slane %v29300_v29, %v19921_v47  ;;  %v29302_v41 = vld [vmem:[#allocation87_spill] sm:$0xff] }
 0x46e   :  { %v9676_v57 = vrot.slane %v29300_v29, %v19930_v4  ;;  %v9683_v11 = vrot.slane %v29300_v29, %v19933_v38  ;;  %16666 = vperm.xlu0 %18688, %v14251_v34   ;;  %v9634_v22 = vrot.slane %v29301_v15, %v19918_v55  ;;  %v14098_v3 = vcombine.low %v14090_v61, %v14097_v62 }
 0x46f   :  { %v14124_v8 = vrot.slane %v29302_v41, %v19962_v25  ;;  %v14131_v58 = vrot.slane %v29303_v27, %v19962_v25  ;;  %v9641_v23 = vrot.slane %v29301_v15, %v19921_v47  ;;  %v14285_v17 = vcombine.low %v14277_v45, %v14284_v48  ;;  %v25472_v27 = vpop.permute.xlu1 %16447  ;;  %v25474_v45 = vpop.permute.xlu0 %16480 }
 0x470   :  { %v14311_v63 = vrot.slane %v24065_v42, %v19962_v25  ;;  %v14318_v34 = vrot.slane %v24073_v51, %v19962_v25  ;;  %v25464_v29 = vcombine.low %v9620_v0, %v9627_v20  ;;  %v25466_v52 = vcombine.low %v9578_v46, %v9585_v35  ;;  %29306 = vst [vmem:[#allocation194_spill] sm:$0xff] %v25472_v27  ;;  %v29310_v51 = vld [vmem:[#allocation24_spill] sm:$0xff] }
 0x471   :  { %v9648_v61 = vrot.slane %v29301_v15, %v19930_v4  ;;  %v9655_v62 = vrot.slane %v29301_v15, %v19933_v38  ;;  %16639 = vperm.xlu1 %18689, %v14098_v3   ;;  %29307 = vst [vmem:[#allocation203_spill] sm:$0xff] %v25474_v45  ;;  %v25476_v48 = vcombine.low %v9662_v16, %v9669_v37  ;;  %v29312_v15 = vld [vmem:[#allocation221_spill] sm:$0xff]  ;;  %v29313_v3 = vld [vmem:[#allocation164_spill] sm:$0xff] }
 0x472   :  { %29304 = vst [vmem:[#allocation76_spill] sm:$0xff] %v25464_v29  ;;  %29305 = vst [vmem:[#allocation96_spill] sm:$0xff] %v25466_v52  ;;  %v25478_v42 = vcombine.low %v9592_v39, %v9599_v44  ;;  %v9718_v0 = vrot.slane %v29310_v51, %v19918_v55  ;;  %v9725_v20 = vrot.slane %v29310_v51, %v19921_v47  ;;  %16672 = vperm.xlu0 %18688, %v14285_v17   ;;  %v29323_v45 = vld [vmem:[#allocation241_spill] sm:$0xff] }
 0x473   :  { %29308 = vst [vmem:[#allocation304_spill] sm:$0xff] %v25476_v48  ;;  %v25484_v46 = vcombine.low %v9676_v57, %v9683_v11  ;;  %v14132_v35 = vcombine.low %v14124_v8, %v14131_v58  ;;  %v14158_v41 = vrot.slane %v29312_v15, %v19962_v25  ;;  %v14165_v27 = vrot.slane %v29313_v3, %v19962_v25  ;;  %v29316_v11 = vld [vmem:[#allocation110_spill] sm:$0xff] }
 0x474   :  { %29309 = vst [vmem:[#allocation100_spill] sm:$0xff] %v25478_v42  ;;  %v25490_v16 = vcombine.low %v9634_v22, %v9641_v23  ;;  %v14319_v39 = vcombine.low %v14311_v63, %v14318_v34  ;;  %v14345_v44 = vrot.slane %v24097_v10, %v19962_v25  ;;  %v14352_v37 = vrot.slane %v24129_v26, %v19962_v25  ;;  %v25504_v23 = vpop.permute.xlu1 %16453  ;;  %v25506_v63 = vpop.permute.xlu0 %16486 }
 0x475   :  { %29311 = vst [vmem:[#allocation17_spill] sm:$0xff] %v25484_v46  ;;  %v9732_v17 = vrot.slane %v29310_v51, %v19930_v4  ;;  %v9739_v58 = vrot.slane %v29310_v51, %v19933_v38  ;;  %v25500_v57 = vcombine.low %v9648_v61, %v9655_v62  ;;  %v9690_v8 = vrot.slane %v29316_v11, %v19918_v55  ;;  %v29320_v61 = vld [vmem:[#allocation113_spill] sm:$0xff] }
 0x476   :  { %29314 = vst [vmem:[#allocation18_spill] sm:$0xff] %v25490_v16  ;;  %29317 = vst [vmem:[#allocation323_spill] sm:$0xff] %v25504_v23  ;;  %16645 = vperm.xlu1 %18689, %v14132_v35   ;;  %v25508_v10 = vcombine.low %v9718_v0, %v9725_v20  ;;  %v9697_v26 = vrot.slane %v29316_v11, %v19921_v47  ;;  %v9704_v22 = vrot.slane %v29316_v11, %v19930_v4  ;;  %v29321_v35 = vld [vmem:[#allocation318_spill] sm:$0xff]  ;;  %v29322_v0 = vld [vmem:[#allocation28_spill] sm:$0xff]  ;;  %v18720_v46 = vmov 0.0  }
 0x477   :  { %29315 = vst [vmem:[#allocation79_spill] sm:$0xff] %v25500_v57  ;;  %29318 = vst [vmem:[#allocation101_spill] sm:$0xff] %v25506_v63  ;;  %v9711_v34 = vrot.slane %v29316_v11, %v19933_v38  ;;  %16678 = vperm.xlu0 %18688, %v14319_v39   ;;  %v9774_v62 = vrot.slane %v29320_v61, %v19918_v55  ;;  %v14166_v51 = vcombine.low %v14158_v41, %v14165_v27  ;;  %v29324_v11 = vld [vmem:[#allocation91_spill] sm:$0xff]  ;;  %v29325_v41 = vld [vmem:[#allocation333_spill] sm:$0xff] }
 0x478   :  { %29319 = vst [vmem:[#allocation19_spill] sm:$0xff] %v25508_v10  ;;  %v14192_v15 = vrot.slane %v29321_v35, %v19962_v25  ;;  %v14199_v20 = vrot.slane %v29322_v0, %v19962_v25  ;;  %v9781_v3 = vrot.slane %v29320_v61, %v19921_v47  ;;  %v14353_v63 = vcombine.low %v14345_v44, %v14352_v37  ;;  %v25536_v16 = vpop.permute.xlu1 %16459  ;;  %v25538_v44 = vpop.permute.xlu0 %16492  ;;  %v29384_v10 = vld [vmem:[#allocation261_spill] sm:$0xff] }
 0x479   :  { %v14379_v23 = vrot.slane %v29323_v45, %v19962_v25  ;;  %v14386_v39 = vrot.slane %v29324_v11, %v19962_v25  ;;  %v9788_v57 = vrot.slane %v29320_v61, %v19930_v4  ;;  %v9795_v27 = vrot.slane %v29320_v61, %v19933_v38  ;;  %29326 = vst [vmem:[#allocation73_spill] sm:$0xff] %v25536_v16 }
 0x47a   :  { %v9746_v35 = vrot.slane %v29325_v41, %v19918_v55  ;;  %v9753_v0 = vrot.slane %v29325_v41, %v19921_v47  ;;  %16651 = vperm.xlu1 %18689, %v14166_v51   ;;  %29327 = vst [vmem:[#allocation199_spill] sm:$0xff] %v25538_v44  ;;  %v25540_v45 = vcombine.low %v9732_v17, %v9739_v58  ;;  %v29332_v51 = vld [vmem:[#allocation94_spill] sm:$0xff]  ;;  %15 = vst [vmem:[#allocation2 + $0x10] sm:$0xf] %v18720_v46 }
 0x47b   :  { %v25542_v37 = vcombine.low %v9690_v8, %v9697_v26  ;;  %v25544_v11 = vcombine.low %v9704_v22, %v9711_v34  ;;  %v9760_v61 = vrot.slane %v29325_v41, %v19930_v4  ;;  %16684 = vperm.xlu0 %18688, %v14353_v63   ;;  %v9767_v42 = vrot.slane %v29325_v41, %v19933_v38  ;;  %v29334_v8 = vld [vmem:[#allocation321_spill] sm:$0xff]  ;;  %v29335_v22 = vld [vmem:[#allocation244_spill] sm:$0xff]  ;;  %v29337_v41 = vld [vmem:[#allocation207_spill] sm:$0xff] }
 0x47c   :  { %29328 = vst [vmem:[#allocation139_spill] sm:$0xff] %v25540_v45  ;;  %v14200_v52 = vcombine.low %v14192_v15, %v14199_v20  ;;  %v14226_v16 = vrot.slane %v29331_v33, %v19962_v25  ;;  %v14233_v44 = vrot.slane %v29332_v51, %v19962_v25  ;;  %v25554_v17 = vcombine.low %v9774_v62, %v9781_v3  ;;  %v25568_v51 = vpop.permute.xlu1 %16465  ;;  %v29341_v3 = vld [vmem:[#allocation114_spill] sm:$0xff] }
 0x47d   :  { %29329 = vst [vmem:[#allocation169_spill] sm:$0xff] %v25542_v37  ;;  %29330 = vst [vmem:[#allocation225_spill] sm:$0xff] %v25544_v11  ;;  %v14387_v58 = vcombine.low %v14379_v23, %v14386_v39  ;;  %v14413_v26 = vrot.slane %v29334_v8, %v19962_v25  ;;  %v14420_v34 = vrot.slane %v29335_v22, %v19962_v25  ;;  %v25570_v23 = vpop.permute.xlu0 %16498  ;;  %v29344_v22 = vld [vmem:[#allocation233_spill] sm:$0xff]  ;;  %v29346_v37 = vld [vmem:[#allocation39_spill] sm:$0xff] }
 0x47e   :  { %29333 = vst [vmem:[#allocation103_spill] sm:$0xff] %v25554_v17  ;;  %v25560_v63 = vcombine.low %v9788_v57, %v9795_v27  ;;  %v9830_v15 = vrot.slane %v29337_v41, %v19918_v55  ;;  %v9837_v33 = vrot.slane %v29337_v41, %v19921_v47  ;;  %v25566_v20 = vcombine.low %v9746_v35, %v9753_v0  ;;  %v29366_v17 = vld [vmem:[#allocation216_spill] sm:$0xff] }
 0x47f   :  { %29339 = vst [vmem:[#allocation212_spill] sm:$0xff] %v25568_v51  ;;  %16657 = vperm.xlu1 %18689, %v14200_v52   ;;  %29340 = vst [vmem:[#allocation330_spill] sm:$0xff] %v25570_v23  ;;  %v9844_v62 = vrot.slane %v29337_v41, %v19930_v4  ;;  %v9851_v57 = vrot.slane %v29337_v41, %v19933_v38  ;;  %v9802_v39 = vrot.slane %v29341_v3, %v19918_v55  ;;  %v29343_v52 = vld [vmem:[#allocation204_spill] sm:$0xff] }
 0x480   :  { %29336 = vst [vmem:[#allocation104_spill] sm:$0xff] %v25560_v63  ;;  %29338 = vst [vmem:[#allocation172_spill] sm:$0xff] %v25566_v20  ;;  %v9809_v27 = vrot.slane %v29341_v3, %v19921_v47  ;;  %16690 = vperm.xlu0 %18688, %v14387_v58   ;;  %v25580_v35 = vcombine.low %v9760_v61, %v9767_v42  ;;  %v14234_v0 = vcombine.low %v14226_v16, %v14233_v44  ;;  %v29345_v20 = vld [vmem:[#allocation97_spill] sm:$0xff]  ;;  %v29348_v42 = vld [vmem:[#allocation336_spill] sm:$0xff] }
 0x481   :  { %v14260_v8 = vrot.slane %v29343_v52, %v19962_v25  ;;  %v14267_v23 = vrot.slane %v29344_v22, %v19962_v25  ;;  %v9816_v51 = vrot.slane %v29341_v3, %v19930_v4  ;;  %v14421_v41 = vcombine.low %v14413_v26, %v14420_v34  ;;  %v25600_v52 = vpop.permute.xlu1 %16471  ;;  %v25602_v26 = vpop.permute.xlu0 %16504 }
 0x482   :  { %29342 = vst [vmem:[#allocation315_spill] sm:$0xff] %v25580_v35  ;;  %v14447_v11 = vrot.slane %v29345_v20, %v19962_v25  ;;  %v14454_v63 = vrot.slane %v29346_v37, %v19962_v25  ;;  %v25592_v58 = vcombine.low %v9830_v15, %v9837_v33  ;;  %v9886_v16 = vrot.slane %v29348_v42, %v19918_v55  ;;  %v29353_v20 = vld [vmem:[#allocation337_spill] sm:$0xff]  ;;  %v29355_v35 = vld [vmem:[#allocation195_spill] sm:$0xff] }
 0x483   :  { %v9893_v44 = vrot.slane %v29348_v42, %v19921_v47  ;;  %v9823_v61 = vrot.slane %v29341_v3, %v19933_v38  ;;  %29349 = vst [vmem:[#allocation331_spill] sm:$0xff] %v25600_v52  ;;  %16663 = vperm.xlu1 %18689, %v14234_v0   ;;  %29350 = vst [vmem:[#allocation107_spill] sm:$0xff] %v25602_v26  ;;  %v25604_v34 = vcombine.low %v9844_v62, %v9851_v57  ;;  %v29354_v52 = vld [vmem:[#allocation153_spill] sm:$0xff] }
 0x484   :  { %29347 = vst [vmem:[#allocation187_spill] sm:$0xff] %v25592_v58  ;;  %v9900_v37 = vrot.slane %v29348_v42, %v19930_v4  ;;  %v9907_v15 = vrot.slane %v29348_v42, %v19933_v38  ;;  %v25610_v33 = vcombine.low %v9802_v39, %v9809_v27  ;;  %16696 = vperm.xlu0 %18688, %v14421_v41  }
 0x485   :  { %29351 = vst [vmem:[#allocation108_spill] sm:$0xff] %v25604_v34  ;;  %v9858_v22 = vrot.slane %v29353_v20, %v19918_v55  ;;  %v14268_v3 = vcombine.low %v14260_v8, %v14267_v23  ;;  %v14294_v0 = vrot.slane %v29354_v52, %v19962_v25  ;;  %v14301_v62 = vrot.slane %v29355_v35, %v19962_v25  ;;  %v25632_v8 = vpop.permute.xlu1 %16477  ;;  %v29362_v52 = vld [vmem:[#allocation99_spill] sm:$0xff] }
 0x486   :  { %29352 = vst [vmem:[#allocation87_spill] sm:$0xff] %v25610_v33  ;;  %v9865_v57 = vrot.slane %v29353_v20, %v19921_v47  ;;  %v14455_v34 = vcombine.low %v14447_v11, %v14454_v63  ;;  %v14481_v42 = vrot.slane %v24277_v59, %v19962_v25  ;;  %v14488_v39 = vrot.slane %v24279_v43, %v19962_v25  ;;  %v25634_v11 = vpop.permute.xlu0 %16510  ;;  %v29360_v59 = vld [vmem:[#allocation119_spill] sm:$0xff]  ;;  %v29365_v33 = vld [vmem:[#allocation252_spill] sm:$0xff] }
 0x487   :  { %v25624_v27 = vcombine.low %v9886_v16, %v9893_v44  ;;  %v25626_v41 = vcombine.low %v9816_v51, %v9823_v61  ;;  %v9872_v23 = vrot.slane %v29353_v20, %v19930_v4  ;;  %v9879_v35 = vrot.slane %v29353_v20, %v19933_v38  ;;  %29358 = vst [vmem:[#allocation221_spill] sm:$0xff] %v25632_v8 }
 0x488   :  { %16669 = vperm.xlu1 %18689, %v14268_v3   ;;  %29359 = vst [vmem:[#allocation164_spill] sm:$0xff] %v25634_v11  ;;  %v9942_v63 = vrot.slane %v29360_v59, %v19918_v55  ;;  %v9949_v43 = vrot.slane %v29360_v59, %v19921_v47  ;;  %v9956_v51 = vrot.slane %v29360_v59, %v19930_v4  ;;  %v29363_v3 = vld [vmem:[#allocation240_spill] sm:$0xff] }
 0x489   :  { %29356 = vst [vmem:[#allocation25_spill] sm:$0xff] %v25624_v27  ;;  %29357 = vst [vmem:[#allocation24_spill] sm:$0xff] %v25626_v41  ;;  %v9963_v16 = vrot.slane %v29360_v59, %v19933_v38  ;;  %16702 = vperm.xlu0 %18688, %v14455_v34   ;;  %v25644_v44 = vcombine.low %v9900_v37, %v9907_v15  ;;  %v14302_v61 = vcombine.low %v14294_v0, %v14301_v62  ;;  %v29368_v34 = vld [vmem:[#allocation121_spill] sm:$0xff] }
 0x48a   :  { %v14328_v20 = vrot.slane %v29362_v52, %v19962_v25  ;;  %v14335_v8 = vrot.slane %v29363_v3, %v19962_v25  ;;  %v25650_v27 = vcombine.low %v9858_v22, %v9865_v57  ;;  %v14489_v41 = vcombine.low %v14481_v42, %v14488_v39  ;;  %v25664_v22 = vpop.permute.xlu1 %16483  ;;  %v25666_v62 = vpop.permute.xlu0 %16516  ;;  %v29374_v52 = vld [vmem:[#allocation209_spill] sm:$0xff]  ;;  %v29375_v3 = vld [vmem:[#allocation320_spill] sm:$0xff] }
 0x48b   :  { %29361 = vst [vmem:[#allocation110_spill] sm:$0xff] %v25644_v44  ;;  %v14515_v58 = vrot.slane %v29365_v33, %v19962_v25  ;;  %v14522_v11 = vrot.slane %v29366_v17, %v19962_v25  ;;  %v25656_v59 = vcombine.low %v9872_v23, %v9879_v35  ;;  %v9914_v37 = vrot.slane %v29368_v34, %v19918_v55  ;;  %v29373_v17 = vld [vmem:[#allocation122_spill] sm:$0xff] }
 0x48c   :  { %29364 = vst [vmem:[#allocation113_spill] sm:$0xff] %v25650_v27  ;;  %v9921_v15 = vrot.slane %v29368_v34, %v19921_v47  ;;  %v9928_v0 = vrot.slane %v29368_v34, %v19930_v4  ;;  %29369 = vst [vmem:[#allocation28_spill] sm:$0xff] %v25664_v22  ;;  %16675 = vperm.xlu1 %18689, %v14302_v61   ;;  %v25668_v33 = vcombine.low %v9942_v63, %v9949_v43  ;;  %v29382_v27 = vld [vmem:[#allocation213_spill] sm:$0xff] }
 0x48d   :  { %29367 = vst [vmem:[#allocation318_spill] sm:$0xff] %v25656_v59  ;;  %29370 = vst [vmem:[#allocation241_spill] sm:$0xff] %v25666_v62  ;;  %v25670_v57 = vcombine.low %v9956_v51, %v9963_v16  ;;  %v9998_v42 = vrot.slane %v29373_v17, %v19918_v55  ;;  %v9935_v39 = vrot.slane %v29368_v34, %v19933_v38  ;;  %16708 = vperm.xlu0 %18688, %v14489_v41   ;;  %v29376_v34 = vld [vmem:[#allocation44_spill] sm:$0xff]  ;;  %v29383_v62 = vld [vmem:[#allocation130_spill] sm:$0xff] }
 0x48e   :  { %29371 = vst [vmem:[#allocation91_spill] sm:$0xff] %v25668_v33  ;;  %v10005_v23 = vrot.slane %v29373_v17, %v19921_v47  ;;  %v14336_v35 = vcombine.low %v14328_v20, %v14335_v8  ;;  %v14362_v61 = vrot.slane %v29374_v52, %v19962_v25  ;;  %v14369_v63 = vrot.slane %v29375_v3, %v19962_v25  ;;  %v29377_v8 = vld [vmem:[#allocation228_spill] sm:$0xff] }
 0x48f   :  { %29372 = vst [vmem:[#allocation333_spill] sm:$0xff] %v25670_v57  ;;  %v10012_v43 = vrot.slane %v29373_v17, %v19930_v4  ;;  %v14523_v51 = vcombine.low %v14515_v58, %v14522_v11  ;;  %v14549_v16 = vrot.slane %v24353_v56, %v19962_v25  ;;  %v14556_v41 = vrot.slane %v29376_v34, %v19962_v25  ;;  %v25696_v57 = vpop.permute.xlu1 %16489  ;;  %v25698_v58 = vpop.permute.xlu0 %16522  ;;  %v29380_v56 = vld [vmem:[#allocation214_spill] sm:$0xff] }
 0x490   :  { %v10019_v22 = vrot.slane %v29373_v17, %v19933_v38  ;;  %v9970_v20 = vrot.slane %v29377_v8, %v19918_v55  ;;  %v9977_v52 = vrot.slane %v29377_v8, %v19921_v47  ;;  %v9984_v3 = vrot.slane %v29377_v8, %v19930_v4  ;;  %29378 = vst [vmem:[#allocation210_spill] sm:$0xff] %v25696_v57 }
 0x491   :  { %16681 = vperm.xlu1 %18689, %v14336_v35   ;;  %29379 = vst [vmem:[#allocation94_spill] sm:$0xff] %v25698_v58  ;;  %v10054_v11 = vrot.slane %v29380_v56, %v19918_v55  ;;  %v10061_v17 = vrot.slane %v29380_v56, %v19921_v47  ;;  %v10068_v34 = vrot.slane %v29380_v56, %v19930_v4  ;;  %v29381_v35 = vld [vmem:[#allocation245_spill] sm:$0xff] }
 0x492   :  { %v9991_v33 = vrot.slane %v29377_v8, %v19933_v38  ;;  %16714 = vperm.xlu0 %18688, %v14523_v51   ;;  %v10075_v44 = vrot.slane %v29380_v56, %v19933_v38  ;;  %v14370_v57 = vcombine.low %v14362_v61, %v14369_v63  ;;  %v14396_v59 = vrot.slane %v29381_v35, %v19962_v25  ;;  %v29385_v8 = vld [vmem:[#allocation15_spill] sm:$0xff] }
 0x493   :  { %v14403_v58 = vrot.slane %v29382_v27, %v19962_v25  ;;  %v10026_v24 = vrot.slane %v29383_v62, %v19918_v55  ;;  %v14557_v45 = vcombine.low %v14549_v16, %v14556_v41  ;;  %v14583_v26 = vrot.slane %v29384_v10, %v19962_v25  ;;  %v25726_v27 = vpop.permute.xlu1 %16495  ;;  %v25728_v35 = vpop.permute.xlu0 %16528 }
 0x494   :  { %v14590_v51 = vrot.slane %v29385_v8, %v19962_v25  ;;  %v10033_v56 = vrot.slane %v29383_v62, %v19921_v47  ;;  %v10040_v61 = vrot.slane %v29383_v62, %v19930_v4  ;;  %v10047_v63 = vrot.slane %v29383_v62, %v19933_v38  ;;  %29386 = vst [vmem:[#allocation321_spill] sm:$0xff] %v25726_v27  ;;  %v29393_v62 = vld [vmem:[#allocation98_spill] sm:$0xff] }
 0x495   :  { %16687 = vperm.xlu1 %18689, %v14370_v57   ;;  %29387 = vst [vmem:[#allocation244_spill] sm:$0xff] %v25728_v35  ;;  %v25730_v16 = vcombine.low %v9998_v42, %v10005_v23  ;;  %v25732_v10 = vcombine.low %v10012_v43, %v10019_v22  ;;  %v25734_v41 = vcombine.low %v9914_v37, %v9921_v15  ;;  %v29394_v57 = vld [vmem:[#allocation248_spill] sm:$0xff]  ;;  %v29396_v37 = vld [vmem:[#allocation109_spill] sm:$0xff] }
 0x496   :  { %v25736_v8 = vcombine.low %v9928_v0, %v9935_v39  ;;  %16720 = vperm.xlu0 %18688, %v14557_v45   ;;  %v25738_v48 = vcombine.low %v9970_v20, %v9977_v52  ;;  %v14404_v29 = vcombine.low %v14396_v59, %v14403_v58  ;;  %v14430_v27 = vrot.slane %v29393_v62, %v19962_v25  ;;  %v29397_v0 = vld [vmem:[#allocation111_spill] sm:$0xff]  ;;  %v29415_v52 = vld [vmem:[#allocation45_spill] sm:$0xff] }
 0x497   :  { %29388 = vst [vmem:[#allocation207_spill] sm:$0xff] %v25730_v16  ;;  %29389 = vst [vmem:[#allocation114_spill] sm:$0xff] %v25732_v10  ;;  %v14437_v35 = vrot.slane %v29394_v57, %v19962_v25  ;;  %v25744_v42 = vcombine.low %v9984_v3, %v9991_v33  ;;  %v14591_v22 = vcombine.low %v14583_v26, %v14590_v51  ;;  %v25758_v43 = vpop.permute.xlu1 %16501  ;;  %v25760_v33 = vpop.permute.xlu0 %16534  ;;  %v29408_v57 = vld [vmem:[#allocation275_spill] sm:$0xff]  ;;  %v29424_v26 = vld [vmem:[#allocation328_spill] sm:$0xff] }
 0x498   :  { %29390 = vst [vmem:[#allocation204_spill] sm:$0xff] %v25734_v41  ;;  %29391 = vst [vmem:[#allocation233_spill] sm:$0xff] %v25736_v8  ;;  %v14617_v15 = vrot.slane %v29396_v37, %v19962_v25  ;;  %v14624_v45 = vrot.slane %v29397_v0, %v19962_v25  ;;  %v25750_v39 = vcombine.low %v10054_v11, %v10061_v17  ;;  %v29409_v37 = vld [vmem:[#allocation343_spill] sm:$0xff] }
 0x499   :  { %29392 = vst [vmem:[#allocation97_spill] sm:$0xff] %v25738_v48  ;;  %29395 = vst [vmem:[#allocation39_spill] sm:$0xff] %v25744_v42  ;;  %v25752_v46 = vcombine.low %v10068_v34, %v10075_v44  ;;  %v25754_v59 = vcombine.low %v10026_v24, %v10033_v56  ;;  %v25756_v23 = vcombine.low %v10040_v61, %v10047_v63  ;;  %16693 = vperm.xlu1 %18689, %v14404_v29   ;;  %v29405_v29 = vld [vmem:[#allocation251_spill] sm:$0xff]  ;;  %v29406_v34 = vld [vmem:[#allocation102_spill] sm:$0xff] }
 0x49a   :  { %29398 = vst [vmem:[#allocation336_spill] sm:$0xff] %v25750_v39  ;;  %29402 = vst [vmem:[#allocation119_spill] sm:$0xff] %v25760_v33  ;;  %16726 = vperm.xlu0 %18688, %v14591_v22   ;;  %v14438_v11 = vcombine.low %v14430_v27, %v14437_v35  ;;  %v14464_v17 = vrot.slane %v29405_v29, %v19962_v25  ;;  %v14471_v51 = vrot.slane %v29406_v34, %v19962_v25  ;;  %v29407_v63 = vld [vmem:[#allocation270_spill] sm:$0xff] }
 0x49b   :  { %29399 = vst [vmem:[#allocation337_spill] sm:$0xff] %v25752_v46  ;;  %29400 = vst [vmem:[#allocation153_spill] sm:$0xff] %v25754_v59  ;;  %v14625_v61 = vcombine.low %v14617_v15, %v14624_v45  ;;  %v14651_v62 = vrot.slane %v29407_v63, %v19962_v25  ;;  %v14658_v22 = vrot.slane %v29408_v57, %v19962_v25  ;;  %v25790_v34 = vpop.permute.xlu1 %16507  ;;  %v25792_v15 = vpop.permute.xlu0 %16540  ;;  %v29412_v45 = vld [vmem:[#allocation344_spill] sm:$0xff] }
 0x49c   :  { %29401 = vst [vmem:[#allocation195_spill] sm:$0xff] %v25756_v23  ;;  %v10166_v0 = vrot.slane %v29409_v37, %v19918_v55  ;;  %v10173_v27 = vrot.slane %v29409_v37, %v19921_v47  ;;  %v10180_v35 = vrot.slane %v29409_v37, %v19930_v4  ;;  %v10187_v29 = vrot.slane %v29409_v37, %v19933_v38  ;;  %v29413_v37 = vld [vmem:[#allocation218_spill] sm:$0xff] }
 0x49d   :  { %29410 = vst [vmem:[#allocation99_spill] sm:$0xff] %v25790_v34  ;;  %16699 = vperm.xlu1 %18689, %v14438_v11   ;;  %29411 = vst [vmem:[#allocation240_spill] sm:$0xff] %v25792_v15  ;;  %v10138_v63 = vrot.slane %v29412_v45, %v19918_v55  ;;  %v10145_v57 = vrot.slane %v29412_v45, %v19921_v47  ;;  %v10152_v3 = vrot.slane %v29412_v45, %v19930_v4  ;;  %v29414_v11 = vld [vmem:[#allocation43_spill] sm:$0xff] }
 0x49e   :  { %v10159_v24 = vrot.slane %v29412_v45, %v19933_v38  ;;  %16732 = vperm.xlu0 %18688, %v14625_v61   ;;  %v10222_v58 = vrot.slane %v29413_v37, %v19918_v55  ;;  %v14472_v56 = vcombine.low %v14464_v17, %v14471_v51  ;;  %v14498_v20 = vrot.slane %v29414_v11, %v19962_v25  ;;  %v29416_v45 = vld [vmem:[#allocation117_spill] sm:$0xff]  ;;  %v29417_v51 = vld [vmem:[#allocation219_spill] sm:$0xff] }
 0x49f   :  { %v14505_v46 = vrot.slane %v29415_v52, %v19962_v25  ;;  %v10229_v39 = vrot.slane %v29413_v37, %v19921_v47  ;;  %v14659_v23 = vcombine.low %v14651_v62, %v14658_v22  ;;  %v14685_v59 = vrot.slane %v24513_v60, %v19962_v25  ;;  %v25822_v16 = vpop.permute.xlu1 %16513  ;;  %v25824_v62 = vpop.permute.xlu0 %16546 }
 0x4a0   :  { %v14692_v61 = vrot.slane %v29416_v45, %v19962_v25  ;;  %v10236_v10 = vrot.slane %v29413_v37, %v19930_v4  ;;  %v10243_v17 = vrot.slane %v29413_v37, %v19933_v38  ;;  %v10194_v11 = vrot.slane %v29417_v51, %v19918_v55  ;;  %29418 = vst [vmem:[#allocation252_spill] sm:$0xff] %v25822_v16 }
 0x4a1   :  { %v10201_v52 = vrot.slane %v29417_v51, %v19921_v47  ;;  %16705 = vperm.xlu1 %18689, %v14472_v56   ;;  %29419 = vst [vmem:[#allocation216_spill] sm:$0xff] %v25824_v62  ;;  %v25826_v60 = vcombine.low %v10166_v0, %v10173_v27  ;;  %v25828_v22 = vcombine.low %v10180_v35, %v10187_v29  ;;  %v29425_v56 = vld [vmem:[#allocation329_spill] sm:$0xff]  ;;  %v29426_v35 = vld [vmem:[#allocation55_spill] sm:$0xff]  ;;  %v29439_v62 = vld [vmem:[#allocation20_spill] sm:$0xff] }
 0x4a2   :  { %v25830_v45 = vcombine.low %v10138_v63, %v10145_v57  ;;  %v25832_v42 = vcombine.low %v10152_v3, %v10159_v24  ;;  %16738 = vperm.xlu0 %18688, %v14659_v23   ;;  %v10208_v37 = vrot.slane %v29417_v51, %v19930_v4  ;;  %v14506_v48 = vcombine.low %v14498_v20, %v14505_v46  ;;  %v29427_v3 = vld [vmem:[#allocation334_spill] sm:$0xff] }
 0x4a3   :  { %29420 = vst [vmem:[#allocation121_spill] sm:$0xff] %v25826_v60  ;;  %29421 = vst [vmem:[#allocation122_spill] sm:$0xff] %v25828_v22  ;;  %v14532_v8 = vrot.slane %v29424_v26, %v19962_v25  ;;  %v14539_v41 = vrot.slane %v29425_v56, %v19962_v25  ;;  %v10215_v0 = vrot.slane %v29417_v51, %v19933_v38  ;;  %v29430_v46 = vld [vmem:[#allocation222_spill] sm:$0xff]  ;;  %v25854_v57 = vpop.permute.xlu1 %16519  ;;  %v25856_v51 = vpop.permute.xlu0 %16552  ;;  %v29435_v56 = vld [vmem:[#allocation269_spill] sm:$0xff] }
 0x4a4   :  { %29422 = vst [vmem:[#allocation209_spill] sm:$0xff] %v25830_v45  ;;  %29423 = vst [vmem:[#allocation320_spill] sm:$0xff] %v25832_v42  ;;  %v14693_v27 = vcombine.low %v14685_v59, %v14692_v61  ;;  %v14719_v29 = vrot.slane %v29426_v35, %v19962_v25  ;;  %v14726_v23 = vrot.slane %v29427_v3, %v19962_v25 }
 0x4a5   :  { %v25846_v24 = vcombine.low %v10222_v58, %v10229_v39  ;;  %v25848_v63 = vcombine.low %v10236_v10, %v10243_v17  ;;  %v10278_v26 = vrot.slane %v29430_v46, %v19918_v55  ;;  %v25852_v20 = vcombine.low %v10194_v11, %v10201_v52  ;;  %29432 = vst [vmem:[#allocation245_spill] sm:$0xff] %v25854_v57  ;;  %v29433_v39 = vld [vmem:[#allocation223_spill] sm:$0xff] }
 0x4a6   :  { %16711 = vperm.xlu1 %18689, %v14506_v48   ;;  %v10285_v59 = vrot.slane %v29430_v46, %v19921_v47  ;;  %v10292_v61 = vrot.slane %v29430_v46, %v19930_v4  ;;  %v10299_v10 = vrot.slane %v29430_v46, %v19933_v38  ;;  %v10250_v58 = vrot.slane %v29433_v39, %v19918_v55  ;;  %v29434_v11 = vld [vmem:[#allocation23_spill] sm:$0xff] }
 0x4a7   :  { %29428 = vst [vmem:[#allocation44_spill] sm:$0xff] %v25846_v24  ;;  %29429 = vst [vmem:[#allocation228_spill] sm:$0xff] %v25848_v63  ;;  %16744 = vperm.xlu0 %18688, %v14693_v27   ;;  %v10257_v17 = vrot.slane %v29433_v39, %v19921_v47  ;;  %v14540_v48 = vcombine.low %v14532_v8, %v14539_v41  ;;  %v14566_v52 = vrot.slane %v29434_v11, %v19962_v25  ;;  %v29436_v63 = vld [vmem:[#allocation143_spill] sm:$0xff] }
 0x4a8   :  { %29431 = vst [vmem:[#allocation214_spill] sm:$0xff] %v25852_v20  ;;  %v14573_v35 = vrot.slane %v29435_v56, %v19962_v25  ;;  %v10264_v3 = vrot.slane %v29433_v39, %v19930_v4  ;;  %v14727_v44 = vcombine.low %v14719_v29, %v14726_v23  ;;  %v14753_v46 = vrot.slane %v24591_v1, %v19962_v25  ;;  %v25886_v56 = vpop.permute.xlu1 %16525  ;;  %v25888_v29 = vpop.permute.xlu0 %16558 }
 0x4a9   :  { %v14760_v27 = vrot.slane %v24597_v2, %v19962_v25  ;;  %v10334_v24 = vrot.slane %v29436_v63, %v19918_v55  ;;  %v10341_v41 = vrot.slane %v29436_v63, %v19921_v47  ;;  %v10348_v8 = vrot.slane %v29436_v63, %v19930_v4  ;;  %29437 = vst [vmem:[#allocation213_spill] sm:$0xff] %v25886_v56  ;;  %v29438_v2 = vld [vmem:[#allocation26_spill] sm:$0xff] }
 0x4aa   :  { %v10271_v11 = vrot.slane %v29433_v39, %v19933_v38  ;;  %16717 = vperm.xlu1 %18689, %v14540_v48   ;;  %v10355_v1 = vrot.slane %v29436_v63, %v19933_v38  ;;  %v10306_v23 = vrot.slane %v29438_v2, %v19918_v55  ;;  %v10313_v22 = vrot.slane %v29438_v2, %v19921_v47  ;;  %v29440_v63 = vld [vmem:[#allocation112_spill] sm:$0xff] }
 0x4ab   :  { %v10320_v60 = vrot.slane %v29438_v2, %v19930_v4  ;;  %16750 = vperm.xlu0 %18688, %v14727_v44   ;;  %v10327_v39 = vrot.slane %v29438_v2, %v19933_v38  ;;  %v14574_v48 = vcombine.low %v14566_v52, %v14573_v35  ;;  %v14600_v20 = vrot.slane %v29439_v62, %v19962_v25  ;;  %v29442_v44 = vld [vmem:[#allocation32_spill] sm:$0xff] }
 0x4ac   :  { %v14607_v15 = vrot.slane %v29440_v63, %v19962_v25  ;;  %v25904_v33 = vcombine.low %v10208_v37, %v10215_v0  ;;  %v14761_v42 = vcombine.low %v14753_v46, %v14760_v27  ;;  %v14787_v45 = vrot.slane %v24599_v14, %v19962_v25  ;;  %v25918_v35 = vpop.permute.xlu1 %16531  ;;  %v25920_v37 = vpop.permute.xlu0 %16564  ;;  %v29455_v27 = vld [vmem:[#allocation258_spill] sm:$0xff]  ;;  %v29460_v63 = vld [vmem:[#allocation229_spill] sm:$0xff] }
 0x4ad   :  { %v14794_v56 = vrot.slane %v29442_v44, %v19962_v25  ;;  %v25910_v57 = vcombine.low %v10278_v26, %v10285_v59  ;;  %v25912_v2 = vcombine.low %v10292_v61, %v10299_v10  ;;  %v25914_v52 = vcombine.low %v10250_v58, %v10257_v17  ;;  %29447 = vst [vmem:[#allocation109_spill] sm:$0xff] %v25918_v35  ;;  %v29451_v26 = vld [vmem:[#allocation242_spill] sm:$0xff]  ;;  %v29453_v58 = vld [vmem:[#allocation115_spill] sm:$0xff]  ;;  %v29461_v44 = vld [vmem:[#allocation37_spill] sm:$0xff] }
 0x4ae   :  { %29441 = vst [vmem:[#allocation130_spill] sm:$0xff] %v25904_v33  ;;  %v25916_v62 = vcombine.low %v10264_v3, %v10271_v11  ;;  %16723 = vperm.xlu1 %18689, %v14574_v48   ;;  %v25922_v0 = vcombine.low %v10334_v24, %v10341_v41  ;;  %v25924_v14 = vcombine.low %v10348_v8, %v10355_v1  ;;  %v29454_v3 = vld [vmem:[#allocation148_spill] sm:$0xff] }
 0x4af   :  { %29443 = vst [vmem:[#allocation261_spill] sm:$0xff] %v25910_v57  ;;  %29444 = vst [vmem:[#allocation15_spill] sm:$0xff] %v25912_v2  ;;  %v25926_v46 = vcombine.low %v10306_v23, %v10313_v22  ;;  %v16985_v59 = vrot.slane %v29451_v26, %v24876_v7  ;;  %16756 = vperm.xlu0 %18688, %v14761_v42   ;;  %v25930_v61 = vcombine.low %v10320_v60, %v10327_v39  ;;  %v29456_v8 = vld [vmem:[#allocation340_spill] sm:$0xff]  ;;  %v29457_v60 = vld [vmem:[#allocation27_spill] sm:$0xff] }
 0x4b0   :  { %29445 = vst [vmem:[#allocation98_spill] sm:$0xff] %v25914_v52  ;;  %29446 = vst [vmem:[#allocation248_spill] sm:$0xff] %v25916_v62  ;;  %v14608_v10 = vcombine.low %v14600_v20, %v14607_v15  ;;  %v14634_v17 = vrot.slane %v29453_v58, %v19962_v25  ;;  %v14641_v24 = vrot.slane %v29454_v3, %v19962_v25  ;;  %v25950_v39 = vpop.permute.xlu1 %16537  ;;  %v29462_v3 = vld [vmem:[#allocation74_spill] sm:$0xff] }
 0x4b1   :  { %29448 = vst [vmem:[#allocation111_spill] sm:$0xff] %v25922_v0  ;;  %29449 = vst [vmem:[#allocation251_spill] sm:$0xff] %v25924_v14  ;;  %v16990_v41 = vrot.slane %v29455_v27, %v24857_v28  ;;  %v14795_v22 = vcombine.low %v14787_v45, %v14794_v56  ;;  %v14821_v11 = vrot.slane %v29456_v8, %v19962_v25  ;;  %v25952_v45 = vpop.permute.xlu0 %16570  ;;  %v29459_v56 = vld [vmem:[#allocation36_spill] sm:$0xff]  ;;  %v29463_v27 = vld [vmem:[#allocation266_spill] sm:$0xff] }
 0x4b2   :  { %29450 = vst [vmem:[#allocation102_spill] sm:$0xff] %v25926_v46  ;;  %29452 = vst [vmem:[#allocation270_spill] sm:$0xff] %v25930_v61  ;;  %v14828_v42 = vrot.slane %v24673_v49, %v19962_v25  ;;  %v10390_v1 = vrot.slane %v29457_v60, %v19918_v55  ;;  %v10397_v15 = vrot.slane %v29457_v60, %v19921_v47  ;;  %16729 = vperm.xlu1 %18689, %v14608_v10   ;;  %v29465_v57 = vld [vmem:[#allocation54_spill] sm:$0xff] }
 0x4b3   :  { %v10404_v20 = vrot.slane %v29457_v60, %v19930_v4  ;;  %v10411_v23 = vrot.slane %v29457_v60, %v19933_v38  ;;  %29458 = vst [vmem:[#allocation275_spill] sm:$0xff] %v25950_v39  ;;  %v10362_v49 = vrot.slane %v29459_v56, %v19918_v55  ;;  %v10369_v48 = vrot.slane %v29459_v56, %v19921_v47  ;;  %v29464_v60 = vld [vmem:[#allocation341_spill] sm:$0xff]  ;;  %v29466_v0 = vld [vmem:[#allocation282_spill] sm:$0xff]  ;;  %v29467_v47 = vld [vmem:[#allocation40_spill] sm:$0xff] }
 0x4b4   :  { %v16997_v26 = vrot.slane %v29461_v44, %v29460_v63  ;;  %v16992_v58 = vsel %vm16991_vm1, %v16990_v41, %v16985_v59  ;;  %16762 = vperm.xlu0 %18688, %v14795_v22   ;;  %v17004_v8 = vrot.slane %v29463_v27, %v29462_v3  ;;  %v14642_v10 = vcombine.low %v14634_v17, %v14641_v24  ;;  %v29468_v44 = vld [vmem:[#allocation293_spill] sm:$0xff]  ;;  %v29471_v27 = vld [vmem:[#allocation255_spill] sm:$0xff]  ;;  %v25981_v62 = vpop.permute.xlu1 %16543  ;;  %v29501_v39 = vld [vmem:[#allocation58_spill] sm:$0xff] }
 0x4b5   :  { %v14668_v2 = vrot.slane %v29464_v60, %v19962_v25  ;;  %v14675_v14 = vrot.slane %v29465_v57, %v19962_v25  ;;  %v17011_v55 = vrot.slane %v29467_v47, %v29466_v0  ;;  %v14829_v61 = vcombine.low %v14821_v11, %v14828_v42  ;;  %v29469_v41 = vld [vmem:[#allocation157_spill] sm:$0xff]  ;;  %29473 = vst [vmem:[#allocation344_spill] sm:$0xff] %v25981_v62  ;;  %v25983_v47 = vpop.permute.xlu0 %16576 }
 0x4b6   :  { %v14855_v59 = vrot.slane %v29468_v44, %v19962_v25  ;;  %v14862_v22 = vrot.slane %v29469_v41, %v19962_v25  ;;  %v25973_v46 = vcombine.low %v10390_v1, %v10397_v15  ;;  %v10376_v17 = vrot.slane %v29459_v56, %v19930_v4  ;;  %v29472_v57 = vld [vmem:[#allocation161_spill] sm:$0xff]  ;;  %16735 = vperm.xlu1 %18689, %v14642_v10   ;;  %v29477_v44 = vld [vmem:[#allocation47_spill] sm:$0xff] }
 0x4b7   :  { %v10383_v24 = vrot.slane %v29459_v56, %v19933_v38  ;;  %v17018_v60 = vrot.slane %v29472_v57, %v29471_v27  ;;  %v25985_v11 = vcombine.low %v10404_v20, %v10411_v23  ;;  %v25987_v42 = vcombine.low %v10362_v49, %v10369_v48  ;;  %v29476_v15 = vld [vmem:[#allocation281_spill] sm:$0xff]  ;;  %v29479_v38 = vld [vmem:[#allocation56_spill] sm:$0xff] }
 0x4b8   :  { %29470 = vst [vmem:[#allocation343_spill] sm:$0xff] %v25973_v46  ;;  %v16999_v1 = vsel %vm16998_vm2, %v16997_v26, %v16992_v58  ;;  %v17025_v41 = vrot.slane %v29477_v44, %v29476_v15  ;;  %16768 = vperm.xlu0 %18688, %v14829_v61   ;;  %v14676_v57 = vcombine.low %v14668_v2, %v14675_v14  ;;  %v29478_v46 = vld [vmem:[#allocation335_spill] sm:$0xff]  ;;  %v29480_v48 = vld [vmem:[#allocation152_spill] sm:$0xff] }
 0x4b9   :  { %29474 = vst [vmem:[#allocation218_spill] sm:$0xff] %v25985_v11  ;;  %29475 = vst [vmem:[#allocation43_spill] sm:$0xff] %v25987_v42  ;;  %v17006_v56 = vsel %vm17005_vm3, %v17004_v8, %v16999_v1  ;;  %v14702_v10 = vrot.slane %v29478_v46, %v19962_v25  ;;  %v14709_v20 = vrot.slane %v29479_v38, %v19962_v25  ;;  %v29481_v58 = vld [vmem:[#allocation64_spill] sm:$0xff]  ;;  %v29483_v8 = vld [vmem:[#allocation75_spill] sm:$0xff]  ;;  %v16550_v38 = vpop.permute.xlu1 %16549 }
 0x4ba   :  { %v17013_v23 = vsel %vm17012_vm4, %v17011_v55, %v17006_v56  ;;  %v14863_v49 = vcombine.low %v14855_v59, %v14862_v22  ;;  %v14889_v26 = vrot.slane %v29480_v48, %v19962_v25  ;;  %v14896_v44 = vrot.slane %v29481_v58, %v19962_v25  ;;  %v29484_v1 = vld [vmem:[#allocation163_spill] sm:$0xff]  ;;  %16741 = vperm.xlu1 %18689, %v14676_v57   ;;  %v26009_v55 = vpop.permute.xlu0 %16582  ;;  %v29486_v59 = vld [vmem:[#allocation120_spill] sm:$0xff]  ;;  %v29487_v22 = vld [vmem:[#allocation41_spill] sm:$0xff] }
 0x4bb   :  { %v26002_v61 = vcombine.low %v10376_v17, %v10383_v24  ;;  %v17046_v2 = vrot.slane %v29484_v1, %v29483_v8  ;;  %v17020_v14 = vsel %vm17019_vm5, %v17018_v60, %v17013_v23  ;;  %v29485_v46 = vld [vmem:[#allocation263_spill] sm:$0xff]  ;;  %v17060_v56 = vrot.slane %v29487_v22, %v29486_v59  ;;  %v29488_v48 = vld [vmem:[#allocation280_spill] sm:$0xff]  ;;  %v29489_v42 = vld [vmem:[#allocation273_spill] sm:$0xff] }
 0x4bc   :  { %v17032_v11 = vrot.slane %v29485_v46, %v25201_v30  ;;  %v17027_v17 = vsel %vm17026_vm6, %v17025_v41, %v17020_v14  ;;  %v29490_v24 = vld [vmem:[#allocation267_spill] sm:$0xff]  ;;  %16774 = vperm.xlu0 %18688, %v14863_v49   ;;  %v17884_v60 = vrot.slane %v16550_v38, %v24876_v7  ;;  %v14710_v23 = vcombine.low %v14702_v10, %v14709_v20  ;;  %v29491_v57 = vld [vmem:[#allocation342_spill] sm:$0xff]  ;;  %v29493_v22 = vld [vmem:[#allocation264_spill] sm:$0xff] }
 0x4bd   :  { %29482 = vst [vmem:[#allocation45_spill] sm:$0xff] %v26002_v61  ;;  %v17039_v1 = vrot.slane %v29490_v24, %v25214_v40  ;;  %v14736_v46 = vrot.slane %v29491_v57, %v19962_v25  ;;  %v29492_v61 = vld [vmem:[#allocation57_spill] sm:$0xff]  ;;  %v17098_v52 = vrot.slane %v29493_v22, %v24857_v28  ;;  %v14897_v58 = vcombine.low %v14889_v26, %v14896_v44  ;;  %v29494_v41 = vld [vmem:[#allocation135_spill] sm:$0xff]  ;;  %v29495_v24 = vld [vmem:[#allocation136_spill] sm:$0xff]  ;;  %v16556_v62 = vpop.permute.xlu1 %16555 }
 0x4be   :  { %v14743_v4 = vrot.slane %v29492_v61, %v19962_v25  ;;  %v14923_v14 = vrot.slane %v29494_v41, %v19962_v25  ;;  %v14930_v33 = vrot.slane %v29495_v24, %v19962_v25  ;;  %v17034_v49 = vsel %vm17033_vm7, %v17032_v11, %v17027_v17  ;;  %v29496_v10 = vld [vmem:[#allocation268_spill] sm:$0xff]  ;;  %v29497_v38 = vld [vmem:[#allocation7_spill] sm:$0xff]  ;;  %16747 = vperm.xlu1 %18689, %v14710_v23   ;;  %v26036_v26 = vpop.permute.xlu0 %16588  ;;  %v29498_v22 = vld [vmem:[#allocation286_spill] sm:$0xff] }
 0x4bf   :  { %v17108_v20 = vrot.slane %v29496_v10, %v29462_v3  ;;  %v17094_v57 = vrot.slane %v29497_v38, %v24876_v7  ;;  %v17888_v61 = vrot.slane %v25856_v51, %v24857_v28  ;;  %v17041_v44 = vsel %vm17040_vm8, %v17039_v1, %v17034_v49  ;;  %v29499_v11 = vld [vmem:[#allocation67_spill] sm:$0xff]  ;;  %v29500_v51 = vld [vmem:[#allocation33_spill] sm:$0xff] }
 0x4c0   :  { %v17053_v41 = vrot.slane %v29498_v22, %v25277_v54  ;;  %v17103_v17 = vrot.slane %v29499_v11, %v29460_v63  ;;  %v17893_v24 = vrot.slane %v16556_v62, %v29460_v63  ;;  %16780 = vperm.xlu0 %18688, %v14897_v58   ;;  %v14744_v38 = vcombine.low %v14736_v46, %v14743_v4  ;;  %v29502_v22 = vld [vmem:[#allocation303_spill] sm:$0xff]  ;;  %v29503_v11 = vld [vmem:[#allocation177_spill] sm:$0xff] }
 0x4c1   :  { %v17889_v10 = vsel %vm16991_vm1, %v17888_v61, %v17884_v60  ;;  %v14770_v23 = vrot.slane %v29500_v51, %v19962_v25  ;;  %v14777_v35 = vrot.slane %v29501_v39, %v19962_v25  ;;  %v14931_v49 = vcombine.low %v14923_v14, %v14930_v33  ;;  %v29504_v58 = vld [vmem:[#allocation175_spill] sm:$0xff]  ;;  %v16562_v39 = vpop.permute.xlu1 %16561 }
 0x4c2   :  { %v17894_v1 = vsel %vm16998_vm2, %v17893_v24, %v17889_v10  ;;  %v14957_v16 = vrot.slane %v29502_v22, %v19962_v25  ;;  %v14964_v34 = vrot.slane %v29503_v11, %v19962_v25  ;;  %v17048_v62 = vsel %vm17047_vm9, %v17046_v2, %v17041_v44  ;;  %16753 = vperm.xlu1 %18689, %v14744_v38   ;;  %v26060_v61 = vpop.permute.xlu0 %16594  ;;  %v29505_v24 = vld [vmem:[#allocation192_spill] sm:$0xff]  ;;  %v29507_v38 = vld [vmem:[#allocation133_spill] sm:$0xff] }
 0x4c3   :  { %v17118_v4 = vrot.slane %v29504_v58, %v29471_v27  ;;  %v17099_v60 = vsel %vm16991_vm1, %v17098_v52, %v17094_v57  ;;  %v17898_v46 = vrot.slane %v25888_v29, %v29462_v3  ;;  %v17055_v33 = vsel %vm17054_vm10, %v17053_v41, %v17048_v62  ;;  %v29506_v57 = vld [vmem:[#allocation132_spill] sm:$0xff]  ;;  %v29509_v62 = vld [vmem:[#allocation309_spill] sm:$0xff] }
 0x4c4   :  { %v17104_v14 = vsel %vm16998_vm2, %v17103_v17, %v17099_v60  ;;  %v17113_v10 = vrot.slane %v29505_v24, %v29466_v0  ;;  %v17903_v2 = vrot.slane %v16562_v39, %v29466_v0  ;;  %16786 = vperm.xlu0 %18688, %v14931_v49   ;;  %v14778_v52 = vcombine.low %v14770_v23, %v14777_v35  ;;  %v29508_v17 = vld [vmem:[#allocation66_spill] sm:$0xff] }
 0x4c5   :  { %v17899_v44 = vsel %vm17005_vm3, %v17898_v46, %v17894_v1  ;;  %v14804_v29 = vrot.slane %v29506_v57, %v19962_v25  ;;  %v14811_v51 = vrot.slane %v29507_v38, %v19962_v25  ;;  %v14965_v41 = vcombine.low %v14957_v16, %v14964_v34  ;;  %v29510_v1 = vld [vmem:[#allocation52_spill] sm:$0xff]  ;;  %v16568_v46 = vpop.permute.xlu1 %16567  ;;  %v29511_v16 = vld [vmem:[#allocation53_spill] sm:$0xff] }
 0x4c6   :  { %v17904_v22 = vsel %vm17012_vm4, %v17903_v2, %v17899_v44  ;;  %v14991_v11 = vrot.slane %v29508_v17, %v19962_v25  ;;  %v14998_v58 = vrot.slane %v29509_v62, %v19962_v25  ;;  %v17062_v49 = vsel %vm17061_vm11, %v17060_v56, %v17055_v33  ;;  %16759 = vperm.xlu1 %18689, %v14778_v52   ;;  %v26083_v39 = vpop.permute.xlu0 %16600  ;;  %v29512_v2 = vld [vmem:[#allocation191_spill] sm:$0xff]  ;;  %v29514_v52 = vld [vmem:[#allocation61_spill] sm:$0xff] }
 0x4c7   :  { %v17067_v35 = vrot.slane %v29510_v1, %v25290_v6  ;;  %v17109_v23 = vsel %vm17005_vm3, %v17108_v20, %v17104_v14  ;;  %v17908_v60 = vrot.slane %v25920_v37, %v29471_v27  ;;  %v17128_v34 = vrot.slane %v29511_v16, %v25201_v30  ;;  %v29513_v37 = vld [vmem:[#allocation144_spill] sm:$0xff]  ;;  %v29516_v1 = vld [vmem:[#allocation49_spill] sm:$0xff] }
 0x4c8   :  { %v17114_v24 = vsel %vm17012_vm4, %v17113_v10, %v17109_v23  ;;  %v17123_v56 = vrot.slane %v29512_v2, %v29476_v15  ;;  %v17913_v33 = vrot.slane %v16568_v46, %v29476_v15  ;;  %16792 = vperm.xlu0 %18688, %v14965_v41   ;;  %v14812_v14 = vcombine.low %v14804_v29, %v14811_v51  ;;  %v29515_v10 = vld [vmem:[#allocation147_spill] sm:$0xff] }
 0x4c9   :  { %v17909_v20 = vsel %vm17019_vm5, %v17908_v60, %v17904_v22  ;;  %v14838_v44 = vrot.slane %v29513_v37, %v19962_v25  ;;  %v14845_v57 = vrot.slane %v29514_v52, %v19962_v25  ;;  %v14999_v17 = vcombine.low %v14991_v11, %v14998_v58  ;;  %v29517_v29 = vld [vmem:[#allocation279_spill] sm:$0xff]  ;;  %v16574_v46 = vpop.permute.xlu1 %16573 }
 0x4ca   :  { %v17914_v38 = vsel %vm17026_vm6, %v17913_v33, %v17909_v20  ;;  %v15025_v62 = vrot.slane %v29515_v10, %v19962_v25  ;;  %v15032_v23 = vrot.slane %v29516_v1, %v19962_v25  ;;  %v26102_v41 = vsel %vm17068_vm12, %v17067_v35, %v17062_v49  ;;  %16765 = vperm.xlu1 %18689, %v14812_v14   ;;  %v26109_v11 = vpop.permute.xlu0 %16606  ;;  %v29518_v58 = vld [vmem:[#allocation283_spill] sm:$0xff] }
 0x4cb   :  { %v17119_v22 = vsel %vm17019_vm5, %v17118_v4, %v17114_v24  ;;  %v17918_v60 = vrot.slane %v25952_v45, %v25201_v30  ;;  %v29519_v49 = vld [vmem:[#allocation307_spill] sm:$0xff]  ;;  %v17923_v33 = vrot.slane %v16574_v46, %v25214_v40  ;;  %v14846_v24 = vcombine.low %v14838_v44, %v14845_v57  ;;  %v29520_v45 = vld [vmem:[#allocation297_spill] sm:$0xff]  ;;  %v29525_v44 = vld [vmem:[#allocation198_spill] sm:$0xff] }
 0x4cc   :  { %v17124_v2 = vsel %vm17026_vm6, %v17123_v56, %v17119_v22  ;;  %v17173_v35 = vrot.slane %v29519_v49, %v24876_v7  ;;  %16798 = vperm.xlu0 %18688, %v14999_v17   ;;  %v14872_v20 = vrot.slane %v29520_v45, %v19962_v25  ;;  %v29521_v14 = vld [vmem:[#allocation151_spill] sm:$0xff]  ;;  %v15033_v10 = vcombine.low %v15025_v62, %v15032_v23  ;;  %v29522_v56 = vld [vmem:[#allocation166_spill] sm:$0xff]  ;;  %v29524_v17 = vld [vmem:[#allocation197_spill] sm:$0xff] }
 0x4cd   :  { %v17919_v4 = vsel %vm17033_vm7, %v17918_v60, %v17914_v38  ;;  %v14879_v37 = vrot.slane %v29521_v14, %v19962_v25  ;;  %v15059_v1 = vrot.slane %v29522_v56, %v19962_v25  ;;  %v29523_v22 = vld [vmem:[#allocation274_spill] sm:$0xff]  ;;  %v17177_v38 = vrot.slane %v29524_v17, %v24857_v28  ;;  %v29526_v60 = vld [vmem:[#allocation80_spill] sm:$0xff]  ;;  %v29528_v14 = vld [vmem:[#allocation137_spill] sm:$0xff] }
 0x4ce   :  { %v17924_v52 = vsel %vm17040_vm8, %v17923_v33, %v17919_v4  ;;  %v15066_v46 = vrot.slane %v29523_v22, %v19962_v25  ;;  %v17133_v57 = vrot.slane %v29525_v44, %v25214_v40  ;;  %v17182_v49 = vrot.slane %v29526_v60, %v29460_v63  ;;  %v16580_v33 = vpop.permute.xlu1 %16579  ;;  %16771 = vperm.xlu1 %18689, %v14846_v24   ;;  %v26135_v62 = vpop.permute.xlu0 %16612  ;;  %v29529_v22 = vld [vmem:[#allocation138_spill] sm:$0xff]  ;;  %v29530_v44 = vld [vmem:[#allocation295_spill] sm:$0xff] }
 0x4cf   :  { %v17928_v45 = vrot.slane %v25983_v47, %v29483_v8  ;;  %29527 = vst [vmem:[#allocation117_spill] sm:$0xff] %v26135_v62  ;;  %v17129_v23 = vsel %vm17033_vm7, %v17128_v34, %v17124_v2  ;;  %v17933_v4 = vrot.slane %v16580_v33, %v25277_v54  ;;  %v14906_v56 = vrot.slane %v29528_v14, %v19962_v25  ;;  %v29532_v14 = vld [vmem:[#allocation159_spill] sm:$0xff] }
 0x4d0   :  { %16804 = vperm.xlu0 %18688, %v15033_v10   ;;  %v14913_v17 = vrot.slane %v29529_v22, %v19962_v25  ;;  %v17187_v60 = vrot.slane %v29530_v44, %v29462_v3  ;;  %v17178_v47 = vsel %vm16991_vm1, %v17177_v38, %v17173_v35  ;;  %v14880_v16 = vcombine.low %v14872_v20, %v14879_v37  ;;  %v29531_v10 = vld [vmem:[#allocation181_spill] sm:$0xff]  ;;  %v29533_v44 = vld [vmem:[#allocation316_spill] sm:$0xff]  ;;  %v29535_v38 = vld [vmem:[#allocation226_spill] sm:$0xff] }
 0x4d1   :  { %v17929_v24 = vsel %vm17047_vm9, %v17928_v45, %v17924_v52  ;;  %v15067_v2 = vcombine.low %v15059_v1, %v15066_v46  ;;  %v15093_v33 = vrot.slane %v29531_v10, %v19962_v25  ;;  %v15100_v51 = vrot.slane %v29532_v14, %v19962_v25  ;;  %v29534_v1 = vld [vmem:[#allocation313_spill] sm:$0xff] }
 0x4d2   :  { %v17934_v34 = vsel %vm17054_vm10, %v17933_v4, %v17929_v24  ;;  %v17134_v22 = vsel %vm17040_vm8, %v17133_v57, %v17129_v23  ;;  %v17183_v62 = vsel %vm16998_vm2, %v17182_v49, %v17178_v47  ;;  %v17192_v35 = vrot.slane %v29533_v44, %v29466_v0  ;;  %v16586_v37 = vpop.permute.xlu1 %16585  ;;  %16777 = vperm.xlu1 %18689, %v14880_v16   ;;  %v26158_v52 = vpop.permute.xlu0 %16618  ;;  %v29537_v47 = vld [vmem:[#allocation146_spill] sm:$0xff]  ;;  %v29538_v44 = vld [vmem:[#allocation285_spill] sm:$0xff] }
 0x4d3   :  { %v17938_v20 = vrot.slane %v26009_v55, %v29486_v59  ;;  %v17256_v46 = vrot.slane %v29534_v1, %v24857_v28  ;;  %v17252_v45 = vrot.slane %v29535_v38, %v24876_v7  ;;  %v17943_v57 = vrot.slane %v16586_v37, %v25290_v6  ;;  %v29536_v55 = vld [vmem:[#allocation345_spill] sm:$0xff] }
 0x4d4   :  { %16810 = vperm.xlu0 %18688, %v15067_v2   ;;  %v14914_v49 = vcombine.low %v14906_v56, %v14913_v17  ;;  %v17948_v23 = vrot.slane %v26036_v26, %v29488_v48  ;;  %v14940_v16 = vrot.slane %v29536_v55, %v19962_v25  ;;  %v14947_v24 = vrot.slane %v29537_v47, %v19962_v25  ;;  %v29539_v2 = vld [vmem:[#allocation149_spill] sm:$0xff]  ;;  %v29540_v17 = vld [vmem:[#allocation202_spill] sm:$0xff] }
 0x4d5   :  { %v17939_v4 = vsel %vm17061_vm11, %v17938_v20, %v17934_v34  ;;  %v15101_v14 = vcombine.low %v15093_v33, %v15100_v51  ;;  %v15127_v1 = vrot.slane %v29538_v44, %v19962_v25  ;;  %v15134_v56 = vrot.slane %v29539_v2, %v19962_v25  ;;  %v29541_v20 = vld [vmem:[#allocation16_spill] sm:$0xff]  ;;  %v29542_v33 = vld [vmem:[#allocation311_spill] sm:$0xff]  ;;  %v29543_v2 = vld [vmem:[#allocation246_spill] sm:$0xff] }
 0x4d6   :  { %v17944_v10 = vsel %vm17068_vm12, %v17943_v57, %v17939_v4  ;;  %v17197_v26 = vrot.slane %v29540_v17, %v29471_v27  ;;  %v17188_v34 = vsel %vm17005_vm3, %v17187_v60, %v17183_v62  ;;  %v17261_v37 = vrot.slane %v29541_v20, %v29460_v63  ;;  %v16592_v38 = vpop.permute.xlu1 %16591  ;;  %16783 = vperm.xlu1 %18689, %v14914_v49   ;;  %v26183_v57 = vpop.permute.xlu0 %16624  ;;  %v29544_v49 = vld [vmem:[#allocation310_spill] sm:$0xff] }
 0x4d7   :  { %v17949_v55 = vsel %vm17075_vm13, %v17948_v23, %v17944_v10  ;;  %v17193_v51 = vsel %vm17012_vm4, %v17192_v35, %v17188_v34  ;;  %v17202_v4 = vrot.slane %v29542_v33, %v29476_v15  ;;  %v17257_v47 = vsel %vm16991_vm1, %v17256_v46, %v17252_v45  ;;  %v29545_v34 = vld [vmem:[#allocation201_spill] sm:$0xff]  ;;  %v29546_v46 = vld [vmem:[#allocation294_spill] sm:$0xff] }
 0x4d8   :  { %v17953_v44 = vrot.slane %v16592_v38, %v25388_v50  ;;  %16816 = vperm.xlu0 %18688, %v15101_v14   ;;  %v17958_v62 = vrot.slane %v26060_v61, %v25148_v53  ;;  %v14948_v60 = vcombine.low %v14940_v16, %v14947_v24  ;;  %v14974_v23 = vrot.slane %v29543_v2, %v19962_v25  ;;  %v29547_v16 = vld [vmem:[#allocation29_spill] sm:$0xff] }
 0x4d9   :  { %v14981_v10 = vrot.slane %v29544_v49, %v19962_v25  ;;  %v15135_v17 = vcombine.low %v15127_v1, %v15134_v56  ;;  %v15161_v20 = vrot.slane %v29545_v34, %v19962_v25  ;;  %v15168_v45 = vrot.slane %v29546_v46, %v19962_v25  ;;  %v29549_v56 = vld [vmem:[#allocation13_spill] sm:$0xff]  ;;  %v29554_v34 = vld [vmem:[#allocation72_spill] sm:$0xff] }
 0x4da   :  { %v17954_v35 = vsel %vm17082_vm14, %v17953_v44, %v17949_v55  ;;  %v17198_v14 = vsel %vm17019_vm5, %v17197_v26, %v17193_v51  ;;  %v17262_v61 = vsel %vm16998_vm2, %v17261_v37, %v17257_v47  ;;  %v17271_v24 = vrot.slane %v29547_v16, %v29466_v0  ;;  %v26208_v33 = vpop.permute.xlu1 %16597  ;;  %16789 = vperm.xlu1 %18689, %v14948_v60   ;;  %v26210_v1 = vpop.permute.xlu0 %16630  ;;  %v29550_v26 = vld [vmem:[#allocation22_spill] sm:$0xff]  ;;  %v29553_v60 = vld [vmem:[#allocation71_spill] sm:$0xff] }
 0x4db   :  { %v26206_v38 = vsel %vm17089_vm15, %v17958_v62, %v17954_v35  ;;  %v17143_v55 = vrot.slane %v29549_v56, %v25277_v54  ;;  %v17203_v44 = vsel %vm17026_vm6, %v17202_v4, %v17198_v14  ;;  %v17212_v51 = vrot.slane %v29550_v26, %v25214_v40  ;;  %v29551_v37 = vld [vmem:[#allocation314_spill] sm:$0xff]  ;;  %v29552_v62 = vld [vmem:[#allocation193_spill] sm:$0xff]  ;;  %v29556_v26 = vld [vmem:[#allocation83_spill] sm:$0xff] }
 0x4dc   :  { %29548 = vst [vmem:[#allocation219_spill] sm:$0xff] %v26206_v38  ;;  %v17266_v47 = vrot.slane %v29551_v37, %v29462_v3  ;;  %16822 = vperm.xlu0 %18688, %v15135_v17   ;;  %v17207_v2 = vrot.slane %v29552_v62, %v25201_v30  ;;  %v14982_v49 = vcombine.low %v14974_v23, %v14981_v10  ;;  %v29555_v14 = vld [vmem:[#allocation186_spill] sm:$0xff]  ;;  %v29613_v38 = vld [vmem:[#allocation312_spill] sm:$0xff] }
 0x4dd   :  { %v15008_v35 = vrot.slane %v29553_v60, %v19962_v25  ;;  %v15015_v46 = vrot.slane %v29554_v34, %v19962_v25  ;;  %v15169_v4 = vcombine.low %v15161_v20, %v15168_v45  ;;  %v15195_v56 = vrot.slane %v29555_v14, %v19962_v25  ;;  %v29558_v60 = vld [vmem:[#allocation9_spill] sm:$0xff] }
 0x4de   :  { %v17267_v16 = vsel %vm17005_vm3, %v17266_v47, %v17262_v61  ;;  %v15202_v37 = vrot.slane %v29556_v26, %v19962_v25  ;;  %v29557_v17 = vrot.slane %v29517_v29, %v29483_v8  ;;  %v17208_v10 = vsel %vm17033_vm7, %v17207_v2, %v17203_v44  ;;  %v26238_v61 = vpop.permute.xlu1 %16603  ;;  %16795 = vperm.xlu1 %18689, %v14982_v49   ;;  %v26240_v20 = vpop.permute.xlu0 %16636  ;;  %v29560_v47 = vld [vmem:[#allocation142_spill] sm:$0xff] }
 0x4df   :  { %v17272_v62 = vsel %vm17012_vm4, %v17271_v24, %v17267_v16  ;;  %v17281_v34 = vrot.slane %v29558_v60, %v29476_v15  ;;  %29559 = vst [vmem:[#allocation328_spill] sm:$0xff] %v26240_v20  ;;  %v17217_v14 = vrot.slane %v29560_v47, %v29483_v8  ;;  %v17213_v29 = vsel %vm17040_vm8, %v17212_v51, %v17208_v10  ;;  %v29562_v24 = vld [vmem:[#allocation185_spill] sm:$0xff]  ;;  %v29563_v26 = vld [vmem:[#allocation46_spill] sm:$0xff] }
 0x4e0   :  { %v17139_v23 = vsel %vm17047_vm9, %v29557_v17, %v17134_v22  ;;  %v29561_v22 = vld [vmem:[#allocation220_spill] sm:$0xff]  ;;  %16828 = vperm.xlu0 %18688, %v15169_v4   ;;  %v17222_v2 = vrot.slane %v29562_v24, %v25277_v54  ;;  %v15016_v16 = vcombine.low %v15008_v35, %v15015_v46  ;;  %v15042_v49 = vrot.slane %v29563_v26, %v19962_v25  ;;  %v29564_v17 = vld [vmem:[#allocation278_spill] sm:$0xff] }
 0x4e1   :  { %v17144_v45 = vsel %vm17054_vm10, %v17143_v55, %v17139_v23  ;;  %v17276_v44 = vrot.slane %v29561_v22, %v29471_v27  ;;  %v15049_v60 = vrot.slane %v29564_v17, %v19962_v25  ;;  %v15203_v23 = vcombine.low %v15195_v56, %v15202_v37  ;;  %v29566_v46 = vld [vmem:[#allocation184_spill] sm:$0xff] }
 0x4e2   :  { %v15229_v51 = vrot.slane %v25174_v32, %v19962_v25  ;;  %v15236_v10 = vrot.slane %v25186_v21, %v19962_v25  ;;  %v29565_v4 = vrot.slane %v29489_v42, %v29488_v48  ;;  %v17081_v47 = vrot.slane %v29566_v46, %v25388_v50  ;;  %v26269_v37 = vpop.permute.xlu1 %16609  ;;  %16801 = vperm.xlu1 %18689, %v15016_v16   ;;  %v26271_v32 = vpop.permute.xlu0 %16642  ;;  %v29572_v16 = vld [vmem:[#allocation77_spill] sm:$0xff]  ;;  %v29573_v46 = vld [vmem:[#allocation271_spill] sm:$0xff] }
 0x4e3   :  { %v17277_v55 = vsel %vm17019_vm5, %v17276_v44, %v17272_v62  ;;  %v29567_v62 = vld [vmem:[#allocation88_spill] sm:$0xff]  ;;  %29568 = vst [vmem:[#allocation329_spill] sm:$0xff] %v26271_v32  ;;  %v29569_v21 = vrot.slane %v29518_v58, %v29486_v59  ;;  %v17218_v24 = vsel %vm17047_vm9, %v17217_v14, %v17213_v29  ;;  %v15083_v58 = vrot.slane %v29573_v46, %v19962_v25 }
 0x4e4   :  { %v17076_v35 = vsel %vm17075_vm13, %v29565_v4, %v26102_v41  ;;  %v17282_v22 = vsel %vm17026_vm6, %v17281_v34, %v17277_v55  ;;  %v17291_v56 = vrot.slane %v29567_v62, %v25214_v40  ;;  %v29570_v41 = vld [vmem:[#allocation68_spill] sm:$0xff]  ;;  %v29571_v34 = vld [vmem:[#allocation86_spill] sm:$0xff]  ;;  %16834 = vperm.xlu0 %18688, %v15203_v23   ;;  %v17223_v17 = vsel %vm17054_vm10, %v17222_v2, %v17218_v24  ;;  %v29575_v2 = vld [vmem:[#allocation81_spill] sm:$0xff] }
 0x4e5   :  { %v17149_v42 = vsel %vm17061_vm11, %v29569_v21, %v17144_v45  ;;  %v17153_v44 = vrot.slane %v29570_v41, %v25290_v6  ;;  %v17286_v26 = vrot.slane %v29571_v34, %v25201_v30  ;;  %v15050_v55 = vcombine.low %v15042_v49, %v15049_v60  ;;  %v29574_v29 = vld [vmem:[#allocation308_spill] sm:$0xff] }
 0x4e6   :  { %v15076_v4 = vrot.slane %v29572_v16, %v19962_v25  ;;  %v15237_v62 = vcombine.low %v15229_v51, %v15236_v10  ;;  %v15263_v21 = vrot.slane %v25220_v13, %v19962_v25  ;;  %v15270_v14 = vrot.slane %v25228_v9, %v19962_v25  ;;  %v29576_v41 = vld [vmem:[#allocation8_spill] sm:$0xff]  ;;  %v26299_v34 = vpop.permute.xlu1 %16615  ;;  %v26301_v51 = vpop.permute.xlu0 %16648  ;;  %v29577_v9 = vld [vmem:[#allocation189_spill] sm:$0xff] }
 0x4e7   :  { %v17287_v45 = vsel %vm17033_vm7, %v17286_v26, %v17282_v22  ;;  %v17227_v23 = vrot.slane %v29574_v29, %v29486_v59  ;;  %v17232_v49 = vrot.slane %v29575_v2, %v25290_v6  ;;  %v17301_v24 = vrot.slane %v29576_v41, %v25277_v54  ;;  %16807 = vperm.xlu1 %18689, %v15050_v55   ;;  %v29578_v26 = vld [vmem:[#allocation188_spill] sm:$0xff] }
 0x4e8   :  { %v17292_v60 = vsel %vm17040_vm8, %v17291_v56, %v17287_v45  ;;  %v17083_v13 = vsel %vm17082_vm14, %v17081_v47, %v17076_v35  ;;  %v17158_v10 = vrot.slane %v29577_v9, %v29488_v48  ;;  %v17154_v22 = vsel %vm17068_vm12, %v17153_v44, %v17149_v42  ;;  %16840 = vperm.xlu0 %18688, %v15237_v62   ;;  %v29579_v45 = vld [vmem:[#allocation50_spill] sm:$0xff]  ;;  %v29580_v55 = vld [vmem:[#allocation176_spill] sm:$0xff]  ;;  %v29581_v44 = vld [vmem:[#allocation305_spill] sm:$0xff] }
 0x4e9   :  { %v17296_v16 = vrot.slane %v29578_v26, %v29483_v8  ;;  %v17228_v56 = vsel %vm17061_vm11, %v17227_v23, %v17223_v17  ;;  %v15084_v46 = vcombine.low %v15076_v4, %v15083_v58  ;;  %v15110_v29 = vrot.slane %v29579_v45, %v19962_v25  ;;  %v29582_v58 = vld [vmem:[#allocation12_spill] sm:$0xff]  ;;  %v29585_v26 = vld [vmem:[#allocation82_spill] sm:$0xff] }
 0x4ea   :  { %v15117_v2 = vrot.slane %v29580_v55, %v19962_v25  ;;  %v15271_v47 = vcombine.low %v15263_v21, %v15270_v14  ;;  %v15297_v41 = vrot.slane %v25270_v12, %v19962_v25  ;;  %v15304_v42 = vrot.slane %v25272_v31, %v19962_v25  ;;  %v26325_v9 = vpop.permute.xlu1 %16621  ;;  %v26327_v21 = vpop.permute.xlu0 %16654  ;;  %v29583_v12 = vld [vmem:[#allocation200_spill] sm:$0xff]  ;;  %v29584_v31 = vld [vmem:[#allocation317_spill] sm:$0xff] }
 0x4eb   :  { %v17297_v35 = vsel %vm17047_vm9, %v17296_v16, %v17292_v60  ;;  %v17163_v62 = vrot.slane %v29581_v44, %v25388_v50  ;;  %v17233_v17 = vsel %vm17068_vm12, %v17232_v49, %v17228_v56  ;;  %v17311_v23 = vrot.slane %v29582_v58, %v25290_v6  ;;  %16813 = vperm.xlu1 %18689, %v15084_v46   ;;  %v29587_v56 = vld [vmem:[#allocation277_spill] sm:$0xff]  ;;  %v29588_v55 = vld [vmem:[#allocation160_spill] sm:$0xff] }
 0x4ec   :  { %v17302_v4 = vsel %vm17054_vm10, %v17301_v24, %v17297_v35  ;;  %v17242_v14 = vrot.slane %v29583_v12, %v25388_v50  ;;  %v17306_v60 = vrot.slane %v29584_v31, %v29486_v59  ;;  %16846 = vperm.xlu0 %18688, %v15271_v47   ;;  %v15144_v49 = vrot.slane %v29585_v26, %v19962_v25  ;;  %v29586_v24 = vld [vmem:[#allocation170_spill] sm:$0xff]  ;;  %v29589_v47 = vld [vmem:[#allocation89_spill] sm:$0xff] }
 0x4ed   :  { %v15151_v16 = vrot.slane %v29586_v24, %v19962_v25  ;;  %v17088_v45 = vrot.slane %v29587_v56, %v25148_v53  ;;  %v17159_v46 = vsel %vm17075_vm13, %v17158_v10, %v17154_v22  ;;  %v17237_v35 = vrot.slane %v29588_v55, %v29488_v48 }
 0x4ee   :  { %v15118_v44 = vcombine.low %v15110_v29, %v15117_v2  ;;  %v17307_v58 = vsel %vm17061_vm11, %v17306_v60, %v17302_v4  ;;  %v15305_v12 = vcombine.low %v15297_v41, %v15304_v42  ;;  %v15331_v31 = vrot.slane %v29589_v47, %v19962_v25  ;;  %v26353_v55 = vpop.permute.xlu1 %16627  ;;  %v26355_v29 = vpop.permute.xlu0 %16660  ;;  %v29591_v41 = vld [vmem:[#allocation85_spill] sm:$0xff]  ;;  %v29598_v47 = vld [vmem:[#allocation211_spill] sm:$0xff] }
 0x4ef   :  { %v15338_v26 = vrot.slane %v25336_v19, %v19962_v25  ;;  %v26348_v24 = vsel %vm17089_vm15, %v17088_v45, %v17083_v13  ;;  %v17164_v56 = vsel %vm17082_vm14, %v17163_v62, %v17159_v46  ;;  %v17238_v10 = vsel %vm17075_vm13, %v17237_v35, %v17233_v17  ;;  %v29592_v19 = vld [vmem:[#allocation156_spill] sm:$0xff]  ;;  %v29593_v62 = vld [vmem:[#allocation287_spill] sm:$0xff]  ;;  %v29596_v35 = vld [vmem:[#allocation78_spill] sm:$0xff] }
 0x4f0   :  { %29590 = vst [vmem:[#allocation55_spill] sm:$0xff] %v26348_v24  ;;  %v17312_v22 = vsel %vm17068_vm12, %v17311_v23, %v17307_v58  ;;  %16819 = vperm.xlu1 %18689, %v15118_v44   ;;  %v17243_v2 = vsel %vm17082_vm14, %v17242_v14, %v17238_v10  ;;  %v17316_v42 = vrot.slane %v29591_v41, %v29488_v48  ;;  %v29594_v23 = vld [vmem:[#allocation84_spill] sm:$0xff]  ;;  %v29597_v44 = vld [vmem:[#allocation10_spill] sm:$0xff] }
 0x4f1   :  { %v17321_v13 = vrot.slane %v29592_v19, %v25388_v50  ;;  %16852 = vperm.xlu0 %18688, %v15305_v12   ;;  %v15152_v4 = vcombine.low %v15144_v49, %v15151_v16  ;;  %v15178_v17 = vrot.slane %v29593_v62, %v19962_v25  ;;  %v15185_v60 = vrot.slane %v29594_v23, %v19962_v25  ;;  %v29595_v45 = vld [vmem:[#allocation60_spill] sm:$0xff]  ;;  %v29599_v19 = vld [vmem:[#allocation291_spill] sm:$0xff]  ;;  %v29600_v23 = vld [vmem:[#allocation70_spill] sm:$0xff] }
 0x4f2   :  { %v15365_v46 = vrot.slane %v29595_v45, %v19962_v25  ;;  %v15372_v14 = vrot.slane %v29596_v35, %v19962_v25  ;;  %v17168_v58 = vrot.slane %v29597_v44, %v25148_v53  ;;  %v17247_v10 = vrot.slane %v29598_v47, %v25148_v53  ;;  %v26375_v12 = vpop.permute.xlu1 %16633  ;;  %v26377_v41 = vpop.permute.xlu0 %16666 }
 0x4f3   :  { %v17317_v49 = vsel %vm17075_vm13, %v17316_v42, %v17312_v22  ;;  %v15339_v16 = vcombine.low %v15331_v31, %v15338_v26  ;;  %v15212_v62 = vrot.slane %v29599_v19, %v19962_v25  ;;  %v15219_v45 = vrot.slane %v29600_v23, %v19962_v25 }
 0x4f4   :  { %16825 = vperm.xlu1 %18689, %v15152_v4   ;;  %v15399_v35 = vrot.slane %v25400_v18, %v19962_v25  ;;  %v15406_v44 = vrot.slane %v25412_v36, %v19962_v25  ;;  %v26388_v22 = vsel %vm17089_vm15, %v17168_v58, %v17164_v56  ;;  %v26391_v31 = vsel %vm17089_vm15, %v17247_v10, %v17243_v2  ;;  %v29604_v18 = vld [vmem:[#allocation178_spill] sm:$0xff]  ;;  %v29605_v36 = vld [vmem:[#allocation319_spill] sm:$0xff]  ;;  %v29606_v2 = vld [vmem:[#allocation76_spill] sm:$0xff] }
 0x4f5   :  { %29601 = vst [vmem:[#allocation334_spill] sm:$0xff] %v26388_v22  ;;  %29602 = vst [vmem:[#allocation222_spill] sm:$0xff] %v26391_v31  ;;  %v26396_v4 = vsel %vm17082_vm14, %v17321_v13, %v17317_v49  ;;  %16858 = vperm.xlu0 %18688, %v15339_v16   ;;  %v15186_v47 = vcombine.low %v15178_v17, %v15185_v60  ;;  %v15373_v19 = vcombine.low %v15365_v46, %v15372_v14  ;;  %v29607_v10 = vld [vmem:[#allocation206_spill] sm:$0xff]  ;;  %v29608_v13 = vld [vmem:[#allocation65_spill] sm:$0xff] }
 0x4f6   :  { %v15246_v23 = vrot.slane %v29604_v18, %v19962_v25  ;;  %v15253_v24 = vrot.slane %v29605_v36, %v19962_v25  ;;  %v15433_v56 = vrot.slane %v25432_v5, %v19962_v25  ;;  %v15440_v58 = vrot.slane %v29606_v2, %v19962_v25  ;;  %v26412_v60 = vpop.permute.xlu1 %16639  ;;  %v26414_v46 = vpop.permute.xlu0 %16672  ;;  %v29609_v5 = vld [vmem:[#allocation304_spill] sm:$0xff]  ;;  %v29610_v36 = vld [vmem:[#allocation99_spill] sm:$0xff] }
 0x4f7   :  { %v15280_v42 = vrot.slane %v29607_v10, %v19962_v25  ;;  %v15287_v49 = vrot.slane %v29608_v13, %v19962_v25  ;;  %v17805_v17 = vrot.slane %v25758_v43, %v24876_v7  ;;  %v15220_v14 = vcombine.low %v15212_v62, %v15219_v45  ;;  %v29611_v10 = vld [vmem:[#allocation17_spill] sm:$0xff]  ;;  %v29612_v31 = vld [vmem:[#allocation288_spill] sm:$0xff]  ;;  %v29614_v22 = vld [vmem:[#allocation107_spill] sm:$0xff] }
 0x4f8   :  { %16831 = vperm.xlu1 %18689, %v15186_v47   ;;  %v15407_v16 = vcombine.low %v15399_v35, %v15406_v44  ;;  %v15467_v18 = vrot.slane %v29609_v5, %v19962_v25  ;;  %v17814_v2 = vrot.slane %v29610_v36, %v29460_v63  ;;  %v15474_v13 = vrot.slane %v29611_v10, %v19962_v25  ;;  %v29615_v35 = vld [vmem:[#allocation19_spill] sm:$0xff] }
 0x4f9   :  { %16864 = vperm.xlu0 %18688, %v15373_v19   ;;  %v15314_v43 = vrot.slane %v29612_v31, %v19962_v25  ;;  %v15321_v47 = vrot.slane %v29613_v38, %v19962_v25  ;;  %v17809_v62 = vrot.slane %v29614_v22, %v24857_v28  ;;  %v17963_v45 = vrot.slane %v26208_v33, %v24876_v7  ;;  %v29616_v19 = vld [vmem:[#allocation139_spill] sm:$0xff] }
 0x4fa   :  { %v15501_v44 = vrot.slane %v29615_v35, %v19962_v25  ;;  %v15508_v5 = vrot.slane %v29616_v19, %v19962_v25  ;;  %v17972_v36 = vrot.slane %v26238_v61, %v29460_v63  ;;  %v15254_v10 = vcombine.low %v15246_v23, %v15253_v24  ;;  %v16646_v20 = vpop.permute.xlu1 %16645  ;;  %v26439_v33 = vpop.permute.xlu0 %16678  ;;  %v29617_v35 = vld [vmem:[#allocation306_spill] sm:$0xff]  ;;  %v29618_v19 = vld [vmem:[#allocation179_spill] sm:$0xff]  ;;  %v29619_v24 = vld [vmem:[#allocation252_spill] sm:$0xff] }
 0x4fb   :  { %v15441_v31 = vcombine.low %v15433_v56, %v15440_v58  ;;  %v15288_v32 = vcombine.low %v15280_v42, %v15287_v49  ;;  %v17810_v38 = vsel %vm16991_vm1, %v17809_v62, %v17805_v17  ;;  %v17967_v22 = vrot.slane %v26083_v39, %v24857_v28  ;;  %v29620_v39 = vld [vmem:[#allocation164_spill] sm:$0xff] }
 0x4fc   :  { %16837 = vperm.xlu1 %18689, %v15220_v14   ;;  %v15348_v53 = vrot.slane %v29617_v35, %v19962_v25  ;;  %v15355_v26 = vrot.slane %v29618_v19, %v19962_v25  ;;  %v17815_v61 = vsel %vm16998_vm2, %v17814_v2, %v17810_v38  ;;  %v17824_v42 = vrot.slane %v29619_v24, %v29466_v0  ;;  %v29621_v2 = vld [vmem:[#allocation103_spill] sm:$0xff]  ;;  %v29624_v19 = vld [vmem:[#allocation300_spill] sm:$0xff] }
 0x4fd   :  { %16870 = vperm.xlu0 %18688, %v15407_v16   ;;  %v15475_v23 = vcombine.low %v15467_v18, %v15474_v13  ;;  %v15322_v56 = vcombine.low %v15314_v43, %v15321_v47  ;;  %v17819_v58 = vrot.slane %v29620_v39, %v29462_v3  ;;  %v17968_v49 = vsel %vm16991_vm1, %v17967_v22, %v17963_v45  ;;  %v29622_v16 = vld [vmem:[#allocation104_spill] sm:$0xff] }
 0x4fe   :  { %v18042_v17 = vrot.slane %v16646_v20, %v24876_v7  ;;  %v15509_v14 = vcombine.low %v15501_v44, %v15508_v5  ;;  %v17973_v62 = vsel %vm16998_vm2, %v17972_v36, %v17968_v49  ;;  %v17982_v35 = vrot.slane %v26269_v37, %v29466_v0  ;;  %v16652_v47 = vpop.permute.xlu1 %16651  ;;  %v26464_v45 = vpop.permute.xlu0 %16684  ;;  %v29623_v5 = vld [vmem:[#allocation245_spill] sm:$0xff] }
 0x4ff   :  { %v15535_v38 = vrot.slane %v29621_v2, %v19962_v25  ;;  %v15542_v18 = vrot.slane %v29622_v16, %v19962_v25  ;;  %v17820_v13 = vsel %vm17005_vm3, %v17819_v58, %v17815_v61  ;;  %v17977_v43 = vrot.slane %v26109_v11, %v29462_v3  ;;  %v29625_v11 = vld [vmem:[#allocation241_spill] sm:$0xff]  ;;  %v29627_v58 = vld [vmem:[#allocation187_spill] sm:$0xff] }
 0x500   :  { %v18046_v20 = vrot.slane %v26301_v51, %v24857_v28  ;;  %16843 = vperm.xlu1 %18689, %v15254_v10   ;;  %v15356_v44 = vcombine.low %v15348_v53, %v15355_v26  ;;  %v17825_v37 = vsel %vm17012_vm4, %v17824_v42, %v17820_v13  ;;  %v17834_v36 = vrot.slane %v29623_v5, %v29476_v15  ;;  %v29626_v53 = vld [vmem:[#allocation301_spill] sm:$0xff] }
 0x501   :  { %v18051_v22 = vrot.slane %v16652_v47, %v29460_v63  ;;  %16876 = vperm.xlu0 %18688, %v15441_v31   ;;  %v15382_v61 = vrot.slane %v29624_v19, %v19962_v25  ;;  %v17829_v24 = vrot.slane %v29625_v11, %v29471_v27  ;;  %v17978_v51 = vsel %vm17005_vm3, %v17977_v43, %v17973_v62  ;;  %v29628_v16 = vld [vmem:[#allocation117_spill] sm:$0xff] }
 0x502   :  { %v18047_v10 = vsel %vm16991_vm1, %v18046_v20, %v18042_v17  ;;  %v15389_v26 = vrot.slane %v29626_v53, %v19962_v25  ;;  %v17983_v42 = vsel %vm17012_vm4, %v17982_v35, %v17978_v51  ;;  %v17992_v39 = vrot.slane %v26299_v34, %v29476_v15  ;;  %v16658_v13 = vpop.permute.xlu1 %16657  ;;  %v26489_v43 = vpop.permute.xlu0 %16690  ;;  %v29629_v35 = vld [vmem:[#allocation108_spill] sm:$0xff]  ;;  %v29630_v47 = vld [vmem:[#allocation213_spill] sm:$0xff] }
 0x503   :  { %v18052_v31 = vsel %vm16998_vm2, %v18051_v22, %v18047_v10  ;;  %v15569_v49 = vrot.slane %v29627_v58, %v19962_v25  ;;  %v17830_v2 = vsel %vm17019_vm5, %v17829_v24, %v17825_v37  ;;  %v17987_v62 = vrot.slane %v29628_v16, %v29471_v27  ;;  %v29631_v22 = vld [vmem:[#allocation96_spill] sm:$0xff] }
 0x504   :  { %v18056_v17 = vrot.slane %v26327_v21, %v29462_v3  ;;  %16849 = vperm.xlu1 %18689, %v15288_v32   ;;  %v15576_v34 = vrot.slane %v29629_v35, %v19962_v25  ;;  %v17835_v20 = vsel %vm17026_vm6, %v17834_v36, %v17830_v2  ;;  %v17844_v5 = vrot.slane %v29630_v47, %v25214_v40  ;;  %v29632_v21 = vld [vmem:[#allocation94_spill] sm:$0xff]  ;;  %v29633_v51 = vld [vmem:[#allocation100_spill] sm:$0xff] }
 0x505   :  { %v18061_v37 = vrot.slane %v16658_v13, %v29466_v0  ;;  %16882 = vperm.xlu0 %18688, %v15475_v23   ;;  %v15416_v19 = vrot.slane %v29631_v22, %v19962_v25  ;;  %v17839_v11 = vrot.slane %v29632_v21, %v25201_v30  ;;  %v17988_v32 = vsel %vm17019_vm5, %v17987_v62, %v17983_v42  ;;  %v29635_v35 = vld [vmem:[#allocation244_spill] sm:$0xff]  ;;  %v29637_v21 = vld [vmem:[#allocation209_spill] sm:$0xff] }
 0x506   :  { %v18057_v24 = vsel %vm17005_vm3, %v18056_v17, %v18052_v31  ;;  %v15423_v10 = vrot.slane %v29633_v51, %v19962_v25  ;;  %v17993_v36 = vsel %vm17026_vm6, %v17992_v39, %v17988_v32  ;;  %v18002_v53 = vrot.slane %v26325_v9, %v25214_v40  ;;  %v16664_v31 = vpop.permute.xlu1 %16663  ;;  %v26514_v62 = vpop.permute.xlu0 %16696  ;;  %v29634_v9 = vld [vmem:[#allocation109_spill] sm:$0xff]  ;;  %v29638_v32 = vld [vmem:[#allocation275_spill] sm:$0xff] }
 0x507   :  { %v18062_v23 = vsel %vm17012_vm4, %v18061_v37, %v18057_v24  ;;  %v15543_v58 = vcombine.low %v15535_v38, %v15542_v18  ;;  %v17840_v2 = vsel %vm17033_vm7, %v17839_v11, %v17835_v20  ;;  %v17997_v16 = vrot.slane %v26158_v52, %v25201_v30 }
 0x508   :  { %v18066_v42 = vrot.slane %v26355_v29, %v29471_v27  ;;  %16855 = vperm.xlu1 %18689, %v15322_v56   ;;  %v15390_v17 = vcombine.low %v15382_v61, %v15389_v26  ;;  %v17845_v39 = vsel %vm17040_vm8, %v17844_v5, %v17840_v2  ;;  %v17854_v13 = vrot.slane %v29634_v9, %v25277_v54  ;;  %v29636_v5 = vld [vmem:[#allocation18_spill] sm:$0xff] }
 0x509   :  { %v18071_v38 = vrot.slane %v16664_v31, %v29476_v15  ;;  %16888 = vperm.xlu0 %18688, %v15509_v14   ;;  %v15577_v18 = vcombine.low %v15569_v49, %v15576_v34  ;;  %v17849_v52 = vrot.slane %v29635_v35, %v29483_v8  ;;  %v17998_v20 = vsel %vm17033_vm7, %v17997_v16, %v17993_v36  ;;  %v29642_v31 = vld [vmem:[#allocation169_spill] sm:$0xff] }
 0x50a   :  { %v18067_v29 = vsel %vm17019_vm5, %v18066_v42, %v18062_v23  ;;  %v15424_v56 = vcombine.low %v15416_v19, %v15423_v10  ;;  %v18003_v47 = vsel %vm17040_vm8, %v18002_v53, %v17998_v20  ;;  %v18012_v61 = vrot.slane %v26353_v55, %v25277_v54  ;;  %v16670_v22 = vpop.permute.xlu1 %16669  ;;  %v26535_v19 = vpop.permute.xlu0 %16702  ;;  %v29641_v23 = vld [vmem:[#allocation79_spill] sm:$0xff]  ;;  %v29643_v20 = vld [vmem:[#allocation225_spill] sm:$0xff] }
 0x50b   :  { %v18072_v26 = vsel %vm17026_vm6, %v18071_v38, %v18067_v29  ;;  %v15450_v37 = vrot.slane %v29636_v5, %v19962_v25  ;;  %v17850_v14 = vsel %vm17047_vm9, %v17849_v52, %v17845_v39  ;;  %v18007_v49 = vrot.slane %v26183_v57, %v29483_v8  ;;  %v29639_v57 = vld [vmem:[#allocation320_spill] sm:$0xff] }
 0x50c   :  { %v18076_v34 = vrot.slane %v26377_v41, %v25201_v30  ;;  %16861 = vperm.xlu1 %18689, %v15356_v44   ;;  %v15756_v55 = vrot.slane %v29637_v21, %v19962_v25  ;;  %v17855_v11 = vsel %vm17054_vm10, %v17854_v13, %v17850_v14  ;;  %v17864_v24 = vrot.slane %v29638_v32, %v25290_v6  ;;  %v29640_v41 = vld [vmem:[#allocation119_spill] sm:$0xff]  ;;  %v29648_v32 = vld [vmem:[#allocation30_spill] sm:$0xff] }
 0x50d   :  { %v18081_v51 = vrot.slane %v16670_v22, %v25214_v40  ;;  %16894 = vperm.xlu0 %18688, %v15543_v58   ;;  %v15763_v10 = vrot.slane %v29639_v57, %v19962_v25  ;;  %v17859_v36 = vrot.slane %v29640_v41, %v29486_v59  ;;  %v18008_v44 = vsel %vm17047_vm9, %v18007_v49, %v18003_v47  ;;  %v29644_v47 = vld [vmem:[#allocation344_spill] sm:$0xff]  ;;  %v29646_v49 = vld [vmem:[#allocation214_spill] sm:$0xff] }
 0x50e   :  { %v18077_v53 = vsel %vm17033_vm7, %v18076_v34, %v18072_v26  ;;  %v15457_v2 = vrot.slane %v29641_v23, %v19962_v25  ;;  %v18013_v16 = vsel %vm17054_vm10, %v18012_v61, %v18008_v44  ;;  %v18022_v42 = vrot.slane %v26375_v12, %v25290_v6  ;;  %v16676_v35 = vpop.permute.xlu1 %16675  ;;  %v26562_v52 = vpop.permute.xlu0 %16708  ;;  %v29651_v41 = vld [vmem:[#allocation328_spill] sm:$0xff] }
 0x50f   :  { %v18082_v58 = vsel %vm17040_vm8, %v18081_v51, %v18077_v53  ;;  %v15484_v39 = vrot.slane %v29642_v31, %v19962_v25  ;;  %v17860_v9 = vsel %vm17061_vm11, %v17859_v36, %v17855_v11  ;;  %v18017_v13 = vrot.slane %v26210_v1, %v29486_v59  ;;  %v29645_v1 = vld [vmem:[#allocation240_spill] sm:$0xff] }
 0x510   :  { %v18086_v38 = vrot.slane %v26414_v46, %v29483_v8  ;;  %16867 = vperm.xlu1 %18689, %v15390_v17   ;;  %v15491_v12 = vrot.slane %v29643_v20, %v19962_v25  ;;  %v17865_v29 = vsel %vm17068_vm12, %v17864_v24, %v17860_v9  ;;  %v17874_v61 = vrot.slane %v29644_v47, %v25388_v50  ;;  %v29649_v24 = vld [vmem:[#allocation173_spill] sm:$0xff]  ;;  %v29653_v31 = vld [vmem:[#allocation216_spill] sm:$0xff] }
 0x511   :  { %v18091_v26 = vrot.slane %v16676_v35, %v25277_v54  ;;  %16900 = vperm.xlu0 %18688, %v15577_v18   ;;  %v15764_v5 = vcombine.low %v15756_v55, %v15763_v10  ;;  %v17869_v14 = vrot.slane %v29645_v1, %v29488_v48  ;;  %v18018_v46 = vsel %vm17061_vm11, %v18017_v13, %v18013_v16  ;;  %v29647_v18 = vld [vmem:[#allocation130_spill] sm:$0xff] }
 0x512   :  { %v18087_v17 = vsel %vm17047_vm9, %v18086_v38, %v18082_v58  ;;  %v15790_v34 = vrot.slane %v29646_v49, %v19962_v25  ;;  %v18023_v22 = vsel %vm17068_vm12, %v18022_v42, %v18018_v46  ;;  %v18032_v21 = vrot.slane %v26412_v60, %v25388_v50  ;;  %v16682_v60 = vpop.permute.xlu1 %16681  ;;  %v26592_v53 = vpop.permute.xlu0 %16714  ;;  %v29657_v46 = vld [vmem:[#allocation219_spill] sm:$0xff] }
 0x513   :  { %v18092_v11 = vsel %vm17054_vm10, %v18091_v26, %v18087_v17  ;;  %v15797_v55 = vrot.slane %v29647_v18, %v19962_v25  ;;  %v29650_v51 = vrot.slane %v29648_v32, %v29649_v24  ;;  %v17870_v10 = vsel %vm17075_vm13, %v17869_v14, %v17865_v29  ;;  %v29656_v14 = vld [vmem:[#allocation334_spill] sm:$0xff] }
 0x514   :  { %v18027_v36 = vrot.slane %v29651_v41, %v29488_v48  ;;  %v18096_v44 = vrot.slane %v26439_v33, %v29486_v59  ;;  %16873 = vperm.xlu1 %18689, %v15424_v56   ;;  %v17875_v23 = vsel %vm17082_vm14, %v17874_v61, %v17870_v10  ;;  %v18101_v16 = vrot.slane %v16682_v60, %v25290_v6  ;;  %v29654_v56 = vld [vmem:[#allocation248_spill] sm:$0xff]  ;;  %v29661_v10 = vld [vmem:[#allocation102_spill] sm:$0xff] }
 0x515   :  { %v17327_v57 = vsel %vm17089_vm15, %v29650_v51, %v26396_v4  ;;  %16933 = vperm.xlu0 %18688, %v15764_v5   ;;  %v15458_v42 = vcombine.low %v15450_v37, %v15457_v2  ;;  %v29652_v4 = vld [vmem:[#allocation98_spill] sm:$0xff]  ;;  %v17879_v9 = vrot.slane %v29653_v31, %v29649_v24  ;;  %v15831_v38 = vrot.slane %v29654_v56, %v19962_v25  ;;  %v29655_v2 = vld [vmem:[#allocation329_spill] sm:$0xff] }
 0x516   :  { %v15824_v58 = vrot.slane %v29652_v4, %v19962_v25  ;;  %v18028_v13 = vsel %vm17075_vm13, %v18027_v36, %v18023_v22  ;;  %v18097_v33 = vsel %vm17061_vm11, %v18096_v44, %v18092_v11  ;;  %v15798_v29 = vcombine.low %v15790_v34, %v15797_v55  ;;  %v16688_v5 = vpop.permute.xlu1 %16687  ;;  %v26611_v1 = vpop.permute.xlu0 %16720  ;;  %v29659_v34 = vld [vmem:[#allocation315_spill] sm:$0xff]  ;;  %v29662_v36 = vld [vmem:[#allocation270_spill] sm:$0xff] }
 0x517   :  { %v18033_v35 = vsel %vm17082_vm14, %v18032_v21, %v18028_v13  ;;  %v18102_v20 = vsel %vm17068_vm12, %v18101_v16, %v18097_v33  ;;  %v15492_v47 = vcombine.low %v15484_v39, %v15491_v12  ;;  %v17880_v37 = vsel %vm17089_vm15, %v17879_v9, %v17875_v23  ;;  %v29658_v39 = vld [vmem:[#allocation172_spill] sm:$0xff]  ;;  %v29660_v55 = vld [vmem:[#allocation55_spill] sm:$0xff]  ;;  %v29665_v9 = vld [vmem:[#allocation222_spill] sm:$0xff] }
 0x518   :  { %v18037_v61 = vrot.slane %v29655_v2, %v29649_v24  ;;  %v18106_v26 = vrot.slane %v26464_v45, %v29488_v48  ;;  %16879 = vperm.xlu1 %18689, %v15458_v42   ;;  %v18594_v17 = vsel %vm18592_vm0, %v29657_v46, %v29656_v14  ;;  %v18111_v49 = vrot.slane %v16688_v5, %v25388_v50  ;;  %v29663_v42 = vld [vmem:[#allocation87_spill] sm:$0xff] }
 0x519   :  { %16939 = vperm.xlu0 %18688, %v15798_v29   ;;  %v15518_v12 = vrot.slane %v29658_v39, %v19962_v25  ;;  %v15525_v22 = vrot.slane %v29659_v34, %v19962_v25  ;;  %v18116_v45 = vrot.slane %v26489_v43, %v29649_v24  ;;  %v15832_v18 = vcombine.low %v15824_v58, %v15831_v38  ;;  %v29664_v58 = vld [vmem:[#allocation24_spill] sm:$0xff]  ;;  %v29669_v14 = vld [vmem:[#allocation111_spill] sm:$0xff] }
 0x51a   :  { %v18038_v21 = vsel %vm17089_vm15, %v18037_v61, %v18033_v35  ;;  %v18107_v11 = vsel %vm17075_vm13, %v18106_v26, %v18102_v20  ;;  %v18593_v32 = vsel %vm18592_vm0, %v17880_v37, %v29660_v55  ;;  %v15858_v41 = vrot.slane %v29661_v10, %v19962_v25  ;;  %v16694_v16 = vpop.permute.xlu1 %16693  ;;  %v26633_v43 = vpop.permute.xlu0 %16726  ;;  %v29666_v35 = vld [vmem:[#allocation123_spill] sm:$0xff]  ;;  %v29667_v20 = vld [vmem:[#allocation234_spill] sm:$0xff] }
 0x51b   :  { %v18112_v51 = vsel %vm17082_vm14, %v18111_v49, %v18107_v11  ;;  %v15865_v44 = vrot.slane %v29662_v36, %v19962_v25  ;;  %v18603_v60 = vcombine.low %v18593_v32, %v18594_v17  ;;  %v15552_v4 = vrot.slane %v29663_v42, %v19962_v25  ;;  %v29671_v17 = vld [vmem:[#allocation249_spill] sm:$0xff] }
 0x51c   :  { %v18117_v23 = vsel %vm17089_vm15, %v18116_v45, %v18112_v51  ;;  %16885 = vperm.xlu1 %18689, %v15492_v47   ;;  %v15559_v31 = vrot.slane %v29664_v58, %v19962_v25  ;;  %v18595_v13 = vsel %vm18592_vm0, %v18038_v21, %v29665_v9  ;;  %v18125_v33 = vrot.slane %v26514_v62, %v24857_v28  ;;  %v29668_v47 = vld [vmem:[#allocation124_spill] sm:$0xff]  ;;  %v29670_v62 = vld [vmem:[#allocation251_spill] sm:$0xff]  ;;  %v29674_v36 = vld [vmem:[#allocation113_spill] sm:$0xff] }
 0x51d   :  { %v18596_v56 = vsel %vm18592_vm0, %v18117_v23, %v17327_v57  ;;  %v18121_v38 = vrot.slane %v16694_v16, %v24876_v7  ;;  %16945 = vperm.xlu0 %18688, %v15832_v18   ;;  %v10446_v29 = vrot.slane %v29667_v20, %v29666_v35  ;;  %v10453_v37 = vrot.slane %v29667_v20, %v29668_v47  ;;  %v29672_v45 = vld [vmem:[#allocation127_spill] sm:$0xff]  ;;  %v29673_v18 = vld [vmem:[#allocation128_spill] sm:$0xff] }
 0x51e   :  { %v18604_v2 = vcombine.low %v18595_v13, %v18596_v56  ;;  %v15526_v61 = vcombine.low %v15518_v12, %v15525_v22  ;;  %v15866_v5 = vcombine.low %v15858_v41, %v15865_v44  ;;  %v15875_v46 = vrot.slane %v29669_v14, %v19962_v25  ;;  %v16700_v22 = vpop.permute.xlu1 %16699  ;;  %v26664_v21 = vpop.permute.xlu0 %16732  ;;  %v29676_v58 = vld [vmem:[#allocation43_spill] sm:$0xff] }
 0x51f   :  { %v18126_v26 = vsel %vm16991_vm1, %v18125_v33, %v18121_v38  ;;  %v15882_v57 = vrot.slane %v29670_v62, %v19962_v25  ;;  %v10418_v49 = vrot.slane %v29671_v17, %v29666_v35  ;;  %v10425_v39 = vrot.slane %v29671_v17, %v29668_v47  ;;  %v29678_v62 = vld [vmem:[#allocation121_spill] sm:$0xff] }
 0x520   :  { %v26659_v34 = vrot.slane %v18603_v60, %v19962_v25  ;;  %v26662_v12 = vrot.slane %v18604_v2, %v19962_v25  ;;  %16891 = vperm.xlu1 %18689, %v15526_v61   ;;  %v10432_v11 = vrot.slane %v29671_v17, %v29672_v45  ;;  %v10439_v55 = vrot.slane %v29671_v17, %v29673_v18  ;;  %v29675_v60 = vld [vmem:[#allocation318_spill] sm:$0xff] }
 0x521   :  { %v18130_v32 = vrot.slane %v16700_v22, %v29460_v63  ;;  %16951 = vperm.xlu0 %18688, %v15866_v5   ;;  %v15560_v51 = vcombine.low %v15552_v4, %v15559_v31  ;;  %v18135_v10 = vrot.slane %v26535_v19, %v29462_v3  ;;  %v15586_v44 = vrot.slane %v29674_v36, %v19962_v25  ;;  %v29677_v4 = vld [vmem:[#allocation45_spill] sm:$0xff] }
 0x522   :  { %v18619_v41 = vcombine.low %v26659_v34, %v26662_v12  ;;  %v15593_v23 = vrot.slane %v29675_v60, %v19962_v25  ;;  %v15883_v42 = vcombine.low %v15875_v46, %v15882_v57  ;;  %v15892_v9 = vrot.slane %v29676_v58, %v19962_v25  ;;  %v16706_v33 = vpop.permute.xlu1 %16705  ;;  %v26689_v38 = vpop.permute.xlu0 %16738  ;;  %v29679_v57 = vld [vmem:[#allocation122_spill] sm:$0xff] }
 0x523   :  { %v18131_v16 = vsel %vm16998_vm2, %v18130_v32, %v18126_v26  ;;  %v15899_v31 = vrot.slane %v29677_v4, %v19962_v25  ;;  %v10460_v19 = vrot.slane %v29667_v20, %v29672_v45  ;;  %v10467_v13 = vrot.slane %v29667_v20, %v29673_v18 }
 0x524   :  { %v18136_v56 = vsel %vm17005_vm3, %v18135_v10, %v18131_v16  ;;  %16897 = vperm.xlu1 %18689, %v15560_v51   ;;  %v26691_v2 = vcombine.low %v10446_v29, %v10453_v37  ;;  %v15918_v61 = vcombine.low %v10418_v49, %v10425_v39  ;;  %v15919_v26 = vcombine.low %v10432_v11, %v10439_v55  ;;  %v29680_v29 = vld [vmem:[#allocation343_spill] sm:$0xff]  ;;  %v29681_v49 = vld [vmem:[#allocation218_spill] sm:$0xff] }
 0x525   :  { %v18140_v5 = vrot.slane %v16706_v33, %v29466_v0  ;;  %16954 = vperm.xlu0 %18688, %v15883_v42   ;;  %v18145_v14 = vrot.slane %v26562_v52, %v29471_v27  ;;  %v15594_v46 = vcombine.low %v15586_v44, %v15593_v23  ;;  %v15773_v20 = vrot.slane %v29678_v62, %v19962_v25  ;;  %v29682_v55 = vld [vmem:[#allocation250_spill] sm:$0xff] }
 0x526   :  { %v15780_v17 = vrot.slane %v29679_v57, %v19962_v25  ;;  %v15900_v32 = vcombine.low %v15892_v9, %v15899_v31  ;;  %v15909_v37 = vrot.slane %v29680_v29, %v19962_v25  ;;  %v15916_v39 = vrot.slane %v29681_v49, %v19962_v25  ;;  %v29683_v51 = vld [vmem:[#allocation150_spill] sm:$0xff]  ;;  %v16712_v36 = vpop.permute.xlu1 %16711  ;;  %v26710_v60 = vpop.permute.xlu0 %16744  ;;  %v29684_v31 = vld [vmem:[#allocation44_spill] sm:$0xff] }
 0x527   :  { %v18141_v22 = vsel %vm17012_vm4, %v18140_v5, %v18136_v56  ;;  %v15936_v11 = vcombine.low %v10460_v19, %v10467_v13  ;;  %v10502_v52 = vrot.slane %v29682_v55, %v29666_v35  ;;  %v10474_v10 = vrot.slane %v29683_v51, %v29666_v35  ;;  %v29685_v13 = vld [vmem:[#allocation228_spill] sm:$0xff] }
 0x528   :  { %v18146_v44 = vsel %vm17019_vm5, %v18145_v14, %v18141_v22  ;;  %16903 = vperm.xlu1 %18689, %v15594_v46   ;;  %v10481_v23 = vrot.slane %v29683_v51, %v29668_v47  ;;  %v10488_v16 = vrot.slane %v29683_v51, %v29672_v45  ;;  %v10495_v42 = vrot.slane %v29683_v51, %v29673_v18 }
 0x529   :  { %v18150_v58 = vrot.slane %v16712_v36, %v29476_v15  ;;  %16957 = vperm.xlu0 %18688, %v15900_v32   ;;  %v18155_v9 = vrot.slane %v26592_v53, %v25201_v30  ;;  %v15781_v4 = vcombine.low %v15773_v20, %v15780_v17  ;;  %v15807_v19 = vrot.slane %v29684_v31, %v19962_v25  ;;  %v29686_v32 = vld [vmem:[#allocation131_spill] sm:$0xff] }
 0x52a   :  { %v15814_v33 = vrot.slane %v29685_v13, %v19962_v25  ;;  %v15917_v5 = vcombine.low %v15909_v37, %v15916_v39  ;;  %v15926_v14 = vrot.slane %v15918_v61, %v19962_v25  ;;  %v15933_v46 = vrot.slane %v15919_v26, %v19962_v25  ;;  %v16718_v57 = vpop.permute.xlu1 %16717  ;;  %v26735_v22 = vpop.permute.xlu0 %16750  ;;  %v29688_v36 = vld [vmem:[#allocation15_spill] sm:$0xff] }
 0x52b   :  { %v18151_v56 = vsel %vm17026_vm6, %v18150_v58, %v18146_v44  ;;  %v10509_v62 = vrot.slane %v29682_v55, %v29668_v47  ;;  %v10516_v53 = vrot.slane %v29682_v55, %v29672_v45  ;;  %v10523_v20 = vrot.slane %v29682_v55, %v29673_v18  ;;  %v29687_v55 = vld [vmem:[#allocation261_spill] sm:$0xff] }
 0x52c   :  { %v18156_v17 = vsel %vm17033_vm7, %v18155_v9, %v18151_v56  ;;  %16936 = vperm.xlu1 %18689, %v15781_v4   ;;  %v10096_v61 = vrot.slane %v29686_v32, %v29672_v45  ;;  %v15952_v29 = vcombine.low %v10474_v10, %v10481_v23  ;;  %v15953_v26 = vcombine.low %v10488_v16, %v10495_v42  ;;  %v29689_v4 = vld [vmem:[#allocation257_spill] sm:$0xff] }
 0x52d   :  { %v18160_v37 = vrot.slane %v16718_v57, %v25214_v40  ;;  %16960 = vperm.xlu0 %18688, %v15917_v5   ;;  %v18165_v49 = vrot.slane %v26611_v1, %v29483_v8  ;;  %v15815_v39 = vcombine.low %v15807_v19, %v15814_v33  ;;  %v15841_v51 = vrot.slane %v29687_v55, %v19962_v25 }
 0x52e   :  { %v15848_v44 = vrot.slane %v29688_v36, %v19962_v25  ;;  %v15934_v9 = vcombine.low %v15926_v14, %v15933_v46  ;;  %v15943_v10 = vrot.slane %v26691_v2, %v19962_v25  ;;  %v15950_v23 = vrot.slane %v15936_v11, %v19962_v25  ;;  %v16724_v31 = vpop.permute.xlu1 %16723  ;;  %v26753_v13 = vpop.permute.xlu0 %16756  ;;  %v29690_v14 = vld [vmem:[#allocation25_spill] sm:$0xff] }
 0x52f   :  { %v18161_v58 = vsel %vm17040_vm8, %v18160_v37, %v18156_v17  ;;  %v15969_v16 = vcombine.low %v10502_v52, %v10509_v62  ;;  %v15970_v42 = vcombine.low %v10516_v53, %v10523_v20  ;;  %v10530_v1 = vrot.slane %v29689_v4, %v29666_v35  ;;  %v29691_v62 = vld [vmem:[#allocation110_spill] sm:$0xff] }
 0x530   :  { %v18166_v19 = vsel %vm17047_vm9, %v18165_v49, %v18161_v58  ;;  %16942 = vperm.xlu1 %18689, %v15815_v39   ;;  %v10537_v33 = vrot.slane %v29689_v4, %v29668_v47  ;;  %v10544_v56 = vrot.slane %v29689_v4, %v29672_v45  ;;  %v10551_v2 = vrot.slane %v29689_v4, %v29673_v18  ;;  %v29692_v49 = vld [vmem:[#allocation154_spill] sm:$0xff]  ;;  %v29693_v4 = vld [vmem:[#allocation204_spill] sm:$0xff] }
 0x531   :  { %v18170_v11 = vrot.slane %v16724_v31, %v25277_v54  ;;  %16963 = vperm.xlu0 %18688, %v15934_v9   ;;  %v18175_v52 = vrot.slane %v26633_v43, %v29486_v59  ;;  %v15849_v5 = vcombine.low %v15841_v51, %v15848_v44  ;;  %v15603_v46 = vrot.slane %v29690_v14, %v19962_v25 }
 0x532   :  { %v15610_v53 = vrot.slane %v29691_v62, %v19962_v25  ;;  %v15951_v57 = vcombine.low %v15943_v10, %v15950_v23  ;;  %v15960_v17 = vrot.slane %v15952_v29, %v19962_v25  ;;  %v15967_v37 = vrot.slane %v15953_v26, %v19962_v25  ;;  %v16730_v51 = vpop.permute.xlu1 %16729 }
 0x533   :  { %v18171_v20 = vsel %vm17054_vm10, %v18170_v11, %v18166_v19  ;;  %v10558_v39 = vrot.slane %v29692_v49, %v29666_v35  ;;  %v10565_v43 = vrot.slane %v29692_v49, %v29668_v47  ;;  %v10572_v55 = vrot.slane %v29692_v49, %v29672_v45  ;;  %v26778_v44 = vpop.permute.xlu0 %16762  ;;  %v29694_v19 = vld [vmem:[#allocation233_spill] sm:$0xff] }
 0x534   :  { %v18176_v36 = vsel %vm17061_vm11, %v18175_v52, %v18171_v20  ;;  %16948 = vperm.xlu1 %18689, %v15849_v5   ;;  %v10579_v29 = vrot.slane %v29692_v49, %v29673_v18  ;;  %v15986_v58 = vcombine.low %v10530_v1, %v10537_v33  ;;  %v15987_v26 = vcombine.low %v10544_v56, %v10551_v2  ;;  %v29695_v33 = vld [vmem:[#allocation215_spill] sm:$0xff] }
 0x535   :  { %v18180_v9 = vrot.slane %v16730_v51, %v25290_v6  ;;  %16966 = vperm.xlu0 %18688, %v15951_v57   ;;  %v18185_v10 = vrot.slane %v26664_v21, %v29488_v48  ;;  %v15611_v23 = vcombine.low %v15603_v46, %v15610_v53  ;;  %v15620_v31 = vrot.slane %v29693_v4, %v19962_v25 }
 0x536   :  { %v15627_v11 = vrot.slane %v29694_v19, %v19962_v25  ;;  %v15968_v5 = vcombine.low %v15960_v17, %v15967_v37  ;;  %v15977_v14 = vrot.slane %v15969_v16, %v19962_v25  ;;  %v15984_v1 = vrot.slane %v15970_v42, %v19962_v25  ;;  %v16736_v53 = vpop.permute.xlu1 %16735  ;;  %v29698_v42 = vld [vmem:[#allocation322_spill] sm:$0xff] }
 0x537   :  { %v18181_v52 = vsel %vm17068_vm12, %v18180_v9, %v18176_v36  ;;  %v29696_v56 = vrot.slane %v29695_v33, %v29668_v47  ;;  %v29697_v21 = vrot.slane %v29695_v33, %v29666_v35  ;;  %v10103_v46 = vrot.slane %v29686_v32, %v29673_v18  ;;  %v26803_v57 = vpop.permute.xlu0 %16768  ;;  %v29699_v37 = vld [vmem:[#allocation106_spill] sm:$0xff] }
 0x538   :  { %v16003_v62 = vcombine.low %v10558_v39, %v10565_v43  ;;  %v18186_v20 = vsel %vm17075_vm13, %v18185_v10, %v18181_v52  ;;  %16906 = vperm.xlu1 %18689, %v15611_v23   ;;  %v16004_v16 = vcombine.low %v10572_v55, %v10579_v29  ;;  %v17335_v17 = vrot.slane %v29698_v42, %v24857_v28  ;;  %v29700_v43 = vld [vmem:[#allocation91_spill] sm:$0xff]  ;;  %v29701_v10 = vld [vmem:[#allocation333_spill] sm:$0xff] }
 0x539   :  { %v26798_v2 = vcombine.low %v29697_v21, %v29696_v56  ;;  %v17331_v49 = vrot.slane %v29699_v37, %v24876_v7  ;;  %v18190_v51 = vrot.slane %v16736_v53, %v25388_v50  ;;  %16969 = vperm.xlu0 %18688, %v15968_v5   ;;  %v18195_v36 = vrot.slane %v26689_v38, %v29649_v24  ;;  %v29705_v56 = vld [vmem:[#allocation116_spill] sm:$0xff]  ;;  %v29707_v42 = vld [vmem:[#allocation217_spill] sm:$0xff] }
 0x53a   :  { %v15628_v39 = vcombine.low %v15620_v31, %v15627_v11  ;;  %v15637_v9 = vrot.slane %v29700_v43, %v19962_v25  ;;  %v15644_v23 = vrot.slane %v29701_v10, %v19962_v25  ;;  %v15985_v29 = vcombine.low %v15977_v14, %v15984_v1  ;;  %v29704_v11 = vld [vmem:[#allocation253_spill] sm:$0xff]  ;;  %v29709_v43 = vld [vmem:[#allocation39_spill] sm:$0xff] }
 0x53b   :  { %v18191_v55 = vsel %vm17082_vm14, %v18190_v51, %v18186_v20  ;;  %v15994_v4 = vrot.slane %v15986_v58, %v19962_v25  ;;  %v16001_v19 = vrot.slane %v15987_v26, %v19962_v25  ;;  %v29702_v52 = vrot.slane %v29686_v32, %v29668_v47  ;;  %v16742_v58 = vpop.permute.xlu1 %16741  ;;  %v26834_v26 = vpop.permute.xlu0 %16774  ;;  %v29706_v1 = vld [vmem:[#allocation129_spill] sm:$0xff] }
 0x53c   :  { %v29703_v38 = vrot.slane %v29686_v32, %v29666_v35  ;;  %v17340_v5 = vrot.slane %v29704_v11, %v29460_v63  ;;  %v17410_v21 = vrot.slane %v29705_v56, %v24876_v7  ;;  %v26832_v14 = vsel %vm17089_vm15, %v18195_v36, %v18191_v55  ;;  %16909 = vperm.xlu1 %18689, %v15628_v39   ;;  %v29708_v36 = vld [vmem:[#allocation97_spill] sm:$0xff] }
 0x53d   :  { %v17336_v47 = vsel %vm16991_vm1, %v17335_v17, %v17331_v49  ;;  %v17419_v35 = vrot.slane %v29706_v1, %v29460_v63  ;;  %v18204_v53 = vrot.slane %v26710_v60, %v24857_v28  ;;  %v18200_v20 = vrot.slane %v16742_v58, %v24876_v7  ;;  %16972 = vperm.xlu0 %18688, %v15985_v29  }
 0x53e   :  { %v26825_v31 = vcombine.low %v29703_v38, %v29702_v52  ;;  %v17414_v37 = vrot.slane %v29707_v42, %v24857_v28  ;;  %v15645_v51 = vcombine.low %v15637_v9, %v15644_v23  ;;  %v15654_v39 = vrot.slane %v29708_v36, %v19962_v25  ;;  %v29710_v52 = vld [vmem:[#allocation31_spill] sm:$0xff]  ;;  %v29711_v9 = vld [vmem:[#allocation324_spill] sm:$0xff]  ;;  %v29715_v42 = vld [vmem:[#allocation114_spill] sm:$0xff] }
 0x53f   :  { %v15661_v10 = vrot.slane %v29709_v43, %v19962_v25  ;;  %v18205_v17 = vsel %vm16991_vm1, %v18204_v53, %v18200_v20  ;;  %v16002_v49 = vcombine.low %v15994_v4, %v16001_v19  ;;  %v16011_v55 = vrot.slane %v16003_v62, %v19962_v25  ;;  %v16748_v56 = vpop.permute.xlu1 %16747  ;;  %v26857_v58 = vpop.permute.xlu0 %16780  ;;  %v29712_v4 = vld [vmem:[#allocation205_spill] sm:$0xff] }
 0x540   :  { %v16018_v60 = vrot.slane %v16004_v16, %v19962_v25  ;;  %v17345_v29 = vrot.slane %v29710_v52, %v29462_v3  ;;  %v17341_v38 = vsel %vm16998_vm2, %v17340_v5, %v17336_v47  ;;  %v17350_v23 = vrot.slane %v29711_v9, %v29466_v0  ;;  %16912 = vperm.xlu1 %18689, %v15645_v51   ;;  %v29713_v16 = vld [vmem:[#allocation284_spill] sm:$0xff]  ;;  %v29716_v51 = vld [vmem:[#allocation90_spill] sm:$0xff] }
 0x541   :  { %v17415_v11 = vsel %vm16991_vm1, %v17414_v37, %v17410_v21  ;;  %v17424_v19 = vrot.slane %v29712_v4, %v29462_v3  ;;  %v17429_v1 = vrot.slane %v29713_v16, %v29466_v0  ;;  %v18209_v53 = vrot.slane %v16748_v56, %v29460_v63  ;;  %16975 = vperm.xlu0 %18688, %v16002_v49   ;;  %v29714_v21 = vld [vmem:[#allocation207_spill] sm:$0xff]  ;;  %v29717_v9 = vld [vmem:[#allocation256_spill] sm:$0xff]  ;;  %v29718_v4 = vld [vmem:[#allocation118_spill] sm:$0xff] }
 0x542   :  { %v17420_v62 = vsel %vm16998_vm2, %v17419_v35, %v17415_v11  ;;  %v18214_v5 = vrot.slane %v26735_v22, %v29462_v3  ;;  %v15662_v47 = vcombine.low %v15654_v39, %v15661_v10  ;;  %v15671_v20 = vrot.slane %v29714_v21, %v19962_v25 }
 0x543   :  { %v15678_v37 = vrot.slane %v29715_v42, %v19962_v25  ;;  %v17355_v36 = vrot.slane %v29716_v51, %v29471_v27  ;;  %v17346_v35 = vsel %vm17005_vm3, %v17345_v29, %v17341_v38  ;;  %v18210_v43 = vsel %vm16998_vm2, %v18209_v53, %v18205_v17  ;;  %v16754_v10 = vpop.permute.xlu1 %16753  ;;  %v26880_v56 = vpop.permute.xlu0 %16786  ;;  %v29719_v17 = vld [vmem:[#allocation227_spill] sm:$0xff] }
 0x544   :  { %v16019_v52 = vcombine.low %v16011_v55, %v16018_v60  ;;  %v17351_v49 = vsel %vm17012_vm4, %v17350_v23, %v17346_v35  ;;  %v17360_v22 = vrot.slane %v29717_v9, %v29476_v15  ;;  %v17425_v39 = vsel %vm17005_vm3, %v17424_v19, %v17420_v62  ;;  %16915 = vperm.xlu1 %18689, %v15662_v47   ;;  %v29720_v19 = vld [vmem:[#allocation153_spill] sm:$0xff]  ;;  %v29721_v53 = vld [vmem:[#allocation195_spill] sm:$0xff] }
 0x545   :  { %v18215_v11 = vsel %vm17005_vm3, %v18214_v5, %v18210_v43  ;;  %v17434_v16 = vrot.slane %v29718_v4, %v29471_v27  ;;  %v17430_v29 = vsel %vm17012_vm4, %v17429_v1, %v17425_v39  ;;  %v17439_v55 = vrot.slane %v29719_v17, %v29476_v15  ;;  %v29722_v47 = vld [vmem:[#allocation35_spill] sm:$0xff] }
 0x546   :  { %v18219_v60 = vrot.slane %v16754_v10, %v29466_v0  ;;  %16978 = vperm.xlu0 %18688, %v16019_v52   ;;  %v18224_v38 = vrot.slane %v26753_v13, %v29471_v27  ;;  %v15679_v23 = vcombine.low %v15671_v20, %v15678_v37  ;;  %v15688_v62 = vrot.slane %v29720_v19, %v19962_v25  ;;  %v29723_v37 = vld [vmem:[#allocation326_spill] sm:$0xff] }
 0x547   :  { %v15695_v5 = vrot.slane %v29721_v53, %v19962_v25  ;;  %v15715_v1 = vcombine.low %v10096_v61, %v10103_v46  ;;  %v17365_v21 = vrot.slane %v29722_v47, %v25201_v30  ;;  %v17356_v42 = vsel %vm17019_vm5, %v17355_v36, %v17351_v49  ;;  %v16760_v43 = vpop.permute.xlu1 %16759  ;;  %v26909_v32 = vpop.permute.xlu0 %16792  ;;  %v29724_v61 = vld [vmem:[#allocation48_spill] sm:$0xff]  ;;  %v29725_v49 = vld [vmem:[#allocation125_spill] sm:$0xff] }
 0x548   :  { %v18220_v13 = vsel %vm17012_vm4, %v18219_v60, %v18215_v11  ;;  %v17361_v20 = vsel %vm17026_vm6, %v17360_v22, %v17356_v42  ;;  %v17370_v51 = vrot.slane %v29723_v37, %v25214_v40  ;;  %v17435_v35 = vsel %vm17019_vm5, %v17434_v16, %v17430_v29  ;;  %16918 = vperm.xlu1 %18689, %v15679_v23   ;;  %v29726_v11 = vld [vmem:[#allocation336_spill] sm:$0xff]  ;;  %v29727_v16 = vld [vmem:[#allocation337_spill] sm:$0xff] }
 0x549   :  { %v18225_v52 = vsel %vm17019_vm5, %v18224_v38, %v18220_v13  ;;  %v17444_v46 = vrot.slane %v29724_v61, %v25201_v30  ;;  %v17440_v36 = vsel %vm17026_vm6, %v17439_v55, %v17435_v35  ;;  %v17449_v9 = vrot.slane %v29725_v49, %v25214_v40  ;;  %v29730_v38 = vld [vmem:[#allocation105_spill] sm:$0xff]  ;;  %v29731_v53 = vld [vmem:[#allocation224_spill] sm:$0xff] }
 0x54a   :  { %v18229_v22 = vrot.slane %v16760_v43, %v29476_v15  ;;  %v18234_v39 = vrot.slane %v26778_v44, %v25201_v30  ;;  %v15696_v10 = vcombine.low %v15688_v62, %v15695_v5  ;;  %v15705_v4 = vrot.slane %v29726_v11, %v19962_v25 }
 0x54b   :  { %v15712_v29 = vrot.slane %v29727_v16, %v19962_v25  ;;  %v29728_v17 = vrot.slane %v29695_v33, %v29673_v18  ;;  %v29729_v55 = vrot.slane %v29695_v33, %v29672_v45  ;;  %v17375_v23 = vrot.slane %v29730_v38, %v29483_v8  ;;  %v16766_v42 = vpop.permute.xlu1 %16765  ;;  %v26938_v45 = vpop.permute.xlu0 %16798  ;;  %v29732_v33 = vld [vmem:[#allocation51_spill] sm:$0xff] }
 0x54c   :  { %v17366_v19 = vsel %vm17033_vm7, %v17365_v21, %v17361_v20  ;;  %v18230_v44 = vsel %vm17026_vm6, %v18229_v22, %v18225_v52  ;;  %v17380_v5 = vrot.slane %v29731_v53, %v25277_v54  ;;  %v17445_v47 = vsel %vm17033_vm7, %v17444_v46, %v17440_v36  ;;  %16921 = vperm.xlu1 %18689, %v15696_v10   ;;  %v29733_v20 = vld [vmem:[#allocation292_spill] sm:$0xff]  ;;  %v29734_v46 = vld [vmem:[#allocation327_spill] sm:$0xff] }
 0x54d   :  { %v15732_v60 = vcombine.low %v29729_v55, %v29728_v17  ;;  %v17371_v62 = vsel %vm17040_vm8, %v17370_v51, %v17366_v19  ;;  %v18235_v18 = vsel %vm17033_vm7, %v18234_v39, %v18230_v44  ;;  %v17454_v13 = vrot.slane %v29732_v33, %v29483_v8  ;;  %v29735_v39 = vld [vmem:[#allocation262_spill] sm:$0xff]  ;;  %v29737_v17 = vld [vmem:[#allocation236_spill] sm:$0xff] }
 0x54e   :  { %v17450_v21 = vsel %vm17040_vm8, %v17449_v9, %v17445_v47  ;;  %v17459_v37 = vrot.slane %v29733_v20, %v25277_v54  ;;  %v18239_v51 = vrot.slane %v16766_v42, %v25214_v40  ;;  %v18244_v35 = vrot.slane %v26803_v57, %v29483_v8 }
 0x54f   :  { %v15713_v43 = vcombine.low %v15705_v4, %v15712_v29  ;;  %v15722_v52 = vrot.slane %v26825_v31, %v19962_v25  ;;  %v15729_v61 = vrot.slane %v15715_v1, %v19962_v25  ;;  %v17385_v36 = vrot.slane %v29734_v46, %v29486_v59  ;;  %v16772_v11 = vpop.permute.xlu1 %16771  ;;  %v26960_v31 = vpop.permute.xlu0 %16804  ;;  %v29736_v1 = vld [vmem:[#allocation126_spill] sm:$0xff] }
 0x550   :  { %v17376_v49 = vsel %vm17047_vm9, %v17375_v23, %v17371_v62  ;;  %v18240_v9 = vsel %vm17040_vm8, %v18239_v51, %v18235_v18  ;;  %v17390_v10 = vrot.slane %v29735_v39, %v25290_v6  ;;  %v17455_v57 = vsel %vm17047_vm9, %v17454_v13, %v17450_v21  ;;  %v29740_v51 = vld [vmem:[#allocation14_spill] sm:$0xff] }
 0x551   :  { %v17381_v22 = vsel %vm17054_vm10, %v17380_v5, %v17376_v49  ;;  %v18245_v4 = vsel %vm17047_vm9, %v18244_v35, %v18240_v9  ;;  %16924 = vperm.xlu1 %18689, %v15713_v43   ;;  %v17464_v16 = vrot.slane %v29736_v1, %v29486_v59  ;;  %v17460_v29 = vsel %vm17054_vm10, %v17459_v37, %v17455_v57  ;;  %v29741_v43 = vld [vmem:[#allocation276_spill] sm:$0xff] }
 0x552   :  { %v17469_v55 = vrot.slane %v29737_v17, %v25290_v6  ;;  %v18249_v38 = vrot.slane %v16772_v11, %v25277_v54  ;;  %v18254_v23 = vrot.slane %v26834_v26, %v29486_v59  ;;  %v15730_v19 = vcombine.low %v15722_v52, %v15729_v61  ;;  %v29738_v26 = vld [vmem:[#allocation332_spill] sm:$0xff] }
 0x553   :  { %v15739_v44 = vrot.slane %v26798_v2, %v19962_v25  ;;  %v15746_v62 = vrot.slane %v15732_v60, %v19962_v25  ;;  %v17386_v53 = vsel %vm17061_vm11, %v17385_v36, %v17381_v22  ;;  %v17465_v42 = vsel %vm17061_vm11, %v17464_v16, %v17460_v29  ;;  %v16778_v18 = vpop.permute.xlu1 %16777  ;;  %v26978_v13 = vpop.permute.xlu0 %16810  ;;  %v29739_v60 = vld [vmem:[#allocation62_spill] sm:$0xff]  ;;  %v29743_v16 = vld [vmem:[#allocation21_spill] sm:$0xff] }
 0x554   :  { %v18250_v5 = vsel %vm17054_vm10, %v18249_v38, %v18245_v4  ;;  %v17391_v47 = vsel %vm17068_vm12, %v17390_v10, %v17386_v53  ;;  %v17400_v21 = vrot.slane %v29738_v26, %v25388_v50  ;;  %v17470_v2 = vsel %vm17068_vm12, %v17469_v55, %v17465_v42 }
 0x555   :  { %v18255_v33 = vsel %vm17061_vm11, %v18254_v23, %v18250_v5  ;;  %16927 = vperm.xlu1 %18689, %v15730_v19   ;;  %v17479_v20 = vrot.slane %v29739_v60, %v25388_v50  ;;  %v18259_v37 = vrot.slane %v16778_v18, %v25290_v6  ;;  %v17395_v35 = vrot.slane %v29740_v51, %v29488_v48 }
 0x556   :  { %v17474_v52 = vrot.slane %v29741_v43, %v29488_v48  ;;  %v18264_v61 = vrot.slane %v26857_v58, %v29488_v48  ;;  %v15747_v46 = vcombine.low %v15739_v44, %v15746_v62  ;;  %v29742_v58 = vld [vmem:[#allocation325_spill] sm:$0xff]  ;;  %v17484_v29 = vrot.slane %v29743_v16, %v29649_v24  ;;  %v29744_v43 = vld [vmem:[#allocation243_spill] sm:$0xff] }
 0x557   :  { %v18260_v36 = vsel %vm17068_vm12, %v18259_v37, %v18255_v33  ;;  %v17396_v49 = vsel %vm17075_vm13, %v17395_v35, %v17391_v47  ;;  %v16784_v22 = vpop.permute.xlu1 %16783  ;;  %v26996_v10 = vpop.permute.xlu0 %16816  ;;  %v17405_v1 = vrot.slane %v29742_v58, %v29649_v24  ;;  %v18274_v17 = vrot.slane %v26880_v56, %v29649_v24 }
 0x558   :  { %v17475_v9 = vsel %vm17075_vm13, %v17474_v52, %v17470_v2  ;;  %v18265_v39 = vsel %vm17075_vm13, %v18264_v61, %v18260_v36  ;;  %v17401_v57 = vsel %vm17082_vm14, %v17400_v21, %v17396_v49  ;;  %v18269_v4 = vrot.slane %v16784_v22, %v25388_v50  ;;  %v29745_v61 = vld [vmem:[#allocation235_spill] sm:$0xff] }
 0x559   :  { %16930 = vperm.xlu1 %18689, %v15747_v46   ;;  %v17480_v11 = vsel %vm17082_vm14, %v17479_v20, %v17475_v9  ;;  %v17406_v38 = vsel %vm17089_vm15, %v17405_v1, %v17401_v57  ;;  %v17489_v52 = vrot.slane %v29744_v43, %v24876_v7  ;;  %v17498_v46 = vrot.slane %v29745_v61, %v29460_v63  ;;  %v29747_v57 = vld [vmem:[#allocation237_spill] sm:$0xff] }
 0x55a   :  { %v18270_v55 = vsel %vm17082_vm14, %v18269_v4, %v18265_v39  ;;  %v17485_v23 = vsel %vm17089_vm15, %v17484_v29, %v17480_v11  ;;  %v27015_v53 = vsel %vm18592_vm0, %v26832_v14, %v17406_v38  ;;  %v18660_v14 = vmul.f32 0.015625, %v18619_v41  ;;  %v29746_v41 = vld [vmem:[#allocation231_spill] sm:$0xff]  ;;  %v29748_v4 = vld [vmem:[#allocation162_spill] sm:$0xff] }
 0x55b   :  { %v18275_v19 = vsel %vm17089_vm15, %v18274_v17, %v18270_v55  ;;  %v16790_v44 = vpop.permute.xlu1 %16789  ;;  %v27011_v62 = vpop.permute.xlu0 %16822  ;;  %v17493_v36 = vrot.slane %v29746_v41, %v24857_v28  ;;  %v17508_v11 = vrot.slane %v29747_v57, %v29466_v0  ;;  %v17568_v58 = vrot.slane %v29748_v4, %v24876_v7  ;;  %v29749_v17 = vld [vmem:[#allocation338_spill] sm:$0xff]  ;;  %v29750_v38 = vld [vmem:[#allocation247_spill] sm:$0xff] }
 0x55c   :  { %v27018_v5 = vsel %vm18592_vm0, %v18275_v19, %v17485_v23  ;;  %18663 = vst [vmem:[#allocation3] sm:$0xff] %v18660_v14  ;;  %v18279_v49 = vrot.slane %v16790_v44, %v24876_v7  ;;  %v18283_v1 = vrot.slane %v26909_v32, %v24857_v28  ;;  %v17503_v55 = vrot.slane %v29749_v17, %v29462_v3  ;;  %v29751_v19 = vld [vmem:[#allocation259_spill] sm:$0xff] }
 0x55d   :  { %v18620_v56 = vcombine.low %v27015_v53, %v27018_v5  ;;  %v17494_v9 = vsel %vm16991_vm1, %v17493_v36, %v17489_v52  ;;  %v17577_v23 = vrot.slane %v29750_v38, %v29460_v63  ;;  %v17572_v44 = vrot.slane %v29751_v19, %v24857_v28  ;;  %v29776_v5 = vld [vmem:[#allocation63_spill] sm:$0xff] }
 0x55e   :  { %v17499_v39 = vsel %vm16998_vm2, %v17498_v46, %v17494_v9  ;;  %v18293_v41 = vrot.slane %v26938_v45, %v29462_v3  ;;  %v29755_v45 = vld [vmem:[#allocation260_spill] sm:$0xff] }
 0x55f   :  { %v16796_v47 = vpop.permute.xlu1 %16795  ;;  %v27022_v42 = vpop.permute.xlu0 %16828  ;;  %v17504_v43 = vsel %vm17005_vm3, %v17503_v55, %v17499_v39  ;;  %v17573_v46 = vsel %vm16991_vm1, %v17572_v44, %v17568_v58  ;;  %v29754_v58 = vld [vmem:[#allocation339_spill] sm:$0xff] }
 0x560   :  { %v18288_v22 = vrot.slane %v16796_v47, %v29460_v63  ;;  %v18284_v47 = vsel %vm16991_vm1, %v18283_v1, %v18279_v49  ;;  %v17509_v61 = vsel %vm17012_vm4, %v17508_v11, %v17504_v43  ;;  %v29752_v49 = vld [vmem:[#allocation158_spill] sm:$0xff]  ;;  %v17578_v39 = vsel %vm16998_vm2, %v17577_v23, %v17573_v46 }
 0x561   :  { %v17518_v4 = vrot.slane %v29752_v49, %v29476_v15  ;;  %v17513_v1 = vrot.slane %v29754_v58, %v29471_v27  ;;  %v29758_v49 = vld [vmem:[#allocation165_spill] sm:$0xff] }
 0x562   :  { %v18289_v32 = vsel %vm16998_vm2, %v18288_v22, %v18284_v47  ;;  %v29753_v22 = vld [vmem:[#allocation182_spill] sm:$0xff]  ;;  %v18303_v47 = vrot.slane %v26960_v31, %v29471_v27  ;;  %v17592_v31 = vrot.slane %v29758_v49, %v29471_v27  ;;  %v18323_v49 = vrot.slane %v26996_v10, %v29483_v8 }
 0x563   :  { %v16802_v18 = vpop.permute.xlu1 %16801  ;;  %v27024_v33 = vpop.permute.xlu0 %16834  ;;  %v17514_v19 = vsel %vm17019_vm5, %v17513_v1, %v17509_v61  ;;  %v29757_v61 = vld [vmem:[#allocation230_spill] sm:$0xff] }
 0x564   :  { %v18298_v52 = vrot.slane %v16802_v18, %v29466_v0  ;;  %v17587_v18 = vrot.slane %v29753_v22, %v29466_v0  ;;  %v29759_v22 = vld [vmem:[#allocation238_spill] sm:$0xff] }
 0x567   :  { %v27026_v26 = vpop.permute.xlu1 %16807  ;;  %v16841_v21 = vpop.permute.xlu0 %16840 }
 0x568   :  { %v18362_v36 = vrot.slane %v16841_v21, %v24857_v28  ;;  %v18294_v21 = vsel %vm17005_vm3, %v18293_v41, %v18289_v32  ;;  %v18308_v38 = vrot.slane %v27026_v26, %v29476_v15  ;;  %v29756_v26 = vld [vmem:[#allocation167_spill] sm:$0xff] }
 0x569   :  { %v18299_v55 = vsel %vm17012_vm4, %v18298_v52, %v18294_v21  ;;  %v17597_v41 = vrot.slane %v29756_v26, %v29476_v15 }
 0x56b   :  { %v27031_v2 = vpop.permute.xlu1 %16813  ;;  %v16847_v60 = vpop.permute.xlu0 %16846 }
 0x56c   :  { %v18372_v43 = vrot.slane %v16847_v60, %v29462_v3  ;;  %v18304_v60 = vsel %vm17019_vm5, %v18303_v47, %v18299_v55  ;;  %v29761_v47 = vld [vmem:[#allocation254_spill] sm:$0xff] }
 0x56f   :  { %v27033_v20 = vpop.permute.xlu1 %16819 }
 0x570   :  { %v27035_v37 = vpop.permute.xlu0 %16852  ;;  %v18328_v26 = vrot.slane %v27033_v20, %v25277_v54  ;;  %v29764_v20 = vld [vmem:[#allocation174_spill] sm:$0xff] }
 0x573   :  { %v27037_v51 = vpop.permute.xlu1 %16825 }
 0x574   :  { %v27039_v35 = vpop.permute.xlu0 %16858 }
 0x577   :  { %v27045_v34 = vpop.permute.xlu1 %16831 }
 0x578   :  { %v27047_v12 = vpop.permute.xlu0 %16864 }
 0x57b   :  { %v16838_v16 = vpop.permute.xlu1 %16837 }
 0x57c   :  { %v27061_v29 = vpop.permute.xlu0 %16870  ;;  %v18358_v14 = vrot.slane %v16838_v16, %v24876_v7  ;;  %v17582_v16 = vrot.slane %v29755_v45, %v29462_v3  ;;  %v18313_v45 = vrot.slane %v26978_v13, %v25201_v30  ;;  %v17602_v13 = vrot.slane %v29761_v47, %v25201_v30 }
 0x57e   :  { %v18363_v17 = vsel %vm16991_vm1, %v18362_v36, %v18358_v14  ;;  %v17583_v44 = vsel %vm17005_vm3, %v17582_v16, %v17578_v39  ;;  %v17519_v14 = vsel %vm17026_vm6, %v17518_v4, %v17514_v19  ;;  %v17523_v4 = vrot.slane %v29759_v22, %v25201_v30 }
 0x57f   :  { %v16844_v9 = vpop.permute.xlu1 %16843  ;;  %v17588_v52 = vsel %vm17012_vm4, %v17587_v18, %v17583_v44  ;;  %v18309_v18 = vsel %vm17026_vm6, %v18308_v38, %v18304_v60  ;;  %v18382_v16 = vrot.slane %v27035_v37, %v29471_v27 }
 0x580   :  { %v27079_v57 = vpop.permute.xlu0 %16876  ;;  %v18367_v11 = vrot.slane %v16844_v9, %v29460_v63  ;;  %v17528_v9 = vrot.slane %v29757_v61, %v25214_v40  ;;  %v17593_v1 = vsel %vm17019_vm5, %v17592_v31, %v17588_v52  ;;  %v17524_v55 = vsel %vm17033_vm7, %v17523_v4, %v17519_v14 }
 0x581   :  { %v17598_v38 = vsel %vm17026_vm6, %v17597_v41, %v17593_v1  ;;  %v18392_v31 = vrot.slane %v27039_v35, %v25201_v30  ;;  %v17617_v4 = vrot.slane %v29764_v20, %v25277_v54  ;;  %v18412_v20 = vrot.slane %v27061_v29, %v29486_v59 }
 0x582   :  { %v18368_v23 = vsel %vm16998_vm2, %v18367_v11, %v18363_v17  ;;  %v18318_v11 = vrot.slane %v27031_v2, %v25214_v40  ;;  %v17529_v44 = vsel %vm17040_vm8, %v17528_v9, %v17524_v55  ;;  %v17603_v9 = vsel %vm17033_vm7, %v17602_v13, %v17598_v38  ;;  %v29766_v38 = vld [vmem:[#allocation42_spill] sm:$0xff] }
 0x583   :  { %v16850_v46 = vpop.permute.xlu1 %16849  ;;  %v18373_v39 = vsel %vm17005_vm3, %v18372_v43, %v18368_v23  ;;  %v29760_v23 = vld [vmem:[#allocation299_spill] sm:$0xff]  ;;  %v18314_v43 = vsel %vm17033_vm7, %v18313_v45, %v18309_v18 }
 0x584   :  { %v27102_v32 = vpop.permute.xlu0 %16882  ;;  %v18377_v36 = vrot.slane %v16850_v46, %v29466_v0  ;;  %v17607_v2 = vrot.slane %v29760_v23, %v25214_v40  ;;  %v29762_v46 = vld [vmem:[#allocation232_spill] sm:$0xff]  ;;  %v18319_v14 = vsel %vm17040_vm8, %v18318_v11, %v18314_v43  ;;  %v17548_v23 = vrot.slane %v29766_v38, %v25290_v6  ;;  %v29767_v43 = vld [vmem:[#allocation38_spill] sm:$0xff] }
 0x585   :  { %v17538_v52 = vrot.slane %v29762_v46, %v25277_v54  ;;  %v18324_v10 = vsel %vm17047_vm9, %v18323_v49, %v18319_v14  ;;  %v29768_v46 = vld [vmem:[#allocation272_spill] sm:$0xff] }
 0x586   :  { %v18378_v58 = vsel %vm17012_vm4, %v18377_v36, %v18373_v39  ;;  %v29763_v36 = vld [vmem:[#allocation134_spill] sm:$0xff]  ;;  %v17608_v22 = vsel %vm17040_vm8, %v17607_v2, %v17603_v9  ;;  %v18348_v9 = vrot.slane %v27045_v34, %v25388_v50  ;;  %v29771_v34 = vld [vmem:[#allocation180_spill] sm:$0xff] }
 0x587   :  { %v16856_v21 = vpop.permute.xlu1 %16855  ;;  %v18383_v37 = vsel %vm17019_vm5, %v18382_v16, %v18378_v58  ;;  %v17533_v61 = vrot.slane %v29763_v36, %v29483_v8  ;;  %v29765_v58 = vld [vmem:[#allocation34_spill] sm:$0xff]  ;;  %v18329_v16 = vsel %vm17054_vm10, %v18328_v26, %v18324_v10  ;;  %v29769_v26 = vld [vmem:[#allocation171_spill] sm:$0xff]  ;;  %v17637_v10 = vrot.slane %v29771_v34, %v25388_v50 }
 0x588   :  { %v27126_v17 = vpop.permute.xlu0 %16888  ;;  %v18387_v19 = vrot.slane %v16856_v21, %v29476_v15  ;;  %v17612_v1 = vrot.slane %v29765_v58, %v29483_v8  ;;  %v18338_v21 = vrot.slane %v27037_v51, %v25290_v6 }
 0x589   :  { %v17534_v11 = vsel %vm17047_vm9, %v17533_v61, %v17529_v44  ;;  %v18402_v44 = vrot.slane %v27047_v12, %v29483_v8 }
 0x58a   :  { %v18388_v41 = vsel %vm17026_vm6, %v18387_v19, %v18383_v37  ;;  %v17539_v35 = vsel %vm17054_vm10, %v17538_v52, %v17534_v11  ;;  %v17613_v2 = vsel %vm17047_vm9, %v17612_v1, %v17608_v22  ;;  %v18333_v19 = vrot.slane %v27011_v62, %v29486_v59  ;;  %v29770_v11 = vld [vmem:[#allocation239_spill] sm:$0xff] }
 0x58b   :  { %v16862_v60 = vpop.permute.xlu1 %16861  ;;  %v18393_v45 = vsel %vm17033_vm7, %v18392_v31, %v18388_v41  ;;  %v17543_v37 = vrot.slane %v29767_v43, %v29486_v59  ;;  %v17618_v51 = vsel %vm17054_vm10, %v17617_v4, %v17613_v2  ;;  %v17627_v52 = vrot.slane %v29768_v46, %v25290_v6 }
 0x58c   :  { %v27151_v39 = vpop.permute.xlu0 %16894  ;;  %v18397_v18 = vrot.slane %v16862_v60, %v25214_v40  ;;  %v17622_v41 = vrot.slane %v29769_v26, %v29486_v59  ;;  %v18334_v62 = vsel %vm17061_vm11, %v18333_v19, %v18329_v16  ;;  %v18343_v22 = vrot.slane %v27022_v42, %v29488_v48  ;;  %v29773_v42 = vld [vmem:[#allocation265_spill] sm:$0xff] }
 0x58d   :  { %v17544_v36 = vsel %vm17061_vm11, %v17543_v37, %v17539_v35  ;;  %v18339_v61 = vsel %vm17068_vm12, %v18338_v21, %v18334_v62  ;;  %v17558_v58 = vrot.slane %v29770_v11, %v25388_v50  ;;  %v29772_v35 = vld [vmem:[#allocation302_spill] sm:$0xff]  ;;  %v17632_v21 = vrot.slane %v29773_v42, %v29488_v48 }
 0x58e   :  { %v18398_v55 = vsel %vm17040_vm8, %v18397_v18, %v18393_v45  ;;  %v17549_v31 = vsel %vm17068_vm12, %v17548_v23, %v17544_v36  ;;  %v17623_v60 = vsel %vm17061_vm11, %v17622_v41, %v17618_v51  ;;  %v17553_v16 = vrot.slane %v29772_v35, %v29488_v48  ;;  %v29774_v51 = vld [vmem:[#allocation155_spill] sm:$0xff]  ;;  %v29775_v41 = vld [vmem:[#allocation290_spill] sm:$0xff] }
 0x58f   :  { %v16868_v47 = vpop.permute.xlu1 %16867  ;;  %v18403_v12 = vsel %vm17047_vm9, %v18402_v44, %v18398_v55  ;;  %v17628_v1 = vsel %vm17068_vm12, %v17627_v52, %v17623_v60  ;;  %v18344_v29 = vsel %vm17075_vm13, %v18343_v22, %v18339_v61  ;;  %v18353_v44 = vrot.slane %v27024_v33, %v29649_v24 }
 0x590   :  { %v27174_v13 = vpop.permute.xlu0 %16900  ;;  %v18407_v14 = vrot.slane %v16868_v47, %v25277_v54  ;;  %v18349_v38 = vsel %vm17082_vm14, %v18348_v9, %v18344_v29  ;;  %v17554_v2 = vsel %vm17075_vm13, %v17553_v16, %v17549_v31  ;;  %v17633_v19 = vsel %vm17075_vm13, %v17632_v21, %v17628_v1 }
 0x591   :  { %v18422_v47 = vrot.slane %v27079_v57, %v29488_v48  ;;  %v17563_v46 = vrot.slane %v29774_v51, %v29649_v24  ;;  %v17559_v52 = vsel %vm17082_vm14, %v17558_v58, %v17554_v2  ;;  %v17642_v62 = vrot.slane %v29775_v41, %v29649_v24 }
 0x592   :  { %v18408_v49 = vsel %vm17054_vm10, %v18407_v14, %v18403_v12  ;;  %v17638_v14 = vsel %vm17082_vm14, %v17637_v10, %v17633_v19  ;;  %v18354_v12 = vsel %vm17089_vm15, %v18353_v44, %v18349_v38  ;;  %v18432_v33 = vrot.slane %v27102_v32, %v29649_v24  ;;  %v29777_v38 = vld [vmem:[#allocation298_spill] sm:$0xff]  ;;  %v29778_v44 = vld [vmem:[#allocation168_spill] sm:$0xff] }
 0x593   :  { %v16874_v4 = vpop.permute.xlu1 %16873  ;;  %v18413_v55 = vsel %vm17061_vm11, %v18412_v20, %v18408_v49  ;;  %v17564_v61 = vsel %vm17089_vm15, %v17563_v46, %v17559_v52  ;;  %v17643_v9 = vsel %vm17089_vm15, %v17642_v62, %v17638_v14  ;;  %v18628_v32 = vrot.slane %v18620_v56, %v19962_v25  ;;  %v29780_v62 = vld [vmem:[#allocation323_spill] sm:$0xff] }
 0x594   :  { %v16934_v18 = vpop.permute.xlu0 %16933  ;;  %v18417_v45 = vrot.slane %v16874_v4, %v25290_v6  ;;  %v18599_v22 = vsel %vm18592_vm0, %v18354_v12, %v17564_v61  ;;  %v17647_v56 = vrot.slane %v29776_v5, %v24876_v7  ;;  %v17726_v12 = vrot.slane %v29780_v62, %v24876_v7  ;;  %v29782_v61 = vld [vmem:[#allocation73_spill] sm:$0xff] }
 0x596   :  { %v18418_v23 = vsel %vm17068_vm12, %v18417_v45, %v18413_v55 }
 0x597   :  { %v16880_v43 = vpop.permute.xlu1 %16879  ;;  %v18423_v57 = vsel %vm17075_vm13, %v18422_v47, %v18418_v23  ;;  %v17656_v23 = vrot.slane %v29777_v38, %v29460_v63  ;;  %v17651_v47 = vrot.slane %v29778_v44, %v24857_v28  ;;  %v29786_v44 = vld [vmem:[#allocation212_spill] sm:$0xff] }
 0x598   :  { %v16940_v37 = vpop.permute.xlu0 %16939  ;;  %v18427_v26 = vrot.slane %v16880_v43, %v25388_v50  ;;  %v18516_v43 = vrot.slane %v16934_v18, %v24876_v7  ;;  %v29781_v18 = vld [vmem:[#allocation59_spill] sm:$0xff] }
 0x599   :  { %v17652_v51 = vsel %vm16991_vm1, %v17651_v47, %v17647_v56  ;;  %v17745_v47 = vrot.slane %v29786_v44, %v29466_v0 }
 0x59a   :  { %v18428_v36 = vsel %vm17082_vm14, %v18427_v26, %v18423_v57  ;;  %v17657_v14 = vsel %vm16998_vm2, %v17656_v23, %v17652_v51  ;;  %v29779_v26 = vld [vmem:[#allocation196_spill] sm:$0xff] }
 0x59b   :  { %v18433_v49 = vsel %vm17089_vm15, %v18432_v33, %v18428_v36  ;;  %v27232_v31 = vpop.permute.xlu1 %16885  ;;  %v17666_v41 = vrot.slane %v29779_v26, %v29466_v0  ;;  %v18525_v33 = vrot.slane %v16940_v37, %v29460_v63  ;;  %v17661_v36 = vrot.slane %v29781_v18, %v29462_v3  ;;  %v29789_v18 = vld [vmem:[#allocation289_spill] sm:$0xff] }
 0x59c   :  { %v16946_v60 = vpop.permute.xlu0 %16945  ;;  %v18600_v20 = vsel %vm18592_vm0, %v18433_v49, %v17643_v9  ;;  %v17735_v9 = vrot.slane %v29782_v61, %v29460_v63  ;;  %v29783_v49 = vld [vmem:[#allocation69_spill] sm:$0xff] }
 0x59d   :  { %v18621_v4 = vcombine.low %v18599_v22, %v18600_v20  ;;  %v17730_v22 = vrot.slane %v29783_v49, %v24857_v28  ;;  %v18535_v5 = vrot.slane %v16946_v60, %v29466_v0 }
 0x59f   :  { %v18635_v11 = vrot.slane %v18621_v4, %v19962_v25  ;;  %v27241_v58 = vpop.permute.xlu1 %16891 }
 0x5a0   :  { %v16952_v1 = vpop.permute.xlu0 %16951 }
 0x5a1   :  { %v18636_v34 = vcombine.low %v18628_v32, %v18635_v11  ;;  %v17662_v32 = vsel %vm17005_vm3, %v17661_v36, %v17657_v14  ;;  %v29788_v14 = vld [vmem:[#allocation145_spill] sm:$0xff]  ;;  %v18545_v62 = vrot.slane %v16952_v1, %v29476_v15  ;;  %v17681_v36 = vrot.slane %v29789_v18, %v25201_v30 }
 0x5a2   :  { %v17686_v26 = vrot.slane %v29788_v14, %v25214_v40 }
 0x5a3   :  { %v27243_v10 = vpop.permute.xlu1 %16897  ;;  %v18661_v35 = vmul.f32 0.015625, %v18636_v34  ;;  %v17667_v34 = vsel %vm17012_vm4, %v17666_v41, %v17662_v32 }
 0x5a4   :  { %v27245_v45 = vpop.permute.xlu0 %16954 }
 0x5a5   :  { %18664 = vst [vmem:[#allocation3 + $0x8] sm:$0xff] %v18661_v35  ;;  %v29784_v35 = vld [vmem:[#allocation208_spill] sm:$0xff]  ;;  %v18550_v1 = vrot.slane %v27245_v45, %v25201_v30  ;;  %v29794_v45 = vld [vmem:[#allocation93_spill] sm:$0xff] }
 0x5a7   :  { %v27247_v16 = vpop.permute.xlu1 %16903 }
 0x5a8   :  { %v27249_v42 = vpop.permute.xlu0 %16957 }
 0x5ab   :  { %v16937_v21 = vpop.permute.xlu1 %16936 }
 0x5ac   :  { %v27251_v29 = vpop.permute.xlu0 %16960  ;;  %v18520_v55 = vrot.slane %v16937_v21, %v24857_v28  ;;  %v17676_v21 = vrot.slane %v29784_v35, %v29476_v15 }
 0x5ae   :  { %v18521_v46 = vsel %vm16991_vm1, %v18520_v55, %v18516_v43  ;;  %v29785_v55 = vld [vmem:[#allocation190_spill] sm:$0xff] }
 0x5af   :  { %v16943_v53 = vpop.permute.xlu1 %16942  ;;  %v18526_v20 = vsel %vm16998_vm2, %v18525_v33, %v18521_v46  ;;  %v17671_v38 = vrot.slane %v29785_v55, %v29471_v27  ;;  %v29793_v55 = vld [vmem:[#allocation221_spill] sm:$0xff] }
 0x5b0   :  { %v27258_v2 = vpop.permute.xlu0 %16963  ;;  %v18530_v52 = vrot.slane %v16943_v53, %v29462_v3  ;;  %v17731_v53 = vsel %vm16991_vm1, %v17730_v22, %v17726_v12  ;;  %v29791_v22 = vld [vmem:[#allocation11_spill] sm:$0xff] }
 0x5b1   :  { %v17736_v23 = vsel %vm16998_vm2, %v17735_v9, %v17731_v53  ;;  %v17672_v46 = vsel %vm17019_vm5, %v17671_v38, %v17667_v34  ;;  %v29790_v9 = vld [vmem:[#allocation331_spill] sm:$0xff]  ;;  %v17765_v38 = vrot.slane %v29793_v55, %v25214_v40 }
 0x5b2   :  { %v18531_v11 = vsel %vm17005_vm3, %v18530_v52, %v18526_v20  ;;  %v17677_v60 = vsel %vm17026_vm6, %v17676_v21, %v17672_v46  ;;  %v17755_v49 = vrot.slane %v29790_v9, %v29476_v15  ;;  %v17750_v20 = vrot.slane %v29791_v22, %v29471_v27  ;;  %v29798_v9 = vld [vmem:[#allocation296_spill] sm:$0xff] }
 0x5b3   :  { %v16949_v19 = vpop.permute.xlu1 %16948  ;;  %v18536_v51 = vsel %vm17012_vm4, %v18535_v5, %v18531_v11  ;;  %v17682_v11 = vsel %vm17033_vm7, %v17681_v36, %v17677_v60  ;;  %v18555_v46 = vrot.slane %v27249_v42, %v25214_v40  ;;  %v18441_v60 = vrot.slane %v27126_v17, %v24857_v28  ;;  %v29797_v17 = vld [vmem:[#allocation203_spill] sm:$0xff] }
 0x5b4   :  { %v27281_v4 = vpop.permute.xlu0 %16966  ;;  %v18540_v37 = vrot.slane %v16949_v19, %v29471_v27  ;;  %v29787_v19 = vld [vmem:[#allocation92_spill] sm:$0xff]  ;;  %v17687_v35 = vsel %vm17040_vm8, %v17686_v26, %v17682_v11  ;;  %v17770_v18 = vrot.slane %v29797_v17, %v29483_v8  ;;  %v18451_v22 = vrot.slane %v27151_v39, %v29462_v3 }
 0x5b5   :  { %v17740_v43 = vrot.slane %v29787_v19, %v29462_v3  ;;  %v29795_v19 = vld [vmem:[#allocation140_spill] sm:$0xff]  ;;  %v29800_v3 = vld [vmem:[#allocation210_spill] sm:$0xff] }
 0x5b6   :  { %v18541_v52 = vsel %vm17019_vm5, %v18540_v37, %v18536_v51  ;;  %v29792_v37 = vld [vmem:[#allocation183_spill] sm:$0xff]  ;;  %v18446_v51 = vrot.slane %v27241_v58, %v29460_v63  ;;  %v29796_v63 = vld [vmem:[#allocation28_spill] sm:$0xff]  ;;  %v17785_v39 = vrot.slane %v29800_v3, %v25290_v6 }
 0x5b7   :  { %v27272_v57 = vpop.permute.xlu1 %16906  ;;  %v17741_v41 = vsel %vm17005_vm3, %v17740_v43, %v17736_v23  ;;  %v18546_v32 = vsel %vm17026_vm6, %v18545_v62, %v18541_v52  ;;  %v17691_v34 = vrot.slane %v29792_v37, %v29483_v8  ;;  %v18437_v23 = vrot.slane %v27232_v31, %v24876_v7 }
 0x5b8   :  { %v27308_v12 = vpop.permute.xlu0 %16969  ;;  %v17746_v61 = vsel %vm17012_vm4, %v17745_v47, %v17741_v41  ;;  %v18551_v44 = vsel %vm17033_vm7, %v18550_v1, %v18546_v32  ;;  %v17696_v47 = vrot.slane %v29794_v45, %v25277_v54  ;;  %v17760_v43 = vrot.slane %v29795_v19, %v25201_v30 }
 0x5b9   :  { %v17751_v21 = vsel %vm17019_vm5, %v17750_v20, %v17746_v61  ;;  %v17692_v7 = vsel %vm17047_vm9, %v17691_v34, %v17687_v35  ;;  %v18556_v14 = vsel %vm17040_vm8, %v18555_v46, %v18551_v44  ;;  %v17775_v58 = vrot.slane %v29796_v63, %v25277_v54 }
 0x5ba   :  { %v17756_v5 = vsel %vm17026_vm6, %v17755_v49, %v17751_v21  ;;  %v18442_v42 = vsel %vm16991_vm1, %v18441_v60, %v18437_v23  ;;  %v18560_v62 = vrot.slane %v27251_v29, %v29483_v8  ;;  %v17697_v28 = vsel %vm17054_vm10, %v17696_v47, %v17692_v7  ;;  %v29799_v29 = vld [vmem:[#allocation95_spill] sm:$0xff]  ;;  %v29802_v47 = vld [vmem:[#allocation6_spill] sm:$0xff] }
 0x5bb   :  { %v27291_v56 = vpop.permute.xlu1 %16909  ;;  %v17761_v31 = vsel %vm17033_vm7, %v17760_v43, %v17756_v5  ;;  %v18447_v36 = vsel %vm16998_vm2, %v18446_v51, %v18442_v42  ;;  %v18456_v61 = vrot.slane %v27243_v10, %v29466_v0  ;;  %v17701_v49 = vrot.slane %v29798_v9, %v29486_v59  ;;  %v29805_v42 = vld [vmem:[#allocation199_spill] sm:$0xff] }
 0x5bc   :  { %v27343_v52 = vpop.permute.xlu0 %16972  ;;  %v17766_v41 = vsel %vm17040_vm8, %v17765_v38, %v17761_v31  ;;  %v18561_v20 = vsel %vm17047_vm9, %v18560_v62, %v18556_v14  ;;  %v17706_v32 = vrot.slane %v29799_v29, %v25290_v6  ;;  %v18565_v1 = vrot.slane %v27258_v2, %v25277_v54  ;;  %v29801_v2 = vld [vmem:[#allocation101_spill] sm:$0xff] }
 0x5bd   :  { %v17771_v11 = vsel %vm17047_vm9, %v17770_v18, %v17766_v41  ;;  %v17702_v0 = vsel %vm17061_vm11, %v17701_v49, %v17697_v28  ;;  %v18452_v35 = vsel %vm17005_vm3, %v18451_v22, %v18447_v36  ;;  %v18466_v5 = vrot.slane %v27247_v16, %v29476_v15  ;;  %v29803_v15 = vld [vmem:[#allocation194_spill] sm:$0xff]  ;;  %v29804_v31 = vld [vmem:[#allocation321_spill] sm:$0xff] }
 0x5be   :  { %v17776_v10 = vsel %vm17054_vm10, %v17775_v58, %v17771_v11  ;;  %v18457_v21 = vsel %vm17012_vm4, %v18456_v61, %v18452_v35  ;;  %v18566_v55 = vsel %vm17054_vm10, %v18565_v1, %v18561_v20  ;;  %v17780_v38 = vrot.slane %v29801_v2, %v29486_v59  ;;  %v29807_v11 = vld [vmem:[#allocation330_spill] sm:$0xff] }
 0x5bf   :  { %v27310_v33 = vpop.permute.xlu1 %16912  ;;  %v18461_v23 = vrot.slane %v27174_v13, %v29471_v27  ;;  %v18570_v44 = vrot.slane %v27281_v4, %v29486_v59  ;;  %v18471_v45 = vrot.slane %v27272_v57, %v25201_v30  ;;  %v17711_v19 = vrot.slane %v29802_v47, %v29488_v48 }
 0x5c0   :  { %v16976_v37 = vpop.permute.xlu0 %16975  ;;  %v17707_v43 = vsel %vm17068_vm12, %v17706_v32, %v17702_v0  ;;  %v17716_v16 = vrot.slane %v29803_v15, %v25388_v50  ;;  %v18476_v51 = vrot.slane %v27291_v56, %v25214_v40  ;;  %v17781_v27 = vsel %vm17061_vm11, %v17780_v38, %v17776_v10 }
 0x5c1   :  { %v18462_v13 = vsel %vm17019_vm5, %v18461_v23, %v18457_v21  ;;  %v18571_v4 = vsel %vm17061_vm11, %v18570_v44, %v18566_v55  ;;  %v18481_v30 = vrot.slane %v27310_v33, %v29483_v8  ;;  %v17786_v57 = vsel %vm17068_vm12, %v17785_v39, %v17781_v27  ;;  %v338_v55 = vld [vmem:[#allocation2 + $0x10] sm:$0xf] }
 0x5c2   :  { %v18467_v60 = vsel %vm17026_vm6, %v18466_v5, %v18462_v13  ;;  %v18575_v7 = vrot.slane %v27308_v12, %v25290_v6  ;;  %v17795_v14 = vrot.slane %v29804_v31, %v25388_v50  ;;  %v18580_v63 = vrot.slane %v27343_v52, %v29488_v48 }
 0x5c3   :  { %v27327_v53 = vpop.permute.xlu1 %16915  ;;  %v18472_v41 = vsel %vm17033_vm7, %v18471_v45, %v18467_v60  ;;  %v18585_v12 = vrot.slane %v16976_v37, %v25388_v50  ;;  %v17790_v62 = vrot.slane %v29805_v42, %v29488_v48  ;;  %v17712_v61 = vsel %vm17075_vm13, %v17711_v19, %v17707_v43 }
 0x5c4   :  { %v18486_v40 = vrot.slane %v27327_v53, %v25277_v54  ;;  %v18576_v33 = vsel %vm17068_vm12, %v18575_v7, %v18571_v4  ;;  %v18477_v58 = vsel %vm17040_vm8, %v18476_v51, %v18472_v41  ;;  %v17717_v22 = vsel %vm17082_vm14, %v17716_v16, %v17712_v61 }
 0x5c5   :  { %v16979_v56 = vpop.permute.xlu0 %16978  ;;  %v18482_v28 = vsel %vm17047_vm9, %v18481_v30, %v18477_v58  ;;  %v18581_v9 = vsel %vm17075_vm13, %v18580_v63, %v18576_v33 }
 0x5c6   :  { %v18590_v17 = vrot.slane %v16979_v56, %v29649_v24  ;;  %v18487_v18 = vsel %vm17054_vm10, %v18486_v40, %v18482_v28 }
 0x5c7   :  { %v27350_v26 = vpop.permute.xlu1 %16918 }
 0x5c8   :  { %v18491_v8 = vrot.slane %v27350_v26, %v29486_v59  ;;  %v29806_v59 = vld [vmem:[#allocation141_spill] sm:$0xff] }
 0x5c9   :  { %v17721_v26 = vrot.slane %v29806_v59, %v29649_v24 }
 0x5ca   :  { %v18492_v49 = vsel %vm17061_vm11, %v18491_v8, %v18487_v18 }
 0x5cb   :  { %v16922_v34 = vpop.permute.xlu1 %16921  ;;  %v17722_v10 = vsel %vm17089_vm15, %v17721_v26, %v17717_v22 }
 0x5cc   :  { %v18496_v54 = vrot.slane %v16922_v34, %v25290_v6  ;;  %v17791_v6 = vsel %vm17075_vm13, %v17790_v62, %v17786_v57 }
 0x5cd   :  { %v17796_v20 = vsel %vm17082_vm14, %v17795_v14, %v17791_v6 }
 0x5ce   :  { %v18497_v29 = vsel %vm17068_vm12, %v18496_v54, %v18492_v49 }
 0x5d0   :  { %v16925_v46 = vpop.permute.xlu1 %16924 }
 0x5d1   :  { %v18501_v52 = vrot.slane %v16925_v46, %v29488_v48  ;;  %v18586_v48 = vsel %vm17082_vm14, %v18585_v12, %v18581_v9 }
 0x5d2   :  { %v18591_v1 = vsel %vm17089_vm15, %v18590_v17, %v18586_v48 }
 0x5d3   :  { %v18502_v37 = vsel %vm17075_vm13, %v18501_v52, %v18497_v29 }
 0x5d4   :  { %v16928_v53 = vpop.permute.xlu1 %16927 }
 0x5d5   :  { %v18506_v36 = vrot.slane %v16928_v53, %v25388_v50  ;;  %v17800_v50 = vrot.slane %v29807_v11, %v29649_v24 }
 0x5d7   :  { %v18507_v0 = vsel %vm17082_vm14, %v18506_v36, %v18502_v37  ;;  %v17801_v35 = vsel %vm17089_vm15, %v17800_v50, %v17796_v20 }
 0x5d8   :  { %v16931_v32 = vpop.permute.xlu1 %16930  ;;  %v18602_v39 = vsel %vm18592_vm0, %v18591_v1, %v17801_v35 }
 0x5d9   :  { %v18511_v34 = vrot.slane %v16931_v32, %v29649_v24 }
 0x5db   :  { %v18512_v3 = vsel %vm17089_vm15, %v18511_v34, %v18507_v0 }
 0x5dc   :  { %v18601_v21 = vsel %vm18592_vm0, %v18512_v3, %v17722_v10 }
 0x5dd   :  { %v18637_v5 = vcombine.low %v18601_v21, %v18602_v39 }
 0x5df   :  { %v18644_v2 = vrot.slane %v18637_v5, %v19962_v25 }
 0x5e1   :  { %v18650_v38 = vadd.f32 %v18644_v2, %v338_v55 }
 0x5e3   :  { %18653 = vst [vmem:[#allocation2 + $0x10] sm:$0xf] %v18650_v38 }
 0x5ea   :  { %v18659_v24 = vld [vmem:[#allocation2 + $0x10] sm:$0xf] }
 0x5eb   :  { %v18662_v23 = vmul.f32 0.015625, %v18659_v24 }
 0x5ed   :  { %18665 = vst [vmem:[#allocation3 + $0x10] sm:$0xf] %v18662_v23 }
 0x5ee   :  { %18701 = shalt.err (!%p18698_p4)
}
 0x5ef   :  { %s18702_s12 = scalar_lea.hbm %s27462_s1, 320 }
 0x5f0   :  { %p18703_p5 = scmp.ne.s32.totalorder %s27462_s1, %s18702_s12  ;;  %p18706_p6 = scmp.lt.u32.totalorder %s18702_s12, %s27462_s1 }
 0x5f2   :  { %p18708_p7 = pnand %p18706_p6, %p18703_p5 }
 0x5f4   :  { %18711 = shalt.err (!%p18708_p7)
}
 0x5f5   :  { %18675 = dma.vmem_to_hbm [thread:$0]  %s18673_s8, 320, %s27462_s1, [#allocation4]  }
 0x5f6   :  { %18712 = dma.done.wait [#allocation4], 320  }
 0x5f7   :  { %18713 = vsyncadd [#allocation4], 4294966976 }
 0x5f8   :  { %18679 = vsyncpa [#allocation4], 1 }

</bundles_post_ra>
